<compile_context>
chip_gen: v6e
topology: v6e:2x2x1
jax: 0.10.0
libtpu: 0.0.40
codegen_flags: <defaults>
</compile_context>

<pallas_src>
import numpy as np
import jax
import jax.numpy as jnp
from jax import lax
from jax.experimental import pallas as pl
from jax.experimental.pallas import tpu as pltpu

# ---------------- configuration (small synthetic shapes) ----------------
TRANSFORMER_DIM = 32
NUM_MULTIMASK_OUTPUTS = 3
NUM_MASK_TOKENS = NUM_MULTIMASK_OUTPUTS + 1            # 4
IOU_HIDDEN = 32                                        # == TRANSFORMER_DIM
IOU_DEPTH = 3
UPSCALING_DIMS = [TRANSFORMER_DIM // 4, TRANSFORMER_DIM // 8]   # [8, 4]

_VMEM_LIMIT = 32 * 1024 * 1024                         # far below v7x's 64 MiB physical VMEM
_PADW = 128                                            # lane-dense width of small head outputs


def _gelu(x):
    # TODO(synk): tanh approximation of GELU; PyTorch nn.GELU default is erf-based.
    c = 0.7978845608028654
    return 0.5 * x * (1.0 + jnp.tanh(c * (x + 0.044715 * x * x * x)))


def _cp():
    return pltpu.CompilerParams(dimension_semantics=("parallel",),
                                vmem_limit_bytes=_VMEM_LIMIT)


def _full_spec(arr):
    """BlockSpec that keeps the whole (grid-invariant) array resident in VMEM."""
    n = arr.ndim
    return pl.BlockSpec(arr.shape, lambda b, n=n: (0,) * n)


# ---------------- constant lane-matrix builders (run once in prepare_params) ----------------
def _ct_mats(wt, Win):
    """ConvTranspose2d(k=2,s=2) lane matrices. wt:(Cin,Cout,2,2) -> (2, Win*Cin, 2*Win*Cout)."""
    mats = []
    for dy in range(2):
        m = 0.0
        for dx in range(2):
            E = np.zeros((Win, 2 * Win), np.float32)
            E[np.arange(Win), 2 * np.arange(Win) + dx] = 1.0
            m = m + jnp.kron(jnp.asarray(E), wt[:, :, dy, dx])
        mats.append(m)
    return jnp.stack(mats)


def _ct_rows(Hin):
    """Row scatter for the conv-transpose pixel shuffle: (2, 2*Hin, Hin)."""
    R = np.zeros((2, 2 * Hin, Hin), np.float32)
    for dy in range(2):
        R[dy, 2 * np.arange(Hin) + dy, np.arange(Hin)] = 1.0
    return jnp.asarray(R)


def _conv3_mats(wt, W):
    """Conv2d(3x3,p=1) lane matrices (shift-in-W + channel mix). wt:(Cout,Cin,3,3)->(3, W*Cin, W*Cout)."""
    mats = []
    for ki in range(3):
        m = 0.0
        for kj in range(3):
            E = np.zeros((W, W), np.float32)
            for wo in range(W):
                wi = wo + kj - 1
                if 0 <= wi < W:
                    E[wi, wo] = 1.0
            m = m + jnp.kron(jnp.asarray(E), wt[:, :, ki, kj].T)
        mats.append(m)
    return jnp.stack(mats)


def _row_shift3(H):
    """Row shift (with zero padding) matrices for the 3x3 conv: (3, H, H)."""
    S = np.zeros((3, H, H), np.float32)
    for ki in range(3):
        for ho in range(H):
            hi = ho + ki - 1
            if 0 <= hi < H:
                S[ki, ho, hi] = 1.0
    return jnp.asarray(S)


def _ln_avg(W, C):
    """Per-pixel channel-average matrix for LayerNorm2d in (H, W*C) layout: (W*C, W*C)."""
    return jnp.asarray(np.kron(np.eye(W, dtype=np.float32),
                               np.ones((C, C), np.float32) / C))


# ---------------- one-time constant preparation (hoisted out of the forward path) ----------------
def prepare_params(p, H, W):
    D = TRANSFORMER_DIM
    C = D
    M = NUM_MASK_TOKENS
    Cup = UPSCALING_DIMS[-1]
    chn = D // 16
    tp = p["transformer"]

    # attention: packed q|k|v projection (lane-dense 4C=128 wide) + image-layout src projection
    wpack = jnp.pad(jnp.concatenate([tp["wq"], tp["wk"], tp["wv"]], axis=1),
                    ((0, 0), (0, C)))                                               # (C, 4C)
    bpack = jnp.pad(jnp.concatenate([tp["bq"], tp["bk"], tp["bv"]]), (0, C))[None, :]  # (1, 4C)
    wskron = jnp.kron(jnp.eye(W, dtype=jnp.float32), tp["ws"])                      # (W*C, W*C)
    bsrow = jnp.tile(tp["bs"], W)[None, :]                                          # (1, W*C)

    # hypernetwork MLPs: block-diagonal / stacked-wide weights (single 128-lane matmuls)
    hw1_wide = jnp.concatenate([p["hyper_mlps"][i][0][0] for i in range(M)], axis=1)  # (C, M*C)
    hb1_wide = jnp.concatenate([p["hyper_mlps"][i][0][1] for i in range(M)])          # (M*C,)
    blockmask = jnp.asarray(np.kron(np.eye(M, dtype=np.float32),
                                    np.ones((1, C), np.float32)))                    # (M, M*C)
    hb2_rows = jnp.stack([jnp.pad(p["hyper_mlps"][i][1][1], (0, _PADW - Cup))
                          for i in range(M)])                                        # (M, 128)
    hrows = jnp.concatenate([hb1_wide[None, :], blockmask, hb2_rows], axis=0)        # (1+2M, 128)
    hw2_stack = jnp.pad(jnp.concatenate([p["hyper_mlps"][i][1][0] for i in range(M)], axis=0),
                        ((0, 0), (0, _PADW - Cup)))                                  # (M*C, 128)

    # hr-hypernetwork + IoU heads
    m32 = jnp.stack([p["hyper_hr"][0][0], p["iou_head"][0][0], p["iou_head"][1][0],
                     p["iou_head_hr"][0][0], p["iou_head_hr"][1][0]])                # (5, C, C)
    b32 = jnp.stack([p["hyper_hr"][0][1], p["iou_head"][0][1], p["iou_head"][1][1],
                     p["iou_head_hr"][0][1], p["iou_head_hr"][1][1]])                # (5, C)

    def _padw(wm):
        return jnp.pad(wm, ((0, 0), (0, _PADW - wm.shape[1])))

    def _padv(vv):
        return jnp.pad(vv, (0, _PADW - vv.shape[0]))

    fpad = jnp.stack([_padw(p["hyper_hr"][1][0]), _padw(p["iou_head"][2][0]),
                      _padw(p["iou_head_hr"][2][0])])                                # (3, C, 128)
    fb = jnp.stack([_padv(p["hyper_hr"][1][1]), _padv(p["iou_head"][2][1]),
                    _padv(p["iou_head_hr"][2][1])])                                  # (3, 128)

    # upscaling / HR chain lane matrices
    m0, r0 = _ct_mats(p["up0_w"], W), _ct_rows(H)
    m1, r1 = _ct_mats(p["up1_w"], 2 * W), _ct_rows(2 * H)
    m2, r2 = _ct_mats(p["hr_ct0_w"], 4 * W), _ct_rows(4 * H)
    m3, r3 = _ct_mats(p["hr_ct1_w"], 8 * W), _ct_rows(8 * H)
    amid = _ln_avg(8 * W, chn)
    abig = _ln_avg(16 * W, chn)
    s3 = _row_shift3(16 * H)
    cm = jnp.concatenate([_conv3_mats(p["hr_cv_w"][i], 16 * W) for i in range(4)], axis=0)

    rhalf = jnp.stack([
        jnp.tile(p["up0_b"], 2 * W),
        jnp.tile(p["up0_gn_g"], 2 * W),
        jnp.tile(p["up0_gn_b"], 2 * W),
        jnp.tile(p["up1_b"], 4 * W),
        jnp.tile(p["hr_ct0_b"], 8 * W),
        jnp.tile(p["hr_ln0_g"], 8 * W),
        jnp.tile(p["hr_ln0_b"], 8 * W),
    ])                                                                               # (7, W*D/2)
    rfull = jnp.stack(
        [jnp.tile(p["hr_ct1_b"], 16 * W),
         jnp.tile(p["hr_ln1_g"], 16 * W),
         jnp.tile(p["hr_ln1_b"], 16 * W)]
        + [jnp.tile(p["hr_cv_b"][i], 16 * W) for i in range(4)]
        + [jnp.tile(p["hr_ln_g"][i], 16 * W) for i in range(3)]
        + [jnp.tile(p["hr_ln_b"][i], 16 * W) for i in range(3)])                     # (13, W*D)

    consts = (wpack, bpack, wskron, bsrow,
              hw1_wide, hrows, hw2_stack, m32, b32, fpad, fb,
              m0, r0, m1, r1, m2, r2, m3, r3, amid, abig, s3, cm, rhalf, rfull)

    out_tokens = jnp.concatenate([p["iou_token"], p["mask_tokens"]], axis=0)         # (1+M, C)
    return {"out_tokens": out_tokens, "consts": consts}


# ---------------- the single fused decoder kernel ----------------
def _decoder_fused(ts, simg, consts, H, W, T):
    B, Tall, C = ts.shape
    HW = H * W
    assert Tall == T + HW
    M = NUM_MASK_TOKENS
    c1 = UPSCALING_DIMS[-1]
    chn = TRANSFORMER_DIM // 16
    Hu, Wu, Hh, Wh = 4 * H, 4 * W, 16 * H, 16 * W
    scale = 1.0 / float(np.sqrt(C))
    f32 = jnp.float32

    def kernel(ts_ref, simg_ref, wpack_ref, bpack_ref, wskron_ref, bsrow_ref,
               hw1_ref, hrows_ref, hw2_ref, m32_ref, b32_ref, fpad_ref, fb_ref,
               m0_ref, r0_ref, m1_ref, r1_ref, m2_ref, r2_ref, m3_ref, r3_ref,
               amid_ref, abig_ref, s3_ref, cm_ref, rhalf_ref, rfull_ref,
               up_ref, hr_ref, small_ref):
        # ---------- attention (stand-in single cross-attention, packed lane-dense projections) ----------
        # TODO(synk): the real `transformer` is a dependency-injected TwoWayTransformer.
        ts_v = ts_ref[0]                                          # (HW+T, C): rows [0,HW)=src, [HW,..)=tokens
        proj = jnp.dot(ts_v, wpack_ref[...], preferred_element_type=f32) + bpack_ref[...]
        q = proj[HW:HW + T, 0:C]
        k = proj[0:HW, C:2 * C]
        v = proj[0:HW, 2 * C:3 * C]
        logits = jnp.dot(q, k.T, preferred_element_type=f32) * scale    # (T, HW)
        mx = jnp.max(logits, axis=-1, keepdims=True)
        e = jnp.exp(logits - mx)
        attn = e * pl.reciprocal(jnp.sum(e, axis=-1, keepdims=True), approx=True)
        hs = ts_v[HW:HW + T, :] + jnp.dot(attn, v, preferred_element_type=f32)      # (T, C)

        # src residual + projection directly in the lane-dense (H, W*C) image layout
        simg_v = simg_ref[0]                                        # (H, W*C)
        x = simg_v + jnp.dot(simg_v, wskron_ref[...], preferred_element_type=f32) + bsrow_ref[...]

        # ---------- hypernetwork MLPs (block-diagonal) + IoU heads ----------
        mask_toks = hs[1:1 + M, :]                                  # (M, C)
        hid = _gelu(jnp.dot(mask_toks, hw1_ref[...], preferred_element_type=f32) + hrows_ref[0:1, :])
        hid = hid * hrows_ref[1:1 + M, :]                           # keep only each token's own block
        hyper_pad = (jnp.dot(hid, hw2_ref[...], preferred_element_type=f32)
                     + hrows_ref[1 + M:1 + 2 * M, :])               # (M, 128), cols [0,Cup) valid

        iou_tok = hs[0:1, :]
        tok0 = hs[1:2, :]
        hh = _gelu(jnp.dot(tok0, m32_ref[0], preferred_element_type=f32) + b32_ref[0:1, :])
        hyper_hr = jnp.dot(hh, fpad_ref[0], preferred_element_type=f32) + fb_ref[0:1, :]
        tmp = _gelu(jnp.dot(iou_tok, m32_ref[1], preferred_element_type=f32) + b32_ref[1:2, :])
        tmp = _gelu(jnp.dot(tmp, m32_ref[2], preferred_element_type=f32) + b32_ref[2:3, :])
        iou = jnp.dot(tmp, fpad_ref[1], preferred_element_type=f32) + fb_ref[1:2, :]
        tmp = _gelu(jnp.dot(iou_tok, m32_ref[3], preferred_element_type=f32) + b32_ref[3:4, :])
        tmp = _gelu(jnp.dot(tmp, m32_ref[4], preferred_element_type=f32) + b32_ref[4:5, :])
        iou_hr = jnp.dot(tmp, fpad_ref[2], preferred_element_type=f32) + fb_ref[2:3, :]

        # single lane-dense (8,128) small-output block
        small_ref[0, 0:M, :] = hyper_pad
        small_ref[0, M:M + 1, :] = hyper_hr
        small_ref[0, M + 1:M + 2, :] = iou
        small_ref[0, M + 2:M + 3, :] = iou_hr
        small_ref[0, M + 3:M + 4, :] = jnp.zeros((1, _PADW), f32)

        # ---------- upscaling + HR conv/norm chain (all VMEM-resident, matmul-only) ----------
        rh = rhalf_ref[...]
        rf = rfull_ref[...]

        def conv_t(xx, m_ref, r_ref, brow):
            y = jnp.dot(r_ref[0], jnp.dot(xx, m_ref[0], preferred_element_type=f32),
                        preferred_element_type=f32)
            y = y + jnp.dot(r_ref[1], jnp.dot(xx, m_ref[1], preferred_element_type=f32),
                            preferred_element_type=f32)
            return y + brow

        def ln2d(xx, a, grow, brow):
            mu = jnp.dot(xx, a, preferred_element_type=f32)
            d = xx - mu
            var = jnp.dot(d * d, a, preferred_element_type=f32)
            return d * lax.rsqrt(var + 1e-6) * grow + brow

        def conv3(xx, ci):
            acc = jnp.zeros_like(xx)
            for ki in range(3):
                t = jnp.dot(xx, cm_ref[3 * ci + ki], preferred_element_type=f32)
                acc = acc + jnp.dot(s3_ref[ki], t, preferred_element_type=f32)
            return acc + rf[3 + ci:4 + ci, :]

        # final_output_upscaling_layers[0]: ConvTranspose -> GroupNorm(1,.) -> GELU
        x = conv_t(x, m0_ref, r0_ref, rh[0:1, :])                   # (2H, 2W*(D/4))
        mu = jnp.mean(jnp.mean(x, axis=1, keepdims=True), axis=0, keepdims=True)
        d = x - mu
        var = jnp.mean(jnp.mean(d * d, axis=1, keepdims=True), axis=0, keepdims=True)
        x = _gelu(d * lax.rsqrt(var + 1e-5) * rh[1:2, :] + rh[2:3, :])
        # final_output_upscaling_layers[1]: ConvTranspose -> Identity -> GELU
        x = _gelu(conv_t(x, m1_ref, r1_ref, rh[3:4, :]))            # (4H, 4W*(D/8))
        up_ref[0] = x

        # output_upscaling_hr
        h2 = conv_t(x, m2_ref, r2_ref, rh[4:5, :])                  # (8H, 8W*(D/16))
        h2 = _gelu(ln2d(h2, amid_ref[...], rh[5:6, :], rh[6:7, :]))
        h2 = conv_t(h2, m3_ref, r3_ref, rf[0:1, :])                 # (16H, 16W*(D/16))
        h2 = _gelu(ln2d(h2, abig_ref[...], rf[1:2, :], rf[2:3, :]))
        for ci in range(3):
            h2 = conv3(h2, ci)
            h2 = _gelu(ln2d(h2, abig_ref[...], rf[7 + ci:8 + ci, :], rf[10 + ci:11 + ci, :]))
        h2 = _gelu(conv3(h2, 3))
        hr_ref[0] = h2

    in_specs = [pl.BlockSpec((1, Tall, C), lambda b: (b, 0, 0)),
                pl.BlockSpec((1, H, W * C), lambda b: (b, 0, 0))]
    in_specs += [_full_spec(a) for a in consts]

    return pl.pallas_call(
        kernel,
        out_shape=(jax.ShapeDtypeStruct((B, Hu, Wu * c1), jnp.float32),
                   jax.ShapeDtypeStruct((B, Hh, Wh * chn), jnp.float32),
                   jax.ShapeDtypeStruct((B, 2 * M, _PADW), jnp.float32)),
        grid=(B,),
        in_specs=in_specs,
        out_specs=(pl.BlockSpec((1, Hu, Wu * c1), lambda b: (b, 0, 0)),
                   pl.BlockSpec((1, Hh, Wh * chn), lambda b: (b, 0, 0)),
                   pl.BlockSpec((1, 2 * M, _PADW), lambda b: (b, 0, 0))),
        compiler_params=_cp(),
    )(ts, simg, *consts)


# ----------------------------- MaskDecoder -----------------------------
def predict_masks(prep, image_embeddings, image_pe, sparse_prompt_embeddings):
    B = sparse_prompt_embeddings.shape[0]
    b, c, h, w = image_embeddings.shape
    M = NUM_MASK_TOKENS
    D = TRANSFORMER_DIM
    c1 = UPSCALING_DIMS[-1]
    chn = D // 16

    out_toks = jnp.broadcast_to(prep["out_tokens"][None], (B, 1 + M, c))
    tokens = jnp.concatenate([out_toks, sparse_prompt_embeddings], axis=1)            # (B, T, C)
    T = tokens.shape[1]

    # image_pe broadcast happens inside the add (no materialized repeat)
    src_seq = (image_embeddings + image_pe).reshape(b, c, h * w).transpose(0, 2, 1)   # (B, HW, C)
    ts = jnp.concatenate([src_seq, tokens], axis=1)                                   # (B, HW+T, C)
    simg = src_seq.reshape(b, h, w * c)                                               # (B, H, W*C) free reshape

    up, hr, small = _decoder_fused(ts, simg, prep["consts"], h, w, T)

    hyper_in = small[:, 0:M, 0:c1]                     # (B, M, D/8)
    hyper_hr = small[:, M, 0:chn]                      # (B, D/16)
    iou_pred = small[:, M + 1, 0:M]                    # (B, M)
    iou_pred_hr = small[:, M + 2, 0:1]                 # (B, 1)

    Hu, Wu, Hh, Wh = 4 * h, 4 * w, 16 * h, 16 * w
    # TODO(synk): final mask products kept as tiny XLA einsums; in-kernel would need a
    #             channel-major relayout of the lane-interleaved images.
    up_flat = up.reshape(B, Hu * Wu, c1)
    masks = jnp.einsum('bmc,bpc->bmp', hyper_in, up_flat).reshape(B, M, Hu, Wu)
    hr_flat = hr.reshape(B, Hh * Wh, chn)
    # torch broadcast semantics of (B,Chr) @ (B,Chr,HW) -> (B,B,HW)
    hr_masks = jnp.einsum('jc,bpc->bjp', hyper_hr, hr_flat).reshape(B, B, Hh, Wh)
    return masks, hr_masks, iou_pred, iou_pred_hr


def mask_decoder_forward(prep, image_embeddings, image_pe,
                         sparse_prompt_embeddings, multimask_output=False):
    masks, hr_masks, iou_pred, iou_pred_hr = predict_masks(
        prep, image_embeddings, image_pe, sparse_prompt_embeddings)
    if multimask_output and NUM_MULTIMASK_OUTPUTS > 1:
        sl = slice(1, None)
    else:
        sl = slice(0, 1)
    return masks[:, sl, :, :], hr_masks[:, sl, :, :], iou_pred[:, sl], iou_pred_hr


# ------------------------- deterministic params -------------------------
def init_params(key):
    keys = iter(jax.random.split(key, 128))

    def rnd(shape, scale=0.1):
        return jax.random.normal(next(keys), shape, jnp.float32) * scale

    D = TRANSFORMER_DIM
    M = NUM_MASK_TOKENS
    d8, d16 = D // 8, D // 16
    up0, up1 = UPSCALING_DIMS

    p = {}
    p["iou_token"] = rnd((1, D))
    p["mask_tokens"] = rnd((M, D))
    p["transformer"] = dict(
        wq=rnd((D, D)), bq=jnp.zeros((D,), jnp.float32),
        wk=rnd((D, D)), bk=jnp.zeros((D,), jnp.float32),
        wv=rnd((D, D)), bv=jnp.zeros((D,), jnp.float32),
        ws=rnd((D, D)), bs=jnp.zeros((D,), jnp.float32),
    )
    p["up0_w"] = rnd((D, up0, 2, 2)); p["up0_b"] = rnd((up0,))
    p["up0_gn_g"] = jnp.ones((up0,), jnp.float32); p["up0_gn_b"] = jnp.zeros((up0,), jnp.float32)
    p["up1_w"] = rnd((up0, up1, 2, 2)); p["up1_b"] = rnd((up1,))
    out_after = up1
    p["hyper_mlps"] = [[(rnd((D, D)), rnd((D,))), (rnd((D, out_after)), rnd((out_after,)))]
                       for _ in range(M)]
    p["iou_head"] = [(rnd((D, IOU_HIDDEN)), rnd((IOU_HIDDEN,))),
                     (rnd((IOU_HIDDEN, IOU_HIDDEN)), rnd((IOU_HIDDEN,))),
                     (rnd((IOU_HIDDEN, M)), rnd((M,)))]
    p["hr_ct0_w"] = rnd((d8, d16, 2, 2)); p["hr_ct0_b"] = rnd((d16,))
    p["hr_ln0_g"] = jnp.ones((d16,), jnp.float32); p["hr_ln0_b"] = jnp.zeros((d16,), jnp.float32)
    p["hr_ct1_w"] = rnd((d16, d16, 2, 2)); p["hr_ct1_b"] = rnd((d16,))
    p["hr_ln1_g"] = jnp.ones((d16,), jnp.float32); p["hr_ln1_b"] = jnp.zeros((d16,), jnp.float32)
    p["hr_cv_w"] = [rnd((d16, d16, 3, 3)) for _ in range(4)]
    p["hr_cv_b"] = [rnd((d16,)) for _ in range(4)]
    p["hr_ln_g"] = [jnp.ones((d16,), jnp.float32) for _ in range(3)]
    p["hr_ln_b"] = [jnp.zeros((d16,), jnp.float32) for _ in range(3)]
    p["hyper_hr"] = [(rnd((D, D)), rnd((D,))), (rnd((D, d16)), rnd((d16,)))]
    p["iou_head_hr"] = [(rnd((D, IOU_HIDDEN)), rnd((IOU_HIDDEN,))),
                        (rnd((IOU_HIDDEN, IOU_HIDDEN)), rnd((IOU_HIDDEN,))),
                        (rnd((IOU_HIDDEN, 1)), rnd((1,)))]
    return p


# --------------------------------- main ---------------------------------
if __name__ == "__main__":
    key = jax.random.PRNGKey(0)
    kp, k1, k2, k3 = jax.random.split(key, 4)
    params = init_params(kp)

    B, H, W = 2, 4, 4
    NUM_PROMPTS = 2
    image_embeddings = jax.random.normal(k1, (B, TRANSFORMER_DIM, H, W), jnp.float32)
    image_pe = jax.random.normal(k2, (1, TRANSFORMER_DIM, H, W), jnp.float32)
    sparse_prompt_embeddings = jax.random.normal(k3, (B, NUM_PROMPTS, TRANSFORMER_DIM), jnp.float32)

    # one-time constant construction (hoisted out of the per-forward path)
    prep = prepare_params(params, H, W)

    fwd = jax.jit(mask_decoder_forward, static_argnames=("multimask_output",))
    masks, hr_masks, iou_pred, iou_pred_hr = fwd(
        prep, image_embeddings, image_pe, sparse_prompt_embeddings, multimask_output=False)
    jax.block_until_ready((masks, hr_masks, iou_pred, iou_pred_hr))

    assert masks.shape == (B, 1, 4 * H, 4 * W)          # (2, 1, 16, 16)
    assert hr_masks.shape == (B, 1, 16 * H, 16 * W)     # (2, 1, 64, 64)
    assert iou_pred.shape == (B, 1)
    assert iou_pred_hr.shape == (B, 1)
    assert bool(jnp.all(jnp.isfinite(masks))) and bool(jnp.all(jnp.isfinite(hr_masks)))
    assert bool(jnp.all(jnp.isfinite(iou_pred))) and bool(jnp.all(jnp.isfinite(iou_pred_hr)))
    print("KERNEL_OK")
</pallas_src>

<mosaic_0001>
module attributes {stable_mosaic.version = 11 : i64} {
  func.func @kernel(%arg0: i32, %arg1: memref<1x23x32xf32, #tpu.memory_space<vmem>>, %arg2: memref<1x4x128xf32, #tpu.memory_space<vmem>>, %arg3: memref<32x128xf32, #tpu.memory_space<vmem>>, %arg4: memref<1x128xf32, #tpu.memory_space<vmem>>, %arg5: memref<128x128xf32, #tpu.memory_space<vmem>>, %arg6: memref<1x128xf32, #tpu.memory_space<vmem>>, %arg7: memref<32x128xf32, #tpu.memory_space<vmem>>, %arg8: memref<9x128xf32, #tpu.memory_space<vmem>>, %arg9: memref<128x128xf32, #tpu.memory_space<vmem>>, %arg10: memref<5x32x32xf32, #tpu.memory_space<vmem>>, %arg11: memref<5x32xf32, #tpu.memory_space<vmem>>, %arg12: memref<3x32x128xf32, #tpu.memory_space<vmem>>, %arg13: memref<3x128xf32, #tpu.memory_space<vmem>>, %arg14: memref<2x128x64xf32, #tpu.memory_space<vmem>>, %arg15: memref<2x8x4xf32, #tpu.memory_space<vmem>>, %arg16: memref<2x64x64xf32, #tpu.memory_space<vmem>>, %arg17: memref<2x16x8xf32, #tpu.memory_space<vmem>>, %arg18: memref<2x64x64xf32, #tpu.memory_space<vmem>>, %arg19: memref<2x32x16xf32, #tpu.memory_space<vmem>>, %arg20: memref<2x64x128xf32, #tpu.memory_space<vmem>>, %arg21: memref<2x64x32xf32, #tpu.memory_space<vmem>>, %arg22: memref<64x64xf32, #tpu.memory_space<vmem>>, %arg23: memref<128x128xf32, #tpu.memory_space<vmem>>, %arg24: memref<3x64x64xf32, #tpu.memory_space<vmem>>, %arg25: memref<12x128x128xf32, #tpu.memory_space<vmem>>, %arg26: memref<7x64xf32, #tpu.memory_space<vmem>>, %arg27: memref<13x128xf32, #tpu.memory_space<vmem>>, %arg28: memref<1x16x64xf32, #tpu.memory_space<vmem>>, %arg29: memref<1x64x128xf32, #tpu.memory_space<vmem>>, %arg30: memref<1x8x128xf32, #tpu.memory_space<vmem>>) attributes {dimension_semantics = [#tpu.dimension_semantics<parallel>], iteration_bounds = array<i64: 2>, scalar_prefetch = 0 : i64, scratch_operands = 0 : i64, tpu.core_type = #tpu.core_type<tc>, window_params = [{transform_indices = @transform_0, window_bounds = array<i64: 1, 23, 32>}, {transform_indices = @transform_1, window_bounds = array<i64: 1, 4, 128>}, {pipeline_mode = #tpu.pipeline_mode<synchronous>, transform_indices = @transform_2, window_bounds = array<i64: 32, 128>}, {pipeline_mode = #tpu.pipeline_mode<synchronous>, transform_indices = @transform_3, window_bounds = array<i64: 1, 128>}, {pipeline_mode = #tpu.pipeline_mode<synchronous>, transform_indices = @transform_4, window_bounds = array<i64: 128, 128>}, {pipeline_mode = #tpu.pipeline_mode<synchronous>, transform_indices = @transform_5, window_bounds = array<i64: 1, 128>}, {pipeline_mode = #tpu.pipeline_mode<synchronous>, transform_indices = @transform_6, window_bounds = array<i64: 32, 128>}, {pipeline_mode = #tpu.pipeline_mode<synchronous>, transform_indices = @transform_7, window_bounds = array<i64: 9, 128>}, {pipeline_mode = #tpu.pipeline_mode<synchronous>, transform_indices = @transform_8, window_bounds = array<i64: 128, 128>}, {pipeline_mode = #tpu.pipeline_mode<synchronous>, transform_indices = @transform_9, window_bounds = array<i64: 5, 32, 32>}, {pipeline_mode = #tpu.pipeline_mode<synchronous>, transform_indices = @transform_10, window_bounds = array<i64: 5, 32>}, {pipeline_mode = #tpu.pipeline_mode<synchronous>, transform_indices = @transform_11, window_bounds = array<i64: 3, 32, 128>}, {pipeline_mode = #tpu.pipeline_mode<synchronous>, transform_indices = @transform_12, window_bounds = array<i64: 3, 128>}, {pipeline_mode = #tpu.pipeline_mode<synchronous>, transform_indices = @transform_13, window_bounds = array<i64: 2, 128, 64>}, {pipeline_mode = #tpu.pipeline_mode<synchronous>, transform_indices = @transform_14, window_bounds = array<i64: 2, 8, 4>}, {pipeline_mode = #tpu.pipeline_mode<synchronous>, transform_indices = @transform_15, window_bounds = array<i64: 2, 64, 64>}, {pipeline_mode = #tpu.pipeline_mode<synchronous>, transform_indices = @transform_16, window_bounds = array<i64: 2, 16, 8>}, {pipeline_mode = #tpu.pipeline_mode<synchronous>, transform_indices = @transform_17, window_bounds = array<i64: 2, 64, 64>}, {pipeline_mode = #tpu.pipeline_mode<synchronous>, transform_indices = @transform_18, window_bounds = array<i64: 2, 32, 16>}, {pipeline_mode = #tpu.pipeline_mode<synchronous>, transform_indices = @transform_19, window_bounds = array<i64: 2, 64, 128>}, {pipeline_mode = #tpu.pipeline_mode<synchronous>, transform_indices = @transform_20, window_bounds = array<i64: 2, 64, 32>}, {pipeline_mode = #tpu.pipeline_mode<synchronous>, transform_indices = @transform_21, window_bounds = array<i64: 64, 64>}, {pipeline_mode = #tpu.pipeline_mode<synchronous>, transform_indices = @transform_22, window_bounds = array<i64: 128, 128>}, {pipeline_mode = #tpu.pipeline_mode<synchronous>, transform_indices = @transform_23, window_bounds = array<i64: 3, 64, 64>}, {pipeline_mode = #tpu.pipeline_mode<synchronous>, transform_indices = @transform_24, window_bounds = array<i64: 12, 128, 128>}, {pipeline_mode = #tpu.pipeline_mode<synchronous>, transform_indices = @transform_25, window_bounds = array<i64: 7, 64>}, {pipeline_mode = #tpu.pipeline_mode<synchronous>, transform_indices = @transform_26, window_bounds = array<i64: 13, 128>}, {transform_indices = @transform_27, window_bounds = array<i64: 1, 16, 64>}, {transform_indices = @transform_28, window_bounds = array<i64: 1, 64, 128>}, {transform_indices = @transform_29, window_bounds = array<i64: 1, 8, 128>}]} {
    %c0 = arith.constant 0 : index
    %c0_0 = arith.constant 0 : index
    %c0_1 = arith.constant 0 : index
    %0 = vector.load %arg1[%c0, %c0_0, %c0_1] : memref<1x23x32xf32, #tpu.memory_space<vmem>>, vector<1x23x32xf32>
    %1 = vector.shape_cast %0 : vector<1x23x32xf32> to vector<23x32xf32>
    %c0_2 = arith.constant 0 : index
    %c0_3 = arith.constant 0 : index
    %2 = vector.load %arg3[%c0_2, %c0_3] : memref<32x128xf32, #tpu.memory_space<vmem>>, vector<32x128xf32>
    %cst = arith.constant dense<0.000000e+00> : vector<23x128xf32>
    %3 = tpu.matmul %1, %2, %cst {dimension_numbers = #tpu.dot_dimension_numbers<[1], [0], [0], [1], [0, 0, 1, 1], [], []>} : vector<23x32xf32>, vector<32x128xf32>, vector<23x128xf32> -> vector<23x128xf32>
    %c0_4 = arith.constant 0 : index
    %c0_5 = arith.constant 0 : index
    %4 = vector.load %arg4[%c0_4, %c0_5] : memref<1x128xf32, #tpu.memory_space<vmem>>, vector<1x128xf32>
    %5 = vector.broadcast %4 : vector<1x128xf32> to vector<23x128xf32>
    %6 = arith.addf %3, %5 : vector<23x128xf32>
    %7 = vector.extract_strided_slice %6 {offsets = [16, 0], sizes = [7, 32], strides = [1, 1]} : vector<23x128xf32> to vector<7x32xf32>
    %8 = vector.extract_strided_slice %6 {offsets = [0, 32], sizes = [16, 32], strides = [1, 1]} : vector<23x128xf32> to vector<16x32xf32>
    %9 = vector.extract_strided_slice %6 {offsets = [0, 64], sizes = [16, 32], strides = [1, 1]} : vector<23x128xf32> to vector<16x32xf32>
    %10 = tpu.transpose %8, [1, 0] : vector<16x32xf32> -> vector<32x16xf32>
    %cst_6 = arith.constant dense<0.000000e+00> : vector<7x16xf32>
    %11 = tpu.matmul %7, %10, %cst_6 {dimension_numbers = #tpu.dot_dimension_numbers<[1], [0], [0], [1], [0, 0, 1, 1], [], []>} : vector<7x32xf32>, vector<32x16xf32>, vector<7x16xf32> -> vector<7x16xf32>
    %cst_7 = arith.constant 0.176776692 : f32
    %12 = vector.broadcast %cst_7 : f32 to vector<7x16xf32>
    %13 = arith.mulf %11, %12 : vector<7x16xf32>
    %cst_8 = arith.constant dense<0xFF800000> : vector<7xf32>
    %14 = vector.multi_reduction <maximumf>, %13, %cst_8 [1] : vector<7x16xf32> to vector<7xf32>
    %15 = vector.shape_cast %14 : vector<7xf32> to vector<7x1xf32>
    %16 = vector.broadcast %15 : vector<7x1xf32> to vector<7x16xf32>
    %17 = arith.subf %13, %16 : vector<7x16xf32>
    %18 = math.exp %17 : vector<7x16xf32>
    %cst_9 = arith.constant dense<0.000000e+00> : vector<7xf32>
    %19 = vector.multi_reduction <add>, %18, %cst_9 [1] : vector<7x16xf32> to vector<7xf32>
    %20 = vector.shape_cast %19 : vector<7xf32> to vector<7x1xf32>
    %21 = tpu.reciprocal %20 {approx = true} : vector<7x1xf32> -> vector<7x1xf32>
    %22 = vector.broadcast %21 : vector<7x1xf32> to vector<7x16xf32>
    %23 = arith.mulf %18, %22 : vector<7x16xf32>
    %24 = vector.extract_strided_slice %1 {offsets = [16, 0], sizes = [7, 32], strides = [1, 1]} : vector<23x32xf32> to vector<7x32xf32>
    %cst_10 = arith.constant dense<0.000000e+00> : vector<7x32xf32>
    %25 = tpu.matmul %23, %9, %cst_10 {dimension_numbers = #tpu.dot_dimension_numbers<[1], [0], [0], [1], [0, 0, 1, 1], [], []>} : vector<7x16xf32>, vector<16x32xf32>, vector<7x32xf32> -> vector<7x32xf32>
    %26 = arith.addf %24, %25 : vector<7x32xf32>
    %c0_11 = arith.constant 0 : index
    %c0_12 = arith.constant 0 : index
    %c0_13 = arith.constant 0 : index
    %27 = vector.load %arg2[%c0_11, %c0_12, %c0_13] : memref<1x4x128xf32, #tpu.memory_space<vmem>>, vector<1x4x128xf32>
    %28 = vector.shape_cast %27 : vector<1x4x128xf32> to vector<4x128xf32>
    %c0_14 = arith.constant 0 : index
    %c0_15 = arith.constant 0 : index
    %29 = vector.load %arg5[%c0_14, %c0_15] : memref<128x128xf32, #tpu.memory_space<vmem>>, vector<128x128xf32>
    %cst_16 = arith.constant dense<0.000000e+00> : vector<4x128xf32>
    %30 = tpu.matmul %28, %29, %cst_16 {dimension_numbers = #tpu.dot_dimension_numbers<[1], [0], [0], [1], [0, 0, 1, 1], [], []>} : vector<4x128xf32>, vector<128x128xf32>, vector<4x128xf32> -> vector<4x128xf32>
    %31 = arith.addf %28, %30 : vector<4x128xf32>
    %c0_17 = arith.constant 0 : index
    %c0_18 = arith.constant 0 : index
    %32 = vector.load %arg6[%c0_17, %c0_18] : memref<1x128xf32, #tpu.memory_space<vmem>>, vector<1x128xf32>
    %33 = vector.broadcast %32 : vector<1x128xf32> to vector<4x128xf32>
    %34 = arith.addf %31, %33 : vector<4x128xf32>
    %35 = vector.extract_strided_slice %26 {offsets = [1, 0], sizes = [4, 32], strides = [1, 1]} : vector<7x32xf32> to vector<4x32xf32>
    %c0_19 = arith.constant 0 : index
    %c0_20 = arith.constant 0 : index
    %36 = vector.load %arg7[%c0_19, %c0_20] : memref<32x128xf32, #tpu.memory_space<vmem>>, vector<32x128xf32>
    %cst_21 = arith.constant dense<0.000000e+00> : vector<4x128xf32>
    %37 = tpu.matmul %35, %36, %cst_21 {dimension_numbers = #tpu.dot_dimension_numbers<[1], [0], [0], [1], [0, 0, 1, 1], [], []>} : vector<4x32xf32>, vector<32x128xf32>, vector<4x128xf32> -> vector<4x128xf32>
    %c0_22 = arith.constant 0 : index
    %c0_23 = arith.constant 0 : index
    %38 = vector.load %arg8[%c0_22, %c0_23] : memref<9x128xf32, #tpu.memory_space<vmem>>, vector<1x128xf32>
    %39 = vector.broadcast %38 : vector<1x128xf32> to vector<4x128xf32>
    %40 = arith.addf %37, %39 : vector<4x128xf32>
    %cst_24 = arith.constant 5.000000e-01 : f32
    %41 = vector.broadcast %cst_24 : f32 to vector<4x128xf32>
    %42 = arith.mulf %41, %40 : vector<4x128xf32>
    %cst_25 = arith.constant 4.471500e-02 : f32
    %43 = vector.broadcast %cst_25 : f32 to vector<4x128xf32>
    %44 = arith.mulf %43, %40 : vector<4x128xf32>
    %45 = arith.mulf %44, %40 : vector<4x128xf32>
    %46 = arith.mulf %45, %40 : vector<4x128xf32>
    %47 = arith.addf %40, %46 : vector<4x128xf32>
    %cst_26 = arith.constant 0.797884583 : f32
    %48 = vector.broadcast %cst_26 : f32 to vector<4x128xf32>
    %49 = arith.mulf %48, %47 : vector<4x128xf32>
    %50 = math.tanh %49 : vector<4x128xf32>
    %cst_27 = arith.constant 1.000000e+00 : f32
    %51 = vector.broadcast %cst_27 : f32 to vector<4x128xf32>
    %52 = arith.addf %51, %50 : vector<4x128xf32>
    %53 = arith.mulf %42, %52 : vector<4x128xf32>
    %c1 = arith.constant 1 : index
    %c0_28 = arith.constant 0 : index
    %54 = vector.load %arg8[%c1, %c0_28] : memref<9x128xf32, #tpu.memory_space<vmem>>, vector<4x128xf32>
    %55 = arith.mulf %53, %54 : vector<4x128xf32>
    %c0_29 = arith.constant 0 : index
    %c0_30 = arith.constant 0 : index
    %56 = vector.load %arg9[%c0_29, %c0_30] : memref<128x128xf32, #tpu.memory_space<vmem>>, vector<128x128xf32>
    %cst_31 = arith.constant dense<0.000000e+00> : vector<4x128xf32>
    %57 = tpu.matmul %55, %56, %cst_31 {dimension_numbers = #tpu.dot_dimension_numbers<[1], [0], [0], [1], [0, 0, 1, 1], [], []>} : vector<4x128xf32>, vector<128x128xf32>, vector<4x128xf32> -> vector<4x128xf32>
    %c5 = arith.constant 5 : index
    %c0_32 = arith.constant 0 : index
    %58 = vector.load %arg8[%c5, %c0_32] : memref<9x128xf32, #tpu.memory_space<vmem>>, vector<4x128xf32>
    %59 = arith.addf %57, %58 : vector<4x128xf32>
    %60 = vector.extract_strided_slice %26 {offsets = [0, 0], sizes = [1, 32], strides = [1, 1]} : vector<7x32xf32> to vector<1x32xf32>
    %61 = vector.extract_strided_slice %26 {offsets = [1, 0], sizes = [1, 32], strides = [1, 1]} : vector<7x32xf32> to vector<1x32xf32>
    %c0_33 = arith.constant 0 : index
    %c0_34 = arith.constant 0 : index
    %c0_35 = arith.constant 0 : index
    %62 = vector.load %arg10[%c0_33, %c0_34, %c0_35] : memref<5x32x32xf32, #tpu.memory_space<vmem>>, vector<1x32x32xf32>
    %63 = vector.shape_cast %62 : vector<1x32x32xf32> to vector<32x32xf32>
    %cst_36 = arith.constant dense<0.000000e+00> : vector<1x32xf32>
    %64 = tpu.matmul %61, %63, %cst_36 {dimension_numbers = #tpu.dot_dimension_numbers<[1], [0], [0], [1], [0, 0, 1, 1], [], []>} : vector<1x32xf32>, vector<32x32xf32>, vector<1x32xf32> -> vector<1x32xf32>
    %c0_37 = arith.constant 0 : index
    %c0_38 = arith.constant 0 : index
    %65 = vector.load %arg11[%c0_37, %c0_38] : memref<5x32xf32, #tpu.memory_space<vmem>>, vector<1x32xf32>
    %66 = arith.addf %64, %65 : vector<1x32xf32>
    %cst_39 = arith.constant 5.000000e-01 : f32
    %67 = vector.broadcast %cst_39 : f32 to vector<1x32xf32>
    %68 = arith.mulf %67, %66 : vector<1x32xf32>
    %cst_40 = arith.constant 4.471500e-02 : f32
    %69 = vector.broadcast %cst_40 : f32 to vector<1x32xf32>
    %70 = arith.mulf %69, %66 : vector<1x32xf32>
    %71 = arith.mulf %70, %66 : vector<1x32xf32>
    %72 = arith.mulf %71, %66 : vector<1x32xf32>
    %73 = arith.addf %66, %72 : vector<1x32xf32>
    %cst_41 = arith.constant 0.797884583 : f32
    %74 = vector.broadcast %cst_41 : f32 to vector<1x32xf32>
    %75 = arith.mulf %74, %73 : vector<1x32xf32>
    %76 = math.tanh %75 : vector<1x32xf32>
    %cst_42 = arith.constant 1.000000e+00 : f32
    %77 = vector.broadcast %cst_42 : f32 to vector<1x32xf32>
    %78 = arith.addf %77, %76 : vector<1x32xf32>
    %79 = arith.mulf %68, %78 : vector<1x32xf32>
    %c0_43 = arith.constant 0 : index
    %c0_44 = arith.constant 0 : index
    %c0_45 = arith.constant 0 : index
    %80 = vector.load %arg12[%c0_43, %c0_44, %c0_45] : memref<3x32x128xf32, #tpu.memory_space<vmem>>, vector<1x32x128xf32>
    %81 = vector.shape_cast %80 : vector<1x32x128xf32> to vector<32x128xf32>
    %cst_46 = arith.constant dense<0.000000e+00> : vector<1x128xf32>
    %82 = tpu.matmul %79, %81, %cst_46 {dimension_numbers = #tpu.dot_dimension_numbers<[1], [0], [0], [1], [0, 0, 1, 1], [], []>} : vector<1x32xf32>, vector<32x128xf32>, vector<1x128xf32> -> vector<1x128xf32>
    %c0_47 = arith.constant 0 : index
    %c0_48 = arith.constant 0 : index
    %83 = vector.load %arg13[%c0_47, %c0_48] : memref<3x128xf32, #tpu.memory_space<vmem>>, vector<1x128xf32>
    %84 = arith.addf %82, %83 : vector<1x128xf32>
    %c1_49 = arith.constant 1 : index
    %c0_50 = arith.constant 0 : index
    %c0_51 = arith.constant 0 : index
    %85 = vector.load %arg10[%c1_49, %c0_50, %c0_51] : memref<5x32x32xf32, #tpu.memory_space<vmem>>, vector<1x32x32xf32>
    %86 = vector.shape_cast %85 : vector<1x32x32xf32> to vector<32x32xf32>
    %cst_52 = arith.constant dense<0.000000e+00> : vector<1x32xf32>
    %87 = tpu.matmul %60, %86, %cst_52 {dimension_numbers = #tpu.dot_dimension_numbers<[1], [0], [0], [1], [0, 0, 1, 1], [], []>} : vector<1x32xf32>, vector<32x32xf32>, vector<1x32xf32> -> vector<1x32xf32>
    %c1_53 = arith.constant 1 : index
    %c0_54 = arith.constant 0 : index
    %88 = vector.load %arg11[%c1_53, %c0_54] : memref<5x32xf32, #tpu.memory_space<vmem>>, vector<1x32xf32>
    %89 = arith.addf %87, %88 : vector<1x32xf32>
    %cst_55 = arith.constant 5.000000e-01 : f32
    %90 = vector.broadcast %cst_55 : f32 to vector<1x32xf32>
    %91 = arith.mulf %90, %89 : vector<1x32xf32>
    %cst_56 = arith.constant 4.471500e-02 : f32
    %92 = vector.broadcast %cst_56 : f32 to vector<1x32xf32>
    %93 = arith.mulf %92, %89 : vector<1x32xf32>
    %94 = arith.mulf %93, %89 : vector<1x32xf32>
    %95 = arith.mulf %94, %89 : vector<1x32xf32>
    %96 = arith.addf %89, %95 : vector<1x32xf32>
    %cst_57 = arith.constant 0.797884583 : f32
    %97 = vector.broadcast %cst_57 : f32 to vector<1x32xf32>
    %98 = arith.mulf %97, %96 : vector<1x32xf32>
    %99 = math.tanh %98 : vector<1x32xf32>
    %cst_58 = arith.constant 1.000000e+00 : f32
    %100 = vector.broadcast %cst_58 : f32 to vector<1x32xf32>
    %101 = arith.addf %100, %99 : vector<1x32xf32>
    %102 = arith.mulf %91, %101 : vector<1x32xf32>
    %c2 = arith.constant 2 : index
    %c0_59 = arith.constant 0 : index
    %c0_60 = arith.constant 0 : index
    %103 = vector.load %arg10[%c2, %c0_59, %c0_60] : memref<5x32x32xf32, #tpu.memory_space<vmem>>, vector<1x32x32xf32>
    %104 = vector.shape_cast %103 : vector<1x32x32xf32> to vector<32x32xf32>
    %cst_61 = arith.constant dense<0.000000e+00> : vector<1x32xf32>
    %105 = tpu.matmul %102, %104, %cst_61 {dimension_numbers = #tpu.dot_dimension_numbers<[1], [0], [0], [1], [0, 0, 1, 1], [], []>} : vector<1x32xf32>, vector<32x32xf32>, vector<1x32xf32> -> vector<1x32xf32>
    %c2_62 = arith.constant 2 : index
    %c0_63 = arith.constant 0 : index
    %106 = vector.load %arg11[%c2_62, %c0_63] : memref<5x32xf32, #tpu.memory_space<vmem>>, vector<1x32xf32>
    %107 = arith.addf %105, %106 : vector<1x32xf32>
    %cst_64 = arith.constant 5.000000e-01 : f32
    %108 = vector.broadcast %cst_64 : f32 to vector<1x32xf32>
    %109 = arith.mulf %108, %107 : vector<1x32xf32>
    %cst_65 = arith.constant 4.471500e-02 : f32
    %110 = vector.broadcast %cst_65 : f32 to vector<1x32xf32>
    %111 = arith.mulf %110, %107 : vector<1x32xf32>
    %112 = arith.mulf %111, %107 : vector<1x32xf32>
    %113 = arith.mulf %112, %107 : vector<1x32xf32>
    %114 = arith.addf %107, %113 : vector<1x32xf32>
    %cst_66 = arith.constant 0.797884583 : f32
    %115 = vector.broadcast %cst_66 : f32 to vector<1x32xf32>
    %116 = arith.mulf %115, %114 : vector<1x32xf32>
    %117 = math.tanh %116 : vector<1x32xf32>
    %cst_67 = arith.constant 1.000000e+00 : f32
    %118 = vector.broadcast %cst_67 : f32 to vector<1x32xf32>
    %119 = arith.addf %118, %117 : vector<1x32xf32>
    %120 = arith.mulf %109, %119 : vector<1x32xf32>
    %c1_68 = arith.constant 1 : index
    %c0_69 = arith.constant 0 : index
    %c0_70 = arith.constant 0 : index
    %121 = vector.load %arg12[%c1_68, %c0_69, %c0_70] : memref<3x32x128xf32, #tpu.memory_space<vmem>>, vector<1x32x128xf32>
    %122 = vector.shape_cast %121 : vector<1x32x128xf32> to vector<32x128xf32>
    %cst_71 = arith.constant dense<0.000000e+00> : vector<1x128xf32>
    %123 = tpu.matmul %120, %122, %cst_71 {dimension_numbers = #tpu.dot_dimension_numbers<[1], [0], [0], [1], [0, 0, 1, 1], [], []>} : vector<1x32xf32>, vector<32x128xf32>, vector<1x128xf32> -> vector<1x128xf32>
    %c1_72 = arith.constant 1 : index
    %c0_73 = arith.constant 0 : index
    %124 = vector.load %arg13[%c1_72, %c0_73] : memref<3x128xf32, #tpu.memory_space<vmem>>, vector<1x128xf32>
    %125 = arith.addf %123, %124 : vector<1x128xf32>
    %c3 = arith.constant 3 : index
    %c0_74 = arith.constant 0 : index
    %c0_75 = arith.constant 0 : index
    %126 = vector.load %arg10[%c3, %c0_74, %c0_75] : memref<5x32x32xf32, #tpu.memory_space<vmem>>, vector<1x32x32xf32>
    %127 = vector.shape_cast %126 : vector<1x32x32xf32> to vector<32x32xf32>
    %cst_76 = arith.constant dense<0.000000e+00> : vector<1x32xf32>
    %128 = tpu.matmul %60, %127, %cst_76 {dimension_numbers = #tpu.dot_dimension_numbers<[1], [0], [0], [1], [0, 0, 1, 1], [], []>} : vector<1x32xf32>, vector<32x32xf32>, vector<1x32xf32> -> vector<1x32xf32>
    %c3_77 = arith.constant 3 : index
    %c0_78 = arith.constant 0 : index
    %129 = vector.load %arg11[%c3_77, %c0_78] : memref<5x32xf32, #tpu.memory_space<vmem>>, vector<1x32xf32>
    %130 = arith.addf %128, %129 : vector<1x32xf32>
    %cst_79 = arith.constant 5.000000e-01 : f32
    %131 = vector.broadcast %cst_79 : f32 to vector<1x32xf32>
    %132 = arith.mulf %131, %130 : vector<1x32xf32>
    %cst_80 = arith.constant 4.471500e-02 : f32
    %133 = vector.broadcast %cst_80 : f32 to vector<1x32xf32>
    %134 = arith.mulf %133, %130 : vector<1x32xf32>
    %135 = arith.mulf %134, %130 : vector<1x32xf32>
    %136 = arith.mulf %135, %130 : vector<1x32xf32>
    %137 = arith.addf %130, %136 : vector<1x32xf32>
    %cst_81 = arith.constant 0.797884583 : f32
    %138 = vector.broadcast %cst_81 : f32 to vector<1x32xf32>
    %139 = arith.mulf %138, %137 : vector<1x32xf32>
    %140 = math.tanh %139 : vector<1x32xf32>
    %cst_82 = arith.constant 1.000000e+00 : f32
    %141 = vector.broadcast %cst_82 : f32 to vector<1x32xf32>
    %142 = arith.addf %141, %140 : vector<1x32xf32>
    %143 = arith.mulf %132, %142 : vector<1x32xf32>
    %c4 = arith.constant 4 : index
    %c0_83 = arith.constant 0 : index
    %c0_84 = arith.constant 0 : index
    %144 = vector.load %arg10[%c4, %c0_83, %c0_84] : memref<5x32x32xf32, #tpu.memory_space<vmem>>, vector<1x32x32xf32>
    %145 = vector.shape_cast %144 : vector<1x32x32xf32> to vector<32x32xf32>
    %cst_85 = arith.constant dense<0.000000e+00> : vector<1x32xf32>
    %146 = tpu.matmul %143, %145, %cst_85 {dimension_numbers = #tpu.dot_dimension_numbers<[1], [0], [0], [1], [0, 0, 1, 1], [], []>} : vector<1x32xf32>, vector<32x32xf32>, vector<1x32xf32> -> vector<1x32xf32>
    %c4_86 = arith.constant 4 : index
    %c0_87 = arith.constant 0 : index
    %147 = vector.load %arg11[%c4_86, %c0_87] : memref<5x32xf32, #tpu.memory_space<vmem>>, vector<1x32xf32>
    %148 = arith.addf %146, %147 : vector<1x32xf32>
    %cst_88 = arith.constant 5.000000e-01 : f32
    %149 = vector.broadcast %cst_88 : f32 to vector<1x32xf32>
    %150 = arith.mulf %149, %148 : vector<1x32xf32>
    %cst_89 = arith.constant 4.471500e-02 : f32
    %151 = vector.broadcast %cst_89 : f32 to vector<1x32xf32>
    %152 = arith.mulf %151, %148 : vector<1x32xf32>
    %153 = arith.mulf %152, %148 : vector<1x32xf32>
    %154 = arith.mulf %153, %148 : vector<1x32xf32>
    %155 = arith.addf %148, %154 : vector<1x32xf32>
    %cst_90 = arith.constant 0.797884583 : f32
    %156 = vector.broadcast %cst_90 : f32 to vector<1x32xf32>
    %157 = arith.mulf %156, %155 : vector<1x32xf32>
    %158 = math.tanh %157 : vector<1x32xf32>
    %cst_91 = arith.constant 1.000000e+00 : f32
    %159 = vector.broadcast %cst_91 : f32 to vector<1x32xf32>
    %160 = arith.addf %159, %158 : vector<1x32xf32>
    %161 = arith.mulf %150, %160 : vector<1x32xf32>
    %c2_92 = arith.constant 2 : index
    %c0_93 = arith.constant 0 : index
    %c0_94 = arith.constant 0 : index
    %162 = vector.load %arg12[%c2_92, %c0_93, %c0_94] : memref<3x32x128xf32, #tpu.memory_space<vmem>>, vector<1x32x128xf32>
    %163 = vector.shape_cast %162 : vector<1x32x128xf32> to vector<32x128xf32>
    %cst_95 = arith.constant dense<0.000000e+00> : vector<1x128xf32>
    %164 = tpu.matmul %161, %163, %cst_95 {dimension_numbers = #tpu.dot_dimension_numbers<[1], [0], [0], [1], [0, 0, 1, 1], [], []>} : vector<1x32xf32>, vector<32x128xf32>, vector<1x128xf32> -> vector<1x128xf32>
    %c2_96 = arith.constant 2 : index
    %c0_97 = arith.constant 0 : index
    %165 = vector.load %arg13[%c2_96, %c0_97] : memref<3x128xf32, #tpu.memory_space<vmem>>, vector<1x128xf32>
    %166 = arith.addf %164, %165 : vector<1x128xf32>
    %c0_98 = arith.constant 0 : index
    %c0_99 = arith.constant 0 : index
    %c0_100 = arith.constant 0 : index
    %167 = vector.load %arg30[%c0_98, %c0_99, %c0_100] : memref<1x8x128xf32, #tpu.memory_space<vmem>>, vector<1x4x128xf32>
    %168 = vector.shape_cast %167 : vector<1x4x128xf32> to vector<4x128xf32>
    %169 = vector.shape_cast %59 : vector<4x128xf32> to vector<1x4x128xf32>
    tpu.vector_store %arg30[%c0_98, %c0_99, %c0_100], %169 {strides = array<i32>} : memref<1x8x128xf32, #tpu.memory_space<vmem>>, vector<1x4x128xf32>,
    %c0_101 = arith.constant 0 : index
    %c4_102 = arith.constant 4 : index
    %c0_103 = arith.constant 0 : index
    %170 = vector.load %arg30[%c0_101, %c4_102, %c0_103] : memref<1x8x128xf32, #tpu.memory_space<vmem>>, vector<1x1x128xf32>
    %171 = vector.shape_cast %170 : vector<1x1x128xf32> to vector<1x128xf32>
    %172 = vector.shape_cast %84 : vector<1x128xf32> to vector<1x1x128xf32>
    tpu.vector_store %arg30[%c0_101, %c4_102, %c0_103], %172 {strides = array<i32>} : memref<1x8x128xf32, #tpu.memory_space<vmem>>, vector<1x1x128xf32>,
    %c0_104 = arith.constant 0 : index
    %c5_105 = arith.constant 5 : index
    %c0_106 = arith.constant 0 : index
    %173 = vector.load %arg30[%c0_104, %c5_105, %c0_106] : memref<1x8x128xf32, #tpu.memory_space<vmem>>, vector<1x1x128xf32>
    %174 = vector.shape_cast %173 : vector<1x1x128xf32> to vector<1x128xf32>
    %175 = vector.shape_cast %125 : vector<1x128xf32> to vector<1x1x128xf32>
    tpu.vector_store %arg30[%c0_104, %c5_105, %c0_106], %175 {strides = array<i32>} : memref<1x8x128xf32, #tpu.memory_space<vmem>>, vector<1x1x128xf32>,
    %c0_107 = arith.constant 0 : index
    %c6 = arith.constant 6 : index
    %c0_108 = arith.constant 0 : index
    %176 = vector.load %arg30[%c0_107, %c6, %c0_108] : memref<1x8x128xf32, #tpu.memory_space<vmem>>, vector<1x1x128xf32>
    %177 = vector.shape_cast %176 : vector<1x1x128xf32> to vector<1x128xf32>
    %178 = vector.shape_cast %166 : vector<1x128xf32> to vector<1x1x128xf32>
    tpu.vector_store %arg30[%c0_107, %c6, %c0_108], %178 {strides = array<i32>} : memref<1x8x128xf32, #tpu.memory_space<vmem>>, vector<1x1x128xf32>,
    %cst_109 = arith.constant 0.000000e+00 : f32
    %179 = vector.broadcast %cst_109 : f32 to vector<1x128xf32>
    %c0_110 = arith.constant 0 : index
    %c7 = arith.constant 7 : index
    %c0_111 = arith.constant 0 : index
    %180 = vector.load %arg30[%c0_110, %c7, %c0_111] : memref<1x8x128xf32, #tpu.memory_space<vmem>>, vector<1x1x128xf32>
    %181 = vector.shape_cast %180 : vector<1x1x128xf32> to vector<1x128xf32>
    %182 = vector.shape_cast %179 : vector<1x128xf32> to vector<1x1x128xf32>
    tpu.vector_store %arg30[%c0_110, %c7, %c0_111], %182 {strides = array<i32>} : memref<1x8x128xf32, #tpu.memory_space<vmem>>, vector<1x1x128xf32>,
    %c0_112 = arith.constant 0 : index
    %c0_113 = arith.constant 0 : index
    %183 = vector.load %arg26[%c0_112, %c0_113] : memref<7x64xf32, #tpu.memory_space<vmem>>, vector<7x64xf32>
    %c0_114 = arith.constant 0 : index
    %c0_115 = arith.constant 0 : index
    %184 = vector.load %arg27[%c0_114, %c0_115] : memref<13x128xf32, #tpu.memory_space<vmem>>, vector<13x128xf32>
    %185 = vector.extract_strided_slice %183 {offsets = [0, 0], sizes = [1, 64], strides = [1, 1]} : vector<7x64xf32> to vector<1x64xf32>
    %c0_116 = arith.constant 0 : index
    %c0_117 = arith.constant 0 : index
    %c0_118 = arith.constant 0 : index
    %186 = vector.load %arg15[%c0_116, %c0_117, %c0_118] : memref<2x8x4xf32, #tpu.memory_space<vmem>>, vector<1x8x4xf32>
    %187 = vector.shape_cast %186 : vector<1x8x4xf32> to vector<8x4xf32>
    %c0_119 = arith.constant 0 : index
    %c0_120 = arith.constant 0 : index
    %c0_121 = arith.constant 0 : index
    %188 = vector.load %arg14[%c0_119, %c0_120, %c0_121] : memref<2x128x64xf32, #tpu.memory_space<vmem>>, vector<1x128x64xf32>
    %189 = vector.shape_cast %188 : vector<1x128x64xf32> to vector<128x64xf32>
    %cst_122 = arith.constant dense<0.000000e+00> : vector<4x64xf32>
    %190 = tpu.matmul %34, %189, %cst_122 {dimension_numbers = #tpu.dot_dimension_numbers<[1], [0], [0], [1], [0, 0, 1, 1], [], []>} : vector<4x128xf32>, vector<128x64xf32>, vector<4x64xf32> -> vector<4x64xf32>
    %cst_123 = arith.constant dense<0.000000e+00> : vector<8x64xf32>
    %191 = tpu.matmul %187, %190, %cst_123 {dimension_numbers = #tpu.dot_dimension_numbers<[1], [0], [0], [1], [0, 0, 1, 1], [], []>} : vector<8x4xf32>, vector<4x64xf32>, vector<8x64xf32> -> vector<8x64xf32>
    %c1_124 = arith.constant 1 : index
    %c0_125 = arith.constant 0 : index
    %c0_126 = arith.constant 0 : index
    %192 = vector.load %arg15[%c1_124, %c0_125, %c0_126] : memref<2x8x4xf32, #tpu.memory_space<vmem>>, vector<1x8x4xf32>
    %193 = vector.shape_cast %192 : vector<1x8x4xf32> to vector<8x4xf32>
    %c1_127 = arith.constant 1 : index
    %c0_128 = arith.constant 0 : index
    %c0_129 = arith.constant 0 : index
    %194 = vector.load %arg14[%c1_127, %c0_128, %c0_129] : memref<2x128x64xf32, #tpu.memory_space<vmem>>, vector<1x128x64xf32>
    %195 = vector.shape_cast %194 : vector<1x128x64xf32> to vector<128x64xf32>
    %cst_130 = arith.constant dense<0.000000e+00> : vector<4x64xf32>
    %196 = tpu.matmul %34, %195, %cst_130 {dimension_numbers = #tpu.dot_dimension_numbers<[1], [0], [0], [1], [0, 0, 1, 1], [], []>} : vector<4x128xf32>, vector<128x64xf32>, vector<4x64xf32> -> vector<4x64xf32>
    %cst_131 = arith.constant dense<0.000000e+00> : vector<8x64xf32>
    %197 = tpu.matmul %193, %196, %cst_131 {dimension_numbers = #tpu.dot_dimension_numbers<[1], [0], [0], [1], [0, 0, 1, 1], [], []>} : vector<8x4xf32>, vector<4x64xf32>, vector<8x64xf32> -> vector<8x64xf32>
    %198 = arith.addf %191, %197 : vector<8x64xf32>
    %199 = vector.broadcast %185 : vector<1x64xf32> to vector<8x64xf32>
    %200 = arith.addf %198, %199 : vector<8x64xf32>
    %cst_132 = arith.constant dense<0.000000e+00> : vector<8xf32>
    %201 = vector.multi_reduction <add>, %200, %cst_132 [1] : vector<8x64xf32> to vector<8xf32>
    %202 = vector.shape_cast %201 : vector<8xf32> to vector<8x1xf32>
    %cst_133 = arith.constant 6.400000e+01 : f32
    %203 = vector.broadcast %cst_133 : f32 to vector<8x1xf32>
    %204 = arith.divf %202, %203 : vector<8x1xf32>
    %cst_134 = arith.constant dense<0.000000e+00> : vector<1xf32>
    %205 = vector.multi_reduction <add>, %204, %cst_134 [0] : vector<8x1xf32> to vector<1xf32>
    %206 = vector.shape_cast %205 : vector<1xf32> to vector<1x1xf32>
    %cst_135 = arith.constant 8.000000e+00 : f32
    %207 = vector.broadcast %cst_135 : f32 to vector<1x1xf32>
    %208 = arith.divf %206, %207 : vector<1x1xf32>
    %209 = vector.broadcast %208 : vector<1x1xf32> to vector<8x64xf32>
    %210 = arith.subf %200, %209 : vector<8x64xf32>
    %211 = arith.mulf %210, %210 : vector<8x64xf32>
    %cst_136 = arith.constant dense<0.000000e+00> : vector<8xf32>
    %212 = vector.multi_reduction <add>, %211, %cst_136 [1] : vector<8x64xf32> to vector<8xf32>
    %213 = vector.shape_cast %212 : vector<8xf32> to vector<8x1xf32>
    %cst_137 = arith.constant 6.400000e+01 : f32
    %214 = vector.broadcast %cst_137 : f32 to vector<8x1xf32>
    %215 = arith.divf %213, %214 : vector<8x1xf32>
    %cst_138 = arith.constant dense<0.000000e+00> : vector<1xf32>
    %216 = vector.multi_reduction <add>, %215, %cst_138 [0] : vector<8x1xf32> to vector<1xf32>
    %217 = vector.shape_cast %216 : vector<1xf32> to vector<1x1xf32>
    %cst_139 = arith.constant 8.000000e+00 : f32
    %218 = vector.broadcast %cst_139 : f32 to vector<1x1xf32>
    %219 = arith.divf %217, %218 : vector<1x1xf32>
    %cst_140 = arith.constant 9.99999974E-6 : f32
    %220 = vector.broadcast %cst_140 : f32 to vector<1x1xf32>
    %221 = arith.addf %219, %220 : vector<1x1xf32>
    %222 = math.rsqrt %221 : vector<1x1xf32>
    %223 = vector.broadcast %222 : vector<1x1xf32> to vector<8x64xf32>
    %224 = arith.mulf %210, %223 : vector<8x64xf32>
    %225 = vector.extract_strided_slice %183 {offsets = [1, 0], sizes = [1, 64], strides = [1, 1]} : vector<7x64xf32> to vector<1x64xf32>
    %226 = vector.broadcast %225 : vector<1x64xf32> to vector<8x64xf32>
    %227 = arith.mulf %224, %226 : vector<8x64xf32>
    %228 = vector.extract_strided_slice %183 {offsets = [2, 0], sizes = [1, 64], strides = [1, 1]} : vector<7x64xf32> to vector<1x64xf32>
    %229 = vector.broadcast %228 : vector<1x64xf32> to vector<8x64xf32>
    %230 = arith.addf %227, %229 : vector<8x64xf32>
    %cst_141 = arith.constant 5.000000e-01 : f32
    %231 = vector.broadcast %cst_141 : f32 to vector<8x64xf32>
    %232 = arith.mulf %231, %230 : vector<8x64xf32>
    %cst_142 = arith.constant 4.471500e-02 : f32
    %233 = vector.broadcast %cst_142 : f32 to vector<8x64xf32>
    %234 = arith.mulf %233, %230 : vector<8x64xf32>
    %235 = arith.mulf %234, %230 : vector<8x64xf32>
    %236 = arith.mulf %235, %230 : vector<8x64xf32>
    %237 = arith.addf %230, %236 : vector<8x64xf32>
    %cst_143 = arith.constant 0.797884583 : f32
    %238 = vector.broadcast %cst_143 : f32 to vector<8x64xf32>
    %239 = arith.mulf %238, %237 : vector<8x64xf32>
    %240 = math.tanh %239 : vector<8x64xf32>
    %cst_144 = arith.constant 1.000000e+00 : f32
    %241 = vector.broadcast %cst_144 : f32 to vector<8x64xf32>
    %242 = arith.addf %241, %240 : vector<8x64xf32>
    %243 = arith.mulf %232, %242 : vector<8x64xf32>
    %244 = vector.extract_strided_slice %183 {offsets = [3, 0], sizes = [1, 64], strides = [1, 1]} : vector<7x64xf32> to vector<1x64xf32>
    %c0_145 = arith.constant 0 : index
    %c0_146 = arith.constant 0 : index
    %c0_147 = arith.constant 0 : index
    %245 = vector.load %arg17[%c0_145, %c0_146, %c0_147] : memref<2x16x8xf32, #tpu.memory_space<vmem>>, vector<1x16x8xf32>
    %246 = vector.shape_cast %245 : vector<1x16x8xf32> to vector<16x8xf32>
    %c0_148 = arith.constant 0 : index
    %c0_149 = arith.constant 0 : index
    %c0_150 = arith.constant 0 : index
    %247 = vector.load %arg16[%c0_148, %c0_149, %c0_150] : memref<2x64x64xf32, #tpu.memory_space<vmem>>, vector<1x64x64xf32>
    %248 = vector.shape_cast %247 : vector<1x64x64xf32> to vector<64x64xf32>
    %cst_151 = arith.constant dense<0.000000e+00> : vector<8x64xf32>
    %249 = tpu.matmul %243, %248, %cst_151 {dimension_numbers = #tpu.dot_dimension_numbers<[1], [0], [0], [1], [0, 0, 1, 1], [], []>} : vector<8x64xf32>, vector<64x64xf32>, vector<8x64xf32> -> vector<8x64xf32>
    %cst_152 = arith.constant dense<0.000000e+00> : vector<16x64xf32>
    %250 = tpu.matmul %246, %249, %cst_152 {dimension_numbers = #tpu.dot_dimension_numbers<[1], [0], [0], [1], [0, 0, 1, 1], [], []>} : vector<16x8xf32>, vector<8x64xf32>, vector<16x64xf32> -> vector<16x64xf32>
    %c1_153 = arith.constant 1 : index
    %c0_154 = arith.constant 0 : index
    %c0_155 = arith.constant 0 : index
    %251 = vector.load %arg17[%c1_153, %c0_154, %c0_155] : memref<2x16x8xf32, #tpu.memory_space<vmem>>, vector<1x16x8xf32>
    %252 = vector.shape_cast %251 : vector<1x16x8xf32> to vector<16x8xf32>
    %c1_156 = arith.constant 1 : index
    %c0_157 = arith.constant 0 : index
    %c0_158 = arith.constant 0 : index
    %253 = vector.load %arg16[%c1_156, %c0_157, %c0_158] : memref<2x64x64xf32, #tpu.memory_space<vmem>>, vector<1x64x64xf32>
    %254 = vector.shape_cast %253 : vector<1x64x64xf32> to vector<64x64xf32>
    %cst_159 = arith.constant dense<0.000000e+00> : vector<8x64xf32>
    %255 = tpu.matmul %243, %254, %cst_159 {dimension_numbers = #tpu.dot_dimension_numbers<[1], [0], [0], [1], [0, 0, 1, 1], [], []>} : vector<8x64xf32>, vector<64x64xf32>, vector<8x64xf32> -> vector<8x64xf32>
    %cst_160 = arith.constant dense<0.000000e+00> : vector<16x64xf32>
    %256 = tpu.matmul %252, %255, %cst_160 {dimension_numbers = #tpu.dot_dimension_numbers<[1], [0], [0], [1], [0, 0, 1, 1], [], []>} : vector<16x8xf32>, vector<8x64xf32>, vector<16x64xf32> -> vector<16x64xf32>
    %257 = arith.addf %250, %256 : vector<16x64xf32>
    %258 = vector.broadcast %244 : vector<1x64xf32> to vector<16x64xf32>
    %259 = arith.addf %257, %258 : vector<16x64xf32>
    %cst_161 = arith.constant 5.000000e-01 : f32
    %260 = vector.broadcast %cst_161 : f32 to vector<16x64xf32>
    %261 = arith.mulf %260, %259 : vector<16x64xf32>
    %cst_162 = arith.constant 4.471500e-02 : f32
    %262 = vector.broadcast %cst_162 : f32 to vector<16x64xf32>
    %263 = arith.mulf %262, %259 : vector<16x64xf32>
    %264 = arith.mulf %263, %259 : vector<16x64xf32>
    %265 = arith.mulf %264, %259 : vector<16x64xf32>
    %266 = arith.addf %259, %265 : vector<16x64xf32>
    %cst_163 = arith.constant 0.797884583 : f32
    %267 = vector.broadcast %cst_163 : f32 to vector<16x64xf32>
    %268 = arith.mulf %267, %266 : vector<16x64xf32>
    %269 = math.tanh %268 : vector<16x64xf32>
    %cst_164 = arith.constant 1.000000e+00 : f32
    %270 = vector.broadcast %cst_164 : f32 to vector<16x64xf32>
    %271 = arith.addf %270, %269 : vector<16x64xf32>
    %272 = arith.mulf %261, %271 : vector<16x64xf32>
    %c0_165 = arith.constant 0 : index
    %c0_166 = arith.constant 0 : index
    %c0_167 = arith.constant 0 : index
    %273 = vector.load %arg28[%c0_165, %c0_166, %c0_167] : memref<1x16x64xf32, #tpu.memory_space<vmem>>, vector<1x16x64xf32>
    %274 = vector.shape_cast %273 : vector<1x16x64xf32> to vector<16x64xf32>
    %275 = vector.shape_cast %272 : vector<16x64xf32> to vector<1x16x64xf32>
    tpu.vector_store %arg28[%c0_165, %c0_166, %c0_167], %275 {strides = array<i32>} : memref<1x16x64xf32, #tpu.memory_space<vmem>>, vector<1x16x64xf32>,
    %276 = vector.extract_strided_slice %183 {offsets = [4, 0], sizes = [1, 64], strides = [1, 1]} : vector<7x64xf32> to vector<1x64xf32>
    %c0_168 = arith.constant 0 : index
    %c0_169 = arith.constant 0 : index
    %c0_170 = arith.constant 0 : index
    %277 = vector.load %arg19[%c0_168, %c0_169, %c0_170] : memref<2x32x16xf32, #tpu.memory_space<vmem>>, vector<1x32x16xf32>
    %278 = vector.shape_cast %277 : vector<1x32x16xf32> to vector<32x16xf32>
    %c0_171 = arith.constant 0 : index
    %c0_172 = arith.constant 0 : index
    %c0_173 = arith.constant 0 : index
    %279 = vector.load %arg18[%c0_171, %c0_172, %c0_173] : memref<2x64x64xf32, #tpu.memory_space<vmem>>, vector<1x64x64xf32>
    %280 = vector.shape_cast %279 : vector<1x64x64xf32> to vector<64x64xf32>
    %cst_174 = arith.constant dense<0.000000e+00> : vector<16x64xf32>
    %281 = tpu.matmul %272, %280, %cst_174 {dimension_numbers = #tpu.dot_dimension_numbers<[1], [0], [0], [1], [0, 0, 1, 1], [], []>} : vector<16x64xf32>, vector<64x64xf32>, vector<16x64xf32> -> vector<16x64xf32>
    %cst_175 = arith.constant dense<0.000000e+00> : vector<32x64xf32>
    %282 = tpu.matmul %278, %281, %cst_175 {dimension_numbers = #tpu.dot_dimension_numbers<[1], [0], [0], [1], [0, 0, 1, 1], [], []>} : vector<32x16xf32>, vector<16x64xf32>, vector<32x64xf32> -> vector<32x64xf32>
    %c1_176 = arith.constant 1 : index
    %c0_177 = arith.constant 0 : index
    %c0_178 = arith.constant 0 : index
    %283 = vector.load %arg19[%c1_176, %c0_177, %c0_178] : memref<2x32x16xf32, #tpu.memory_space<vmem>>, vector<1x32x16xf32>
    %284 = vector.shape_cast %283 : vector<1x32x16xf32> to vector<32x16xf32>
    %c1_179 = arith.constant 1 : index
    %c0_180 = arith.constant 0 : index
    %c0_181 = arith.constant 0 : index
    %285 = vector.load %arg18[%c1_179, %c0_180, %c0_181] : memref<2x64x64xf32, #tpu.memory_space<vmem>>, vector<1x64x64xf32>
    %286 = vector.shape_cast %285 : vector<1x64x64xf32> to vector<64x64xf32>
    %cst_182 = arith.constant dense<0.000000e+00> : vector<16x64xf32>
    %287 = tpu.matmul %272, %286, %cst_182 {dimension_numbers = #tpu.dot_dimension_numbers<[1], [0], [0], [1], [0, 0, 1, 1], [], []>} : vector<16x64xf32>, vector<64x64xf32>, vector<16x64xf32> -> vector<16x64xf32>
    %cst_183 = arith.constant dense<0.000000e+00> : vector<32x64xf32>
    %288 = tpu.matmul %284, %287, %cst_183 {dimension_numbers = #tpu.dot_dimension_numbers<[1], [0], [0], [1], [0, 0, 1, 1], [], []>} : vector<32x16xf32>, vector<16x64xf32>, vector<32x64xf32> -> vector<32x64xf32>
    %289 = arith.addf %282, %288 : vector<32x64xf32>
    %290 = vector.broadcast %276 : vector<1x64xf32> to vector<32x64xf32>
    %291 = arith.addf %289, %290 : vector<32x64xf32>
    %c0_184 = arith.constant 0 : index
    %c0_185 = arith.constant 0 : index
    %292 = vector.load %arg22[%c0_184, %c0_185] : memref<64x64xf32, #tpu.memory_space<vmem>>, vector<64x64xf32>
    %293 = vector.extract_strided_slice %183 {offsets = [5, 0], sizes = [1, 64], strides = [1, 1]} : vector<7x64xf32> to vector<1x64xf32>
    %294 = vector.extract_strided_slice %183 {offsets = [6, 0], sizes = [1, 64], strides = [1, 1]} : vector<7x64xf32> to vector<1x64xf32>
    %cst_186 = arith.constant dense<0.000000e+00> : vector<32x64xf32>
    %295 = tpu.matmul %291, %292, %cst_186 {dimension_numbers = #tpu.dot_dimension_numbers<[1], [0], [0], [1], [0, 0, 1, 1], [], []>} : vector<32x64xf32>, vector<64x64xf32>, vector<32x64xf32> -> vector<32x64xf32>
    %296 = arith.subf %291, %295 : vector<32x64xf32>
    %297 = arith.mulf %296, %296 : vector<32x64xf32>
    %cst_187 = arith.constant dense<0.000000e+00> : vector<32x64xf32>
    %298 = tpu.matmul %297, %292, %cst_187 {dimension_numbers = #tpu.dot_dimension_numbers<[1], [0], [0], [1], [0, 0, 1, 1], [], []>} : vector<32x64xf32>, vector<64x64xf32>, vector<32x64xf32> -> vector<32x64xf32>
    %cst_188 = arith.constant 9.99999997E-7 : f32
    %299 = vector.broadcast %cst_188 : f32 to vector<32x64xf32>
    %300 = arith.addf %298, %299 : vector<32x64xf32>
    %301 = math.rsqrt %300 : vector<32x64xf32>
    %302 = arith.mulf %296, %301 : vector<32x64xf32>
    %303 = vector.broadcast %293 : vector<1x64xf32> to vector<32x64xf32>
    %304 = arith.mulf %302, %303 : vector<32x64xf32>
    %305 = vector.broadcast %294 : vector<1x64xf32> to vector<32x64xf32>
    %306 = arith.addf %304, %305 : vector<32x64xf32>
    %cst_189 = arith.constant 5.000000e-01 : f32
    %307 = vector.broadcast %cst_189 : f32 to vector<32x64xf32>
    %308 = arith.mulf %307, %306 : vector<32x64xf32>
    %cst_190 = arith.constant 4.471500e-02 : f32
    %309 = vector.broadcast %cst_190 : f32 to vector<32x64xf32>
    %310 = arith.mulf %309, %306 : vector<32x64xf32>
    %311 = arith.mulf %310, %306 : vector<32x64xf32>
    %312 = arith.mulf %311, %306 : vector<32x64xf32>
    %313 = arith.addf %306, %312 : vector<32x64xf32>
    %cst_191 = arith.constant 0.797884583 : f32
    %314 = vector.broadcast %cst_191 : f32 to vector<32x64xf32>
    %315 = arith.mulf %314, %313 : vector<32x64xf32>
    %316 = math.tanh %315 : vector<32x64xf32>
    %cst_192 = arith.constant 1.000000e+00 : f32
    %317 = vector.broadcast %cst_192 : f32 to vector<32x64xf32>
    %318 = arith.addf %317, %316 : vector<32x64xf32>
    %319 = arith.mulf %308, %318 : vector<32x64xf32>
    %320 = vector.extract_strided_slice %184 {offsets = [0, 0], sizes = [1, 128], strides = [1, 1]} : vector<13x128xf32> to vector<1x128xf32>
    %c0_193 = arith.constant 0 : index
    %c0_194 = arith.constant 0 : index
    %c0_195 = arith.constant 0 : index
    %321 = vector.load %arg21[%c0_193, %c0_194, %c0_195] : memref<2x64x32xf32, #tpu.memory_space<vmem>>, vector<1x64x32xf32>
    %322 = vector.shape_cast %321 : vector<1x64x32xf32> to vector<64x32xf32>
    %c0_196 = arith.constant 0 : index
    %c0_197 = arith.constant 0 : index
    %c0_198 = arith.constant 0 : index
    %323 = vector.load %arg20[%c0_196, %c0_197, %c0_198] : memref<2x64x128xf32, #tpu.memory_space<vmem>>, vector<1x64x128xf32>
    %324 = vector.shape_cast %323 : vector<1x64x128xf32> to vector<64x128xf32>
    %cst_199 = arith.constant dense<0.000000e+00> : vector<32x128xf32>
    %325 = tpu.matmul %319, %324, %cst_199 {dimension_numbers = #tpu.dot_dimension_numbers<[1], [0], [0], [1], [0, 0, 1, 1], [], []>} : vector<32x64xf32>, vector<64x128xf32>, vector<32x128xf32> -> vector<32x128xf32>
    %cst_200 = arith.constant dense<0.000000e+00> : vector<64x128xf32>
    %326 = tpu.matmul %322, %325, %cst_200 {dimension_numbers = #tpu.dot_dimension_numbers<[1], [0], [0], [1], [0, 0, 1, 1], [], []>} : vector<64x32xf32>, vector<32x128xf32>, vector<64x128xf32> -> vector<64x128xf32>
    %c1_201 = arith.constant 1 : index
    %c0_202 = arith.constant 0 : index
    %c0_203 = arith.constant 0 : index
    %327 = vector.load %arg21[%c1_201, %c0_202, %c0_203] : memref<2x64x32xf32, #tpu.memory_space<vmem>>, vector<1x64x32xf32>
    %328 = vector.shape_cast %327 : vector<1x64x32xf32> to vector<64x32xf32>
    %c1_204 = arith.constant 1 : index
    %c0_205 = arith.constant 0 : index
    %c0_206 = arith.constant 0 : index
    %329 = vector.load %arg20[%c1_204, %c0_205, %c0_206] : memref<2x64x128xf32, #tpu.memory_space<vmem>>, vector<1x64x128xf32>
    %330 = vector.shape_cast %329 : vector<1x64x128xf32> to vector<64x128xf32>
    %cst_207 = arith.constant dense<0.000000e+00> : vector<32x128xf32>
    %331 = tpu.matmul %319, %330, %cst_207 {dimension_numbers = #tpu.dot_dimension_numbers<[1], [0], [0], [1], [0, 0, 1, 1], [], []>} : vector<32x64xf32>, vector<64x128xf32>, vector<32x128xf32> -> vector<32x128xf32>
    %cst_208 = arith.constant dense<0.000000e+00> : vector<64x128xf32>
    %332 = tpu.matmul %328, %331, %cst_208 {dimension_numbers = #tpu.dot_dimension_numbers<[1], [0], [0], [1], [0, 0, 1, 1], [], []>} : vector<64x32xf32>, vector<32x128xf32>, vector<64x128xf32> -> vector<64x128xf32>
    %333 = arith.addf %326, %332 : vector<64x128xf32>
    %334 = vector.broadcast %320 : vector<1x128xf32> to vector<64x128xf32>
    %335 = arith.addf %333, %334 : vector<64x128xf32>
    %c0_209 = arith.constant 0 : index
    %c0_210 = arith.constant 0 : index
    %336 = vector.load %arg23[%c0_209, %c0_210] : memref<128x128xf32, #tpu.memory_space<vmem>>, vector<128x128xf32>
    %337 = vector.extract_strided_slice %184 {offsets = [1, 0], sizes = [1, 128], strides = [1, 1]} : vector<13x128xf32> to vector<1x128xf32>
    %338 = vector.extract_strided_slice %184 {offsets = [2, 0], sizes = [1, 128], strides = [1, 1]} : vector<13x128xf32> to vector<1x128xf32>
    %cst_211 = arith.constant dense<0.000000e+00> : vector<64x128xf32>
    %339 = tpu.matmul %335, %336, %cst_211 {dimension_numbers = #tpu.dot_dimension_numbers<[1], [0], [0], [1], [0, 0, 1, 1], [], []>} : vector<64x128xf32>, vector<128x128xf32>, vector<64x128xf32> -> vector<64x128xf32>
    %340 = arith.subf %335, %339 : vector<64x128xf32>
    %341 = arith.mulf %340, %340 : vector<64x128xf32>
    %cst_212 = arith.constant dense<0.000000e+00> : vector<64x128xf32>
    %342 = tpu.matmul %341, %336, %cst_212 {dimension_numbers = #tpu.dot_dimension_numbers<[1], [0], [0], [1], [0, 0, 1, 1], [], []>} : vector<64x128xf32>, vector<128x128xf32>, vector<64x128xf32> -> vector<64x128xf32>
    %cst_213 = arith.constant 9.99999997E-7 : f32
    %343 = vector.broadcast %cst_213 : f32 to vector<64x128xf32>
    %344 = arith.addf %342, %343 : vector<64x128xf32>
    %345 = math.rsqrt %344 : vector<64x128xf32>
    %346 = arith.mulf %340, %345 : vector<64x128xf32>
    %347 = vector.broadcast %337 : vector<1x128xf32> to vector<64x128xf32>
    %348 = arith.mulf %346, %347 : vector<64x128xf32>
    %349 = vector.broadcast %338 : vector<1x128xf32> to vector<64x128xf32>
    %350 = arith.addf %348, %349 : vector<64x128xf32>
    %cst_214 = arith.constant 5.000000e-01 : f32
    %351 = vector.broadcast %cst_214 : f32 to vector<64x128xf32>
    %352 = arith.mulf %351, %350 : vector<64x128xf32>
    %cst_215 = arith.constant 4.471500e-02 : f32
    %353 = vector.broadcast %cst_215 : f32 to vector<64x128xf32>
    %354 = arith.mulf %353, %350 : vector<64x128xf32>
    %355 = arith.mulf %354, %350 : vector<64x128xf32>
    %356 = arith.mulf %355, %350 : vector<64x128xf32>
    %357 = arith.addf %350, %356 : vector<64x128xf32>
    %cst_216 = arith.constant 0.797884583 : f32
    %358 = vector.broadcast %cst_216 : f32 to vector<64x128xf32>
    %359 = arith.mulf %358, %357 : vector<64x128xf32>
    %360 = math.tanh %359 : vector<64x128xf32>
    %cst_217 = arith.constant 1.000000e+00 : f32
    %361 = vector.broadcast %cst_217 : f32 to vector<64x128xf32>
    %362 = arith.addf %361, %360 : vector<64x128xf32>
    %363 = arith.mulf %352, %362 : vector<64x128xf32>
    %cst_218 = arith.constant 0.000000e+00 : f32
    %364 = vector.broadcast %cst_218 : f32 to vector<64x128xf32>
    %c0_219 = arith.constant 0 : index
    %c0_220 = arith.constant 0 : index
    %c0_221 = arith.constant 0 : index
    %365 = vector.load %arg25[%c0_219, %c0_220, %c0_221] : memref<12x128x128xf32, #tpu.memory_space<vmem>>, vector<1x128x128xf32>
    %366 = vector.shape_cast %365 : vector<1x128x128xf32> to vector<128x128xf32>
    %cst_222 = arith.constant dense<0.000000e+00> : vector<64x128xf32>
    %367 = tpu.matmul %363, %366, %cst_222 {dimension_numbers = #tpu.dot_dimension_numbers<[1], [0], [0], [1], [0, 0, 1, 1], [], []>} : vector<64x128xf32>, vector<128x128xf32>, vector<64x128xf32> -> vector<64x128xf32>
    %c0_223 = arith.constant 0 : index
    %c0_224 = arith.constant 0 : index
    %c0_225 = arith.constant 0 : index
    %368 = vector.load %arg24[%c0_223, %c0_224, %c0_225] : memref<3x64x64xf32, #tpu.memory_space<vmem>>, vector<1x64x64xf32>
    %369 = vector.shape_cast %368 : vector<1x64x64xf32> to vector<64x64xf32>
    %cst_226 = arith.constant dense<0.000000e+00> : vector<64x128xf32>
    %370 = tpu.matmul %369, %367, %cst_226 {dimension_numbers = #tpu.dot_dimension_numbers<[1], [0], [0], [1], [0, 0, 1, 1], [], []>} : vector<64x64xf32>, vector<64x128xf32>, vector<64x128xf32> -> vector<64x128xf32>
    %371 = arith.addf %364, %370 : vector<64x128xf32>
    %c1_227 = arith.constant 1 : index
    %c0_228 = arith.constant 0 : index
    %c0_229 = arith.constant 0 : index
    %372 = vector.load %arg25[%c1_227, %c0_228, %c0_229] : memref<12x128x128xf32, #tpu.memory_space<vmem>>, vector<1x128x128xf32>
    %373 = vector.shape_cast %372 : vector<1x128x128xf32> to vector<128x128xf32>
    %cst_230 = arith.constant dense<0.000000e+00> : vector<64x128xf32>
    %374 = tpu.matmul %363, %373, %cst_230 {dimension_numbers = #tpu.dot_dimension_numbers<[1], [0], [0], [1], [0, 0, 1, 1], [], []>} : vector<64x128xf32>, vector<128x128xf32>, vector<64x128xf32> -> vector<64x128xf32>
    %c1_231 = arith.constant 1 : index
    %c0_232 = arith.constant 0 : index
    %c0_233 = arith.constant 0 : index
    %375 = vector.load %arg24[%c1_231, %c0_232, %c0_233] : memref<3x64x64xf32, #tpu.memory_space<vmem>>, vector<1x64x64xf32>
    %376 = vector.shape_cast %375 : vector<1x64x64xf32> to vector<64x64xf32>
    %cst_234 = arith.constant dense<0.000000e+00> : vector<64x128xf32>
    %377 = tpu.matmul %376, %374, %cst_234 {dimension_numbers = #tpu.dot_dimension_numbers<[1], [0], [0], [1], [0, 0, 1, 1], [], []>} : vector<64x64xf32>, vector<64x128xf32>, vector<64x128xf32> -> vector<64x128xf32>
    %378 = arith.addf %371, %377 : vector<64x128xf32>
    %c2_235 = arith.constant 2 : index
    %c0_236 = arith.constant 0 : index
    %c0_237 = arith.constant 0 : index
    %379 = vector.load %arg25[%c2_235, %c0_236, %c0_237] : memref<12x128x128xf32, #tpu.memory_space<vmem>>, vector<1x128x128xf32>
    %380 = vector.shape_cast %379 : vector<1x128x128xf32> to vector<128x128xf32>
    %cst_238 = arith.constant dense<0.000000e+00> : vector<64x128xf32>
    %381 = tpu.matmul %363, %380, %cst_238 {dimension_numbers = #tpu.dot_dimension_numbers<[1], [0], [0], [1], [0, 0, 1, 1], [], []>} : vector<64x128xf32>, vector<128x128xf32>, vector<64x128xf32> -> vector<64x128xf32>
    %c2_239 = arith.constant 2 : index
    %c0_240 = arith.constant 0 : index
    %c0_241 = arith.constant 0 : index
    %382 = vector.load %arg24[%c2_239, %c0_240, %c0_241] : memref<3x64x64xf32, #tpu.memory_space<vmem>>, vector<1x64x64xf32>
    %383 = vector.shape_cast %382 : vector<1x64x64xf32> to vector<64x64xf32>
    %cst_242 = arith.constant dense<0.000000e+00> : vector<64x128xf32>
    %384 = tpu.matmul %383, %381, %cst_242 {dimension_numbers = #tpu.dot_dimension_numbers<[1], [0], [0], [1], [0, 0, 1, 1], [], []>} : vector<64x64xf32>, vector<64x128xf32>, vector<64x128xf32> -> vector<64x128xf32>
    %385 = arith.addf %378, %384 : vector<64x128xf32>
    %386 = vector.extract_strided_slice %184 {offsets = [3, 0], sizes = [1, 128], strides = [1, 1]} : vector<13x128xf32> to vector<1x128xf32>
    %387 = vector.broadcast %386 : vector<1x128xf32> to vector<64x128xf32>
    %388 = arith.addf %385, %387 : vector<64x128xf32>
    %c0_243 = arith.constant 0 : index
    %c0_244 = arith.constant 0 : index
    %389 = vector.load %arg23[%c0_243, %c0_244] : memref<128x128xf32, #tpu.memory_space<vmem>>, vector<128x128xf32>
    %390 = vector.extract_strided_slice %184 {offsets = [7, 0], sizes = [1, 128], strides = [1, 1]} : vector<13x128xf32> to vector<1x128xf32>
    %391 = vector.extract_strided_slice %184 {offsets = [10, 0], sizes = [1, 128], strides = [1, 1]} : vector<13x128xf32> to vector<1x128xf32>
    %cst_245 = arith.constant dense<0.000000e+00> : vector<64x128xf32>
    %392 = tpu.matmul %388, %389, %cst_245 {dimension_numbers = #tpu.dot_dimension_numbers<[1], [0], [0], [1], [0, 0, 1, 1], [], []>} : vector<64x128xf32>, vector<128x128xf32>, vector<64x128xf32> -> vector<64x128xf32>
    %393 = arith.subf %388, %392 : vector<64x128xf32>
    %394 = arith.mulf %393, %393 : vector<64x128xf32>
    %cst_246 = arith.constant dense<0.000000e+00> : vector<64x128xf32>
    %395 = tpu.matmul %394, %389, %cst_246 {dimension_numbers = #tpu.dot_dimension_numbers<[1], [0], [0], [1], [0, 0, 1, 1], [], []>} : vector<64x128xf32>, vector<128x128xf32>, vector<64x128xf32> -> vector<64x128xf32>
    %cst_247 = arith.constant 9.99999997E-7 : f32
    %396 = vector.broadcast %cst_247 : f32 to vector<64x128xf32>
    %397 = arith.addf %395, %396 : vector<64x128xf32>
    %398 = math.rsqrt %397 : vector<64x128xf32>
    %399 = arith.mulf %393, %398 : vector<64x128xf32>
    %400 = vector.broadcast %390 : vector<1x128xf32> to vector<64x128xf32>
    %401 = arith.mulf %399, %400 : vector<64x128xf32>
    %402 = vector.broadcast %391 : vector<1x128xf32> to vector<64x128xf32>
    %403 = arith.addf %401, %402 : vector<64x128xf32>
    %cst_248 = arith.constant 5.000000e-01 : f32
    %404 = vector.broadcast %cst_248 : f32 to vector<64x128xf32>
    %405 = arith.mulf %404, %403 : vector<64x128xf32>
    %cst_249 = arith.constant 4.471500e-02 : f32
    %406 = vector.broadcast %cst_249 : f32 to vector<64x128xf32>
    %407 = arith.mulf %406, %403 : vector<64x128xf32>
    %408 = arith.mulf %407, %403 : vector<64x128xf32>
    %409 = arith.mulf %408, %403 : vector<64x128xf32>
    %410 = arith.addf %403, %409 : vector<64x128xf32>
    %cst_250 = arith.constant 0.797884583 : f32
    %411 = vector.broadcast %cst_250 : f32 to vector<64x128xf32>
    %412 = arith.mulf %411, %410 : vector<64x128xf32>
    %413 = math.tanh %412 : vector<64x128xf32>
    %cst_251 = arith.constant 1.000000e+00 : f32
    %414 = vector.broadcast %cst_251 : f32 to vector<64x128xf32>
    %415 = arith.addf %414, %413 : vector<64x128xf32>
    %416 = arith.mulf %405, %415 : vector<64x128xf32>
    %cst_252 = arith.constant 0.000000e+00 : f32
    %417 = vector.broadcast %cst_252 : f32 to vector<64x128xf32>
    %c3_253 = arith.constant 3 : index
    %c0_254 = arith.constant 0 : index
    %c0_255 = arith.constant 0 : index
    %418 = vector.load %arg25[%c3_253, %c0_254, %c0_255] : memref<12x128x128xf32, #tpu.memory_space<vmem>>, vector<1x128x128xf32>
    %419 = vector.shape_cast %418 : vector<1x128x128xf32> to vector<128x128xf32>
    %cst_256 = arith.constant dense<0.000000e+00> : vector<64x128xf32>
    %420 = tpu.matmul %416, %419, %cst_256 {dimension_numbers = #tpu.dot_dimension_numbers<[1], [0], [0], [1], [0, 0, 1, 1], [], []>} : vector<64x128xf32>, vector<128x128xf32>, vector<64x128xf32> -> vector<64x128xf32>
    %c0_257 = arith.constant 0 : index
    %c0_258 = arith.constant 0 : index
    %c0_259 = arith.constant 0 : index
    %421 = vector.load %arg24[%c0_257, %c0_258, %c0_259] : memref<3x64x64xf32, #tpu.memory_space<vmem>>, vector<1x64x64xf32>
    %422 = vector.shape_cast %421 : vector<1x64x64xf32> to vector<64x64xf32>
    %cst_260 = arith.constant dense<0.000000e+00> : vector<64x128xf32>
    %423 = tpu.matmul %422, %420, %cst_260 {dimension_numbers = #tpu.dot_dimension_numbers<[1], [0], [0], [1], [0, 0, 1, 1], [], []>} : vector<64x64xf32>, vector<64x128xf32>, vector<64x128xf32> -> vector<64x128xf32>
    %424 = arith.addf %417, %423 : vector<64x128xf32>
    %c4_261 = arith.constant 4 : index
    %c0_262 = arith.constant 0 : index
    %c0_263 = arith.constant 0 : index
    %425 = vector.load %arg25[%c4_261, %c0_262, %c0_263] : memref<12x128x128xf32, #tpu.memory_space<vmem>>, vector<1x128x128xf32>
    %426 = vector.shape_cast %425 : vector<1x128x128xf32> to vector<128x128xf32>
    %cst_264 = arith.constant dense<0.000000e+00> : vector<64x128xf32>
    %427 = tpu.matmul %416, %426, %cst_264 {dimension_numbers = #tpu.dot_dimension_numbers<[1], [0], [0], [1], [0, 0, 1, 1], [], []>} : vector<64x128xf32>, vector<128x128xf32>, vector<64x128xf32> -> vector<64x128xf32>
    %c1_265 = arith.constant 1 : index
    %c0_266 = arith.constant 0 : index
    %c0_267 = arith.constant 0 : index
    %428 = vector.load %arg24[%c1_265, %c0_266, %c0_267] : memref<3x64x64xf32, #tpu.memory_space<vmem>>, vector<1x64x64xf32>
    %429 = vector.shape_cast %428 : vector<1x64x64xf32> to vector<64x64xf32>
    %cst_268 = arith.constant dense<0.000000e+00> : vector<64x128xf32>
    %430 = tpu.matmul %429, %427, %cst_268 {dimension_numbers = #tpu.dot_dimension_numbers<[1], [0], [0], [1], [0, 0, 1, 1], [], []>} : vector<64x64xf32>, vector<64x128xf32>, vector<64x128xf32> -> vector<64x128xf32>
    %431 = arith.addf %424, %430 : vector<64x128xf32>
    %c5_269 = arith.constant 5 : index
    %c0_270 = arith.constant 0 : index
    %c0_271 = arith.constant 0 : index
    %432 = vector.load %arg25[%c5_269, %c0_270, %c0_271] : memref<12x128x128xf32, #tpu.memory_space<vmem>>, vector<1x128x128xf32>
    %433 = vector.shape_cast %432 : vector<1x128x128xf32> to vector<128x128xf32>
    %cst_272 = arith.constant dense<0.000000e+00> : vector<64x128xf32>
    %434 = tpu.matmul %416, %433, %cst_272 {dimension_numbers = #tpu.dot_dimension_numbers<[1], [0], [0], [1], [0, 0, 1, 1], [], []>} : vector<64x128xf32>, vector<128x128xf32>, vector<64x128xf32> -> vector<64x128xf32>
    %c2_273 = arith.constant 2 : index
    %c0_274 = arith.constant 0 : index
    %c0_275 = arith.constant 0 : index
    %435 = vector.load %arg24[%c2_273, %c0_274, %c0_275] : memref<3x64x64xf32, #tpu.memory_space<vmem>>, vector<1x64x64xf32>
    %436 = vector.shape_cast %435 : vector<1x64x64xf32> to vector<64x64xf32>
    %cst_276 = arith.constant dense<0.000000e+00> : vector<64x128xf32>
    %437 = tpu.matmul %436, %434, %cst_276 {dimension_numbers = #tpu.dot_dimension_numbers<[1], [0], [0], [1], [0, 0, 1, 1], [], []>} : vector<64x64xf32>, vector<64x128xf32>, vector<64x128xf32> -> vector<64x128xf32>
    %438 = arith.addf %431, %437 : vector<64x128xf32>
    %439 = vector.extract_strided_slice %184 {offsets = [4, 0], sizes = [1, 128], strides = [1, 1]} : vector<13x128xf32> to vector<1x128xf32>
    %440 = vector.broadcast %439 : vector<1x128xf32> to vector<64x128xf32>
    %441 = arith.addf %438, %440 : vector<64x128xf32>
    %c0_277 = arith.constant 0 : index
    %c0_278 = arith.constant 0 : index
    %442 = vector.load %arg23[%c0_277, %c0_278] : memref<128x128xf32, #tpu.memory_space<vmem>>, vector<128x128xf32>
    %443 = vector.extract_strided_slice %184 {offsets = [8, 0], sizes = [1, 128], strides = [1, 1]} : vector<13x128xf32> to vector<1x128xf32>
    %444 = vector.extract_strided_slice %184 {offsets = [11, 0], sizes = [1, 128], strides = [1, 1]} : vector<13x128xf32> to vector<1x128xf32>
    %cst_279 = arith.constant dense<0.000000e+00> : vector<64x128xf32>
    %445 = tpu.matmul %441, %442, %cst_279 {dimension_numbers = #tpu.dot_dimension_numbers<[1], [0], [0], [1], [0, 0, 1, 1], [], []>} : vector<64x128xf32>, vector<128x128xf32>, vector<64x128xf32> -> vector<64x128xf32>
    %446 = arith.subf %441, %445 : vector<64x128xf32>
    %447 = arith.mulf %446, %446 : vector<64x128xf32>
    %cst_280 = arith.constant dense<0.000000e+00> : vector<64x128xf32>
    %448 = tpu.matmul %447, %442, %cst_280 {dimension_numbers = #tpu.dot_dimension_numbers<[1], [0], [0], [1], [0, 0, 1, 1], [], []>} : vector<64x128xf32>, vector<128x128xf32>, vector<64x128xf32> -> vector<64x128xf32>
    %cst_281 = arith.constant 9.99999997E-7 : f32
    %449 = vector.broadcast %cst_281 : f32 to vector<64x128xf32>
    %450 = arith.addf %448, %449 : vector<64x128xf32>
    %451 = math.rsqrt %450 : vector<64x128xf32>
    %452 = arith.mulf %446, %451 : vector<64x128xf32>
    %453 = vector.broadcast %443 : vector<1x128xf32> to vector<64x128xf32>
    %454 = arith.mulf %452, %453 : vector<64x128xf32>
    %455 = vector.broadcast %444 : vector<1x128xf32> to vector<64x128xf32>
    %456 = arith.addf %454, %455 : vector<64x128xf32>
    %cst_282 = arith.constant 5.000000e-01 : f32
    %457 = vector.broadcast %cst_282 : f32 to vector<64x128xf32>
    %458 = arith.mulf %457, %456 : vector<64x128xf32>
    %cst_283 = arith.constant 4.471500e-02 : f32
    %459 = vector.broadcast %cst_283 : f32 to vector<64x128xf32>
    %460 = arith.mulf %459, %456 : vector<64x128xf32>
    %461 = arith.mulf %460, %456 : vector<64x128xf32>
    %462 = arith.mulf %461, %456 : vector<64x128xf32>
    %463 = arith.addf %456, %462 : vector<64x128xf32>
    %cst_284 = arith.constant 0.797884583 : f32
    %464 = vector.broadcast %cst_284 : f32 to vector<64x128xf32>
    %465 = arith.mulf %464, %463 : vector<64x128xf32>
    %466 = math.tanh %465 : vector<64x128xf32>
    %cst_285 = arith.constant 1.000000e+00 : f32
    %467 = vector.broadcast %cst_285 : f32 to vector<64x128xf32>
    %468 = arith.addf %467, %466 : vector<64x128xf32>
    %469 = arith.mulf %458, %468 : vector<64x128xf32>
    %cst_286 = arith.constant 0.000000e+00 : f32
    %470 = vector.broadcast %cst_286 : f32 to vector<64x128xf32>
    %c6_287 = arith.constant 6 : index
    %c0_288 = arith.constant 0 : index
    %c0_289 = arith.constant 0 : index
    %471 = vector.load %arg25[%c6_287, %c0_288, %c0_289] : memref<12x128x128xf32, #tpu.memory_space<vmem>>, vector<1x128x128xf32>
    %472 = vector.shape_cast %471 : vector<1x128x128xf32> to vector<128x128xf32>
    %cst_290 = arith.constant dense<0.000000e+00> : vector<64x128xf32>
    %473 = tpu.matmul %469, %472, %cst_290 {dimension_numbers = #tpu.dot_dimension_numbers<[1], [0], [0], [1], [0, 0, 1, 1], [], []>} : vector<64x128xf32>, vector<128x128xf32>, vector<64x128xf32> -> vector<64x128xf32>
    %c0_291 = arith.constant 0 : index
    %c0_292 = arith.constant 0 : index
    %c0_293 = arith.constant 0 : index
    %474 = vector.load %arg24[%c0_291, %c0_292, %c0_293] : memref<3x64x64xf32, #tpu.memory_space<vmem>>, vector<1x64x64xf32>
    %475 = vector.shape_cast %474 : vector<1x64x64xf32> to vector<64x64xf32>
    %cst_294 = arith.constant dense<0.000000e+00> : vector<64x128xf32>
    %476 = tpu.matmul %475, %473, %cst_294 {dimension_numbers = #tpu.dot_dimension_numbers<[1], [0], [0], [1], [0, 0, 1, 1], [], []>} : vector<64x64xf32>, vector<64x128xf32>, vector<64x128xf32> -> vector<64x128xf32>
    %477 = arith.addf %470, %476 : vector<64x128xf32>
    %c7_295 = arith.constant 7 : index
    %c0_296 = arith.constant 0 : index
    %c0_297 = arith.constant 0 : index
    %478 = vector.load %arg25[%c7_295, %c0_296, %c0_297] : memref<12x128x128xf32, #tpu.memory_space<vmem>>, vector<1x128x128xf32>
    %479 = vector.shape_cast %478 : vector<1x128x128xf32> to vector<128x128xf32>
    %cst_298 = arith.constant dense<0.000000e+00> : vector<64x128xf32>
    %480 = tpu.matmul %469, %479, %cst_298 {dimension_numbers = #tpu.dot_dimension_numbers<[1], [0], [0], [1], [0, 0, 1, 1], [], []>} : vector<64x128xf32>, vector<128x128xf32>, vector<64x128xf32> -> vector<64x128xf32>
    %c1_299 = arith.constant 1 : index
    %c0_300 = arith.constant 0 : index
    %c0_301 = arith.constant 0 : index
    %481 = vector.load %arg24[%c1_299, %c0_300, %c0_301] : memref<3x64x64xf32, #tpu.memory_space<vmem>>, vector<1x64x64xf32>
    %482 = vector.shape_cast %481 : vector<1x64x64xf32> to vector<64x64xf32>
    %cst_302 = arith.constant dense<0.000000e+00> : vector<64x128xf32>
    %483 = tpu.matmul %482, %480, %cst_302 {dimension_numbers = #tpu.dot_dimension_numbers<[1], [0], [0], [1], [0, 0, 1, 1], [], []>} : vector<64x64xf32>, vector<64x128xf32>, vector<64x128xf32> -> vector<64x128xf32>
    %484 = arith.addf %477, %483 : vector<64x128xf32>
    %c8 = arith.constant 8 : index
    %c0_303 = arith.constant 0 : index
    %c0_304 = arith.constant 0 : index
    %485 = vector.load %arg25[%c8, %c0_303, %c0_304] : memref<12x128x128xf32, #tpu.memory_space<vmem>>, vector<1x128x128xf32>
    %486 = vector.shape_cast %485 : vector<1x128x128xf32> to vector<128x128xf32>
    %cst_305 = arith.constant dense<0.000000e+00> : vector<64x128xf32>
    %487 = tpu.matmul %469, %486, %cst_305 {dimension_numbers = #tpu.dot_dimension_numbers<[1], [0], [0], [1], [0, 0, 1, 1], [], []>} : vector<64x128xf32>, vector<128x128xf32>, vector<64x128xf32> -> vector<64x128xf32>
    %c2_306 = arith.constant 2 : index
    %c0_307 = arith.constant 0 : index
    %c0_308 = arith.constant 0 : index
    %488 = vector.load %arg24[%c2_306, %c0_307, %c0_308] : memref<3x64x64xf32, #tpu.memory_space<vmem>>, vector<1x64x64xf32>
    %489 = vector.shape_cast %488 : vector<1x64x64xf32> to vector<64x64xf32>
    %cst_309 = arith.constant dense<0.000000e+00> : vector<64x128xf32>
    %490 = tpu.matmul %489, %487, %cst_309 {dimension_numbers = #tpu.dot_dimension_numbers<[1], [0], [0], [1], [0, 0, 1, 1], [], []>} : vector<64x64xf32>, vector<64x128xf32>, vector<64x128xf32> -> vector<64x128xf32>
    %491 = arith.addf %484, %490 : vector<64x128xf32>
    %492 = vector.extract_strided_slice %184 {offsets = [5, 0], sizes = [1, 128], strides = [1, 1]} : vector<13x128xf32> to vector<1x128xf32>
    %493 = vector.broadcast %492 : vector<1x128xf32> to vector<64x128xf32>
    %494 = arith.addf %491, %493 : vector<64x128xf32>
    %c0_310 = arith.constant 0 : index
    %c0_311 = arith.constant 0 : index
    %495 = vector.load %arg23[%c0_310, %c0_311] : memref<128x128xf32, #tpu.memory_space<vmem>>, vector<128x128xf32>
    %496 = vector.extract_strided_slice %184 {offsets = [9, 0], sizes = [1, 128], strides = [1, 1]} : vector<13x128xf32> to vector<1x128xf32>
    %497 = vector.extract_strided_slice %184 {offsets = [12, 0], sizes = [1, 128], strides = [1, 1]} : vector<13x128xf32> to vector<1x128xf32>
    %cst_312 = arith.constant dense<0.000000e+00> : vector<64x128xf32>
    %498 = tpu.matmul %494, %495, %cst_312 {dimension_numbers = #tpu.dot_dimension_numbers<[1], [0], [0], [1], [0, 0, 1, 1], [], []>} : vector<64x128xf32>, vector<128x128xf32>, vector<64x128xf32> -> vector<64x128xf32>
    %499 = arith.subf %494, %498 : vector<64x128xf32>
    %500 = arith.mulf %499, %499 : vector<64x128xf32>
    %cst_313 = arith.constant dense<0.000000e+00> : vector<64x128xf32>
    %501 = tpu.matmul %500, %495, %cst_313 {dimension_numbers = #tpu.dot_dimension_numbers<[1], [0], [0], [1], [0, 0, 1, 1], [], []>} : vector<64x128xf32>, vector<128x128xf32>, vector<64x128xf32> -> vector<64x128xf32>
    %cst_314 = arith.constant 9.99999997E-7 : f32
    %502 = vector.broadcast %cst_314 : f32 to vector<64x128xf32>
    %503 = arith.addf %501, %502 : vector<64x128xf32>
    %504 = math.rsqrt %503 : vector<64x128xf32>
    %505 = arith.mulf %499, %504 : vector<64x128xf32>
    %506 = vector.broadcast %496 : vector<1x128xf32> to vector<64x128xf32>
    %507 = arith.mulf %505, %506 : vector<64x128xf32>
    %508 = vector.broadcast %497 : vector<1x128xf32> to vector<64x128xf32>
    %509 = arith.addf %507, %508 : vector<64x128xf32>
    %cst_315 = arith.constant 5.000000e-01 : f32
    %510 = vector.broadcast %cst_315 : f32 to vector<64x128xf32>
    %511 = arith.mulf %510, %509 : vector<64x128xf32>
    %cst_316 = arith.constant 4.471500e-02 : f32
    %512 = vector.broadcast %cst_316 : f32 to vector<64x128xf32>
    %513 = arith.mulf %512, %509 : vector<64x128xf32>
    %514 = arith.mulf %513, %509 : vector<64x128xf32>
    %515 = arith.mulf %514, %509 : vector<64x128xf32>
    %516 = arith.addf %509, %515 : vector<64x128xf32>
    %cst_317 = arith.constant 0.797884583 : f32
    %517 = vector.broadcast %cst_317 : f32 to vector<64x128xf32>
    %518 = arith.mulf %517, %516 : vector<64x128xf32>
    %519 = math.tanh %518 : vector<64x128xf32>
    %cst_318 = arith.constant 1.000000e+00 : f32
    %520 = vector.broadcast %cst_318 : f32 to vector<64x128xf32>
    %521 = arith.addf %520, %519 : vector<64x128xf32>
    %522 = arith.mulf %511, %521 : vector<64x128xf32>
    %cst_319 = arith.constant 0.000000e+00 : f32
    %523 = vector.broadcast %cst_319 : f32 to vector<64x128xf32>
    %c9 = arith.constant 9 : index
    %c0_320 = arith.constant 0 : index
    %c0_321 = arith.constant 0 : index
    %524 = vector.load %arg25[%c9, %c0_320, %c0_321] : memref<12x128x128xf32, #tpu.memory_space<vmem>>, vector<1x128x128xf32>
    %525 = vector.shape_cast %524 : vector<1x128x128xf32> to vector<128x128xf32>
    %cst_322 = arith.constant dense<0.000000e+00> : vector<64x128xf32>
    %526 = tpu.matmul %522, %525, %cst_322 {dimension_numbers = #tpu.dot_dimension_numbers<[1], [0], [0], [1], [0, 0, 1, 1], [], []>} : vector<64x128xf32>, vector<128x128xf32>, vector<64x128xf32> -> vector<64x128xf32>
    %c0_323 = arith.constant 0 : index
    %c0_324 = arith.constant 0 : index
    %c0_325 = arith.constant 0 : index
    %527 = vector.load %arg24[%c0_323, %c0_324, %c0_325] : memref<3x64x64xf32, #tpu.memory_space<vmem>>, vector<1x64x64xf32>
    %528 = vector.shape_cast %527 : vector<1x64x64xf32> to vector<64x64xf32>
    %cst_326 = arith.constant dense<0.000000e+00> : vector<64x128xf32>
    %529 = tpu.matmul %528, %526, %cst_326 {dimension_numbers = #tpu.dot_dimension_numbers<[1], [0], [0], [1], [0, 0, 1, 1], [], []>} : vector<64x64xf32>, vector<64x128xf32>, vector<64x128xf32> -> vector<64x128xf32>
    %530 = arith.addf %523, %529 : vector<64x128xf32>
    %c10 = arith.constant 10 : index
    %c0_327 = arith.constant 0 : index
    %c0_328 = arith.constant 0 : index
    %531 = vector.load %arg25[%c10, %c0_327, %c0_328] : memref<12x128x128xf32, #tpu.memory_space<vmem>>, vector<1x128x128xf32>
    %532 = vector.shape_cast %531 : vector<1x128x128xf32> to vector<128x128xf32>
    %cst_329 = arith.constant dense<0.000000e+00> : vector<64x128xf32>
    %533 = tpu.matmul %522, %532, %cst_329 {dimension_numbers = #tpu.dot_dimension_numbers<[1], [0], [0], [1], [0, 0, 1, 1], [], []>} : vector<64x128xf32>, vector<128x128xf32>, vector<64x128xf32> -> vector<64x128xf32>
    %c1_330 = arith.constant 1 : index
    %c0_331 = arith.constant 0 : index
    %c0_332 = arith.constant 0 : index
    %534 = vector.load %arg24[%c1_330, %c0_331, %c0_332] : memref<3x64x64xf32, #tpu.memory_space<vmem>>, vector<1x64x64xf32>
    %535 = vector.shape_cast %534 : vector<1x64x64xf32> to vector<64x64xf32>
    %cst_333 = arith.constant dense<0.000000e+00> : vector<64x128xf32>
    %536 = tpu.matmul %535, %533, %cst_333 {dimension_numbers = #tpu.dot_dimension_numbers<[1], [0], [0], [1], [0, 0, 1, 1], [], []>} : vector<64x64xf32>, vector<64x128xf32>, vector<64x128xf32> -> vector<64x128xf32>
    %537 = arith.addf %530, %536 : vector<64x128xf32>
    %c11 = arith.constant 11 : index
    %c0_334 = arith.constant 0 : index
    %c0_335 = arith.constant 0 : index
    %538 = vector.load %arg25[%c11, %c0_334, %c0_335] : memref<12x128x128xf32, #tpu.memory_space<vmem>>, vector<1x128x128xf32>
    %539 = vector.shape_cast %538 : vector<1x128x128xf32> to vector<128x128xf32>
    %cst_336 = arith.constant dense<0.000000e+00> : vector<64x128xf32>
    %540 = tpu.matmul %522, %539, %cst_336 {dimension_numbers = #tpu.dot_dimension_numbers<[1], [0], [0], [1], [0, 0, 1, 1], [], []>} : vector<64x128xf32>, vector<128x128xf32>, vector<64x128xf32> -> vector<64x128xf32>
    %c2_337 = arith.constant 2 : index
    %c0_338 = arith.constant 0 : index
    %c0_339 = arith.constant 0 : index
    %541 = vector.load %arg24[%c2_337, %c0_338, %c0_339] : memref<3x64x64xf32, #tpu.memory_space<vmem>>, vector<1x64x64xf32>
    %542 = vector.shape_cast %541 : vector<1x64x64xf32> to vector<64x64xf32>
    %cst_340 = arith.constant dense<0.000000e+00> : vector<64x128xf32>
    %543 = tpu.matmul %542, %540, %cst_340 {dimension_numbers = #tpu.dot_dimension_numbers<[1], [0], [0], [1], [0, 0, 1, 1], [], []>} : vector<64x64xf32>, vector<64x128xf32>, vector<64x128xf32> -> vector<64x128xf32>
    %544 = arith.addf %537, %543 : vector<64x128xf32>
    %545 = vector.extract_strided_slice %184 {offsets = [6, 0], sizes = [1, 128], strides = [1, 1]} : vector<13x128xf32> to vector<1x128xf32>
    %546 = vector.broadcast %545 : vector<1x128xf32> to vector<64x128xf32>
    %547 = arith.addf %544, %546 : vector<64x128xf32>
    %cst_341 = arith.constant 5.000000e-01 : f32
    %548 = vector.broadcast %cst_341 : f32 to vector<64x128xf32>
    %549 = arith.mulf %548, %547 : vector<64x128xf32>
    %cst_342 = arith.constant 4.471500e-02 : f32
    %550 = vector.broadcast %cst_342 : f32 to vector<64x128xf32>
    %551 = arith.mulf %550, %547 : vector<64x128xf32>
    %552 = arith.mulf %551, %547 : vector<64x128xf32>
    %553 = arith.mulf %552, %547 : vector<64x128xf32>
    %554 = arith.addf %547, %553 : vector<64x128xf32>
    %cst_343 = arith.constant 0.797884583 : f32
    %555 = vector.broadcast %cst_343 : f32 to vector<64x128xf32>
    %556 = arith.mulf %555, %554 : vector<64x128xf32>
    %557 = math.tanh %556 : vector<64x128xf32>
    %cst_344 = arith.constant 1.000000e+00 : f32
    %558 = vector.broadcast %cst_344 : f32 to vector<64x128xf32>
    %559 = arith.addf %558, %557 : vector<64x128xf32>
    %560 = arith.mulf %549, %559 : vector<64x128xf32>
    %c0_345 = arith.constant 0 : index
    %c0_346 = arith.constant 0 : index
    %c0_347 = arith.constant 0 : index
    %561 = vector.load %arg29[%c0_345, %c0_346, %c0_347] : memref<1x64x128xf32, #tpu.memory_space<vmem>>, vector<1x64x128xf32>
    %562 = vector.shape_cast %561 : vector<1x64x128xf32> to vector<64x128xf32>
    %563 = vector.shape_cast %560 : vector<64x128xf32> to vector<1x64x128xf32>
    tpu.vector_store %arg29[%c0_345, %c0_346, %c0_347], %563 {strides = array<i32>} : memref<1x64x128xf32, #tpu.memory_space<vmem>>, vector<1x64x128xf32>,
    return
  }
  func.func @transform_0(%arg0: i32) -> (i32, i32, i32) {
    %c0_i32 = arith.constant 0 : i32
    %c0_i32_0 = arith.constant 0 : i32
    %c0_i32_1 = arith.constant 0 : i32
    return %arg0, %c0_i32, %c0_i32_0 : i32, i32, i32
  }
  func.func @transform_1(%arg0: i32) -> (i32, i32, i32) {
    %c0_i32 = arith.constant 0 : i32
    %c0_i32_0 = arith.constant 0 : i32
    %c0_i32_1 = arith.constant 0 : i32
    return %arg0, %c0_i32, %c0_i32_0 : i32, i32, i32
  }
  func.func @transform_2(%arg0: i32) -> (i32, i32) {
    %c0_i32 = arith.constant 0 : i32
    %c0_i32_0 = arith.constant 0 : i32
    %c0_i32_1 = arith.constant 0 : i32
    return %c0_i32, %c0_i32_0 : i32, i32
  }
  func.func @transform_3(%arg0: i32) -> (i32, i32) {
    %c0_i32 = arith.constant 0 : i32
    %c0_i32_0 = arith.constant 0 : i32
    %c0_i32_1 = arith.constant 0 : i32
    return %c0_i32, %c0_i32_0 : i32, i32
  }
  func.func @transform_4(%arg0: i32) -> (i32, i32) {
    %c0_i32 = arith.constant 0 : i32
    %c0_i32_0 = arith.constant 0 : i32
    %c0_i32_1 = arith.constant 0 : i32
    return %c0_i32, %c0_i32_0 : i32, i32
  }
  func.func @transform_5(%arg0: i32) -> (i32, i32) {
    %c0_i32 = arith.constant 0 : i32
    %c0_i32_0 = arith.constant 0 : i32
    %c0_i32_1 = arith.constant 0 : i32
    return %c0_i32, %c0_i32_0 : i32, i32
  }
  func.func @transform_6(%arg0: i32) -> (i32, i32) {
    %c0_i32 = arith.constant 0 : i32
    %c0_i32_0 = arith.constant 0 : i32
    %c0_i32_1 = arith.constant 0 : i32
    return %c0_i32, %c0_i32_0 : i32, i32
  }
  func.func @transform_7(%arg0: i32) -> (i32, i32) {
    %c0_i32 = arith.constant 0 : i32
    %c0_i32_0 = arith.constant 0 : i32
    %c0_i32_1 = arith.constant 0 : i32
    return %c0_i32, %c0_i32_0 : i32, i32
  }
  func.func @transform_8(%arg0: i32) -> (i32, i32) {
    %c0_i32 = arith.constant 0 : i32
    %c0_i32_0 = arith.constant 0 : i32
    %c0_i32_1 = arith.constant 0 : i32
    return %c0_i32, %c0_i32_0 : i32, i32
  }
  func.func @transform_9(%arg0: i32) -> (i32, i32, i32) {
    %c0_i32 = arith.constant 0 : i32
    %c0_i32_0 = arith.constant 0 : i32
    %c0_i32_1 = arith.constant 0 : i32
    %c0_i32_2 = arith.constant 0 : i32
    return %c0_i32, %c0_i32_0, %c0_i32_1 : i32, i32, i32
  }
  func.func @transform_10(%arg0: i32) -> (i32, i32) {
    %c0_i32 = arith.constant 0 : i32
    %c0_i32_0 = arith.constant 0 : i32
    %c0_i32_1 = arith.constant 0 : i32
    return %c0_i32, %c0_i32_0 : i32, i32
  }
  func.func @transform_11(%arg0: i32) -> (i32, i32, i32) {
    %c0_i32 = arith.constant 0 : i32
    %c0_i32_0 = arith.constant 0 : i32
    %c0_i32_1 = arith.constant 0 : i32
    %c0_i32_2 = arith.constant 0 : i32
    return %c0_i32, %c0_i32_0, %c0_i32_1 : i32, i32, i32
  }
  func.func @transform_12(%arg0: i32) -> (i32, i32) {
    %c0_i32 = arith.constant 0 : i32
    %c0_i32_0 = arith.constant 0 : i32
    %c0_i32_1 = arith.constant 0 : i32
    return %c0_i32, %c0_i32_0 : i32, i32
  }
  func.func @transform_13(%arg0: i32) -> (i32, i32, i32) {
    %c0_i32 = arith.constant 0 : i32
    %c0_i32_0 = arith.constant 0 : i32
    %c0_i32_1 = arith.constant 0 : i32
    %c0_i32_2 = arith.constant 0 : i32
    return %c0_i32, %c0_i32_0, %c0_i32_1 : i32, i32, i32
  }
  func.func @transform_14(%arg0: i32) -> (i32, i32, i32) {
    %c0_i32 = arith.constant 0 : i32
    %c0_i32_0 = arith.constant 0 : i32
    %c0_i32_1 = arith.constant 0 : i32
    %c0_i32_2 = arith.constant 0 : i32
    return %c0_i32, %c0_i32_0, %c0_i32_1 : i32, i32, i32
  }
  func.func @transform_15(%arg0: i32) -> (i32, i32, i32) {
    %c0_i32 = arith.constant 0 : i32
    %c0_i32_0 = arith.constant 0 : i32
    %c0_i32_1 = arith.constant 0 : i32
    %c0_i32_2 = arith.constant 0 : i32
    return %c0_i32, %c0_i32_0, %c0_i32_1 : i32, i32, i32
  }
  func.func @transform_16(%arg0: i32) -> (i32, i32, i32) {
    %c0_i32 = arith.constant 0 : i32
    %c0_i32_0 = arith.constant 0 : i32
    %c0_i32_1 = arith.constant 0 : i32
    %c0_i32_2 = arith.constant 0 : i32
    return %c0_i32, %c0_i32_0, %c0_i32_1 : i32, i32, i32
  }
  func.func @transform_17(%arg0: i32) -> (i32, i32, i32) {
    %c0_i32 = arith.constant 0 : i32
    %c0_i32_0 = arith.constant 0 : i32
    %c0_i32_1 = arith.constant 0 : i32
    %c0_i32_2 = arith.constant 0 : i32
    return %c0_i32, %c0_i32_0, %c0_i32_1 : i32, i32, i32
  }
  func.func @transform_18(%arg0: i32) -> (i32, i32, i32) {
    %c0_i32 = arith.constant 0 : i32
    %c0_i32_0 = arith.constant 0 : i32
    %c0_i32_1 = arith.constant 0 : i32
    %c0_i32_2 = arith.constant 0 : i32
    return %c0_i32, %c0_i32_0, %c0_i32_1 : i32, i32, i32
  }
  func.func @transform_19(%arg0: i32) -> (i32, i32, i32) {
    %c0_i32 = arith.constant 0 : i32
    %c0_i32_0 = arith.constant 0 : i32
    %c0_i32_1 = arith.constant 0 : i32
    %c0_i32_2 = arith.constant 0 : i32
    return %c0_i32, %c0_i32_0, %c0_i32_1 : i32, i32, i32
  }
  func.func @transform_20(%arg0: i32) -> (i32, i32, i32) {
    %c0_i32 = arith.constant 0 : i32
    %c0_i32_0 = arith.constant 0 : i32
    %c0_i32_1 = arith.constant 0 : i32
    %c0_i32_2 = arith.constant 0 : i32
    return %c0_i32, %c0_i32_0, %c0_i32_1 : i32, i32, i32
  }
  func.func @transform_21(%arg0: i32) -> (i32, i32) {
    %c0_i32 = arith.constant 0 : i32
    %c0_i32_0 = arith.constant 0 : i32
    %c0_i32_1 = arith.constant 0 : i32
    return %c0_i32, %c0_i32_0 : i32, i32
  }
  func.func @transform_22(%arg0: i32) -> (i32, i32) {
    %c0_i32 = arith.constant 0 : i32
    %c0_i32_0 = arith.constant 0 : i32
    %c0_i32_1 = arith.constant 0 : i32
    return %c0_i32, %c0_i32_0 : i32, i32
  }
  func.func @transform_23(%arg0: i32) -> (i32, i32, i32) {
    %c0_i32 = arith.constant 0 : i32
    %c0_i32_0 = arith.constant 0 : i32
    %c0_i32_1 = arith.constant 0 : i32
    %c0_i32_2 = arith.constant 0 : i32
    return %c0_i32, %c0_i32_0, %c0_i32_1 : i32, i32, i32
  }
  func.func @transform_24(%arg0: i32) -> (i32, i32, i32) {
    %c0_i32 = arith.constant 0 : i32
    %c0_i32_0 = arith.constant 0 : i32
    %c0_i32_1 = arith.constant 0 : i32
    %c0_i32_2 = arith.constant 0 : i32
    return %c0_i32, %c0_i32_0, %c0_i32_1 : i32, i32, i32
  }
  func.func @transform_25(%arg0: i32) -> (i32, i32) {
    %c0_i32 = arith.constant 0 : i32
    %c0_i32_0 = arith.constant 0 : i32
    %c0_i32_1 = arith.constant 0 : i32
    return %c0_i32, %c0_i32_0 : i32, i32
  }
  func.func @transform_26(%arg0: i32) -> (i32, i32) {
    %c0_i32 = arith.constant 0 : i32
    %c0_i32_0 = arith.constant 0 : i32
    %c0_i32_1 = arith.constant 0 : i32
    return %c0_i32, %c0_i32_0 : i32, i32
  }
  func.func @transform_27(%arg0: i32) -> (i32, i32, i32) {
    %c0_i32 = arith.constant 0 : i32
    %c0_i32_0 = arith.constant 0 : i32
    %c0_i32_1 = arith.constant 0 : i32
    return %arg0, %c0_i32, %c0_i32_0 : i32, i32, i32
  }
  func.func @transform_28(%arg0: i32) -> (i32, i32, i32) {
    %c0_i32 = arith.constant 0 : i32
    %c0_i32_0 = arith.constant 0 : i32
    %c0_i32_1 = arith.constant 0 : i32
    return %arg0, %c0_i32, %c0_i32_0 : i32, i32, i32
  }
  func.func @transform_29(%arg0: i32) -> (i32, i32, i32) {
    %c0_i32 = arith.constant 0 : i32
    %c0_i32_0 = arith.constant 0 : i32
    %c0_i32_1 = arith.constant 0 : i32
    return %arg0, %c0_i32, %c0_i32_0 : i32, i32, i32
  }
}

</mosaic_0001>

<bundles_post_ra>
// kernel: mask_decoder_forward.1
= control target key start
LH: loop header
LB: loop body
LE: loop exit
PB: predicated region body
PF: predicated region fallthrough
CT: control target
= control target key end

     0   :  { %s13078_s6 = smov 1   ;;  %s13079_s10 = smov 2   ;;  %s15048_s0 = inlined_call_operand.smem [shape: u32[30], index: -1, kind: input, shape index: {}] }
   0x1   :  { %s13141_s5 = sld [smem:[%s15048_s0]]   ;;  %s13080_s14 = smov 3  }
   0x2   :  { %s13146_s9 = sld [smem:[%s15048_s0 + %s13078_s6]]   ;;  %s13081_s18 = smov 4  }
   0x3   :  { %s13151_s13 = sld [smem:[%s15048_s0 + %s13079_s10]]   ;;  %s13082_s22 = smov 5  }
   0x4   :  { %s13156_s17 = sld [smem:[%s15048_s0 + %s13080_s14]]   ;;  %s13083_s26 = smov 6  }
   0x5   :  { %s13161_s21 = sld [smem:[%s15048_s0 + %s13081_s18]]   ;;  %s13084_s30 = smov 7  }
   0x6   :  { %s13166_s25 = sld [smem:[%s15048_s0 + %s13082_s22]]   ;;  %s13085_s4 = smov 8  }
   0x7   :  { %15056 = sst [smem:[#allocation44_spill]] %s13141_s5  ;;  %s13086_s10 = smov 9  }
   0x8   :  { %15057 = sst [smem:[#allocation45_spill]] %s13146_s9  ;;  %s13087_s15 = smov 10  }
   0x9   :  { %s13171_s29 = sld [smem:[%s15048_s0 + %s13083_s26]]   ;;  %s13088_s20 = smov 11  }
   0xa   :  { %s13176_s3 = sld [smem:[%s15048_s0 + %s13084_s30]]   ;;  %s13089_s26 = smov 12  }
   0xb   :  { %s13181_s8 = sld [smem:[%s15048_s0 + %s13085_s4]]   ;;  %s13090_s1 = smov 13  }
   0xc   :  { %s13186_s14 = sld [smem:[%s15048_s0 + %s13086_s10]]   ;;  %s13091_s7 = smov 14  }
   0xd   :  { %s13191_s19 = sld [smem:[%s15048_s0 + %s13087_s15]]   ;;  %s13092_s15 = smov 15  }
   0xe   :  { %s13196_s24 = sld [smem:[%s15048_s0 + %s13088_s20]]   ;;  %s13093_s22 = smov 16  }
   0xf   :  { %s13201_s30 = sld [smem:[%s15048_s0 + %s13089_s26]]   ;;  %s13094_s28 = smov 17  }
  0x10   :  { %15058 = sst [smem:[#allocation46_spill]] %s13176_s3 }
  0x11   :  { %s13206_s6 = sld [smem:[%s15048_s0 + %s13090_s1]]  }
  0x12   :  { %s13211_s12 = sld [smem:[%s15048_s0 + %s13091_s7]]   ;;  %s13095_s7 = smov 18  }
  0x13   :  { %s13216_s20 = sld [smem:[%s15048_s0 + %s13092_s15]]   ;;  %s13096_s15 = smov 19  }
  0x14   :  { %s13221_s27 = sld [smem:[%s15048_s0 + %s13093_s22]]   ;;  %s13097_s22 = smov 20  }
  0x15   :  { %15059 = sst [smem:[#allocation47_spill]] %s13201_s30 }
  0x16   :  { %s13226_s4 = sld [smem:[%s15048_s0 + %s13094_s28]]   ;;  %s13098_s28 = smov 21  }
  0x17   :  { %15060 = sst [smem:[#allocation48_spill]] %s13206_s6 }
  0x18   :  { %15061 = sst [smem:[#allocation49_spill]] %s13211_s12 }
  0x19   :  { %s13231_s12 = sld [smem:[%s15048_s0 + %s13095_s7]]   ;;  %s13099_s7 = smov 22  }
  0x1a   :  { %15062 = sst [smem:[#allocation50_spill]] %s13221_s27 }
  0x1b   :  { %s13236_s6 = sld [smem:[%s15048_s0 + %s13096_s15]]   ;;  %s13100_s15 = smov 23  }
  0x1c   :  { %15063 = sst [smem:[#allocation51_spill]] %s13226_s4 }
  0x1d   :  { %s13241_s27 = sld [smem:[%s15048_s0 + %s13097_s22]]   ;;  %s13101_s22 = smov 24  }
  0x1e   :  { %s13246_s9 = sld [smem:[%s15048_s0 + %s13098_s28]]   ;;  %s13102_s28 = smov 25  }
  0x1f   :  { %15064 = sst [smem:[#allocation52_spill]] %s13231_s12 }
  0x20   :  { %s13251_s12 = sld [smem:[%s15048_s0 + %s13099_s7]]   ;;  %s13103_s7 = smov 26  }
  0x21   :  { %15065 = sst [smem:[#allocation53_spill]] %s13236_s6 }
  0x22   :  { %s13256_s5 = sld [smem:[%s15048_s0 + %s13100_s15]]   ;;  %s13104_s15 = smov 27  }
  0x23   :  { %15066 = sst [smem:[#allocation54_spill]] %s13241_s27 }
  0x24   :  { %15067 = sst [smem:[#allocation55_spill]] %s13246_s9 }
  0x25   :  { %s13261_s27 = sld [smem:[%s15048_s0 + %s13101_s22]]   ;;  %s13105_s22 = smov 28  }
  0x26   :  { %s13266_s9 = sld [smem:[%s15048_s0 + %s13102_s28]]   ;;  %s13106_s28 = smov 29  }
  0x27   :  { %s13271_s4 = sld [smem:[%s15048_s0 + %s13103_s7]]  }
  0x28   :  { %15068 = sst [smem:[#allocation56_spill]] %s13256_s5 }
  0x29   :  { %s13276_s5 = sld [smem:[%s15048_s0 + %s13104_s15]]  }
  0x2a   :  { %s13281_s30 = sld [smem:[%s15048_s0 + %s13105_s22]]  }
  0x2c   :  { %15069 = sst [smem:[#allocation57_spill]] %s13266_s9 }
  0x2d   :  { %s13286_s9 = sld [smem:[%s15048_s0 + %s13106_s28]]  }
  0x2e   :  { %65 = vsyncpa [#allocation3], 0 }
  0x2f   :  { %66 = vsyncpa [#allocation5], 0 }
  0x30   :  { %67 = vsyncpa [#allocation8], 0 }
  0x31   :  { %68 = vsyncpa [#allocation11], 0 }
  0x32   :  { %69 = vsyncpa [#allocation14], 0 }
  0x33   :  { %70 = vsyncpa [#allocation17], 0 }
  0x34   :  { %71 = vsyncpa [#allocation20], 0 }
  0x35   :  { %72 = vsyncpa [#allocation23], 0 }
  0x36   :  { %73 = vsyncpa [#allocation26], 0 }
  0x37   :  { %74 = vsyncpa [#allocation29], 0 }
  0x38   :  { %75 = vsyncpa [#allocation32], 0  ;;  %s13288_s7 = smov 0  }
  0x39 LB: > { %s13107_s0 = smov [#allocation4]   ;;  %s13294_s11 = sadd.s32 4294967295, %s13076_s7   ;;  %s13076_s7 = sphi %s13288_s7, %s81_s7  }
  0x3a   : > { %s767_s10 = sshll.u32 %s13107_s0, 4  ;;  %p9040_p0 = scmp.ge.s32.totalorder %s13076_s7, 1  ;;  %s768_s10 = int_to_ptr.vmem [resolvable:$true] %s767_s10 }
  0x3b   : > { %p741_p1 = scmp.lt.s32.totalorder %s13076_s7, 3  ;;  %p15054_p2 = scmp.eq.s32.totalorder %s13294_s11, 0 }
  0x3c   : > { %s13108_s16 = smov [#allocation7]   ;;  %s13109_s23 = smov [#allocation10]  }
  0x3d   : > { %p13299_p3 = pnand %p9040_p0, %p741_p1  ;;  %s791_s18 = sshll.u32 %s13108_s16, 4  ;;  %s13305_s18 = int_to_ptr.vmem [resolvable:$true] %s791_s18 }
  0x3e   : > { %s814_s26 = sshll.u32 %s13109_s23, 4  ;;  %s13110_s28 = smov [#allocation13]   ;;  %s13313_s26 = int_to_ptr.vmem [resolvable:$true] %s814_s26 }
  0x3f   : > { %s15070_s15 = scalar_select %p13299_p3, 1, 0 }
  0x40   : > { %p12035_p4 = pneg %p13299_p3  ;;  %s13315_s1 = sshll.u32 %s13110_s28, 4  ;;  %s841_s1 = int_to_ptr.vmem [resolvable:$true] %s13315_s1 }
  0x41   : > { %s12517_s0 = scalar_lea.vmem %s768_s10, 16  ;;  %s12524_s16 = scalar_lea.vmem %s768_s10, 32 }
  0x42   : > { %p13309_p5 = pnand %p15054_p2, %p12035_p4  ;;  %p12518_p7 = scmp.ne.s32.totalorder %s768_s10, %s12517_s0 }
  0x43   : > { %p12525_p10 = scmp.lt.s32.totalorder %s768_s10, %s768_s10  ;;  %p12526_p11 = scmp.lt.s32.totalorder %s12524_s16, %s12517_s0 }
  0x44   : > { %p13319_p6 = pneg %p13309_p5 }
  0x45   : > { %p12527_p12 = por %p12526_p11, %p12525_p10 }
  0x46   : > { %p12520_p8 = pnand %p12518_p7, %p13319_p6 }
  0x48   : > { %p12521_p9 = pneg %p12520_p8 }
  0x4a   : > { %p12528_p13 = pnand %p12527_p12, %p12521_p9 }
  0x4c   : > { %12531 = shalt.err (!%p12528_p13)
}
  0x4d   : > { %12041 = dma.hbm_to_vmem [thread:$0]  (!%p13309_p5), %s13156_s17, 16, %s768_s10, [#allocation5]  }
  0x4e   : > { %s12543_s23 = scalar_lea.vmem %s13305_s18, 16  ;;  %s12550_s28 = scalar_lea.vmem %s13305_s18, 32 }
  0x4f   : > { %p12544_p0 = scmp.ne.s32.totalorder %s13305_s18, %s12543_s23  ;;  %p12551_p7 = scmp.lt.s32.totalorder %s13305_s18, %s13305_s18 }
  0x50   : > { %p12552_p8 = scmp.lt.s32.totalorder %s12550_s28, %s12543_s23 }
  0x51   : > { %p12546_p1 = pnand %p12544_p0, %p13319_p6 }
  0x52   : > { %p12553_p9 = por %p12552_p8, %p12551_p7 }
  0x53   : > { %p12547_p4 = pneg %p12546_p1 }
  0x55   : > { %p12554_p10 = pnand %p12553_p9, %p12547_p4 }
  0x57   : > { %12557 = shalt.err (!%p12554_p10)
}
  0x58   : > { %12047 = dma.hbm_to_vmem [thread:$0]  (!%p13309_p5), %s13166_s25, 16, %s13305_s18, [#allocation8]  }
  0x59   : > { %s12569_s10 = scalar_lea.vmem %s13313_s26, 256  ;;  %p12577_p0 = scmp.lt.s32.totalorder %s13313_s26, %s13313_s26 }
  0x5a   : > { %p12570_p11 = scmp.ne.s32.totalorder %s13313_s26, %s12569_s10  ;;  %p12578_p1 = scmp.lt.s32.totalorder %s12569_s10, %s12569_s10 }
  0x5c   : > { %p12572_p12 = pnand %p12570_p11, %p13319_p6  ;;  %p12579_p7 = por %p12578_p1, %p12577_p0 }
  0x5e   : > { %p12573_p13 = pneg %p12572_p12 }
  0x60   : > { %p12580_p4 = pnand %p12579_p7, %p12573_p13 }
  0x62   : > { %12583 = shalt.err (!%p12580_p4)
}
  0x63   : > { %s13111_s0 = smov 128   ;;  %s15073_s3 = sld [smem:[#allocation46_spill]] }
  0x64   : > { %s13112_s16 = smov 8   ;;  %s12595_s18 = scalar_lea.vmem %s841_s1, 2560 }
  0x65   : > { %p12596_p8 = scmp.ne.s32.totalorder %s841_s1, %s12595_s18  ;;  %p12603_p11 = scmp.lt.s32.totalorder %s841_s1, %s841_s1 }
  0x66   : > { %p12604_p12 = scmp.lt.s32.totalorder %s12595_s18, %s12595_s18 }
  0x67   : > { %p12598_p9 = pnand %p12596_p8, %p13319_p6 }
  0x68   : > { %p12605_p13 = por %p12604_p12, %p12603_p11 }
  0x69   : > { %12053 = dma.hbm_to_vmem [thread:$0]  (!%p13309_p5), %s15073_s3, 256, %s13313_s26, [#allocation11], %s13111_s0, %s13111_s0, %s13112_s16  }
  0x6a   : > { %p12599_p10 = pneg %p12598_p9 }
  0x6c   : > { %p12606_p0 = pnand %p12605_p13, %p12599_p10 }
  0x6e   : > { %12609 = shalt.err (!%p12606_p0)
}
  0x6f   : > { %12059 = dma.hbm_to_vmem [thread:$0]  (!%p13309_p5), %s13186_s14, 2560, %s841_s1, [#allocation14], %s13111_s0, %s13111_s0, %s13112_s16  }
  0x70   : > { %s13113_s26 = smov [#allocation16]   ;;  %s13114_s28 = smov [#allocation19]  }
  0x71   : > { %s864_s23 = sshll.u32 %s13113_s26, 4  ;;  %s894_s10 = sshll.u32 %s13114_s28, 4  ;;  %s865_s23 = int_to_ptr.vmem [resolvable:$true] %s864_s23  ;;  %s895_s10 = int_to_ptr.vmem [resolvable:$true] %s894_s10 }
  0x72   : > { %s12621_s3 = scalar_lea.vmem %s865_s23, 1536  ;;  %p12629_p8 = scmp.lt.s32.totalorder %s865_s23, %s865_s23 }
  0x73   : > { %p12622_p1 = scmp.ne.s32.totalorder %s865_s23, %s12621_s3  ;;  %p12630_p9 = scmp.lt.s32.totalorder %s12621_s3, %s12621_s3 }
  0x75   : > { %p12624_p7 = pnand %p12622_p1, %p13319_p6  ;;  %p12631_p10 = por %p12630_p9, %p12629_p8 }
  0x77   : > { %p12625_p4 = pneg %p12624_p7 }
  0x79   : > { %p12632_p11 = pnand %p12631_p10, %p12625_p4 }
  0x7b   : > { %12635 = shalt.err (!%p12632_p11)
}
  0x7c   : > { %12065 = dma.hbm_to_vmem [thread:$0]  (!%p13309_p5), %s13196_s24, 1536, %s865_s23, [#allocation17], %s13111_s0, %s13111_s0, %s13112_s16  }
  0x7d   : > { %s12647_s1 = scalar_lea.vmem %s895_s10, 2048  ;;  %p12655_p1 = scmp.lt.s32.totalorder %s895_s10, %s895_s10 }
  0x7e   : > { %p12648_p12 = scmp.ne.s32.totalorder %s895_s10, %s12647_s1  ;;  %p12656_p7 = scmp.lt.s32.totalorder %s12647_s1, %s12647_s1 }
  0x80   : > { %p12650_p13 = pnand %p12648_p12, %p13319_p6  ;;  %p12657_p2 = por %p12656_p7, %p12655_p1 }
  0x82   : > { %p12651_p0 = pneg %p12650_p13 }
  0x84   : > { %p12658_p8 = pnand %p12657_p2, %p12651_p0 }
  0x86   : > { %12661 = shalt.err (!%p12658_p8)
}
  0x87   : > { %12071 = dma.hbm_to_vmem [thread:$0]  (!%p13309_p5), %s13216_s20, 2048, %s895_s10, [#allocation20], %s13111_s0, %s13111_s0, %s13112_s16  }
  0x88   : > { %s13115_s3 = smov [#allocation22]   ;;  %s13116_s26 = smov [#allocation25]  }
  0x89   : > { %s926_s18 = sshll.u32 %s13115_s3, 4  ;;  %s955_s23 = sshll.u32 %s13116_s26, 4  ;;  %s927_s18 = int_to_ptr.vmem [resolvable:$true] %s926_s18  ;;  %s956_s23 = int_to_ptr.vmem [resolvable:$true] %s955_s23 }
  0x8a   : > { %s12673_s28 = scalar_lea.vmem %s927_s18, 2048  ;;  %p12681_p2 = scmp.lt.s32.totalorder %s927_s18, %s927_s18 }
  0x8b   : > { %p12674_p4 = scmp.ne.s32.totalorder %s927_s18, %s12673_s28  ;;  %p12682_p11 = scmp.lt.s32.totalorder %s12673_s28, %s12673_s28 }
  0x8d   : > { %p12676_p9 = pnand %p12674_p4, %p13319_p6  ;;  %p12683_p12 = por %p12682_p11, %p12681_p2 }
  0x8f   : > { %p12677_p10 = pneg %p12676_p9 }
  0x91   : > { %p12684_p13 = pnand %p12683_p12, %p12677_p10 }
  0x93   : > { %12687 = shalt.err (!%p12684_p13)
}
  0x94   : > { %s15074_s6 = sld [smem:[#allocation53_spill]]  ;;  %s12699_s10 = scalar_lea.vmem %s956_s23, 2048 }
  0x95   : > { %p12700_p0 = scmp.ne.s32.totalorder %s956_s23, %s12699_s10  ;;  %p12707_p8 = scmp.lt.s32.totalorder %s956_s23, %s956_s23 }
  0x96   : > { %p12708_p4 = scmp.lt.s32.totalorder %s12699_s10, %s12699_s10 }
  0x97   : > { %p12702_p1 = pnand %p12700_p0, %p13319_p6 }
  0x98   : > { %p12709_p9 = por %p12708_p4, %p12707_p8 }
  0x99   : > { %p12703_p7 = pneg %p12702_p1 }
  0x9a   : > { %12077 = dma.hbm_to_vmem [thread:$0]  (!%p13309_p5), %s15074_s6, 2048, %s927_s18, [#allocation23], %s13111_s0, %s13111_s0, %s13112_s16  }
  0x9b   : > { %p12710_p2 = pnand %p12709_p9, %p12703_p7 }
  0x9d   : > { %12713 = shalt.err (!%p12710_p2)
}
  0x9e   : > { %12083 = dma.hbm_to_vmem [thread:$0]  (!%p13309_p5), %s13251_s12, 2048, %s956_s23, [#allocation26], %s13111_s0, %s13111_s0, %s13112_s16  }
  0x9f   : > { %s13117_s1 = smov [#allocation28]   ;;  %s13118_s18 = smov [#allocation2]  }
  0xa0   : > { %s981_s3 = sshll.u32 %s13117_s1, 4  ;;  %s753_s26 = sshll.u32 %s13118_s18, 4  ;;  %s982_s3 = int_to_ptr.vmem [resolvable:$true] %s981_s3  ;;  %s754_s26 = int_to_ptr.vmem [resolvable:$true] %s753_s26 }
  0xa1   : > { %s12725_s28 = scalar_lea.vmem %s982_s3, 24576  ;;  %p12733_p13 = scmp.lt.s32.totalorder %s982_s3, %s982_s3 }
  0xa2   : > { %p12726_p10 = scmp.ne.s32.totalorder %s982_s3, %s12725_s28  ;;  %p12734_p0 = scmp.lt.s32.totalorder %s12725_s28, %s12725_s28 }
  0xa4   : > { %p12728_p11 = pnand %p12726_p10, %p13319_p6  ;;  %p12735_p1 = por %p12734_p0, %p12733_p13 }
  0xa6   : > { %p12729_p12 = pneg %p12728_p11 }
  0xa8   : > { %p12736_p7 = pnand %p12735_p1, %p12729_p12 }
  0xaa   : > { %12739 = shalt.err (!%p12736_p7)
}
  0xab   : > { %12089 = dma.hbm_to_vmem [thread:$0]  (!%p13309_p5), %s13261_s27, 24576, %s982_s3, [#allocation29], %s13111_s0, %s13111_s0, %s13112_s16  }
  0xac   : > { %s12751_s23 = scalar_lea.vmem %s754_s26, 512  ;;  %p12759_p2 = scmp.lt.s32.totalorder %s754_s26, %s754_s26 }
  0xad   : > { %p12752_p8 = scmp.ne.s32.totalorder %s754_s26, %s12751_s23  ;;  %p12760_p10 = scmp.lt.s32.totalorder %s12751_s23, %s12751_s23 }
  0xaf   : > { %p12754_p4 = pnand %p12752_p8, %p13319_p6  ;;  %p12761_p11 = por %p12760_p10, %p12759_p2 }
  0xb1   : > { %p12755_p9 = pneg %p12754_p4 }
  0xb3   : > { %p12762_p13 = pnand %p12761_p11, %p12755_p9 }
  0xb5   : > { %12765 = shalt.err (!%p12762_p13)
}
  0xb6   : > { %12038 = dma.hbm_to_vmem [thread:$0]  (!%p13309_p5), %s13151_s13, 512, %s754_s26, [#allocation3], %s13111_s0, %s13111_s0, %s13112_s16  }
  0xb7   : > { %s13119_s10 = smov [#allocation6]   ;;  %s13120_s3 = smov [#allocation9]  }
  0xb8   : > { %s777_s1 = sshll.u32 %s13119_s10, 4  ;;  %s801_s18 = sshll.u32 %s13120_s3, 4  ;;  %s778_s1 = int_to_ptr.vmem [resolvable:$true] %s777_s1  ;;  %s802_s18 = int_to_ptr.vmem [resolvable:$true] %s801_s18 }
  0xb9   : > { %s12777_s28 = scalar_lea.vmem %s778_s1, 2048  ;;  %p12785_p7 = scmp.lt.s32.totalorder %s778_s1, %s778_s1 }
  0xba   : > { %p12778_p12 = scmp.ne.s32.totalorder %s778_s1, %s12777_s28  ;;  %p12786_p8 = scmp.lt.s32.totalorder %s12777_s28, %s12777_s28 }
  0xbc   : > { %p12780_p0 = pnand %p12778_p12, %p13319_p6  ;;  %p12787_p4 = por %p12786_p8, %p12785_p7 }
  0xbe   : > { %p12781_p1 = pneg %p12780_p0 }
  0xc0   : > { %p12788_p9 = pnand %p12787_p4, %p12781_p1 }
  0xc2   : > { %12791 = shalt.err (!%p12788_p9)
}
  0xc3   : > { %12044 = dma.hbm_to_vmem [thread:$0]  (!%p13309_p5), %s13161_s21, 2048, %s778_s1, [#allocation5], %s13111_s0, %s13111_s0, %s13112_s16  }
  0xc4   : > { %s12803_s26 = scalar_lea.vmem %s802_s18, 512  ;;  %p12811_p13 = scmp.lt.s32.totalorder %s802_s18, %s802_s18 }
  0xc5   : > { %p12804_p2 = scmp.ne.s32.totalorder %s802_s18, %s12803_s26  ;;  %p12812_p12 = scmp.lt.s32.totalorder %s12803_s26, %s12803_s26 }
  0xc7   : > { %p12806_p10 = pnand %p12804_p2, %p13319_p6  ;;  %p12813_p0 = por %p12812_p12, %p12811_p13 }
  0xc9   : > { %p12807_p11 = pneg %p12806_p10 }
  0xcb   : > { %p12814_p7 = pnand %p12813_p0, %p12807_p11 }
  0xcd   : > { %12817 = shalt.err (!%p12814_p7)
}
  0xce   : > { %12050 = dma.hbm_to_vmem [thread:$0]  (!%p13309_p5), %s13171_s29, 512, %s802_s18, [#allocation8], %s13111_s0, %s13111_s0, %s13112_s16  }
  0xcf   : > { %s13121_s23 = smov [#allocation12]   ;;  %s13122_s1 = smov [#allocation15]  }
  0xd0   : > { %s827_s10 = sshll.u32 %s13121_s23, 4  ;;  %s854_s3 = sshll.u32 %s13122_s1, 4  ;;  %s828_s10 = int_to_ptr.vmem [resolvable:$true] %s827_s10  ;;  %s855_s3 = int_to_ptr.vmem [resolvable:$true] %s854_s3 }
  0xd1   : > { %s12829_s28 = scalar_lea.vmem %s828_s10, 2048  ;;  %p12837_p9 = scmp.lt.s32.totalorder %s828_s10, %s828_s10 }
  0xd2   : > { %p12830_p1 = scmp.ne.s32.totalorder %s828_s10, %s12829_s28  ;;  %p12838_p2 = scmp.lt.s32.totalorder %s12829_s28, %s12829_s28 }
  0xd4   : > { %p12832_p8 = pnand %p12830_p1, %p13319_p6  ;;  %p12839_p10 = por %p12838_p2, %p12837_p9 }
  0xd6   : > { %p12833_p4 = pneg %p12832_p8 }
  0xd8   : > { %p12840_p11 = pnand %p12839_p10, %p12833_p4 }
  0xda   : > { %12843 = shalt.err (!%p12840_p11)
}
  0xdb   : > { %12056 = dma.hbm_to_vmem [thread:$0]  (!%p13309_p5), %s13181_s8, 2048, %s828_s10, [#allocation11], %s13111_s0, %s13111_s0, %s13112_s16  }
  0xdc   : > { %s12855_s18 = scalar_lea.vmem %s855_s3, 128  ;;  %p12863_p7 = scmp.lt.s32.totalorder %s855_s3, %s855_s3 }
  0xdd   : > { %p12856_p13 = scmp.ne.s32.totalorder %s855_s3, %s12855_s18  ;;  %p12864_p1 = scmp.lt.s32.totalorder %s12855_s18, %s12855_s18 }
  0xdf   : > { %p12858_p12 = pnand %p12856_p13, %p13319_p6  ;;  %p12865_p8 = por %p12864_p1, %p12863_p7 }
  0xe1   : > { %p12859_p0 = pneg %p12858_p12 }
  0xe3   : > { %p12866_p9 = pnand %p12865_p8, %p12859_p0 }
  0xe5   : > { %12869 = shalt.err (!%p12866_p9)
}
  0xe6   : > { %12062 = dma.hbm_to_vmem [thread:$0]  (!%p13309_p5), %s13191_s19, 128, %s855_s3, [#allocation14]  }
  0xe7   : > { %s13123_s26 = smov [#allocation18]   ;;  %s13124_s10 = smov [#allocation21]  }
  0xe8   : > { %s878_s23 = sshll.u32 %s13123_s26, 4  ;;  %s910_s1 = sshll.u32 %s13124_s10, 4  ;;  %s879_s23 = int_to_ptr.vmem [resolvable:$true] %s878_s23  ;;  %s911_s1 = int_to_ptr.vmem [resolvable:$true] %s910_s1 }
  0xe9   : > { %s12881_s28 = scalar_lea.vmem %s879_s23, 64  ;;  %p12889_p11 = scmp.lt.s32.totalorder %s879_s23, %s879_s23 }
  0xea   : > { %p12882_p4 = scmp.ne.s32.totalorder %s879_s23, %s12881_s28  ;;  %p12890_p13 = scmp.lt.s32.totalorder %s12881_s28, %s12881_s28 }
  0xec   : > { %p12884_p2 = pnand %p12882_p4, %p13319_p6  ;;  %p12891_p12 = por %p12890_p13, %p12889_p11 }
  0xee   : > { %p12885_p10 = pneg %p12884_p2 }
  0xf0   : > { %p12892_p0 = pnand %p12891_p12, %p12885_p10 }
  0xf2   : > { %12895 = shalt.err (!%p12892_p0)
}
  0xf3   : > { %s15075_s18 = sld [smem:[#allocation47_spill]]  ;;  %s12907_s3 = scalar_lea.vmem %s911_s1, 2048 }
  0xf4   : > { %p12908_p7 = scmp.ne.s32.totalorder %s911_s1, %s12907_s3  ;;  %p12915_p9 = scmp.lt.s32.totalorder %s911_s1, %s911_s1 }
  0xf5   : > { %p12916_p3 = scmp.lt.s32.totalorder %s12907_s3, %s12907_s3 }
  0xf6   : > { %p12910_p1 = pnand %p12908_p7, %p13319_p6 }
  0xf7   : > { %p12917_p4 = por %p12916_p3, %p12915_p9 }
  0xf8   : > { %p12911_p8 = pneg %p12910_p1 }
  0xf9   : > { %12068 = dma.hbm_to_vmem [thread:$0]  (!%p13309_p5), %s15075_s18, 64, %s879_s23, [#allocation17]  }
  0xfa   : > { %p12918_p2 = pnand %p12917_p4, %p12911_p8 }
  0xfc   : > { %12921 = shalt.err (!%p12918_p2)
}
  0xfd   : > { %s15076_s26 = sld [smem:[#allocation51_spill]]  ;;  %s13125_s23 = smov [#allocation24]  }
  0xfe   : > { %s942_s10 = sshll.u32 %s13125_s23, 4  ;;  %s13126_s28 = smov [#allocation27]   ;;  %s943_s10 = int_to_ptr.vmem [resolvable:$true] %s942_s10 }
  0xff   : > { %s968_s18 = sshll.u32 %s13126_s28, 4  ;;  %s12933_s6 = scalar_lea.vmem %s943_s10, 1024  ;;  %s969_s18 = int_to_ptr.vmem [resolvable:$true] %s968_s18 }
 0x100   : > { %p12934_p10 = scmp.ne.s32.totalorder %s943_s10, %s12933_s6  ;;  %p12941_p13 = scmp.lt.s32.totalorder %s943_s10, %s943_s10 }
 0x101   : > { %p12942_p12 = scmp.lt.s32.totalorder %s12933_s6, %s12933_s6 }
 0x102   : > { %p12936_p11 = pnand %p12934_p10, %p13319_p6 }
 0x103   : > { %12074 = dma.hbm_to_vmem [thread:$0]  (!%p13309_p5), %s15076_s26, 2048, %s911_s1, [#allocation20], %s13111_s0, %s13111_s0, %s13112_s16  }
 0x104   : > { %p12937_p3 = pneg %p12936_p11  ;;  %p12943_p0 = por %p12942_p12, %p12941_p13 }
 0x106   : > { %p12944_p7 = pnand %p12943_p0, %p12937_p3 }
 0x108   : > { %12947 = shalt.err (!%p12944_p7)
}
 0x109   : > { %s15077_s1 = sld [smem:[#allocation55_spill]]  ;;  %s12959_s3 = scalar_lea.vmem %s969_s18, 3072 }
 0x10a   : > { %p12960_p1 = scmp.ne.s32.totalorder %s969_s18, %s12959_s3  ;;  %p12967_p4 = scmp.lt.s32.totalorder %s969_s18, %s969_s18 }
 0x10b   : > { %p12968_p2 = scmp.lt.s32.totalorder %s12959_s3, %s12959_s3 }
 0x10c   : > { %p12962_p8 = pnand %p12960_p1, %p13319_p6 }
 0x10d   : > { %p12969_p10 = por %p12968_p2, %p12967_p4 }
 0x10e   : > { %p12963_p9 = pneg %p12962_p8 }
 0x10f   : > { %12080 = dma.hbm_to_vmem [thread:$0]  (!%p13309_p5), %s15077_s1, 1024, %s943_s10, [#allocation23], %s13111_s0, %s13111_s0, %s13112_s16  }
 0x110   : > { %p12970_p11 = pnand %p12969_p10, %p12963_p9 }
 0x112   : > { %12973 = shalt.err (!%p12970_p11)
}
 0x113   : > { %s15078_s6 = sld [smem:[#allocation56_spill]]  ;;  %s13127_s26 = smov [#allocation30]  }
 0x114   : > { %s995_s23 = sshll.u32 %s13127_s26, 4  ;;  %s13128_s10 = smov [#allocation31]   ;;  %s996_s23 = int_to_ptr.vmem [resolvable:$true] %s995_s23 }
 0x115   : > { %s1005_s28 = sshll.u32 %s13128_s10, 4  ;;  %s12985_s1 = scalar_lea.vmem %s996_s23, 128  ;;  %s1006_s28 = int_to_ptr.vmem [resolvable:$true] %s1005_s28 }
 0x116   : > { %p12986_p3 = scmp.ne.s32.totalorder %s996_s23, %s12985_s1  ;;  %p12993_p0 = scmp.lt.s32.totalorder %s996_s23, %s996_s23 }
 0x117   : > { %p12994_p7 = scmp.lt.s32.totalorder %s12985_s1, %s12985_s1 }
 0x118   : > { %p12988_p13 = pnand %p12986_p3, %p13319_p6 }
 0x119   : > { %12086 = dma.hbm_to_vmem [thread:$0]  (!%p13309_p5), %s15078_s6, 3072, %s969_s18, [#allocation26], %s13111_s0, %s13111_s0, %s13112_s16  }
 0x11a   : > { %p12989_p12 = pneg %p12988_p13  ;;  %p12995_p1 = por %p12994_p7, %p12993_p0 }
 0x11c   : > { %p12996_p8 = pnand %p12995_p1, %p12989_p12 }
 0x11e   : > { %12999 = shalt.err (!%p12996_p8)
}
 0x11f   : > { %s15079_s3 = sld [smem:[#allocation57_spill]]  ;;  %s13011_s18 = scalar_lea.vmem %s1006_s28, 256 }
 0x120   : > { %p13012_p9 = scmp.ne.s32.totalorder %s1006_s28, %s13011_s18  ;;  %p13019_p10 = scmp.lt.s32.totalorder %s1006_s28, %s1006_s28 }
 0x121   : > { %p13020_p11 = scmp.lt.s32.totalorder %s13011_s18, %s13011_s18 }
 0x122   : > { %p13014_p4 = pnand %p13012_p9, %p13319_p6 }
 0x123   : > { %p13021_p3 = por %p13020_p11, %p13019_p10 }
 0x124   : > { %p13015_p2 = pneg %p13014_p4 }
 0x125   : > { %12092 = dma.hbm_to_vmem [thread:$0]  (!%p13309_p5), %s15079_s3, 128, %s996_s23, [#allocation29]  }
 0x126   : > { %p13022_p13 = pnand %p13021_p3, %p13015_p2 }
 0x128   : > { %13025 = shalt.err (!%p13022_p13)
}
 0x129   : > { %12095 = dma.hbm_to_vmem [thread:$0]  (!%p13309_p5), %s13271_s4, 256, %s1006_s28, [#allocation32], %s13111_s0, %s13111_s0, %s13112_s16  }
 0x12a   : > { %p15080_p12 = scmp.ne.s32.totalorder %s15070_s15, 0 }
 0x12b   : > { %p15081_p0 = scmp.eq.s32.totalorder (!%p15080_p12), %s13294_s11, 0 }
 0x12c   : > { %1036 = sbr.rel (%p15080_p12) target bundleno = 9264 (0x2430), region = 128 }
 0x131   : > { %13031 = dma.done.wait (%p15081_p0), [#allocation3], 512   ;;  %p15082_p6 = pmov %p15081_p0 }
 0x132   : > { %p15083_p7 = pmov %p15081_p0 }
 0x133   : > { %13033 = vsyncadd (%p15082_p6), [#allocation3], 4294966784 }
 0x134   : > { %13035 = dma.done.wait (%p15083_p7), [#allocation5], 2064   ;;  %p15084_p1 = pmov %p15081_p0 }
 0x135   : > { %p15085_p8 = pmov %p15081_p0 }
 0x136   : > { %13037 = vsyncadd (%p15084_p1), [#allocation5], 4294965232 }
 0x137   : > { %13039 = dma.done.wait (%p15085_p8), [#allocation8], 528   ;;  %p15086_p5 = pmov %p15081_p0 }
 0x138   : > { %p15087_p9 = pmov %p15081_p0 }
 0x139   : > { %13041 = vsyncadd (%p15086_p5), [#allocation8], 4294966768 }
 0x13a   : > { %13043 = dma.done.wait (%p15087_p9), [#allocation11], 2304   ;;  %p15088_p4 = pmov %p15081_p0 }
 0x13b   : > { %p15089_p2 = pmov %p15081_p0 }
 0x13c   : > { %13045 = vsyncadd (%p15088_p4), [#allocation11], 4294964992 }
 0x13d   : > { %13047 = dma.done.wait (%p15089_p2), [#allocation14], 2688   ;;  %p15090_p10 = pmov %p15081_p0 }
 0x13e   : > { %p15091_p11 = pmov %p15081_p0 }
 0x13f   : > { %13049 = vsyncadd (%p15090_p10), [#allocation14], 4294964608 }
 0x140   : > { %13051 = dma.done.wait (%p15091_p11), [#allocation17], 1600   ;;  %p15092_p3 = pmov %p15081_p0 }
 0x141   : > { %p15093_p13 = pmov %p15081_p0 }
 0x142   : > { %13053 = vsyncadd (%p15092_p3), [#allocation17], 4294965696 }
 0x143   : > { %13055 = dma.done.wait (%p15093_p13), [#allocation20], 4096   ;;  %p15094_p12 = pmov %p15081_p0 }
 0x145   : > { %13057 = vsyncadd (%p15094_p12), [#allocation20], 4294963200 }
 0x146   : > { %13059 = dma.done.wait (%p15081_p0), [#allocation23], 3072   ;;  %p15095_p6 = pmov %p15081_p0 }
 0x147   : > { %p15096_p7 = pmov %p15081_p0 }
 0x148   : > { %13061 = vsyncadd (%p15095_p6), [#allocation23], 4294964224 }
 0x149   : > { %13063 = dma.done.wait (%p15096_p7), [#allocation26], 5120   ;;  %p15097_p1 = pmov %p15081_p0 }
 0x14a   : > { %p15098_p8 = pmov %p15081_p0 }
 0x14b   : > { %13065 = vsyncadd (%p15097_p1), [#allocation26], 4294962176 }
 0x14c   : > { %13067 = dma.done.wait (%p15098_p8), [#allocation29], 24704   ;;  %p15099_p5 = pmov %p15081_p0 }
 0x14d   : > { %p15100_p9 = pmov %p15081_p0 }
 0x14e   : > { %13069 = vsyncadd (%p15099_p5), [#allocation29], 4294942592 }
 0x14f   : > { %13071 = dma.done.wait (%p15100_p9), [#allocation32], 256   ;;  %p15101_p4 = pmov %p15081_p0 }
 0x150   : > { %s15102_s15 = sld [smem:[#allocation44_spill]]  ;;  %p1201_p2 = scmp.lt.s32.totalorder %s13294_s11, 1  ;;  %v13129_v0 = vmov 0.0   ;;  %vm13130_vm0 = vmmov 0   ;;  %v1230_v1 = vld [vmem:[#allocation2 + $0x18] sm:$0xff]  ;;  %v1229_v2 = vld [vmem:[#allocation2 + $0x10] sm:$0xff] }
 0x151   : > { %13073 = vsyncadd (%p15101_p4), [#allocation32], 4294967040  ;;  %10224 = vmatprep.subr.mxu0 %v13129_v0  ;;  %10232 = vmatprep.mubr.msk.f32.mxu0 %vm13130_vm0, %v13129_v0  ;;  %v1228_v3 = vld [vmem:[#allocation2 + $0x8] sm:$0xff]  ;;  %v1227_v4 = vld [vmem:[#allocation2] sm:$0xff]  ;;  %vm1238_vm1 = vcmask 261120   ;;  %s13131_s0 = smov 96  }
 0x152   : > { %s15110_s11 = smov (!%p1201_p2, %s13294_s11), 1  ;;  %10241 = vmatprep.subr.mxu1 %v13129_v0  ;;  %10245 = vmatprep.mubr.msk.f32.mxu1 %vm13130_vm0, %v13129_v0  ;;  %v9090_v10 = vld [vmem:[#allocation4] ss:$0 sm:$0xff]  ;;  %s13132_s16 = smov 64   ;;  %vm1412_vm2 = vcmask 129024   ;;  %v1520_v31 = vld [vmem:[#allocation6 + $0x70] sm:$0xff] }
 0x153   : > { %s11954_s22 = smul.u32 24, %s15110_s11  ;;  %10225 = vmatpush3.msra.mxu0 %v1230_v1  ;;  %v1521_v30 = vld [vmem:[#allocation6 + $0x78] sm:$0xff]  ;;  %v1519_v32 = vld [vmem:[#allocation6 + $0x68] sm:$0xff]  ;;  %v1518_v33 = vld [vmem:[#allocation6 + $0x60] sm:$0xff]  ;;  %s15103_s6 = sld [smem:[#allocation45_spill]]  ;;  %vm1430_vm3 = vcmask 130048  }
 0x154   : > { %10226 = vmatprep.subr.mxu0 %v13129_v0  ;;  %v1517_v34 = vld [vmem:[#allocation6 + $0x58] sm:$0xff]  ;;  %v1516_v35 = vld [vmem:[#allocation6 + $0x50] sm:$0xff]  ;;  %v1515_v36 = vld [vmem:[#allocation6 + $0x48] sm:$0xff]  ;;  %s9084_s26 = sshll.u32 %s15110_s11, 2  ;;  %s9089_s10 = sshll.u32 %s15110_s11, 3  ;;  %vm2638_vm4 = vcmask 1043456  }
 0x155   : > { %10227 = vmatpush3.msra.mxu0 %v1229_v2  ;;  %v1514_v37 = vld [vmem:[#allocation6 + $0x40] sm:$0xff]  ;;  %v1513_v38 = vld [vmem:[#allocation6 + $0x38] sm:$0xff]  ;;  %v1512_v39 = vld [vmem:[#allocation6 + $0x30] sm:$0xff]  ;;  %s13635_s28 = scalar_lea.vmem %s13286_s9, %s9089_s10  ;;  %s15104_s1 = sld [smem:[#allocation48_spill]]  ;;  %vm2634_vm5 = vcmask 31744   ;;  %vm2793_vm6 = vcmask 523264  }
 0x156   : > { %s1205_s2 = scalar_lea.vmem %s15102_s15, %s11954_s22  ;;  %10228 = vmatprep.subr.mxu0 %v13129_v0  ;;  %v1511_v40 = vld [vmem:[#allocation6 + $0x28] sm:$0xff]  ;;  %v1510_v41 = vld [vmem:[#allocation6 + $0x20] sm:$0xff]  ;;  %v1509_v42 = vld [vmem:[#allocation6 + $0x18] sm:$0xff]  ;;  %2454 = vst [vmem:[%s13635_s28 + $0x7] sm:$0x1] %v13129_v0  ;;  %s15105_s3 = sld [smem:[#allocation49_spill]] }
 0x157   : > { %10229 = vmatpush3.msra.mxu0 %v1228_v3  ;;  %v1224_v5 = vld [vmem:[%s1205_s2] sm:$0xff]  ;;  %v1225_v6 = vld [vmem:[%s1205_s2 + $0x8] sm:$0xff]  ;;  %v13548_v7 = vld [vmem:[%s1205_s2 + $0x10] sm:$0x7f]  ;;  %s15106_s18 = sld [smem:[#allocation50_spill]]  ;;  %vm3007_vm7 = vcmask 64512  }
 0x158   : > { %10230 = vmatprep.subr.mxu0 %v13129_v0  ;;  %v1508_v43 = vld [vmem:[#allocation6 + $0x10] sm:$0xff]  ;;  %v1507_v44 = vld [vmem:[#allocation6 + $0x8] sm:$0xff]  ;;  %v1506_v45 = vld [vmem:[#allocation6] sm:$0xff]  ;;  %s9292_s15 = sshll.u32 %s15110_s11, 4  ;;  %s15107_s22 = sld [smem:[#allocation52_spill]] }
 0x159   : > { %10231 = vmatpush3.msra.mxu0 %v1227_v4  ;;  %s1209_s23 = scalar_lea.vmem %s15103_s6, %s9084_s26  ;;  %v1785_v47 = vld [vmem:[#allocation13 + $0x18] sm:$0xff]  ;;  %v1604_v52 = vld [vmem:[#allocation9 + $0x18] sm:$0xff]  ;;  %v1603_v53 = vld [vmem:[#allocation9 + $0x10] sm:$0xff]  ;;  %s1214_s2 = scalar_lea.vmem %s13276_s5, %s9292_s15 }
 0x15a   : > { %10233 = vmatmul.mubr.msk.f32.vlgmr.msra.gmra.mxu0 %vm1238_vm1, %v1224_v5  ;;  %10255 = vmatprep.subr.mxu0 %v13129_v0  ;;  %v13581_v46 = vld [vmem:[%s1209_s23] sm:$0xf]  ;;  %v1784_v54 = vld [vmem:[#allocation13 + $0x10] sm:$0xff]  ;;  %v1602_v55 = vld [vmem:[#allocation9 + $0x8] sm:$0xff] }
 0x15b   : > { %10235 = vmatprep.mubr.msk.f32.mxu0 %vm13130_vm0, %v13129_v0  ;;  %10256 = vmatpush3.msra.mxu0 %v1521_v30  ;;  %v1783_v56 = vld [vmem:[#allocation13 + $0x8] sm:$0xff]  ;;  %v1601_v57 = vld [vmem:[#allocation9] sm:$0xff]  ;;  %v1782_v58 = vld [vmem:[#allocation13] sm:$0xff] }
 0x15c   : > { %10257 = vmatprep.subr.mxu0 %v13129_v0  ;;  %v1710_v2 = vld [vmem:[#allocation12 + $0x78] sm:$0xff]  ;;  %v1709_v3 = vld [vmem:[#allocation12 + $0x70] sm:$0xff]  ;;  %v1708_v4 = vld [vmem:[#allocation12 + $0x68] sm:$0xff] }
 0x15d   : > { %10258 = vmatpush3.msra.mxu0 %v1520_v31  ;;  %v1707_v5 = vld [vmem:[#allocation12 + $0x60] sm:$0xff] }
 0x15e   : > { %10236 = vmatmul.mubr.msk.f32.gmra.mxu0 %vm1238_vm1, %v1225_v6  ;;  %10259 = vmatprep.subr.mxu0 %v13129_v0  ;;  %v1706_v6 = vld [vmem:[#allocation12 + $0x58] sm:$0xff] }
 0x15f   : > { %10238 = vmatprep.mubr.msk.f32.mxu0 %vm13130_vm0, %v13129_v0  ;;  %10260 = vmatpush3.msra.mxu0 %v1519_v32 }
 0x160   : > { %10261 = vmatprep.subr.mxu0 %v13129_v0 }
 0x161   : > { %10262 = vmatpush3.msra.mxu0 %v1518_v33 }
 0x162   : > { %10239 = vmatmul.mubr.msk.f32.gmra.mxu0 %vm1238_vm1, %v13548_v7  ;;  %10263 = vmatprep.subr.mxu0 %v13129_v0 }
 0x163   : > { %10287 = vmatprep.mubr.msk.f32.mxu0 %vm13130_vm0, %v13129_v0  ;;  %10264 = vmatpush3.msra.mxu0 %v1517_v34 }
 0x164   : > { %10265 = vmatprep.subr.mxu0 %v13129_v0 }
 0x165   : > { %10266 = vmatpush3.msra.mxu0 %v1516_v35 }
 0x166   : > { %10267 = vmatprep.subr.mxu0 %v13129_v0 }
 0x167   : > { %10268 = vmatpush3.msra.mxu0 %v1515_v36 }
 0x168   : > { %10269 = vmatprep.subr.mxu0 %v13129_v0 }
 0x169   : > { %10270 = vmatpush3.msra.mxu0 %v1514_v37 }
 0x16a   : > { %10271 = vmatprep.subr.mxu0 %v13129_v0 }
 0x16b   : > { %10272 = vmatpush3.msra.mxu0 %v1513_v38 }
 0x16c   : > { %10273 = vmatprep.subr.mxu0 %v13129_v0 }
 0x16d   : > { %10274 = vmatpush3.msra.mxu0 %v1512_v39 }
 0x16e   : > { %10275 = vmatprep.subr.mxu0 %v13129_v0 }
 0x16f   : > { %10276 = vmatpush3.msra.mxu0 %v1511_v40 }
 0x170   : > { %10277 = vmatprep.subr.mxu0 %v13129_v0 }
 0x171   : > { %10278 = vmatpush3.msra.mxu0 %v1510_v41 }
 0x172   : > { %10279 = vmatprep.subr.mxu0 %v13129_v0 }
 0x173   : > { %10280 = vmatpush3.msra.mxu0 %v1509_v42 }
 0x174   : > { %10281 = vmatprep.subr.mxu0 %v13129_v0 }
 0x175   : > { %10282 = vmatpush3.msra.mxu0 %v1508_v43 }
 0x176   : > { %10283 = vmatprep.subr.mxu0 %v13129_v0 }
 0x177   : > { %10284 = vmatpush3.msra.mxu0 %v1507_v44 }
 0x178   : > { %10285 = vmatprep.subr.mxu0 %v13129_v0 }
 0x179   : > { %10286 = vmatpush3.msra.mxu0 %v1506_v45 }
 0x17a   : > { %10336 = vmatprep.subr.mxu0 %v13129_v0  ;;  %10288 = vmatmul.mubr.f32.vlgmr.msra.gmra.mxu0 %v13581_v46 }
 0x17b   : > { %10337 = vmatpush3.msra.mxu0 %v1785_v47  ;;  %10344 = vmatprep.mubr.msk.f32.mxu0 %vm13130_vm0, %v13129_v0  ;;  %v1693_v47 = vld [vmem:[#allocation10 + $0x1] sm:$0xf] }
 0x17c   : > { %10338 = vmatprep.subr.mxu0 %v13129_v0 }
 0x17d   : > { %10339 = vmatpush3.msra.mxu0 %v1784_v54  ;;  %v1945_v54 = vld [vmem:[#allocation13 + $0x20] sm:$0xff] }
 0x17e   : > { %10340 = vmatprep.subr.mxu0 %v13129_v0 }
 0x17f   : > { %10341 = vmatpush3.msra.mxu0 %v1783_v56  ;;  %v2034_v56 = vld [vmem:[#allocation13 + $0x50] sm:$0xff] }
 0x180   : > { %10342 = vmatprep.subr.mxu0 %v13129_v0 }
 0x181   : > { %10343 = vmatpush3.msra.mxu0 %v1782_v58  ;;  %v2032_v58 = vld [vmem:[#allocation13 + $0x40] sm:$0xff] }
 0x182   : > { %10347 = vmatprep.subr.mxu0 %v13129_v0 }
 0x21a   : > { %v1314_v8 = vpop.f32.mrf.mxu0 }
 0x21b   : > { %v1315_v15 = vadd.f32 %v9090_v10, %v1314_v8  ;;  %v1704_v8 = vld [vmem:[#allocation12 + $0x48] sm:$0xff] }
 0x21c   : > { %v10234_v9 = vpop.f32.mrf.mxu0 }
 0x21d   : > { %v1703_v9 = vld [vmem:[#allocation12 + $0x40] sm:$0xff] }
 0x21e   : > { %v1319_v11 = vpop.f32.mrf.mxu0 }
 0x21f   : > { %v1320_v12 = vadd.f32 %v9090_v10, %v1319_v11  ;;  %v1869_v11 = vld [vmem:[#allocation16 + $0x18] sm:$0xff] }
 0x220   : > { %v10237_v13 = vpop.f32.mrf.mxu0 }
 0x221   : > { %1332 = vrot.lane.b32.xlu0 %v1320_v12, %s13131_s0  ;;  %v1701_v13 = vld [vmem:[#allocation12 + $0x30] sm:$0xff] }
 0x222   : > { %v1324_v14 = vpop.f32.mrf.mxu0 }
 0x223   : > { %v1325_v16 = vadd.f32 %v9090_v10, %v1324_v14  ;;  %v1702_v10 = vld [vmem:[#allocation12 + $0x38] sm:$0xff]  ;;  %v1867_v14 = vld [vmem:[#allocation16 + $0x8] sm:$0xff] }
 0x224   : > { %v10240_v17 = vpop.f32.mrf.mxu0 }
 0x225   : > { %1330 = vrot.lane.b32.xlu0 %v1315_v15, %s13131_s0  ;;  %v1699_v17 = vld [vmem:[#allocation12 + $0x20] sm:$0xff]  ;;  %s15108_s0 = sld [smem:[#allocation54_spill]] }
 0x229   : > { %1426 = vrot.lane.b32.xlu0 %v1320_v12, %s13132_s16  ;;  %v1868_v12 = vld [vmem:[#allocation16 + $0x10] sm:$0xff] }
 0x23a   : > { %v13601_v59 = vpop.f32.mrf.mxu0 }
 0x23c   : > { %v10289_v60 = vpop.f32.mrf.mxu0 }
 0x23d   : > { %v1870_v60 = vld [vmem:[#allocation18] sm:$0x1] }
 0x293   : > { %v1333_v18 = vpop.permute.xlu0 %1332 }
 0x294   : > { %10242 = vmatpush3.xpose.msk.msra.mxu1 %vm1238_vm1, %v1333_v18  ;;  %v1698_v18 = vld [vmem:[#allocation12 + $0x18] sm:$0xff] }
 0x295   : > { %10243 = vmatprep.subr.mxu1 %v13129_v0 }
 0x297   : > { %v1331_v19 = vpop.permute.xlu0 %1330 }
 0x298   : > { %10244 = vmatpush3.xpose.msk.msra.mxu1 %vm1238_vm1, %v1331_v19  ;;  %v1697_v19 = vld [vmem:[#allocation12 + $0x10] sm:$0xff] }
 0x299   : > { %10248 = vmatprep.subr.mxu1 %v13129_v0 }
 0x29b   : > { %v1427_v20 = vpop.permute.xlu0 %1426  ;;  %10246 = vmatmul.mubr.msk.f32.vlgmr.msra.gmra.mxu1 %vm1238_vm1, %v1325_v16  ;;  %v1866_v16 = vld [vmem:[#allocation16] sm:$0xff] }
 0x29c   : > { %10249 = vmatpush3.msra.mxu1 %v1427_v20  ;;  %10252 = vmatprep.mubr.msk.f32.mxu1 %vm13130_vm0, %v13129_v0  ;;  %v1696_v20 = vld [vmem:[#allocation12 + $0x8] sm:$0xff] }
 0x29d   : > { %10250 = vmatprep.subr.mxu1 %v13129_v0 }
 0x35b   : > { %v1407_v21 = vpop.f32.mrf.mxu1 }
 0x35c   : > { %v1411_v22 = vmul.f32 0.17677669, %v1407_v21  ;;  %v1695_v21 = vld [vmem:[#allocation12] sm:$0xff] }
 0x35d   : > { %v10247_v23 = vpop.f32.mrf.mxu1 }
 0x35e   : > { %v1413_v24 = vsel %vm1412_vm2, %v1411_v22, -inf  ;;  %v1786_v23 = vld [vmem:[#allocation15] sm:$0x1] }
 0x35f   : > { %1414 = vmax.xlane.f32.xlu1 %v1413_v24 }
 0x3e8   : > { %v1415_v25 = vpop.xlane.xlu1 %1414 }
 0x3e9   : > { %v1416_v26 = vsub.f32 %v1411_v22, %v1415_v25  ;;  %v9099_v22 = vld [vmem:[#allocation10] ss:$0 sm:$0xff] }
 0x3eb   : > { %v1417_v27 = vmul.f32 1.442695, %v1416_v26 }
 0x3ed   : > { %12199 = vpow2.f32 %v1417_v27 }
 0x3fa   : > { %v13562_v28 = vpop.eup %12199 }
 0x3fb   : > { %v1419_v29 = vsel %vm1412_vm2, %v13562_v28, 0.0 }
 0x3fc   : > { %1420 = vadd.xlane.f32.xlu1 %v1419_v29 }
 0x40d   : > { %1424 = vrot.lane.b32.xlu1 %v1315_v15, %s13132_s16  ;;  %v1700_v15 = vld [vmem:[#allocation12 + $0x28] sm:$0xff]  ;;  %s9293_s16 = sshll.u32 %s15110_s11, 6 }
 0x40e   : > { %s15030_s6 = scalar_lea.vmem %s13281_s30, %s9293_s16 }
 0x485   : > { %v1421_v48 = vpop.xlane.xlu1 %1420 }
 0x486   : > { %12201 = vrcp.f32 %v1421_v48 }
 0x489   : > { %v1425_v49 = vpop.permute.xlu1 %1424 }
 0x48a   : > { %10251 = vmatpush3.msra.mxu1 %v1425_v49 }
 0x48b   : > { %10290 = vmatprep.subr.mxu1 %v13129_v0 }
 0x493   : > { %v12202_v50 = vpop.eup %12201 }
 0x494   : > { %v1423_v51 = vmul.f32 %v12202_v50, %v13562_v28 }
 0x496   : > { %10253 = vmatmul.mubr.msk.f32.vlgmr.msra.gmra.mxu1 %vm1430_vm3, %v1423_v51  ;;  %v1948_v51 = vld [vmem:[#allocation13 + $0x38] sm:$0xff] }
 0x497   : > { %10291 = vmatpush3.msra.mxu1 %v1604_v52  ;;  %10298 = vmatprep.mubr.msk.f32.mxu1 %vm13130_vm0, %v13129_v0  ;;  %v1947_v52 = vld [vmem:[#allocation13 + $0x30] sm:$0xff] }
 0x498   : > { %10292 = vmatprep.subr.mxu1 %v13129_v0 }
 0x499   : > { %10293 = vmatpush3.msra.mxu1 %v1603_v53  ;;  %v1946_v53 = vld [vmem:[#allocation13 + $0x28] sm:$0xff] }
 0x49a   : > { %10294 = vmatprep.subr.mxu1 %v13129_v0 }
 0x49b   : > { %10295 = vmatpush3.msra.mxu1 %v1602_v55  ;;  %v2035_v55 = vld [vmem:[#allocation13 + $0x58] sm:$0xff] }
 0x49c   : > { %10296 = vmatprep.subr.mxu1 %v13129_v0 }
 0x49d   : > { %10297 = vmatpush3.msra.mxu1 %v1601_v57  ;;  %v2033_v57 = vld [vmem:[#allocation13 + $0x48] sm:$0xff] }
 0x49e   : > { %10301 = vmatprep.subr.mxu1 %v13129_v0 }
 0x556   : > { %v1500_v61 = vpop.f32.mrf.mxu1 }
 0x557   : > { %v13604_v62 = vadd.f32 %v1500_v61, %v13548_v7  ;;  %v1705_v7 = vld [vmem:[#allocation12 + $0x50] sm:$0xff] }
 0x558   : > { %v10254_v63 = vpop.f32.mrf.mxu1  ;;  %v1711_v61 = vld [vmem:[#allocation10 + $0x5] sm:$0xf] }
 0x559   : > { %v1611_v1 = vrot.slane %v13604_v62, 1 }
 0x55b   : > { %10299 = vmatmul.mubr.msk.f32.vlgmr.msra.gmra.mxu1 %vm1238_vm1, %v1611_v1  ;;  %10345 = vmatmul.mubr.msk.f32.vlgmr.msra.gmra.mxu0 %vm1238_vm1, %v1611_v1 }
 0x55c   : > { %10355 = vmatprep.mubr.msk.f32.mxu0 %vm13130_vm0, %v13129_v0  ;;  %10333 = vmatprep.mubr.msk.f32.mxu1 %vm13130_vm0, %v13129_v0 }
 0x55d   : > { %10302 = vmatpush3.msra.mxu1 %v1710_v2  ;;  %10348 = vmatpush3.msra.mxu0 %v1869_v11 }
 0x55e   : > { %10303 = vmatprep.subr.mxu1 %v13129_v0  ;;  %10349 = vmatprep.subr.mxu0 %v13129_v0 }
 0x55f   : > { %10304 = vmatpush3.msra.mxu1 %v1709_v3  ;;  %10350 = vmatpush3.msra.mxu0 %v1868_v12 }
 0x560   : > { %10305 = vmatprep.subr.mxu1 %v13129_v0  ;;  %10351 = vmatprep.subr.mxu0 %v13129_v0 }
 0x561   : > { %10306 = vmatpush3.msra.mxu1 %v1708_v4  ;;  %10352 = vmatpush3.msra.mxu0 %v1867_v14 }
 0x562   : > { %10307 = vmatprep.subr.mxu1 %v13129_v0  ;;  %10353 = vmatprep.subr.mxu0 %v13129_v0 }
 0x563   : > { %10308 = vmatpush3.msra.mxu1 %v1707_v5  ;;  %10354 = vmatpush3.msra.mxu0 %v1866_v16 }
 0x564   : > { %10309 = vmatprep.subr.mxu1 %v13129_v0  ;;  %10369 = vmatprep.subr.mxu0 %v13129_v0 }
 0x565   : > { %10310 = vmatpush3.msra.mxu1 %v1706_v6  ;;  %v1949_v6 = vld [vmem:[#allocation15 + $0x1] sm:$0x1] }
 0x566   : > { %10311 = vmatprep.subr.mxu1 %v13129_v0 }
 0x567   : > { %10312 = vmatpush3.msra.mxu1 %v1705_v7 }
 0x568   : > { %10313 = vmatprep.subr.mxu1 %v13129_v0 }
 0x569   : > { %10314 = vmatpush3.msra.mxu1 %v1704_v8 }
 0x56a   : > { %10315 = vmatprep.subr.mxu1 %v13129_v0 }
 0x56b   : > { %10316 = vmatpush3.msra.mxu1 %v1703_v9 }
 0x56c   : > { %10317 = vmatprep.subr.mxu1 %v13129_v0 }
 0x56d   : > { %10318 = vmatpush3.msra.mxu1 %v1702_v10 }
 0x56e   : > { %10319 = vmatprep.subr.mxu1 %v13129_v0 }
 0x56f   : > { %10320 = vmatpush3.msra.mxu1 %v1701_v13 }
 0x570   : > { %10321 = vmatprep.subr.mxu1 %v13129_v0 }
 0x571   : > { %10322 = vmatpush3.msra.mxu1 %v1700_v15 }
 0x572   : > { %10323 = vmatprep.subr.mxu1 %v13129_v0 }
 0x573   : > { %10324 = vmatpush3.msra.mxu1 %v1699_v17 }
 0x574   : > { %10325 = vmatprep.subr.mxu1 %v13129_v0 }
 0x575   : > { %10326 = vmatpush3.msra.mxu1 %v1698_v18 }
 0x576   : > { %10327 = vmatprep.subr.mxu1 %v13129_v0 }
 0x577   : > { %10328 = vmatpush3.msra.mxu1 %v1697_v19  ;;  %v2202_v19 = vld [vmem:[#allocation13 + $0x78] sm:$0xff] }
 0x578   : > { %10329 = vmatprep.subr.mxu1 %v13129_v0 }
 0x579   : > { %10330 = vmatpush3.msra.mxu1 %v1696_v20  ;;  %v2201_v20 = vld [vmem:[#allocation13 + $0x70] sm:$0xff] }
 0x57a   : > { %10331 = vmatprep.subr.mxu1 %v13129_v0 }
 0x57b   : > { %10332 = vmatpush3.msra.mxu1 %v1695_v21  ;;  %v2200_v21 = vld [vmem:[#allocation13 + $0x68] sm:$0xff] }
 0x57c   : > { %10358 = vmatprep.subr.mxu1 %v13129_v0 }
 0x61b   : > { %v1680_v24 = vpop.f32.mrf.mxu1  ;;  %v1853_v25 = vpop.f32.mrf.mxu0 }
 0x61c   : > { %v1681_v26 = vadd.f32 %v9099_v22, %v1680_v24  ;;  %v1854_v27 = vadd.f32 %v1853_v25, %v1786_v23  ;;  %v2199_v22 = vld [vmem:[#allocation13 + $0x60] sm:$0xff]  ;;  %v2122_v24 = vld [vmem:[#allocation16 + $0x30] sm:$0xff]  ;;  %v2121_v25 = vld [vmem:[#allocation16 + $0x28] sm:$0xff] }
 0x61d   : > { %v10300_v28 = vpop.f32.mrf.mxu1  ;;  %v10346_v29 = vpop.f32.mrf.mxu0  ;;  %v2123_v23 = vld [vmem:[#allocation16 + $0x38] sm:$0xff] }
 0x61e   : > { %v1685_v30 = vmul.f32 0.044715, %v1681_v26  ;;  %v1858_v31 = vmul.f32 0.044715, %v1854_v27  ;;  %v1684_v42 = vmul.f32 0.5, %v1681_v26  ;;  %v1857_v44 = vmul.f32 0.5, %v1854_v27 }
 0x620   : > { %v1686_v32 = vmul.f32 %v1685_v30, %v1681_v26  ;;  %v1859_v33 = vmul.f32 %v1858_v31, %v1854_v27 }
 0x622   : > { %v1687_v34 = vmul.f32 %v1686_v32, %v1681_v26  ;;  %v1860_v35 = vmul.f32 %v1859_v33, %v1854_v27  ;;  %v2203_v32 = vld [vmem:[#allocation15 + $0x3] sm:$0x1] }
 0x624   : > { %v1688_v36 = vadd.f32 %v1687_v34, %v1681_v26  ;;  %v1861_v37 = vadd.f32 %v1860_v35, %v1854_v27  ;;  %v2120_v26 = vld [vmem:[#allocation16 + $0x20] sm:$0xff] }
 0x626   : > { %v1689_v38 = vmul.f32 0.7978846, %v1688_v36  ;;  %v1862_v39 = vmul.f32 0.7978846, %v1861_v37 }
 0x628   : > { %12203 = vtanh.f32 %v1689_v38 }
 0x629   : > { %12205 = vtanh.f32 %v1862_v39 }
 0x635   : > { %v12204_v40 = vpop.eup %12203 }
 0x636   : > { %v12206_v41 = vpop.eup %12205  ;;  %v1691_v43 = vadd.f32 1.0, %v12204_v40 }
 0x637   : > { %v1864_v45 = vadd.f32 1.0, %v12206_v41 }
 0x638   : > { %v1692_v48 = vmul.f32 %v1691_v43, %v1684_v42 }
 0x639   : > { %v1865_v49 = vmul.f32 %v1864_v45, %v1857_v44 }
 0x63a   : > { %v1694_v50 = vmul.f32 %v1693_v47, %v1692_v48 }
 0x63b   : > { %10356 = vmatmul.mubr.msk.f32.vlgmr.msra.gmra.mxu0 %vm1238_vm1, %v1865_v49  ;;  %v2287_v49 = vld [vmem:[#allocation13 + $0x98] sm:$0xff] }
 0x63c   : > { %10334 = vmatmul.mubr.f32.vlgmr.msra.gmra.mxu1 %v1694_v50  ;;  %10377 = vmatprep.mubr.msk.f32.mxu0 %vm13130_vm0, %v13129_v0  ;;  %v2286_v50 = vld [vmem:[#allocation13 + $0x90] sm:$0xff] }
 0x63d   : > { %10359 = vmatpush3.msra.mxu1 %v1948_v51  ;;  %10366 = vmatprep.mubr.msk.f32.mxu1 %vm13130_vm0, %v13129_v0  ;;  %v2285_v51 = vld [vmem:[#allocation13 + $0x88] sm:$0xff] }
 0x63e   : > { %10360 = vmatprep.subr.mxu1 %v13129_v0  ;;  %10370 = vmatpush3.msra.mxu0 %v2035_v55 }
 0x63f   : > { %10361 = vmatpush3.msra.mxu1 %v1947_v52  ;;  %10371 = vmatprep.subr.mxu0 %v13129_v0 }
 0x640   : > { %10362 = vmatprep.subr.mxu1 %v13129_v0  ;;  %10372 = vmatpush3.msra.mxu0 %v2034_v56 }
 0x641   : > { %10363 = vmatpush3.msra.mxu1 %v1946_v53  ;;  %10373 = vmatprep.subr.mxu0 %v13129_v0 }
 0x642   : > { %10364 = vmatprep.subr.mxu1 %v13129_v0  ;;  %10374 = vmatpush3.msra.mxu0 %v2033_v57  ;;  %v2474_v57 = vld [vmem:[%s15104_s1 + $0x78] sm:$0xff] }
 0x643   : > { %10365 = vmatpush3.msra.mxu1 %v1945_v54  ;;  %10375 = vmatprep.subr.mxu0 %v13129_v0  ;;  %v2284_v54 = vld [vmem:[#allocation13 + $0x80] sm:$0xff] }
 0x644   : > { %10367 = vmatmul.mubr.msk.f32.vlgmr.msra.gmra.mxu1 %vm1238_vm1, %v13604_v62  ;;  %10380 = vmatprep.subr.mxu1 %v13129_v0 }
 0x645   : > { %10388 = vmatprep.mubr.msk.f32.mxu1 %vm13130_vm0, %v13129_v0  ;;  %10376 = vmatpush3.msra.mxu0 %v2032_v58  ;;  %v2473_v58 = vld [vmem:[%s15104_s1 + $0x70] sm:$0xff] }
 0x646   : > { %10391 = vmatprep.subr.mxu0 %v13129_v0  ;;  %10381 = vmatpush3.msra.mxu1 %v2123_v23 }
 0x647   : > { %10382 = vmatprep.subr.mxu1 %v13129_v0 }
 0x648   : > { %10383 = vmatpush3.msra.mxu1 %v2122_v24 }
 0x649   : > { %10384 = vmatprep.subr.mxu1 %v13129_v0 }
 0x64a   : > { %10385 = vmatpush3.msra.mxu1 %v2121_v25 }
 0x64b   : > { %10386 = vmatprep.subr.mxu1 %v13129_v0 }
 0x64c   : > { %10387 = vmatpush3.msra.mxu1 %v2120_v26 }
 0x64d   : > { %10402 = vmatprep.subr.mxu1 %v13129_v0 }
 0x6fb   : > { %v1940_v63 = vpop.f32.mrf.mxu0 }
 0x6fc   : > { %v1941_v1 = vadd.f32 %v1940_v63, %v1870_v60  ;;  %v1778_v2 = vpop.f32.mrf.mxu1  ;;  %v2472_v60 = vld [vmem:[%s15104_s1 + $0x68] sm:$0xff]  ;;  %v2470_v63 = vld [vmem:[%s15104_s1 + $0x58] sm:$0xff] }
 0x6fd   : > { %v1779_v3 = vadd.f32 %v1778_v2, %v1711_v61  ;;  %v10357_v4 = vpop.f32.mrf.mxu0  ;;  %v2471_v61 = vld [vmem:[%s15104_s1 + $0x60] sm:$0xff]  ;;  %v2468_v2 = vld [vmem:[%s15104_s1 + $0x48] sm:$0xff] }
 0x6fe   : > { %2451 = vst [vmem:[%s13635_s28 + $0x4] sm:$0x1] %v1941_v1  ;;  %v10335_v5 = vpop.f32.mrf.mxu1  ;;  %v2469_v1 = vld [vmem:[%s15104_s1 + $0x50] sm:$0xff]  ;;  %v2466_v4 = vld [vmem:[%s15104_s1 + $0x38] sm:$0xff] }
 0x6ff   : > { %2450 = vst [vmem:[%s13635_s28] sm:$0xf] %v1779_v3  ;;  %v2467_v3 = vld [vmem:[%s15104_s1 + $0x40] sm:$0xff]  ;;  %v2465_v5 = vld [vmem:[%s15104_s1 + $0x30] sm:$0xff] }
 0x704   : > { %v2018_v7 = vpop.f32.mrf.mxu1 }
 0x705   : > { %v2019_v8 = vadd.f32 %v2018_v7, %v1949_v6  ;;  %v2464_v6 = vld [vmem:[%s15104_s1 + $0x28] sm:$0xff]  ;;  %v2463_v7 = vld [vmem:[%s15104_s1 + $0x20] sm:$0xff] }
 0x706   : > { %v10368_v9 = vpop.f32.mrf.mxu1 }
 0x707   : > { %v2023_v10 = vmul.f32 0.044715, %v2019_v8  ;;  %v2022_v16 = vmul.f32 0.5, %v2019_v8  ;;  %v2461_v9 = vld [vmem:[%s15104_s1 + $0x10] sm:$0xff] }
 0x709   : > { %v2024_v11 = vmul.f32 %v2023_v10, %v2019_v8  ;;  %v1592_v10 = vadd.f32 %v13601_v59, %v13581_v46  ;;  %v2375_v46 = vld [vmem:[#allocation16 + $0x58] sm:$0xff]  ;;  %v2374_v59 = vld [vmem:[#allocation16 + $0x50] sm:$0xff] }
 0x70b   : > { %v2025_v12 = vmul.f32 %v2024_v11, %v2019_v8  ;;  %v2460_v11 = vld [vmem:[%s15104_s1 + $0x8] sm:$0xff] }
 0x70d   : > { %v2026_v13 = vadd.f32 %v2025_v12, %v2019_v8  ;;  %v2462_v8 = vld [vmem:[%s15104_s1 + $0x18] sm:$0xff]  ;;  %v9098_v12 = vld [vmem:[#allocation7] ss:$0 sm:$0xff] }
 0x70f   : > { %v2027_v14 = vmul.f32 0.7978846, %v2026_v13  ;;  %v2459_v13 = vld [vmem:[%s15104_s1] sm:$0xff] }
 0x711   : > { %12207 = vtanh.f32 %v2027_v14  ;;  %v13715_v14 = vadd.f32 %v9098_v12, %v1592_v10 }
 0x71e   : > { %v12208_v15 = vpop.eup %12207 }
 0x71f   : > { %v2029_v17 = vadd.f32 1.0, %v12208_v15  ;;  %v2373_v15 = vld [vmem:[#allocation16 + $0x48] sm:$0xff] }
 0x721   : > { %v2030_v18 = vmul.f32 %v2029_v17, %v2022_v16  ;;  %v2372_v16 = vld [vmem:[#allocation16 + $0x40] sm:$0xff] }
 0x722   : > { %v2124_v17 = vld [vmem:[#allocation18 + $0x1] sm:$0x1] }
 0x723   : > { %10378 = vmatmul.mubr.msk.f32.vlgmr.msra.gmra.mxu0 %vm1238_vm1, %v2030_v18 }
 0x724   : > { %10392 = vmatpush3.msra.mxu0 %v2202_v19  ;;  %10399 = vmatprep.mubr.msk.f32.mxu0 %vm13130_vm0, %v13129_v0 }
 0x725   : > { %10393 = vmatprep.subr.mxu0 %v13129_v0 }
 0x726   : > { %10394 = vmatpush3.msra.mxu0 %v2201_v20 }
 0x727   : > { %10395 = vmatprep.subr.mxu0 %v13129_v0 }
 0x728   : > { %10396 = vmatpush3.msra.mxu0 %v2200_v21  ;;  %v2288_v21 = vld [vmem:[#allocation15 + $0x4] sm:$0x1] }
 0x729   : > { %10397 = vmatprep.subr.mxu0 %v13129_v0 }
 0x72a   : > { %10398 = vmatpush3.msra.mxu0 %v2199_v22 }
 0x72b   : > { %10400 = vmatmul.mubr.msk.f32.vlgmr.msra.gmra.mxu0 %vm1238_vm1, %v13604_v62  ;;  %10413 = vmatprep.subr.mxu0 %v13129_v0  ;;  %v2036_v62 = vld [vmem:[#allocation15 + $0x2] sm:$0x1] }
 0x72c   : > { %10421 = vmatprep.mubr.msk.f32.mxu0 %vm13130_vm0, %v13129_v0  ;;  %10414 = vmatpush3.msra.mxu0 %v2375_v46 }
 0x72d   : > { %10415 = vmatprep.subr.mxu0 %v13129_v0 }
 0x72e   : > { %10416 = vmatpush3.msra.mxu0 %v2374_v59 }
 0x72f   : > { %10417 = vmatprep.subr.mxu0 %v13129_v0 }
 0x730   : > { %10418 = vmatpush3.msra.mxu0 %v2373_v15 }
 0x731   : > { %10419 = vmatprep.subr.mxu0 %v13129_v0 }
 0x732   : > { %10420 = vmatpush3.msra.mxu0 %v2372_v16 }
 0x733   : > { %10459 = vmatprep.subr.mxu0 %v13129_v0 }
 0x7e3   : > { %v2106_v27 = vpop.f32.mrf.mxu0 }
 0x7e4   : > { %v2107_v28 = vadd.f32 %v2106_v27, %v2036_v62 }
 0x7e5   : > { %v10379_v29 = vpop.f32.mrf.mxu0 }
 0x7e6   : > { %v2111_v30 = vmul.f32 0.044715, %v2107_v28  ;;  %v2110_v45 = vmul.f32 0.5, %v2107_v28 }
 0x7e8   : > { %v2112_v31 = vmul.f32 %v2111_v30, %v2107_v28 }
 0x7ea   : > { %v2113_v33 = vmul.f32 %v2112_v31, %v2107_v28 }
 0x7eb   : > { %v2270_v34 = vpop.f32.mrf.mxu0 }
 0x7ec   : > { %v2114_v35 = vadd.f32 %v2113_v33, %v2107_v28  ;;  %v2271_v36 = vadd.f32 %v2270_v34, %v2203_v32  ;;  %v9125_v33 = vld [vmem:[%s15104_s1 + $0xf8] sm:$0xff]  ;;  %v9124_v34 = vld [vmem:[%s15104_s1 + $0xf0] sm:$0xff] }
 0x7ed   : > { %v10401_v37 = vpop.f32.mrf.mxu0 }
 0x7ee   : > { %v2115_v38 = vmul.f32 0.7978846, %v2114_v35  ;;  %v2275_v39 = vmul.f32 0.044715, %v2271_v36  ;;  %v2274_v53 = vmul.f32 0.5, %v2271_v36 }
 0x7f0   : > { %12209 = vtanh.f32 %v2115_v38  ;;  %v2276_v40 = vmul.f32 %v2275_v39, %v2271_v36  ;;  %v9122_v38 = vld [vmem:[%s15104_s1 + $0xe0] sm:$0xff]  ;;  %v9121_v39 = vld [vmem:[%s15104_s1 + $0xd8] sm:$0xff] }
 0x7f2   : > { %v2277_v41 = vmul.f32 %v2276_v40, %v2271_v36  ;;  %v9120_v40 = vld [vmem:[%s15104_s1 + $0xd0] sm:$0xff] }
 0x7f4   : > { %v2278_v42 = vadd.f32 %v2277_v41, %v2271_v36  ;;  %v9123_v36 = vld [vmem:[%s15104_s1 + $0xe8] sm:$0xff] }
 0x7f5   : > { %v9119_v41 = vld [vmem:[%s15104_s1 + $0xc8] sm:$0xff] }
 0x7f6   : > { %v2279_v43 = vmul.f32 0.7978846, %v2278_v42  ;;  %v9118_v42 = vld [vmem:[%s15104_s1 + $0xc0] sm:$0xff] }
 0x7f8   : > { %12211 = vtanh.f32 %v2279_v43  ;;  %v9117_v43 = vld [vmem:[%s15104_s1 + $0xb8] sm:$0xff] }
 0x7fd   : > { %v12210_v44 = vpop.eup %12209 }
 0x7fe   : > { %v2117_v47 = vadd.f32 1.0, %v12210_v44  ;;  %v9116_v44 = vld [vmem:[%s15104_s1 + $0xb0] sm:$0xff] }
 0x800   : > { %v2118_v48 = vmul.f32 %v2117_v47, %v2110_v45  ;;  %v9115_v45 = vld [vmem:[%s15104_s1 + $0xa8] sm:$0xff]  ;;  %v9114_v47 = vld [vmem:[%s15104_s1 + $0xa0] sm:$0xff] }
 0x802   : > { %10389 = vmatmul.mubr.msk.f32.vlgmr.msra.gmra.mxu1 %vm1238_vm1, %v2118_v48  ;;  %v9113_v48 = vld [vmem:[%s15104_s1 + $0x98] sm:$0xff] }
 0x803   : > { %10403 = vmatpush3.msra.mxu1 %v2287_v49  ;;  %10410 = vmatprep.mubr.msk.f32.mxu1 %vm13130_vm0, %v13129_v0  ;;  %v9112_v49 = vld [vmem:[%s15104_s1 + $0x90] sm:$0xff] }
 0x804   : > { %10404 = vmatprep.subr.mxu1 %v13129_v0 }
 0x805   : > { %v12212_v52 = vpop.eup %12211  ;;  %10405 = vmatpush3.msra.mxu1 %v2286_v50  ;;  %v9111_v50 = vld [vmem:[%s15104_s1 + $0x88] sm:$0xff] }
 0x806   : > { %10406 = vmatprep.subr.mxu1 %v13129_v0  ;;  %v2281_v55 = vadd.f32 1.0, %v12212_v52  ;;  %v2458_v52 = vld [vmem:[%s15105_s3] sm:$0xff] }
 0x807   : > { %10407 = vmatpush3.msra.mxu1 %v2285_v51  ;;  %v9110_v51 = vld [vmem:[%s15104_s1 + $0x80] sm:$0xff] }
 0x808   : > { %10408 = vmatprep.subr.mxu1 %v13129_v0  ;;  %v2282_v56 = vmul.f32 %v2281_v55, %v2274_v53  ;;  %v2376_v53 = vld [vmem:[#allocation18 + $0x2] sm:$0x1] }
 0x809   : > { %10409 = vmatpush3.msra.mxu1 %v2284_v54 }
 0x80a   : > { %10411 = vmatmul.mubr.msk.f32.vlgmr.msra.gmra.mxu1 %vm1238_vm1, %v2282_v56  ;;  %10424 = vmatprep.subr.mxu1 %v13129_v0 }
 0x80b   : > { %10425 = vmatpush3.msra.mxu1 %v2474_v57  ;;  %10456 = vmatprep.mubr.msk.f32.mxu1 %vm13130_vm0, %v13129_v0  ;;  %v9109_v57 = vld [vmem:[%s15105_s3 + $0x8] sm:$0xff] }
 0x80c   : > { %10426 = vmatprep.subr.mxu1 %v13129_v0 }
 0x80d   : > { %10427 = vmatpush3.msra.mxu1 %v2473_v58 }
 0x80e   : > { %10428 = vmatprep.subr.mxu1 %v13129_v0 }
 0x80f   : > { %10429 = vmatpush3.msra.mxu1 %v2472_v60 }
 0x810   : > { %10430 = vmatprep.subr.mxu1 %v13129_v0 }
 0x811   : > { %10431 = vmatpush3.msra.mxu1 %v2471_v61 }
 0x812   : > { %10432 = vmatprep.subr.mxu1 %v13129_v0 }
 0x813   : > { %10433 = vmatpush3.msra.mxu1 %v2470_v63 }
 0x814   : > { %10434 = vmatprep.subr.mxu1 %v13129_v0 }
 0x815   : > { %10435 = vmatpush3.msra.mxu1 %v2469_v1  ;;  %v2788_v1 = vlaneseq }
 0x816   : > { %10436 = vmatprep.subr.mxu1 %v13129_v0 }
 0x817   : > { %10437 = vmatpush3.msra.mxu1 %v2468_v2  ;;  %v13776_v2 = vshrl.u32 %v2788_v1, 7 }
 0x818   : > { %10438 = vmatprep.subr.mxu1 %v13129_v0 }
 0x819   : > { %10439 = vmatpush3.msra.mxu1 %v2467_v3  ;;  %v13779_v3 = vsub.s32 0, %v13776_v2 }
 0x81a   : > { %10440 = vmatprep.subr.mxu1 %v13129_v0 }
 0x81b   : > { %10441 = vmatpush3.msra.mxu1 %v2466_v4  ;;  %v13781_v4 = vld [vmem:[#allocation30] sm:$0x7f] }
 0x81c   : > { %10442 = vmatprep.subr.mxu1 %v13129_v0 }
 0x81d   : > { %10443 = vmatpush3.msra.mxu1 %v2465_v5  ;;  %v2791_v5 = vrot.slane %v13781_v4, %v13779_v3 }
 0x81e   : > { %10444 = vmatprep.subr.mxu1 %v13129_v0 }
 0x81f   : > { %10445 = vmatpush3.msra.mxu1 %v2464_v6 }
 0x820   : > { %10446 = vmatprep.subr.mxu1 %v13129_v0 }
 0x821   : > { %10447 = vmatpush3.msra.mxu1 %v2463_v7 }
 0x822   : > { %10448 = vmatprep.subr.mxu1 %v13129_v0 }
 0x823   : > { %10449 = vmatpush3.msra.mxu1 %v2462_v8 }
 0x824   : > { %10450 = vmatprep.subr.mxu1 %v13129_v0 }
 0x825   : > { %10451 = vmatpush3.msra.mxu1 %v2461_v9 }
 0x826   : > { %10452 = vmatprep.subr.mxu1 %v13129_v0 }
 0x827   : > { %10453 = vmatpush3.msra.mxu1 %v2460_v11 }
 0x828   : > { %10454 = vmatprep.subr.mxu1 %v13129_v0 }
 0x829   : > { %10455 = vmatpush3.msra.mxu1 %v2459_v13 }
 0x82a   : > { %10457 = vmatmul.mubr.f32.vlgmr.msra.gmra.mxu1 %v13715_v14  ;;  %10494 = vmatprep.subr.mxu1 %v13129_v0 }
 0x82b   : > { %10496 = vmatprep.mubr.msk.f32.mxu1 %vm13130_vm0, %v13129_v0 }
 0x8c2   : > { %v2194_v18 = vpop.f32.mrf.mxu1 }
 0x8c3   : > { %v2195_v19 = vadd.f32 %v2194_v18, %v2124_v17 }
 0x8c4   : > { %v10390_v20 = vpop.f32.mrf.mxu1 }
 0x8c5   : > { %2452 = vst [vmem:[%s13635_s28 + $0x5] sm:$0x1] %v2195_v19 }
 0x8ca   : > { %v2358_v22 = vpop.f32.mrf.mxu1 }
 0x8cb   : > { %v2359_v23 = vadd.f32 %v2358_v22, %v2288_v21  ;;  %v2851_v21 = vld [vmem:[#allocation19 + $0x38] sm:$0xff] }
 0x8cc   : > { %v10412_v24 = vpop.f32.mrf.mxu1  ;;  %v2936_v22 = vld [vmem:[#allocation19 + $0x78] sm:$0xff] }
 0x8cd   : > { %v2363_v25 = vmul.f32 0.044715, %v2359_v23  ;;  %v2362_v30 = vmul.f32 0.5, %v2359_v23  ;;  %v2935_v24 = vld [vmem:[#allocation19 + $0x70] sm:$0xff] }
 0x8cf   : > { %v2364_v26 = vmul.f32 %v2363_v25, %v2359_v23  ;;  %v2849_v25 = vld [vmem:[#allocation19 + $0x28] sm:$0xff] }
 0x8d1   : > { %v2365_v62 = vmul.f32 %v2364_v26, %v2359_v23  ;;  %v2934_v26 = vld [vmem:[#allocation19 + $0x68] sm:$0xff] }
 0x8d3   : > { %v2366_v27 = vadd.f32 %v2365_v62, %v2359_v23  ;;  %v2850_v23 = vld [vmem:[#allocation19 + $0x30] sm:$0xff]  ;;  %v2848_v62 = vld [vmem:[#allocation19 + $0x20] sm:$0xff] }
 0x8d5   : > { %v2367_v28 = vmul.f32 0.7978846, %v2366_v27  ;;  %v2933_v27 = vld [vmem:[#allocation19 + $0x60] sm:$0xff] }
 0x8d7   : > { %12213 = vtanh.f32 %v2367_v28  ;;  %v2847_v28 = vld [vmem:[#allocation19 + $0x18] sm:$0xff] }
 0x8e4   : > { %v12214_v29 = vpop.eup %12213 }
 0x8e5   : > { %v2369_v31 = vadd.f32 1.0, %v12214_v29  ;;  %v2932_v29 = vld [vmem:[#allocation19 + $0x58] sm:$0xff] }
 0x8e7   : > { %v2370_v32 = vmul.f32 %v2369_v31, %v2362_v30  ;;  %v2846_v30 = vld [vmem:[#allocation19 + $0x10] sm:$0xff] }
 0x8e8   : > { %v2931_v31 = vld [vmem:[#allocation19 + $0x50] sm:$0xff] }
 0x8e9   : > { %10422 = vmatmul.mubr.msk.f32.vlgmr.msra.gmra.mxu0 %vm1238_vm1, %v2370_v32  ;;  %v2845_v32 = vld [vmem:[#allocation19 + $0x8] sm:$0xff] }
 0x8ea   : > { %10460 = vmatpush3.msra.mxu0 %v9125_v33  ;;  %v2541_v35 = vpop.f32.mrf.mxu1  ;;  %10491 = vmatprep.mubr.msk.f32.mxu0 %vm13130_vm0, %v13129_v0  ;;  %v2930_v33 = vld [vmem:[#allocation19 + $0x48] sm:$0xff] }
 0x8eb   : > { %10461 = vmatprep.subr.mxu0 %v13129_v0 }
 0x8ec   : > { %10462 = vmatpush3.msra.mxu0 %v9124_v34  ;;  %v10458_v37 = vpop.f32.mrf.mxu1  ;;  %v2844_v34 = vld [vmem:[#allocation19] sm:$0xff] }
 0x8ed   : > { %10463 = vmatprep.subr.mxu0 %v13129_v0 }
 0x8ee   : > { %10464 = vmatpush3.msra.mxu0 %v9123_v36 }
 0x8ef   : > { %10465 = vmatprep.subr.mxu0 %v13129_v0 }
 0x8f0   : > { %10466 = vmatpush3.msra.mxu0 %v9122_v38 }
 0x8f1   : > { %10467 = vmatprep.subr.mxu0 %v13129_v0 }
 0x8f2   : > { %10468 = vmatpush3.msra.mxu0 %v9121_v39 }
 0x8f3   : > { %10469 = vmatprep.subr.mxu0 %v13129_v0 }
 0x8f4   : > { %10470 = vmatpush3.msra.mxu0 %v9120_v40 }
 0x8f5   : > { %10471 = vmatprep.subr.mxu0 %v13129_v0 }
 0x8f6   : > { %10472 = vmatpush3.msra.mxu0 %v9119_v41 }
 0x8f7   : > { %10473 = vmatprep.subr.mxu0 %v13129_v0 }
 0x8f8   : > { %10474 = vmatpush3.msra.mxu0 %v9118_v42 }
 0x8f9   : > { %10475 = vmatprep.subr.mxu0 %v13129_v0 }
 0x8fa   : > { %10476 = vmatpush3.msra.mxu0 %v9117_v43 }
 0x8fb   : > { %10477 = vmatprep.subr.mxu0 %v13129_v0 }
 0x8fc   : > { %10478 = vmatpush3.msra.mxu0 %v9116_v44 }
 0x8fd   : > { %10479 = vmatprep.subr.mxu0 %v13129_v0 }
 0x8fe   : > { %10480 = vmatpush3.msra.mxu0 %v9115_v45 }
 0x8ff   : > { %10481 = vmatprep.subr.mxu0 %v13129_v0 }
 0x900   : > { %10482 = vmatpush3.msra.mxu0 %v9114_v47  ;;  %v13806_v47 = vsub.s32 1, %v13776_v2 }
 0x901   : > { %10483 = vmatprep.subr.mxu0 %v13129_v0 }
 0x902   : > { %10484 = vmatpush3.msra.mxu0 %v9113_v48  ;;  %v13809_v48 = vsub.s32 2, %v13776_v2 }
 0x903   : > { %10485 = vmatprep.subr.mxu0 %v13129_v0 }
 0x904   : > { %10486 = vmatpush3.msra.mxu0 %v9112_v49 }
 0x905   : > { %10487 = vmatprep.subr.mxu0 %v13129_v0 }
 0x906   : > { %10488 = vmatpush3.msra.mxu0 %v9111_v50  ;;  %v2831_v50 = vrot.slane %v13781_v4, %v13809_v48 }
 0x907   : > { %10489 = vmatprep.subr.mxu0 %v13129_v0 }
 0x908   : > { %10490 = vmatpush3.msra.mxu0 %v9110_v51 }
 0x909   : > { %10492 = vmatmul.mubr.f32.vlgmr.msra.gmra.mxu0 %v13715_v14  ;;  %10499 = vmatprep.subr.mxu0 %v13129_v0 }
 0x90a   : > { %10500 = vmatpush3.msk.msra.mxu0 %vm2638_vm4, %v2541_v35  ;;  %10501 = vmatprep.mubr.msk.f32.mxu0 %vm13130_vm0, %v13129_v0  ;;  %v2929_v35 = vld [vmem:[#allocation19 + $0x40] sm:$0xff] }
 0x90b   : > { %10523 = vmatprep.subr.mxu0 %v13129_v0 }
 0x90d   : > { %10502 = vmatmul.mubr.msk.f32.vlgmr.msra.gmra.mxu0 %vm2634_vm5, %v2458_v52 }
 0x90e   : > { %10539 = vmatprep.mubr.msk.f32.mxu0 %vm13130_vm0, %v13129_v0  ;;  %10524 = vmatpush3.msra.mxu0 %v2936_v22  ;;  %v3297_v22 = vld [vmem:[#allocation21 + $0x50] sm:$0xff] }
 0x90f   : > { %10525 = vmatprep.subr.mxu0 %v13129_v0 }
 0x910   : > { %10526 = vmatpush3.msra.mxu0 %v2935_v24  ;;  %v3296_v24 = vld [vmem:[#allocation21 + $0x48] sm:$0xff] }
 0x911   : > { %10527 = vmatprep.subr.mxu0 %v13129_v0 }
 0x912   : > { %10528 = vmatpush3.msra.mxu0 %v2934_v26  ;;  %v3295_v26 = vld [vmem:[#allocation21 + $0x40] sm:$0xff] }
 0x913   : > { %10529 = vmatprep.subr.mxu0 %v13129_v0 }
 0x914   : > { %10530 = vmatpush3.msra.mxu0 %v2933_v27 }
 0x915   : > { %10531 = vmatprep.subr.mxu0 %v13129_v0 }
 0x916   : > { %10532 = vmatpush3.msra.mxu0 %v2932_v29 }
 0x917   : > { %10533 = vmatprep.subr.mxu0 %v13129_v0 }
 0x918   : > { %10534 = vmatpush3.msra.mxu0 %v2931_v31 }
 0x919   : > { %10535 = vmatprep.subr.mxu0 %v13129_v0 }
 0x91a   : > { %10536 = vmatpush3.msra.mxu0 %v2930_v33 }
 0x91b   : > { %10537 = vmatprep.subr.mxu0 %v13129_v0 }
 0x91c   : > { %10538 = vmatpush3.msra.mxu0 %v2929_v35 }
 0x9a9   : > { %v2446_v54 = vpop.f32.mrf.mxu0 }
 0x9aa   : > { %v2447_v55 = vadd.f32 %v2446_v54, %v2376_v53 }
 0x9ab   : > { %v10423_v56 = vpop.f32.mrf.mxu0 }
 0x9ac   : > { %2453 = vst [vmem:[%s13635_s28 + $0x6] sm:$0x1] %v2447_v55 }
 0x9c9   : > { %v2630_v58 = vpop.f32.mrf.mxu0 }
 0x9ca   : > { %10495 = vmatpush3.msk.msra.mxu1 %vm2638_vm4, %v2630_v58 }
 0x9cb   : > { %v10493_v60 = vpop.f32.mrf.mxu0  ;;  %10497 = vmatmul.mubr.msk.f32.vlgmr.msra.gmra.mxu1 %vm2634_vm5, %v9109_v57  ;;  %10504 = vmatprep.subr.mxu1 %v13129_v0 }
 0x9cc   : > { %10520 = vmatprep.mubr.msk.f32.mxu1 %vm13130_vm0, %v13129_v0  ;;  %10505 = vmatpush3.msra.mxu1 %v2851_v21  ;;  %v3202_v21 = vld [vmem:[#allocation21 + $0x10] sm:$0xff] }
 0x9cd   : > { %v2784_v61 = vpop.f32.mrf.mxu0  ;;  %10506 = vmatprep.subr.mxu1 %v13129_v0 }
 0x9ce   : > { %10507 = vmatpush3.msra.mxu1 %v2850_v23  ;;  %v3201_v23 = vld [vmem:[#allocation21 + $0x8] sm:$0xff] }
 0x9cf   : > { %v10503_v63 = vpop.f32.mrf.mxu0  ;;  %10508 = vmatprep.subr.mxu1 %v13129_v0 }
 0x9d0   : > { %10509 = vmatpush3.msra.mxu1 %v2849_v25  ;;  %v3200_v25 = vld [vmem:[#allocation21] sm:$0xff] }
 0x9d1   : > { %10510 = vmatprep.subr.mxu1 %v13129_v0 }
 0x9d2   : > { %10511 = vmatpush3.msra.mxu1 %v2848_v62  ;;  %v13823_v62 = vsub.s32 3, %v13776_v2 }
 0x9d3   : > { %10512 = vmatprep.subr.mxu1 %v13129_v0 }
 0x9d4   : > { %10513 = vmatpush3.msra.mxu1 %v2847_v28  ;;  %v3173_v27 = vrot.slane %v13781_v4, %v13823_v62 }
 0x9d5   : > { %10514 = vmatprep.subr.mxu1 %v13129_v0 }
 0x9d6   : > { %10515 = vmatpush3.msra.mxu1 %v2846_v30 }
 0x9d7   : > { %10516 = vmatprep.subr.mxu1 %v13129_v0 }
 0x9d8   : > { %10517 = vmatpush3.msra.mxu1 %v2845_v32 }
 0x9d9   : > { %10518 = vmatprep.subr.mxu1 %v13129_v0  ;;  %v2826_v0 = vrot.slane %v13781_v4, %v13806_v47 }
 0x9da   : > { %10519 = vmatpush3.msra.mxu1 %v2844_v34 }
 0xa8b   : > { %v2708_v6 = vpop.f32.mrf.mxu1 }
 0xa8c   : > { %v2785_v7 = vadd.f32 %v2784_v61, %v2708_v6  ;;  %v2842_v6 = vld [vmem:[%s15106_s18] sm:$0xff] }
 0xa8d   : > { %v10498_v8 = vpop.f32.mrf.mxu1 }
 0xa8e   : > { %v2792_v9 = vadd.f32 %v2791_v5, %v2785_v7  ;;  %v9131_v5 = vld [vmem:[%s15106_s18 + $0x10] sm:$0xff] }
 0xa90   : > { %v2794_v10 = vsel %vm2793_vm6, %v2792_v9, 0.0 }
 0xa91   : > { %2795 = vadd.xlane.f32.xlu0 %v2794_v10  ;;  %v2843_v10 = vld [vmem:[%s15106_s18 + $0x8] sm:$0xff] }
 0xb1a   : > { %v2796_v11 = vpop.xlane.xlu0 %2795 }
 0xb1b   : > { %v2798_v12 = vmul.f32 0.015625, %v2796_v11 }
 0xb1d   : > { %v2799_v13 = vrot.slane %v2798_v12, 4 }
 0xb1f   : > { %v2800_v14 = vadd.f32 %v2799_v13, %v2798_v12  ;;  %v3207_v13 = vld [vmem:[#allocation21 + $0x38] sm:$0xff] }
 0xb21   : > { %v2801_v46 = vrot.slane %v2800_v14, 2 }
 0xb23   : > { %v2802_v59 = vadd.f32 %v2801_v46, %v2800_v14  ;;  %v3302_v14 = vld [vmem:[#allocation21 + $0x78] sm:$0xff]  ;;  %v3206_v46 = vld [vmem:[#allocation21 + $0x30] sm:$0xff] }
 0xb25   : > { %v2803_v15 = vrot.slane %v2802_v59, 1 }
 0xb27   : > { %v2804_v16 = vadd.f32 %v2803_v15, %v2802_v59  ;;  %v3301_v59 = vld [vmem:[#allocation21 + $0x70] sm:$0xff]  ;;  %v3205_v15 = vld [vmem:[#allocation21 + $0x28] sm:$0xff] }
 0xb29   : > { %v2806_v17 = vmul.f32 0.125, %v2804_v16  ;;  %v3300_v16 = vld [vmem:[#allocation21 + $0x68] sm:$0xff] }
 0xb2b   : > { %v13786_v18 = vsub.f32 %v2792_v9, %v2806_v17  ;;  %v9132_v9 = vld [vmem:[%s15106_s18 + $0x18] sm:$0xff]  ;;  %v3204_v17 = vld [vmem:[#allocation21 + $0x20] sm:$0xff] }
 0xb2d   : > { %v2808_v19 = vmul.f32 %v13786_v18, %v13786_v18 }
 0xb2f   : > { %v2809_v20 = vsel %vm2793_vm6, %v2808_v19, 0.0  ;;  %v3203_v19 = vld [vmem:[#allocation21 + $0x18] sm:$0xff] }
 0xb30   : > { %2810 = vadd.xlane.f32.xlu1 %v2809_v20  ;;  %v3298_v20 = vld [vmem:[#allocation21 + $0x58] sm:$0xff] }
 0xbb9   : > { %v2811_v36 = vpop.xlane.xlu1 %2810 }
 0xbba   : > { %v2812_v37 = vmul.f32 0.015625, %v2811_v36 }
 0xbbc   : > { %v2813_v38 = vrot.slane %v2812_v37, 4 }
 0xbbe   : > { %v2814_v39 = vadd.f32 %v2813_v38, %v2812_v37 }
 0xbc0   : > { %v2815_v40 = vrot.slane %v2814_v39, 2 }
 0xbc2   : > { %v2816_v41 = vadd.f32 %v2815_v40, %v2814_v39 }
 0xbc4   : > { %v2817_v42 = vrot.slane %v2816_v41, 1 }
 0xbc6   : > { %v2818_v43 = vadd.f32 %v2817_v42, %v2816_v41 }
 0xbc8   : > { %v2819_v44 = vmul.f32 0.125, %v2818_v43 }
 0xbca   : > { %v2820_v45 = vadd.f32 1e-05, %v2819_v44 }
 0xbcc   : > { %12215 = vrsqrt.f32 %v2820_v45 }
 0xbd9   : > { %v12216_v49 = vpop.eup %12215 }
 0xbda   : > { %v2822_v51 = vmul.f32 %v12216_v49, %v13786_v18  ;;  %v3299_v18 = vld [vmem:[#allocation21 + $0x60] sm:$0xff] }
 0xbdc   : > { %v2827_v52 = vmul.f32 %v2826_v0, %v2822_v51 }
 0xbde   : > { %v2832_v53 = vadd.f32 %v2831_v50, %v2827_v52 }
 0xbe0   : > { %v2834_v54 = vmul.f32 0.044715, %v2832_v53  ;;  %v2833_v61 = vmul.f32 0.5, %v2832_v53 }
 0xbe2   : > { %v2835_v55 = vmul.f32 %v2834_v54, %v2832_v53 }
 0xbe4   : > { %v2836_v56 = vmul.f32 %v2835_v55, %v2832_v53 }
 0xbe6   : > { %v2837_v57 = vadd.f32 %v2836_v56, %v2832_v53  ;;  %v9140_v56 = vld [vmem:[%s15107_s22 + $0x20] sm:$0xff] }
 0xbe8   : > { %v2838_v58 = vmul.f32 0.7978846, %v2837_v57  ;;  %v3196_v57 = vld [vmem:[%s15107_s22] sm:$0xff] }
 0xbea   : > { %12217 = vtanh.f32 %v2838_v58 }
 0xbf7   : > { %v12218_v60 = vpop.eup %12217 }
 0xbf8   : > { %v2840_v63 = vadd.f32 1.0, %v12218_v60 }
 0xbfa   : > { %v2841_v1 = vmul.f32 %v2840_v63, %v2833_v61 }
 0xbfc   : > { %10521 = vmatmul.mubr.msk.f32.vlgmr.msra.gmra.mxu1 %vm2793_vm6, %v2841_v1  ;;  %10540 = vmatmul.mubr.msk.f32.vlgmr.msra.gmra.mxu0 %vm2793_vm6, %v2841_v1  ;;  %v9141_v1 = vld [vmem:[%s15107_s22 + $0x28] sm:$0xff] }
 0xbfd   : > { %10544 = vmatprep.mubr.msk.f32.mxu1 %vm3007_vm7, %v9131_v5  ;;  %10549 = vmatprep.mubr.msk.f32.mxu0 %vm3007_vm7, %v2842_v6  ;;  %v3197_v5 = vld [vmem:[%s15107_s22 + $0x8] sm:$0xff]  ;;  %v9142_v6 = vld [vmem:[%s15107_s22 + $0x30] sm:$0xff] }
 0xcbc   : > { %v2921_v7 = vpop.f32.mrf.mxu1  ;;  %v3003_v8 = vpop.f32.mrf.mxu0 }
 0xcbd   : > { %10542 = vmatprep.subr.mxu1 %v3003_v8  ;;  %10547 = vmatprep.subr.mxu0 %v2921_v7 }
 0xcbe   : > { %v10522_v11 = vpop.f32.mrf.mxu1  ;;  %v10541_v12 = vpop.f32.mrf.mxu0  ;;  %10543 = vmatpush3.msra.mxu1 %v3003_v8  ;;  %10548 = vmatpush3.msra.mxu0 %v2921_v7  ;;  %v3198_v7 = vld [vmem:[%s15107_s22 + $0x10] sm:$0xff]  ;;  %v3587_v8 = vld [vmem:[#allocation24 + $0x38] sm:$0xff] }
 0xcbf   : > { %10545 = vmatmul.mubr.msk.f32.vlgmr.msra.gmra.mxu1 %vm3007_vm7, %v9132_v9  ;;  %10550 = vmatmul.mubr.msk.f32.vlgmr.msra.gmra.mxu0 %vm3007_vm7, %v2843_v10  ;;  %v9143_v9 = vld [vmem:[%s15107_s22 + $0x38] sm:$0xff]  ;;  %v3586_v11 = vld [vmem:[#allocation24 + $0x30] sm:$0xff]  ;;  %v3585_v12 = vld [vmem:[#allocation24 + $0x28] sm:$0xff] }
 0xcc0   : > { %10552 = vmatprep.subr.mxu1 %v3207_v13  ;;  %10571 = vmatprep.subr.mxu0 %v3302_v14  ;;  %v3199_v10 = vld [vmem:[%s15107_s22 + $0x18] sm:$0xff] }
 0xcc1   : > { %10553 = vmatpush3.msra.mxu1 %v3207_v13  ;;  %10572 = vmatpush3.msra.mxu0 %v3302_v14  ;;  %v3584_v13 = vld [vmem:[#allocation24 + $0x20] sm:$0xff]  ;;  %v3583_v14 = vld [vmem:[#allocation24 + $0x18] sm:$0xff] }
 0xcc2   : > { %10554 = vmatprep.subr.mxu1 %v3206_v46  ;;  %10573 = vmatprep.subr.mxu0 %v3301_v59 }
 0xcc3   : > { %10555 = vmatpush3.msra.mxu1 %v3206_v46  ;;  %10574 = vmatpush3.msra.mxu0 %v3301_v59  ;;  %v3582_v46 = vld [vmem:[#allocation24 + $0x10] sm:$0xff]  ;;  %v3581_v59 = vld [vmem:[#allocation24 + $0x8] sm:$0xff] }
 0xcc4   : > { %10556 = vmatprep.subr.mxu1 %v3205_v15  ;;  %10575 = vmatprep.subr.mxu0 %v3300_v16 }
 0xcc5   : > { %10557 = vmatpush3.msra.mxu1 %v3205_v15  ;;  %10576 = vmatpush3.msra.mxu0 %v3300_v16  ;;  %v3580_v15 = vld [vmem:[#allocation24] sm:$0xff]  ;;  %v13852_v16 = vsub.s32 4, %v13776_v2 }
 0xcc6   : > { %10558 = vmatprep.subr.mxu1 %v3204_v17  ;;  %10577 = vmatprep.subr.mxu0 %v3299_v18 }
 0xcc7   : > { %10559 = vmatpush3.msra.mxu1 %v3204_v17  ;;  %10578 = vmatpush3.msra.mxu0 %v3299_v18 }
 0xcc8   : > { %10560 = vmatprep.subr.mxu1 %v3203_v19  ;;  %10579 = vmatprep.subr.mxu0 %v3298_v20 }
 0xcc9   : > { %10561 = vmatpush3.msra.mxu1 %v3203_v19  ;;  %10580 = vmatpush3.msra.mxu0 %v3298_v20  ;;  %v3575_v20 = vrot.slane %v13781_v4, %v13852_v16 }
 0xcca   : > { %10562 = vmatprep.subr.mxu1 %v3202_v21  ;;  %10581 = vmatprep.subr.mxu0 %v3297_v22 }
 0xccb   : > { %10563 = vmatpush3.msra.mxu1 %v3202_v21  ;;  %10582 = vmatpush3.msra.mxu0 %v3297_v22 }
 0xccc   : > { %10564 = vmatprep.subr.mxu1 %v3201_v23  ;;  %10583 = vmatprep.subr.mxu0 %v3296_v24 }
 0xccd   : > { %10565 = vmatpush3.msra.mxu1 %v3201_v23  ;;  %10584 = vmatpush3.msra.mxu0 %v3296_v24 }
 0xcce   : > { %10566 = vmatprep.subr.mxu1 %v3200_v25  ;;  %10585 = vmatprep.subr.mxu0 %v3295_v26 }
 0xccf   : > { %10567 = vmatpush3.msra.mxu1 %v3200_v25  ;;  %10586 = vmatpush3.msra.mxu0 %v3295_v26 }
 0xd7f   : > { %v10546_v28 = vpop.f32.mrf.mxu1  ;;  %v10551_v29 = vpop.f32.mrf.mxu0 }
 0xd80   : > { %v3167_v30 = vadd.f32 %v10551_v29, %v10546_v28 }
 0xd81   : > { %v3080_v31 = vpop.f32.mrf.mxu1  ;;  %v3161_v32 = vpop.f32.mrf.mxu0 }
 0xd82   : > { %v3175_v33 = vadd.f32 %v3173_v27, %v3167_v30  ;;  %v3162_v34 = vadd.f32 %v3161_v32, %v3080_v31 }
 0xd84   : > { %v3179_v35 = vmul.f32 0.044715, %v3175_v33  ;;  %v3174_v36 = vadd.f32 %v3173_v27, %v3162_v34  ;;  %v3177_v49 = vmul.f32 0.5, %v3175_v33 }
 0xd86   : > { %v3181_v37 = vmul.f32 %v3179_v35, %v3175_v33  ;;  %v3178_v38 = vmul.f32 0.044715, %v3174_v36  ;;  %v3176_v52 = vmul.f32 0.5, %v3174_v36 }
 0xd88   : > { %v3183_v39 = vmul.f32 %v3181_v37, %v3175_v33  ;;  %v3180_v40 = vmul.f32 %v3178_v38, %v3174_v36 }
 0xd8a   : > { %v3185_v41 = vadd.f32 %v3183_v39, %v3175_v33  ;;  %v3182_v42 = vmul.f32 %v3180_v40, %v3174_v36 }
 0xd8c   : > { %v3187_v43 = vmul.f32 0.7978846, %v3185_v41  ;;  %v3184_v44 = vadd.f32 %v3182_v42, %v3174_v36 }
 0xd8e   : > { %12219 = vtanh.f32 %v3187_v43  ;;  %v3186_v45 = vmul.f32 0.7978846, %v3184_v44 }
 0xd90   : > { %12221 = vtanh.f32 %v3186_v45 }
 0xd9b   : > { %v12220_v0 = vpop.eup %12219 }
 0xd9c   : > { %v3191_v50 = vadd.f32 1.0, %v12220_v0  ;;  %v3865_v0 = vld [vmem:[#allocation22 + $0x38] sm:$0xff] }
 0xd9d   : > { %v12222_v51 = vpop.eup %12221 }
 0xd9e   : > { %v3190_v53 = vadd.f32 1.0, %v12222_v51  ;;  %v3193_v54 = vmul.f32 %v3191_v50, %v3177_v49  ;;  %v3980_v49 = vld [vmem:[#allocation22 + $0x78] sm:$0xff]  ;;  %v3864_v50 = vld [vmem:[#allocation22 + $0x30] sm:$0xff] }
 0xd9f   : > { %v3979_v51 = vld [vmem:[#allocation22 + $0x70] sm:$0xff] }
 0xda0   : > { %v3192_v55 = vmul.f32 %v3190_v53, %v3176_v52  ;;  %3195 = vst.msk [vmem:[%s1214_s2 + $0x8] sm:$0xff] %vm2793_vm6, %v3193_v54  ;;  %v3863_v52 = vld [vmem:[#allocation22 + $0x28] sm:$0xff] }
 0xda1   : > { %v3978_v53 = vld [vmem:[#allocation22 + $0x68] sm:$0xff] }
 0xda2   : > { %3194 = vst.msk [vmem:[%s1214_s2] sm:$0xff] %vm2793_vm6, %v3192_v55  ;;  %10568 = vmatprep.mubr.msk.f32.mxu1 %vm2793_vm6, %v3192_v55  ;;  %10587 = vmatprep.mubr.msk.f32.mxu0 %vm2793_vm6, %v3192_v55  ;;  %v3977_v55 = vld [vmem:[#allocation22 + $0x60] sm:$0xff] }
 0xda3   : > { %10569 = vmatmul.mubr.msk.f32.vlgmr.msra.gmra.mxu1 %vm2793_vm6, %v3193_v54  ;;  %10588 = vmatmul.mubr.msk.f32.vlgmr.msra.gmra.mxu0 %vm2793_vm6, %v3193_v54  ;;  %v3862_v54 = vld [vmem:[#allocation22 + $0x20] sm:$0xff] }
 0xda4   : > { %10594 = vmatprep.mubr.msk.f32.mxu1 %vm1430_vm3, %v9140_v56  ;;  %10604 = vmatprep.mubr.msk.f32.mxu0 %vm1430_vm3, %v3196_v57  ;;  %v3861_v56 = vld [vmem:[#allocation22 + $0x18] sm:$0xff] }
 0xda5   : > { %v3976_v57 = vld [vmem:[#allocation22 + $0x58] sm:$0xff] }
 0xe63   : > { %v10570_v58 = vpop.f32.mrf.mxu1  ;;  %v10589_v60 = vpop.f32.mrf.mxu0 }
 0xe64   : > { %10590 = vmatprep.subr.mxu1 %v10589_v60  ;;  %10600 = vmatprep.subr.mxu0 %v10570_v58 }
 0xe65   : > { %v3280_v61 = vpop.f32.mrf.mxu1  ;;  %v3369_v63 = vpop.f32.mrf.mxu0  ;;  %10591 = vmatpush3.msra.mxu1 %v10589_v60  ;;  %10601 = vmatpush3.msra.mxu0 %v10570_v58  ;;  %v3860_v58 = vld [vmem:[#allocation22 + $0x10] sm:$0xff] }
 0xe66   : > { %10592 = vmatprep.subr.mxu1 %v3369_v63  ;;  %10602 = vmatprep.subr.mxu0 %v3280_v61  ;;  %v3975_v60 = vld [vmem:[#allocation22 + $0x50] sm:$0xff] }
 0xe67   : > { %10593 = vmatpush3.msra.mxu1 %v3369_v63  ;;  %10603 = vmatpush3.msra.mxu0 %v3280_v61  ;;  %v3859_v61 = vld [vmem:[#allocation22 + $0x8] sm:$0xff] }
 0xe68   : > { %10595 = vmatmul.mubr.msk.f32.vlgmr.msra.gmra.mxu1 %vm1430_vm3, %v9141_v1  ;;  %10605 = vmatmul.mubr.msk.f32.vlgmr.msra.gmra.mxu0 %vm1430_vm3, %v3197_v5  ;;  %v3974_v63 = vld [vmem:[#allocation22 + $0x48] sm:$0xff]  ;;  %v3858_v1 = vld [vmem:[#allocation22] sm:$0xff] }
 0xe69   : > { %10597 = vmatprep.mubr.msk.f32.mxu1 %vm1430_vm3, %v9142_v6  ;;  %10607 = vmatprep.mubr.msk.f32.mxu0 %vm1430_vm3, %v3198_v7  ;;  %v3973_v5 = vld [vmem:[#allocation22 + $0x40] sm:$0xff] }
 0xe6a   : > { %10610 = vmatprep.subr.mxu1 %v3587_v8  ;;  %10632 = vmatprep.subr.mxu0 %v3587_v8 }
 0xe6b   : > { %10611 = vmatpush3.msra.mxu1 %v3587_v8  ;;  %10633 = vmatpush3.msra.mxu0 %v3587_v8 }
 0xe6c   : > { %10598 = vmatmul.mubr.msk.f32.gmra.mxu1 %vm1430_vm3, %v9143_v9  ;;  %10608 = vmatmul.mubr.msk.f32.gmra.mxu0 %vm1430_vm3, %v3199_v10 }
 0xe6d   : > { %10612 = vmatprep.subr.mxu1 %v3586_v11  ;;  %10634 = vmatprep.subr.mxu0 %v3586_v11 }
 0xe6e   : > { %10613 = vmatpush3.msra.mxu1 %v3586_v11  ;;  %10635 = vmatpush3.msra.mxu0 %v3586_v11 }
 0xe6f   : > { %10614 = vmatprep.subr.mxu1 %v3585_v12  ;;  %10636 = vmatprep.subr.mxu0 %v3585_v12 }
 0xe70   : > { %10615 = vmatpush3.msra.mxu1 %v3585_v12  ;;  %10637 = vmatpush3.msra.mxu0 %v3585_v12 }
 0xe71   : > { %10616 = vmatprep.subr.mxu1 %v3584_v13  ;;  %10638 = vmatprep.subr.mxu0 %v3584_v13 }
 0xe72   : > { %10617 = vmatpush3.msra.mxu1 %v3584_v13  ;;  %10639 = vmatpush3.msra.mxu0 %v3584_v13 }
 0xe73   : > { %10618 = vmatprep.subr.mxu1 %v3583_v14  ;;  %10640 = vmatprep.subr.mxu0 %v3583_v14 }
 0xe74   : > { %10619 = vmatpush3.msra.mxu1 %v3583_v14  ;;  %10641 = vmatpush3.msra.mxu0 %v3583_v14  ;;  %v3800_v14 = vsub.s32 5, %v13776_v2 }
 0xe75   : > { %10620 = vmatprep.subr.mxu1 %v3582_v46  ;;  %10642 = vmatprep.subr.mxu0 %v3582_v46 }
 0xe76   : > { %10621 = vmatpush3.msra.mxu1 %v3582_v46  ;;  %10643 = vmatpush3.msra.mxu0 %v3582_v46  ;;  %v3808_v46 = vsub.s32 6, %v13776_v2 }
 0xe77   : > { %10622 = vmatprep.subr.mxu1 %v3581_v59  ;;  %10644 = vmatprep.subr.mxu0 %v3581_v59 }
 0xe78   : > { %10623 = vmatpush3.msra.mxu1 %v3581_v59  ;;  %10645 = vmatpush3.msra.mxu0 %v3581_v59  ;;  %v3801_v59 = vrot.slane %v13781_v4, %v3800_v14 }
 0xe79   : > { %10624 = vmatprep.subr.mxu1 %v3580_v15  ;;  %10646 = vmatprep.subr.mxu0 %v3580_v15 }
 0xe7a   : > { %10625 = vmatpush3.msra.mxu1 %v3580_v15  ;;  %10647 = vmatpush3.msra.mxu0 %v3580_v15 }
 0xe7b   : > { %10654 = vmatprep.subr.mxu1 %v3865_v0  ;;  %10676 = vmatprep.subr.mxu0 %v3980_v49 }
 0xf28   : > { %v10596_v17 = vpop.f32.mrf.mxu1  ;;  %v10606_v18 = vpop.f32.mrf.mxu0 }
 0xf29   : > { %v3559_v19 = vadd.f32 %v10606_v18, %v10596_v17  ;;  %v3809_v18 = vrot.slane %v13781_v4, %v3808_v46 }
 0xf2a   : > { %v3456_v21 = vpop.f32.mrf.mxu1  ;;  %v3553_v22 = vpop.f32.mrf.mxu0 }
 0xf2b   : > { %v3554_v23 = vadd.f32 %v3553_v22, %v3456_v21  ;;  %v3577_v27 = vadd.f32 %v3575_v20, %v3559_v19 }
 0xf2c   : > { %v10599_v24 = vpop.f32.mrf.mxu1  ;;  %v10609_v25 = vpop.f32.mrf.mxu0 }
 0xf2d   : > { %v3576_v26 = vadd.f32 %v3575_v20, %v3554_v23  ;;  %v3569_v28 = vadd.f32 %v10609_v25, %v10599_v24 }
 0xf2e   : > { %v3466_v29 = vpop.f32.mrf.mxu1  ;;  %v3563_v30 = vpop.f32.mrf.mxu0 }
 0xf2f   : > { %v3564_v31 = vadd.f32 %v3563_v30, %v3466_v29  ;;  %10626 = vmatprep.mubr.msk.f32.mxu1 %vm2793_vm6, %v3576_v26  ;;  %v3579_v33 = vadd.f32 %v3575_v20, %v3569_v28 }
 0xf30   : > { %10627 = vmatmul.mubr.msk.f32.vlgmr.msra.gmra.mxu1 %vm2793_vm6, %v3577_v27 }
 0xf31   : > { %v3578_v32 = vadd.f32 %v3575_v20, %v3564_v31  ;;  %10655 = vmatpush3.msra.mxu1 %v3865_v0 }
 0xf32   : > { %10656 = vmatprep.subr.mxu1 %v3864_v50 }
 0xf33   : > { %10629 = vmatprep.mubr.msk.f32.mxu1 %vm2793_vm6, %v3578_v32  ;;  %10657 = vmatpush3.msra.mxu1 %v3864_v50 }
 0xf34   : > { %10630 = vmatmul.mubr.msk.f32.gmra.mxu1 %vm2793_vm6, %v3579_v33  ;;  %10658 = vmatprep.subr.mxu1 %v3863_v52 }
 0xf35   : > { %10659 = vmatpush3.msra.mxu1 %v3863_v52 }
 0xf36   : > { %10660 = vmatprep.subr.mxu1 %v3862_v54 }
 0xf37   : > { %10661 = vmatpush3.msra.mxu1 %v3862_v54 }
 0xf38   : > { %10662 = vmatprep.subr.mxu1 %v3861_v56 }
 0xf39   : > { %10663 = vmatpush3.msra.mxu1 %v3861_v56 }
 0xf3a   : > { %10664 = vmatprep.subr.mxu1 %v3860_v58 }
 0xf3b   : > { %10665 = vmatpush3.msra.mxu1 %v3860_v58 }
 0xf3c   : > { %10666 = vmatprep.subr.mxu1 %v3859_v61 }
 0xf3d   : > { %10667 = vmatpush3.msra.mxu1 %v3859_v61 }
 0xf3e   : > { %10668 = vmatprep.subr.mxu1 %v3858_v1 }
 0xf3f   : > { %10669 = vmatpush3.msra.mxu1 %v3858_v1 }
 0xff0   : > { %v10628_v34 = vpop.f32.mrf.mxu1 }
 0xff1   : > { %v13860_v35 = vsub.f32 %v3577_v27, %v10628_v34 }
 0xff2   : > { %v3666_v36 = vpop.f32.mrf.mxu1 }
 0xff3   : > { %v13862_v37 = vsub.f32 %v3576_v26, %v3666_v36  ;;  %v3690_v40 = vmul.f32 %v13860_v35, %v13860_v35 }
 0xff4   : > { %v10631_v38 = vpop.f32.mrf.mxu1 }
 0xff5   : > { %v3689_v39 = vmul.f32 %v13862_v37, %v13862_v37  ;;  %v13868_v41 = vsub.f32 %v3579_v33, %v10631_v38 }
 0xff6   : > { %v3676_v42 = vpop.f32.mrf.mxu1 }
 0xff7   : > { %v13870_v43 = vsub.f32 %v3578_v32, %v3676_v42  ;;  %10648 = vmatprep.mubr.msk.f32.mxu0 %vm2793_vm6, %v3689_v39  ;;  %v3692_v45 = vmul.f32 %v13868_v41, %v13868_v41 }
 0xff8   : > { %10649 = vmatmul.mubr.msk.f32.vlgmr.msra.gmra.mxu0 %vm2793_vm6, %v3690_v40 }
 0xff9   : > { %v3691_v44 = vmul.f32 %v13870_v43, %v13870_v43  ;;  %10677 = vmatpush3.msra.mxu0 %v3980_v49 }
 0xffa   : > { %10678 = vmatprep.subr.mxu0 %v3979_v51 }
 0xffb   : > { %10651 = vmatprep.mubr.msk.f32.mxu0 %vm2793_vm6, %v3691_v44  ;;  %10679 = vmatpush3.msra.mxu0 %v3979_v51 }
 0xffc   : > { %10652 = vmatmul.mubr.msk.f32.gmra.mxu0 %vm2793_vm6, %v3692_v45  ;;  %10680 = vmatprep.subr.mxu0 %v3978_v53 }
 0xffd   : > { %10681 = vmatpush3.msra.mxu0 %v3978_v53 }
 0xffe   : > { %10682 = vmatprep.subr.mxu0 %v3977_v55 }
 0xfff   : > { %10683 = vmatpush3.msra.mxu0 %v3977_v55 }
0x1000   : > { %10684 = vmatprep.subr.mxu0 %v3976_v57 }
0x1001   : > { %10685 = vmatpush3.msra.mxu0 %v3976_v57 }
0x1002   : > { %10686 = vmatprep.subr.mxu0 %v3975_v60 }
0x1003   : > { %10687 = vmatpush3.msra.mxu0 %v3975_v60 }
0x1004   : > { %10688 = vmatprep.subr.mxu0 %v3974_v63 }
0x1005   : > { %10689 = vmatpush3.msra.mxu0 %v3974_v63 }
0x1006   : > { %10690 = vmatprep.subr.mxu0 %v3973_v5 }
0x1007   : > { %10691 = vmatpush3.msra.mxu0 %v3973_v5 }
0x10b8   : > { %v10650_v6 = vpop.f32.mrf.mxu0 }
0x10b9   : > { %v3777_v7 = vadd.f32 1e-06, %v10650_v6 }
0x10ba   : > { %v3771_v8 = vpop.f32.mrf.mxu0 }
0x10bb   : > { %12223 = vrsqrt.f32 %v3777_v7  ;;  %v3772_v9 = vadd.f32 1e-06, %v3771_v8 }
0x10bc   : > { %v10653_v10 = vpop.f32.mrf.mxu0 }
0x10bd   : > { %12225 = vrsqrt.f32 %v3772_v9  ;;  %v3787_v11 = vadd.f32 1e-06, %v10653_v10 }
0x10be   : > { %v3781_v12 = vpop.f32.mrf.mxu0 }
0x10bf   : > { %12227 = vrsqrt.f32 %v3787_v11  ;;  %v3782_v13 = vadd.f32 1e-06, %v3781_v12  ;;  %v9166_v12 = vld [vmem:[%s15108_s0 + $0x40] sm:$0xff] }
0x10c1   : > { %12229 = vrsqrt.f32 %v3782_v13  ;;  %v3850_v13 = vld [vmem:[%s15108_s0] sm:$0xff] }
0x10c8   : > { %v12224_v15 = vpop.eup %12223 }
0x10c9   : > { %v3795_v17 = vmul.f32 %v12224_v15, %v13860_v35 }
0x10ca   : > { %v12226_v19 = vpop.eup %12225 }
0x10cb   : > { %v3803_v20 = vmul.f32 %v3801_v59, %v3795_v17  ;;  %v3794_v21 = vmul.f32 %v12226_v19, %v13862_v37 }
0x10cc   : > { %v12228_v22 = vpop.eup %12227 }
0x10cd   : > { %v3811_v23 = vadd.f32 %v3809_v18, %v3803_v20  ;;  %v3802_v24 = vmul.f32 %v3801_v59, %v3794_v21  ;;  %v3797_v25 = vmul.f32 %v12228_v22, %v13868_v41 }
0x10ce   : > { %v12230_v26 = vpop.eup %12229 }
0x10cf   : > { %v3810_v27 = vadd.f32 %v3809_v18, %v3802_v24  ;;  %v3805_v28 = vmul.f32 %v3801_v59, %v3797_v25  ;;  %v3796_v29 = vmul.f32 %v12230_v26, %v13870_v43  ;;  %v3819_v30 = vmul.f32 0.044715, %v3811_v23  ;;  %v3851_v24 = vld [vmem:[%s15108_s0 + $0x8] sm:$0xff]  ;;  %v9168_v25 = vld [vmem:[%s15108_s0 + $0x50] sm:$0xff] }
0x10d0   : > { %v3815_v61 = vmul.f32 0.5, %v3811_v23  ;;  %v3852_v26 = vld [vmem:[%s15108_s0 + $0x10] sm:$0xff] }
0x10d1   : > { %v3813_v31 = vadd.f32 %v3809_v18, %v3805_v28  ;;  %v3804_v32 = vmul.f32 %v3801_v59, %v3796_v29  ;;  %v3818_v33 = vmul.f32 0.044715, %v3810_v27  ;;  %v3823_v34 = vmul.f32 %v3819_v30, %v3811_v23  ;;  %v9169_v28 = vld [vmem:[%s15108_s0 + $0x58] sm:$0xff]  ;;  %v9170_v30 = vld [vmem:[%s15108_s0 + $0x60] sm:$0xff] }
0x10d2   : > { %v3814_v57 = vmul.f32 0.5, %v3810_v27  ;;  %v3853_v29 = vld [vmem:[%s15108_s0 + $0x18] sm:$0xff] }
0x10d3   : > { %v3812_v4 = vadd.f32 %v3809_v18, %v3804_v32  ;;  %v3822_v35 = vmul.f32 %v3818_v33, %v3810_v27  ;;  %v3821_v36 = vmul.f32 0.044715, %v3813_v31  ;;  %v3827_v38 = vmul.f32 %v3823_v34, %v3811_v23  ;;  %v4350_v32 = vld [vmem:[#allocation25 + $0x70] sm:$0xff]  ;;  %v9171_v33 = vld [vmem:[%s15108_s0 + $0x68] sm:$0xff] }
0x10d4   : > { %v3817_v9 = vmul.f32 0.5, %v3813_v31  ;;  %v3855_v34 = vld [vmem:[%s15108_s0 + $0x28] sm:$0xff] }
0x10d5   : > { %v3826_v37 = vmul.f32 %v3822_v35, %v3810_v27  ;;  %v3820_v39 = vmul.f32 0.044715, %v3812_v4  ;;  %v3825_v40 = vmul.f32 %v3821_v36, %v3813_v31  ;;  %v3831_v42 = vadd.f32 %v3827_v38, %v3811_v23  ;;  %v9167_v23 = vld [vmem:[%s15108_s0 + $0x48] sm:$0xff]  ;;  %v3856_v35 = vld [vmem:[%s15108_s0 + $0x30] sm:$0xff]  ;;  %v9173_v38 = vld [vmem:[%s15108_s0 + $0x78] sm:$0xff] }
0x10d6   : > { %v3816_v7 = vmul.f32 0.5, %v3812_v4  ;;  %v4349_v36 = vld [vmem:[#allocation25 + $0x68] sm:$0xff] }
0x10d7   : > { %v3830_v44 = vadd.f32 %v3826_v37, %v3810_v27  ;;  %v3824_v41 = vmul.f32 %v3820_v39, %v3812_v4  ;;  %v3829_v45 = vmul.f32 %v3825_v40, %v3813_v31  ;;  %v3835_v0 = vmul.f32 0.7978846, %v3831_v42  ;;  %v4351_v27 = vld [vmem:[#allocation25 + $0x78] sm:$0xff]  ;;  %v4348_v39 = vld [vmem:[#allocation25 + $0x60] sm:$0xff]  ;;  %v4346_v42 = vld [vmem:[#allocation25 + $0x50] sm:$0xff] }
0x10d8   : > { %v3857_v37 = vld [vmem:[%s15108_s0 + $0x38] sm:$0xff] }
0x10d9   : > { %v3834_v49 = vmul.f32 0.7978846, %v3830_v44  ;;  %v3828_v50 = vmul.f32 %v3824_v41, %v3812_v4  ;;  %v3833_v43 = vadd.f32 %v3829_v45, %v3813_v31  ;;  %12231 = vtanh.f32 %v3835_v0  ;;  %v3854_v31 = vld [vmem:[%s15108_s0 + $0x20] sm:$0xff]  ;;  %v4347_v40 = vld [vmem:[#allocation25 + $0x58] sm:$0xff]  ;;  %v4345_v44 = vld [vmem:[#allocation25 + $0x48] sm:$0xff] }
0x10da   : > { %v4344_v41 = vld [vmem:[#allocation25 + $0x40] sm:$0xff]  ;;  %v4343_v45 = vld [vmem:[#allocation25 + $0x38] sm:$0xff]  ;;  %v4342_v0 = vld [vmem:[#allocation25 + $0x30] sm:$0xff] }
0x10db   : > { %12233 = vtanh.f32 %v3834_v49  ;;  %v3832_v51 = vadd.f32 %v3828_v50, %v3812_v4  ;;  %v3837_v52 = vmul.f32 0.7978846, %v3833_v43  ;;  %v9172_v4 = vld [vmem:[%s15108_s0 + $0x70] sm:$0xff]  ;;  %v4341_v49 = vld [vmem:[#allocation25 + $0x28] sm:$0xff]  ;;  %v4340_v50 = vld [vmem:[#allocation25 + $0x20] sm:$0xff] }
0x10dc   : > { %v13932_v43 = vld [vmem:[#allocation25 + $0x18] sm:$0xff] }
0x10dd   : > { %v3836_v53 = vmul.f32 0.7978846, %v3832_v51  ;;  %12235 = vtanh.f32 %v3837_v52  ;;  %v13937_v51 = vld [vmem:[#allocation25 + $0x10] sm:$0xff]  ;;  %v13943_v52 = vld [vmem:[#allocation25 + $0x8] sm:$0xff] }
0x10df   : > { %12237 = vtanh.f32 %v3836_v53  ;;  %v13949_v53 = vld [vmem:[#allocation25] sm:$0xff] }
0x10e6   : > { %v12232_v54 = vpop.eup %12231 }
0x10e7   : > { %v3843_v56 = vadd.f32 1.0, %v12232_v54  ;;  %v13956_v54 = vld [vmem:[#allocation31] sm:$0xff] }
0x10e8   : > { %v12234_v55 = vpop.eup %12233 }
0x10e9   : > { %v3842_v58 = vadd.f32 1.0, %v12234_v55  ;;  %v3847_v5 = vmul.f32 %v3843_v56, %v3815_v61 }
0x10ea   : > { %v12236_v60 = vpop.eup %12235 }
0x10eb   : > { %v3846_v63 = vmul.f32 %v3842_v58, %v3814_v57  ;;  %v3845_v6 = vadd.f32 1.0, %v12236_v60  ;;  %v4327_v57 = vrot.slane %v13956_v54, %v13779_v3 }
0x10ec   : > { %v12238_v1 = vpop.eup %12237 }
0x10ed   : > { %10670 = vmatprep.mubr.msk.f32.mxu1 %vm2793_vm6, %v3846_v63  ;;  %10692 = vmatprep.mubr.msk.f32.mxu0 %vm2793_vm6, %v3846_v63  ;;  %v3844_v8 = vadd.f32 1.0, %v12238_v1  ;;  %v3849_v11 = vmul.f32 %v3845_v6, %v3817_v9 }
0x10ee   : > { %10671 = vmatmul.mubr.msk.f32.vlgmr.msra.gmra.mxu1 %vm2793_vm6, %v3847_v5  ;;  %10693 = vmatmul.mubr.msk.f32.vlgmr.msra.gmra.mxu0 %vm2793_vm6, %v3847_v5 }
0x10ef   : > { %v3848_v10 = vmul.f32 %v3844_v8, %v3816_v7 }
0x10f1   : > { %10673 = vmatprep.mubr.msk.f32.mxu1 %vm2793_vm6, %v3848_v10  ;;  %10695 = vmatprep.mubr.msk.f32.mxu0 %vm2793_vm6, %v3848_v10 }
0x10f2   : > { %10674 = vmatmul.mubr.msk.f32.gmra.mxu1 %vm2793_vm6, %v3849_v11  ;;  %10696 = vmatmul.mubr.msk.f32.gmra.mxu0 %vm2793_vm6, %v3849_v11 }
0x10f3   : > { %10706 = vmatprep.mubr.msk.f32.mxu1 %vm1238_vm1, %v9166_v12  ;;  %10726 = vmatprep.mubr.msk.f32.mxu0 %vm1238_vm1, %v3850_v13 }
0x11ae   : > { %v10672_v59 = vpop.f32.mrf.mxu1  ;;  %v10694_v15 = vpop.f32.mrf.mxu0 }
0x11b0   : > { %v3944_v17 = vpop.f32.mrf.mxu1  ;;  %v4047_v18 = vpop.f32.mrf.mxu0 }
0x11b2   : > { %v10675_v19 = vpop.f32.mrf.mxu1  ;;  %v10697_v20 = vpop.f32.mrf.mxu0 }
0x11b3   : > { %10698 = vmatprep.subr.mxu1 %v10697_v20  ;;  %10718 = vmatprep.subr.mxu0 %v10675_v19 }
0x11b4   : > { %v3954_v21 = vpop.f32.mrf.mxu1  ;;  %v4057_v22 = vpop.f32.mrf.mxu0  ;;  %10699 = vmatpush3.msra.mxu1 %v10697_v20  ;;  %10719 = vmatpush3.msra.mxu0 %v10675_v19 }
0x11b5   : > { %10700 = vmatprep.subr.mxu1 %v4057_v22  ;;  %10720 = vmatprep.subr.mxu0 %v3954_v21 }
0x11b6   : > { %10701 = vmatpush3.msra.mxu1 %v4057_v22  ;;  %10721 = vmatpush3.msra.mxu0 %v3954_v21 }
0x11b7   : > { %10702 = vmatprep.subr.mxu1 %v10694_v15  ;;  %10722 = vmatprep.subr.mxu0 %v10672_v59 }
0x11b8   : > { %10703 = vmatpush3.msra.mxu1 %v10694_v15  ;;  %10723 = vmatpush3.msra.mxu0 %v10672_v59 }
0x11b9   : > { %10704 = vmatprep.subr.mxu1 %v4047_v18  ;;  %10724 = vmatprep.subr.mxu0 %v3944_v17 }
0x11ba   : > { %10705 = vmatpush3.msra.mxu1 %v4047_v18  ;;  %10725 = vmatpush3.msra.mxu0 %v3944_v17 }
0x11bb   : > { %10707 = vmatmul.mubr.msk.f32.vlgmr.msra.gmra.mxu1 %vm1238_vm1, %v9167_v23  ;;  %10727 = vmatmul.mubr.msk.f32.vlgmr.msra.gmra.mxu0 %vm1238_vm1, %v3851_v24 }
0x11bc   : > { %10709 = vmatprep.mubr.msk.f32.mxu1 %vm1238_vm1, %v9168_v25  ;;  %10729 = vmatprep.mubr.msk.f32.mxu0 %vm1238_vm1, %v3852_v26 }
0x11bd   : > { %10738 = vmatprep.subr.mxu1 %v4351_v27  ;;  %10782 = vmatprep.subr.mxu0 %v4351_v27 }
0x11be   : > { %10739 = vmatpush3.msra.mxu1 %v4351_v27  ;;  %10783 = vmatpush3.msra.mxu0 %v4351_v27 }
0x11bf   : > { %10710 = vmatmul.mubr.msk.f32.gmra.mxu1 %vm1238_vm1, %v9169_v28  ;;  %10730 = vmatmul.mubr.msk.f32.gmra.mxu0 %vm1238_vm1, %v3853_v29 }
0x11c0   : > { %10712 = vmatprep.mubr.msk.f32.mxu1 %vm1238_vm1, %v9170_v30  ;;  %10732 = vmatprep.mubr.msk.f32.mxu0 %vm1238_vm1, %v3854_v31 }
0x11c1   : > { %10740 = vmatprep.subr.mxu1 %v4350_v32  ;;  %10784 = vmatprep.subr.mxu0 %v4350_v32 }
0x11c2   : > { %10741 = vmatpush3.msra.mxu1 %v4350_v32  ;;  %10785 = vmatpush3.msra.mxu0 %v4350_v32 }
0x11c3   : > { %10713 = vmatmul.mubr.msk.f32.gmra.mxu1 %vm1238_vm1, %v9171_v33  ;;  %10733 = vmatmul.mubr.msk.f32.gmra.mxu0 %vm1238_vm1, %v3855_v34 }
0x11c4   : > { %10715 = vmatprep.mubr.msk.f32.mxu1 %vm1238_vm1, %v9172_v4  ;;  %10735 = vmatprep.mubr.msk.f32.mxu0 %vm1238_vm1, %v3856_v35 }
0x11c5   : > { %10742 = vmatprep.subr.mxu1 %v4349_v36  ;;  %10786 = vmatprep.subr.mxu0 %v4349_v36 }
0x11c6   : > { %10743 = vmatpush3.msra.mxu1 %v4349_v36  ;;  %10787 = vmatpush3.msra.mxu0 %v4349_v36 }
0x11c7   : > { %10716 = vmatmul.mubr.msk.f32.gmra.mxu1 %vm1238_vm1, %v9173_v38  ;;  %10736 = vmatmul.mubr.msk.f32.gmra.mxu0 %vm1238_vm1, %v3857_v37 }
0x11c8   : > { %10744 = vmatprep.subr.mxu1 %v4348_v39  ;;  %10788 = vmatprep.subr.mxu0 %v4348_v39 }
0x11c9   : > { %10745 = vmatpush3.msra.mxu1 %v4348_v39  ;;  %10789 = vmatpush3.msra.mxu0 %v4348_v39 }
0x11ca   : > { %10746 = vmatprep.subr.mxu1 %v4347_v40  ;;  %10790 = vmatprep.subr.mxu0 %v4347_v40 }
0x11cb   : > { %10747 = vmatpush3.msra.mxu1 %v4347_v40  ;;  %10791 = vmatpush3.msra.mxu0 %v4347_v40 }
0x11cc   : > { %10748 = vmatprep.subr.mxu1 %v4346_v42  ;;  %10792 = vmatprep.subr.mxu0 %v4346_v42 }
0x11cd   : > { %10749 = vmatpush3.msra.mxu1 %v4346_v42  ;;  %10793 = vmatpush3.msra.mxu0 %v4346_v42 }
0x11ce   : > { %10750 = vmatprep.subr.mxu1 %v4345_v44  ;;  %10794 = vmatprep.subr.mxu0 %v4345_v44 }
0x11cf   : > { %10751 = vmatpush3.msra.mxu1 %v4345_v44  ;;  %10795 = vmatpush3.msra.mxu0 %v4345_v44 }
0x11d0   : > { %10752 = vmatprep.subr.mxu1 %v4344_v41  ;;  %10796 = vmatprep.subr.mxu0 %v4344_v41 }
0x11d1   : > { %10753 = vmatpush3.msra.mxu1 %v4344_v41  ;;  %10797 = vmatpush3.msra.mxu0 %v4344_v41 }
0x11d2   : > { %10754 = vmatprep.subr.mxu1 %v4343_v45  ;;  %10798 = vmatprep.subr.mxu0 %v4343_v45 }
0x11d3   : > { %10755 = vmatpush3.msra.mxu1 %v4343_v45  ;;  %10799 = vmatpush3.msra.mxu0 %v4343_v45 }
0x11d4   : > { %10756 = vmatprep.subr.mxu1 %v4342_v0  ;;  %10800 = vmatprep.subr.mxu0 %v4342_v0 }
0x11d5   : > { %10757 = vmatpush3.msra.mxu1 %v4342_v0  ;;  %10801 = vmatpush3.msra.mxu0 %v4342_v0 }
0x11d6   : > { %10758 = vmatprep.subr.mxu1 %v4341_v49  ;;  %10802 = vmatprep.subr.mxu0 %v4341_v49 }
0x11d7   : > { %10759 = vmatpush3.msra.mxu1 %v4341_v49  ;;  %10803 = vmatpush3.msra.mxu0 %v4341_v49 }
0x11d8   : > { %10760 = vmatprep.subr.mxu1 %v4340_v50  ;;  %10804 = vmatprep.subr.mxu0 %v4340_v50 }
0x11d9   : > { %10761 = vmatpush3.msra.mxu1 %v4340_v50  ;;  %10805 = vmatpush3.msra.mxu0 %v4340_v50 }
0x11da   : > { %10762 = vmatprep.subr.mxu1 %v13932_v43  ;;  %10806 = vmatprep.subr.mxu0 %v13932_v43 }
0x11db   : > { %10763 = vmatpush3.msra.mxu1 %v13932_v43  ;;  %10807 = vmatpush3.msra.mxu0 %v13932_v43 }
0x11dc   : > { %10764 = vmatprep.subr.mxu1 %v13937_v51  ;;  %10808 = vmatprep.subr.mxu0 %v13937_v51 }
0x11dd   : > { %10765 = vmatpush3.msra.mxu1 %v13937_v51  ;;  %10809 = vmatpush3.msra.mxu0 %v13937_v51 }
0x11de   : > { %10766 = vmatprep.subr.mxu1 %v13943_v52  ;;  %10810 = vmatprep.subr.mxu0 %v13943_v52 }
0x11df   : > { %10767 = vmatpush3.msra.mxu1 %v13943_v52  ;;  %10811 = vmatpush3.msra.mxu0 %v13943_v52 }
0x11e0   : > { %10768 = vmatprep.subr.mxu1 %v13949_v53  ;;  %10812 = vmatprep.subr.mxu0 %v13949_v53 }
0x11e1   : > { %10769 = vmatpush3.msra.mxu1 %v13949_v53  ;;  %10813 = vmatpush3.msra.mxu0 %v13949_v53 }
0x127b   : > { %v10708_v55 = vpop.f32.mrf.mxu1  ;;  %v10728_v56 = vpop.f32.mrf.mxu0 }
0x127c   : > { %v4291_v58 = vadd.f32 %v10728_v56, %v10708_v55 }
0x127d   : > { %v4156_v60 = vpop.f32.mrf.mxu1  ;;  %v4285_v61 = vpop.f32.mrf.mxu0 }
0x127e   : > { %v4286_v63 = vadd.f32 %v4285_v61, %v4156_v60  ;;  %v4329_v7 = vadd.f32 %v4327_v57, %v4291_v58 }
0x127f   : > { %v10711_v1 = vpop.f32.mrf.mxu1  ;;  %v10731_v5 = vpop.f32.mrf.mxu0 }
0x1280   : > { %v4328_v6 = vadd.f32 %v4327_v57, %v4286_v63  ;;  %v4301_v8 = vadd.f32 %v10731_v5, %v10711_v1  ;;  %v4705_v63 = vld [vmem:[#allocation28 + $0x78] sm:$0xff]  ;;  %v4704_v5 = vld [vmem:[#allocation28 + $0x70] sm:$0xff] }
0x1281   : > { %v4166_v9 = vpop.f32.mrf.mxu1  ;;  %v4295_v10 = vpop.f32.mrf.mxu0  ;;  %v4835_v1 = vld [vmem:[#allocation28 + $0xf8] sm:$0xff]  ;;  %10826 = vmatprep.subr.mxu1 %v4705_v63 }
0x1282   : > { %v4296_v11 = vadd.f32 %v4295_v10, %v4166_v9  ;;  %10770 = vmatprep.mubr.f32.mxu1 %v4328_v6  ;;  %v4331_v15 = vadd.f32 %v4327_v57, %v4301_v8  ;;  %10870 = vmatprep.subr.mxu0 %v4835_v1  ;;  %v4833_v8 = vld [vmem:[#allocation28 + $0xe8] sm:$0xff]  ;;  %v4702_v9 = vld [vmem:[#allocation28 + $0x60] sm:$0xff] }
0x1283   : > { %v10714_v12 = vpop.f32.mrf.mxu1  ;;  %v10734_v13 = vpop.f32.mrf.mxu0  ;;  %10771 = vmatmul.mubr.f32.vlgmr.msra.gmra.mxu1 %v4329_v7  ;;  %v4832_v10 = vld [vmem:[#allocation28 + $0xe0] sm:$0xff] }
0x1284   : > { %v4330_v59 = vadd.f32 %v4327_v57, %v4296_v11  ;;  %v4311_v17 = vadd.f32 %v10734_v13, %v10714_v12  ;;  %10827 = vmatpush3.msra.mxu1 %v4705_v63  ;;  %v4701_v11 = vld [vmem:[#allocation28 + $0x58] sm:$0xff]  ;;  %v4700_v13 = vld [vmem:[#allocation28 + $0x50] sm:$0xff] }
0x1285   : > { %v4176_v18 = vpop.f32.mrf.mxu1  ;;  %v4305_v19 = vpop.f32.mrf.mxu0  ;;  %10828 = vmatprep.subr.mxu1 %v4704_v5  ;;  %v4831_v12 = vld [vmem:[#allocation28 + $0xd8] sm:$0xff] }
0x1286   : > { %v4306_v20 = vadd.f32 %v4305_v19, %v4176_v18  ;;  %10773 = vmatprep.mubr.f32.mxu1 %v4330_v59  ;;  %v4333_v24 = vadd.f32 %v4327_v57, %v4311_v17  ;;  %10829 = vmatpush3.msra.mxu1 %v4704_v5  ;;  %v4829_v17 = vld [vmem:[#allocation28 + $0xc8] sm:$0xff]  ;;  %v4698_v18 = vld [vmem:[#allocation28 + $0x40] sm:$0xff] }
0x1287   : > { %v10717_v21 = vpop.f32.mrf.mxu1  ;;  %v10737_v22 = vpop.f32.mrf.mxu0  ;;  %10774 = vmatmul.mubr.f32.gmra.mxu1 %v4331_v15  ;;  %v4828_v19 = vld [vmem:[#allocation28 + $0xc0] sm:$0xff] }
0x1288   : > { %v4332_v23 = vadd.f32 %v4327_v57, %v4306_v20  ;;  %v4321_v25 = vadd.f32 %v10737_v22, %v10717_v21  ;;  %v4697_v20 = vld [vmem:[#allocation28 + $0x38] sm:$0xff]  ;;  %v4696_v22 = vld [vmem:[#allocation28 + $0x30] sm:$0xff] }
0x1289   : > { %v4186_v26 = vpop.f32.mrf.mxu1  ;;  %v4315_v27 = vpop.f32.mrf.mxu0  ;;  %v4827_v21 = vld [vmem:[#allocation28 + $0xb8] sm:$0xff] }
0x128a   : > { %v4316_v28 = vadd.f32 %v4315_v27, %v4186_v26  ;;  %10776 = vmatprep.mubr.f32.mxu1 %v4332_v23  ;;  %v4335_v30 = vadd.f32 %v4327_v57, %v4321_v25  ;;  %v4825_v25 = vld [vmem:[#allocation28 + $0xa8] sm:$0xff]  ;;  %v4694_v26 = vld [vmem:[#allocation28 + $0x20] sm:$0xff] }
0x128b   : > { %10777 = vmatmul.mubr.f32.gmra.mxu1 %v4333_v24  ;;  %v4824_v27 = vld [vmem:[#allocation28 + $0xa0] sm:$0xff] }
0x128c   : > { %v4334_v29 = vadd.f32 %v4327_v57, %v4316_v28  ;;  %v4693_v28 = vld [vmem:[#allocation28 + $0x18] sm:$0xff] }
0x128e   : > { %10779 = vmatprep.mubr.f32.mxu1 %v4334_v29 }
0x128f   : > { %10780 = vmatmul.mubr.f32.gmra.mxu1 %v4335_v30 }
0x1343   : > { %v10772_v31 = vpop.f32.mrf.mxu1 }
0x1344   : > { %v13960_v32 = vsub.f32 %v4329_v7, %v10772_v31  ;;  %v4703_v7 = vld [vmem:[#allocation28 + $0x68] sm:$0xff]  ;;  %v4822_v31 = vld [vmem:[#allocation28 + $0x90] sm:$0xff] }
0x1345   : > { %v4418_v33 = vpop.f32.mrf.mxu1  ;;  %10830 = vmatprep.subr.mxu1 %v4703_v7 }
0x1346   : > { %v13962_v34 = vsub.f32 %v4328_v6, %v4418_v33  ;;  %v4466_v36 = vmul.f32 %v13960_v32, %v13960_v32  ;;  %v4834_v6 = vld [vmem:[#allocation28 + $0xf0] sm:$0xff]  ;;  %10831 = vmatpush3.msra.mxu1 %v4703_v7  ;;  %v4691_v33 = vld [vmem:[#allocation28 + $0x8] sm:$0xff]  ;;  %v4597_v7 = vrot.slane %v13956_v54, %v13806_v47 }
0x1347   : > { %v10775_v4 = vpop.f32.mrf.mxu1  ;;  %10832 = vmatprep.subr.mxu1 %v4702_v9 }
0x1348   : > { %v4465_v35 = vmul.f32 %v13962_v34, %v13962_v34  ;;  %v13968_v38 = vsub.f32 %v4331_v15, %v10775_v4  ;;  %10833 = vmatpush3.msra.mxu1 %v4702_v9  ;;  %v4699_v15 = vld [vmem:[#allocation28 + $0x48] sm:$0xff] }
0x1349   : > { %v4428_v37 = vpop.f32.mrf.mxu1  ;;  %10834 = vmatprep.subr.mxu1 %v4701_v11  ;;  %v4821_v4 = vld [vmem:[#allocation28 + $0x88] sm:$0xff] }
0x134a   : > { %v13970_v39 = vsub.f32 %v4330_v59, %v4428_v37  ;;  %10814 = vmatprep.mubr.f32.mxu0 %v4465_v35  ;;  %v4468_v44 = vmul.f32 %v13968_v38, %v13968_v38  ;;  %10835 = vmatpush3.msra.mxu1 %v4701_v11  ;;  %v4830_v59 = vld [vmem:[#allocation28 + $0xd0] sm:$0xff]  ;;  %v4690_v35 = vld [vmem:[#allocation28] sm:$0xff] }
0x134b   : > { %v10778_v40 = vpop.f32.mrf.mxu1  ;;  %10815 = vmatmul.mubr.f32.vlgmr.msra.gmra.mxu0 %v4466_v36  ;;  %10836 = vmatprep.subr.mxu1 %v4700_v13  ;;  %v4820_v36 = vld [vmem:[#allocation28 + $0x80] sm:$0xff] }
0x134c   : > { %v4467_v42 = vmul.f32 %v13970_v39, %v13970_v39  ;;  %v13976_v41 = vsub.f32 %v4333_v24, %v10778_v40  ;;  %10871 = vmatpush3.msra.mxu0 %v4835_v1  ;;  %10837 = vmatpush3.msra.mxu1 %v4700_v13  ;;  %v4695_v24 = vld [vmem:[#allocation28 + $0x28] sm:$0xff] }
0x134d   : > { %v4438_v45 = vpop.f32.mrf.mxu1  ;;  %10872 = vmatprep.subr.mxu0 %v4834_v6  ;;  %10838 = vmatprep.subr.mxu1 %v4699_v15 }
0x134e   : > { %v13978_v0 = vsub.f32 %v4332_v23, %v4438_v45  ;;  %10817 = vmatprep.mubr.f32.mxu0 %v4467_v42  ;;  %v4470_v55 = vmul.f32 %v13976_v41, %v13976_v41  ;;  %10873 = vmatpush3.msra.mxu0 %v4834_v6  ;;  %v4826_v23 = vld [vmem:[#allocation28 + $0xb0] sm:$0xff] }
0x134f   : > { %v10781_v49 = vpop.f32.mrf.mxu1  ;;  %10818 = vmatmul.mubr.f32.gmra.mxu0 %v4468_v44  ;;  %10874 = vmatprep.subr.mxu0 %v4833_v8 }
0x1350   : > { %v4469_v50 = vmul.f32 %v13978_v0, %v13978_v0  ;;  %v13984_v56 = vsub.f32 %v4335_v30, %v10781_v49  ;;  %10875 = vmatpush3.msra.mxu0 %v4833_v8  ;;  %10839 = vmatpush3.msra.mxu1 %v4699_v15  ;;  %v4692_v30 = vld [vmem:[#allocation28 + $0x10] sm:$0xff] }
0x1351   : > { %v4448_v57 = vpop.f32.mrf.mxu1  ;;  %10876 = vmatprep.subr.mxu0 %v4832_v10  ;;  %10840 = vmatprep.subr.mxu1 %v4698_v18 }
0x1352   : > { %v13986_v58 = vsub.f32 %v4334_v29, %v4448_v57  ;;  %10820 = vmatprep.mubr.f32.mxu0 %v4469_v50  ;;  %v4472_v61 = vmul.f32 %v13984_v56, %v13984_v56  ;;  %10877 = vmatpush3.msra.mxu0 %v4832_v10  ;;  %v4823_v29 = vld [vmem:[#allocation28 + $0x98] sm:$0xff]  ;;  %v4609_v10 = vrot.slane %v13956_v54, %v13809_v48 }
0x1353   : > { %10821 = vmatmul.mubr.f32.gmra.mxu0 %v4470_v55  ;;  %10878 = vmatprep.subr.mxu0 %v4831_v12 }
0x1354   : > { %v4471_v60 = vmul.f32 %v13986_v58, %v13986_v58  ;;  %10879 = vmatpush3.msra.mxu0 %v4831_v12  ;;  %10841 = vmatpush3.msra.mxu1 %v4698_v18 }
0x1355   : > { %10880 = vmatprep.subr.mxu0 %v4830_v59  ;;  %10842 = vmatprep.subr.mxu1 %v4697_v20 }
0x1356   : > { %10823 = vmatprep.mubr.f32.mxu0 %v4471_v60  ;;  %10881 = vmatpush3.msra.mxu0 %v4830_v59 }
0x1357   : > { %10824 = vmatmul.mubr.f32.gmra.mxu0 %v4472_v61  ;;  %10882 = vmatprep.subr.mxu0 %v4829_v17 }
0x1358   : > { %10883 = vmatpush3.msra.mxu0 %v4829_v17  ;;  %10843 = vmatpush3.msra.mxu1 %v4697_v20 }
0x1359   : > { %10884 = vmatprep.subr.mxu0 %v4828_v19  ;;  %10844 = vmatprep.subr.mxu1 %v4696_v22 }
0x135a   : > { %10885 = vmatpush3.msra.mxu0 %v4828_v19  ;;  %10845 = vmatpush3.msra.mxu1 %v4696_v22 }
0x135b   : > { %10886 = vmatprep.subr.mxu0 %v4827_v21  ;;  %10846 = vmatprep.subr.mxu1 %v4695_v24 }
0x135c   : > { %10887 = vmatpush3.msra.mxu0 %v4827_v21  ;;  %10847 = vmatpush3.msra.mxu1 %v4695_v24 }
0x135d   : > { %10888 = vmatprep.subr.mxu0 %v4826_v23  ;;  %10848 = vmatprep.subr.mxu1 %v4694_v26 }
0x135e   : > { %10889 = vmatpush3.msra.mxu0 %v4826_v23  ;;  %10849 = vmatpush3.msra.mxu1 %v4694_v26 }
0x135f   : > { %10890 = vmatprep.subr.mxu0 %v4825_v25  ;;  %10850 = vmatprep.subr.mxu1 %v4693_v28 }
0x1360   : > { %10891 = vmatpush3.msra.mxu0 %v4825_v25  ;;  %10851 = vmatpush3.msra.mxu1 %v4693_v28 }
0x1361   : > { %10892 = vmatprep.subr.mxu0 %v4824_v27  ;;  %10852 = vmatprep.subr.mxu1 %v4692_v30 }
0x1362   : > { %10893 = vmatpush3.msra.mxu0 %v4824_v27  ;;  %10853 = vmatpush3.msra.mxu1 %v4692_v30 }
0x1363   : > { %10894 = vmatprep.subr.mxu0 %v4823_v29  ;;  %10854 = vmatprep.subr.mxu1 %v4691_v33 }
0x1364   : > { %10895 = vmatpush3.msra.mxu0 %v4823_v29  ;;  %10855 = vmatpush3.msra.mxu1 %v4691_v33 }
0x1365   : > { %10896 = vmatprep.subr.mxu0 %v4822_v31  ;;  %10856 = vmatprep.subr.mxu1 %v4690_v35 }
0x1366   : > { %10897 = vmatpush3.msra.mxu0 %v4822_v31  ;;  %10857 = vmatpush3.msra.mxu1 %v4690_v35 }
0x1367   : > { %10898 = vmatprep.subr.mxu0 %v4821_v4 }
0x1368   : > { %10899 = vmatpush3.msra.mxu0 %v4821_v4 }
0x1369   : > { %10900 = vmatprep.subr.mxu0 %v4820_v36 }
0x136a   : > { %10901 = vmatpush3.msra.mxu0 %v4820_v36 }
0x140b   : > { %v10816_v37 = vpop.f32.mrf.mxu0 }
0x140c   : > { %v4545_v40 = vadd.f32 1e-06, %v10816_v37 }
0x140d   : > { %v4539_v42 = vpop.f32.mrf.mxu0 }
0x140e   : > { %12239 = vrsqrt.f32 %v4545_v40  ;;  %v4540_v44 = vadd.f32 1e-06, %v4539_v42 }
0x140f   : > { %v10819_v45 = vpop.f32.mrf.mxu0 }
0x1410   : > { %12241 = vrsqrt.f32 %v4540_v44  ;;  %v4555_v49 = vadd.f32 1e-06, %v10819_v45 }
0x1411   : > { %v4549_v50 = vpop.f32.mrf.mxu0 }
0x1412   : > { %12243 = vrsqrt.f32 %v4555_v49  ;;  %v4550_v55 = vadd.f32 1e-06, %v4549_v50 }
0x1413   : > { %v10822_v57 = vpop.f32.mrf.mxu0 }
0x1414   : > { %12245 = vrsqrt.f32 %v4550_v55  ;;  %v4565_v60 = vadd.f32 1e-06, %v10822_v57 }
0x1415   : > { %v4559_v61 = vpop.f32.mrf.mxu0 }
0x1416   : > { %12247 = vrsqrt.f32 %v4565_v60  ;;  %v4560_v63 = vadd.f32 1e-06, %v4559_v61 }
0x1417   : > { %v10825_v1 = vpop.f32.mrf.mxu0 }
0x1418   : > { %12249 = vrsqrt.f32 %v4560_v63  ;;  %v4575_v5 = vadd.f32 1e-06, %v10825_v1 }
0x1419   : > { %v4569_v6 = vpop.f32.mrf.mxu0 }
0x141a   : > { %12251 = vrsqrt.f32 %v4575_v5  ;;  %v4570_v8 = vadd.f32 1e-06, %v4569_v6 }
0x141b   : > { %v12240_v9 = vpop.eup %12239 }
0x141c   : > { %v4587_v11 = vmul.f32 %v12240_v9, %v13960_v32  ;;  %12253 = vrsqrt.f32 %v4570_v8 }
0x141d   : > { %v12242_v12 = vpop.eup %12241 }
0x141e   : > { %v4599_v13 = vmul.f32 %v4597_v7, %v4587_v11  ;;  %v4586_v59 = vmul.f32 %v12242_v12, %v13962_v34 }
0x141f   : > { %v12244_v15 = vpop.eup %12243 }
0x1420   : > { %v13998_v17 = vadd.f32 %v4609_v10, %v4599_v13  ;;  %v4598_v18 = vmul.f32 %v4597_v7, %v4586_v59  ;;  %v4589_v19 = vmul.f32 %v12244_v15, %v13968_v38 }
0x1421   : > { %v12246_v20 = vpop.eup %12245 }
0x1422   : > { %v4601_v21 = vmul.f32 %v4597_v7, %v4589_v19  ;;  %v4588_v22 = vmul.f32 %v12246_v20, %v13970_v39  ;;  %v14002_v23 = vadd.f32 %v4609_v10, %v4598_v18  ;;  %v4627_v32 = vmul.f32 0.044715, %v13998_v17 }
0x1423   : > { %v12248_v54 = vpop.eup %12247 }
0x1424   : > { %v4600_v24 = vmul.f32 %v4597_v7, %v4588_v22  ;;  %v4591_v25 = vmul.f32 %v12248_v54, %v13976_v41  ;;  %v4626_v34 = vmul.f32 0.044715, %v14002_v23  ;;  %v4635_v27 = vmul.f32 %v4627_v32, %v13998_v17 }
0x1425   : > { %v12250_v26 = vpop.eup %12249  ;;  %v14008_v28 = vadd.f32 %v4609_v10, %v4601_v21 }
0x1426   : > { %v4603_v38 = vmul.f32 %v4597_v7, %v4591_v25  ;;  %v4590_v29 = vmul.f32 %v12250_v26, %v13978_v0  ;;  %v4634_v39 = vmul.f32 %v4626_v34, %v14002_v23  ;;  %v14012_v30 = vadd.f32 %v4609_v10, %v4600_v24 }
0x1427   : > { %v12252_v31 = vpop.eup %12251  ;;  %v4643_v33 = vmul.f32 %v4635_v27, %v13998_v17  ;;  %v4629_v4 = vmul.f32 0.044715, %v14008_v28 }
0x1428   : > { %v4602_v41 = vmul.f32 %v4597_v7, %v4590_v29  ;;  %v4593_v35 = vmul.f32 %v12252_v31, %v13984_v56  ;;  %v4642_v36 = vmul.f32 %v4634_v39, %v14002_v23  ;;  %v4628_v42 = vmul.f32 0.044715, %v14012_v30 }
0x1429   : > { %v12254_v37 = vpop.eup %12253  ;;  %v4651_v40 = vadd.f32 %v4643_v33, %v13998_v17  ;;  %v4637_v0 = vmul.f32 %v4629_v4, %v14008_v28  ;;  %v14021_v44 = vadd.f32 %v4609_v10, %v4603_v38  ;;  %v4618_v4 = vmul.f32 0.5, %v14002_v23 }
0x142a   : > { %v4605_v45 = vmul.f32 %v4597_v7, %v4593_v35  ;;  %v4592_v49 = vmul.f32 %v12254_v37, %v13986_v58  ;;  %v4650_v50 = vadd.f32 %v4642_v36, %v14002_v23  ;;  %v14025_v55 = vadd.f32 %v4609_v10, %v4602_v41 }
0x142b   : > { %v4659_v57 = vmul.f32 0.7978846, %v4651_v40  ;;  %v4636_v56 = vmul.f32 %v4628_v42, %v14012_v30  ;;  %v4645_v60 = vmul.f32 %v4637_v0, %v14008_v28  ;;  %v4631_v58 = vmul.f32 0.044715, %v14021_v44 }
0x142c   : > { %v4604_v61 = vmul.f32 %v4597_v7, %v4592_v49  ;;  %v4658_v63 = vmul.f32 0.7978846, %v4650_v50  ;;  %v4630_v1 = vmul.f32 0.044715, %v14025_v55  ;;  %v14036_v11 = vadd.f32 %v4609_v10, %v4605_v45 }
0x142d   : > { %12255 = vtanh.f32 %v4659_v57  ;;  %v4644_v5 = vmul.f32 %v4636_v56, %v14012_v30  ;;  %v4653_v6 = vadd.f32 %v4645_v60, %v14008_v28  ;;  %v4639_v13 = vmul.f32 %v4631_v58, %v14021_v44 }
0x142e   : > { %12257 = vtanh.f32 %v4658_v63  ;;  %v4638_v8 = vmul.f32 %v4630_v1, %v14025_v55  ;;  %v14034_v9 = vadd.f32 %v4609_v10, %v4604_v61  ;;  %v4633_v20 = vmul.f32 0.044715, %v14036_v11 }
0x142f   : > { %v4652_v12 = vadd.f32 %v4644_v5, %v14012_v30  ;;  %v4661_v7 = vmul.f32 0.7978846, %v4653_v6  ;;  %v4647_v19 = vmul.f32 %v4639_v13, %v14021_v44  ;;  %v4619_v35 = vmul.f32 0.5, %v13998_v17  ;;  %v4811_v13 = vld [vmem:[#allocation27] sm:$0xff] }
0x1430   : > { %v4646_v59 = vmul.f32 %v4638_v8, %v14025_v55  ;;  %v4632_v15 = vmul.f32 0.044715, %v14034_v9  ;;  %v4641_v54 = vmul.f32 %v4633_v20, %v14036_v11  ;;  %v4620_v23 = vmul.f32 0.5, %v14012_v30 }
0x1431   : > { %v4660_v18 = vmul.f32 0.7978846, %v4652_v12  ;;  %12259 = vtanh.f32 %v4661_v7  ;;  %v4655_v22 = vadd.f32 %v4647_v19, %v14021_v44  ;;  %v4621_v17 = vmul.f32 0.5, %v14008_v28 }
0x1432   : > { %v4654_v21 = vadd.f32 %v4646_v59, %v14025_v55  ;;  %v4640_v10 = vmul.f32 %v4632_v15, %v14034_v9  ;;  %v4649_v34 = vmul.f32 %v4641_v54, %v14036_v11  ;;  %v4622_v60 = vmul.f32 0.5, %v14025_v55 }
0x1433   : > { %12261 = vtanh.f32 %v4660_v18  ;;  %v4663_v25 = vmul.f32 0.7978846, %v4655_v22  ;;  %v4623_v28 = vmul.f32 0.5, %v14021_v44  ;;  %v4624_v6 = vmul.f32 0.5, %v14034_v9 }
0x1434   : > { %v4662_v32 = vmul.f32 0.7978846, %v4654_v21  ;;  %v4648_v24 = vmul.f32 %v4640_v10, %v14034_v9  ;;  %v4657_v27 = vadd.f32 %v4649_v34, %v14036_v11  ;;  %v4625_v44 = vmul.f32 0.5, %v14036_v11 }
0x1436   : > { %12263 = vtanh.f32 %v4662_v32  ;;  %v4656_v26 = vadd.f32 %v4648_v24, %v14034_v9  ;;  %v4665_v29 = vmul.f32 0.7978846, %v4657_v27  ;;  %v4942_v9 = vld [vmem:[#allocation27 + $0x40] sm:$0xff] }
0x1437   : > { %12265 = vtanh.f32 %v4663_v25 }
0x1438   : > { %v4664_v38 = vmul.f32 0.7978846, %v4656_v26 }
0x143a   : > { %v12256_v39 = vpop.eup %12255  ;;  %12267 = vtanh.f32 %v4664_v38  ;;  %v4943_v38 = vld [vmem:[#allocation27 + $0x48] sm:$0xff] }
0x143b   : > { %v12258_v31 = vpop.eup %12257  ;;  %v4675_v33 = vadd.f32 1.0, %v12256_v39  ;;  %12269 = vtanh.f32 %v4665_v29  ;;  %v5224_v29 = vld [vmem:[#allocation28 + $0x178] sm:$0xff]  ;;  %v4812_v39 = vld [vmem:[#allocation27 + $0x8] sm:$0xff] }
0x143c   : > { %v4674_v41 = vadd.f32 1.0, %v12258_v31  ;;  %v5223_v31 = vld [vmem:[#allocation28 + $0x170] sm:$0xff] }
0x143d   : > { %v14056_v40 = vmul.f32 %v4675_v33, %v4619_v35  ;;  %v4944_v33 = vld [vmem:[#allocation27 + $0x50] sm:$0xff]  ;;  %v5222_v35 = vld [vmem:[#allocation28 + $0x168] sm:$0xff] }
0x143e   : > { %v12260_v36 = vpop.eup %12259  ;;  %v14054_v37 = vmul.f32 %v4674_v41, %v4618_v4  ;;  %v4813_v4 = vld [vmem:[#allocation27 + $0x10] sm:$0xff]  ;;  %v4945_v41 = vld [vmem:[#allocation27 + $0x58] sm:$0xff] }
0x143f   : > { %v4677_v0 = vadd.f32 1.0, %v12260_v36  ;;  %v4946_v36 = vld [vmem:[#allocation27 + $0x60] sm:$0xff] }
0x1440   : > { %v12262_v42 = vpop.eup %12261  ;;  %10858 = vmatprep.mubr.f32.mxu1 %v14054_v37  ;;  %10902 = vmatprep.mubr.f32.mxu0 %v14054_v37 }
0x1441   : > { %10859 = vmatmul.mubr.f32.vlgmr.msra.gmra.mxu1 %v14056_v40  ;;  %10903 = vmatmul.mubr.f32.vlgmr.msra.gmra.mxu0 %v14056_v40  ;;  %v4676_v45 = vadd.f32 1.0, %v12262_v42  ;;  %v14066_v56 = vmul.f32 %v4677_v0, %v4621_v17  ;;  %v5221_v42 = vld [vmem:[#allocation28 + $0x160] sm:$0xff]  ;;  %v4814_v0 = vld [vmem:[#allocation27 + $0x18] sm:$0xff] }
0x1442   : > { %v5220_v17 = vld [vmem:[#allocation28 + $0x158] sm:$0xff] }
0x1443   : > { %v12264_v49 = vpop.eup %12263  ;;  %v14064_v50 = vmul.f32 %v4676_v45, %v4620_v23  ;;  %v4815_v23 = vld [vmem:[#allocation27 + $0x20] sm:$0xff]  ;;  %v4947_v45 = vld [vmem:[#allocation27 + $0x68] sm:$0xff] }
0x1444   : > { %v12266_v57 = vpop.eup %12265  ;;  %v4678_v61 = vadd.f32 1.0, %v12264_v49  ;;  %v4948_v49 = vld [vmem:[#allocation27 + $0x70] sm:$0xff] }
0x1445   : > { %10861 = vmatprep.mubr.f32.mxu1 %v14064_v50  ;;  %10905 = vmatprep.mubr.f32.mxu0 %v14064_v50  ;;  %v4679_v63 = vadd.f32 1.0, %v12266_v57  ;;  %v5219_v57 = vld [vmem:[#allocation28 + $0x150] sm:$0xff] }
0x1446   : > { %10862 = vmatmul.mubr.f32.gmra.mxu1 %v14066_v56  ;;  %10906 = vmatmul.mubr.f32.gmra.mxu0 %v14066_v56  ;;  %v14073_v30 = vmul.f32 %v4678_v61, %v4622_v60  ;;  %v4816_v60 = vld [vmem:[#allocation27 + $0x28] sm:$0xff]  ;;  %v4817_v61 = vld [vmem:[#allocation27 + $0x30] sm:$0xff] }
0x1447   : > { %v12268_v1 = vpop.eup %12267  ;;  %v14078_v55 = vmul.f32 %v4679_v63, %v4623_v28  ;;  %v4949_v63 = vld [vmem:[#allocation27 + $0x78] sm:$0xff]  ;;  %v5218_v28 = vld [vmem:[#allocation28 + $0x148] sm:$0xff] }
0x1448   : > { %v12270_v5 = vpop.eup %12269  ;;  %10864 = vmatprep.mubr.f32.mxu1 %v14073_v30  ;;  %10908 = vmatprep.mubr.f32.mxu0 %v14073_v30  ;;  %v4680_v58 = vadd.f32 1.0, %v12268_v1  ;;  %v5217_v1 = vld [vmem:[#allocation28 + $0x140] sm:$0xff] }
0x1449   : > { %v4681_v8 = vadd.f32 1.0, %v12270_v5  ;;  %v4818_v5 = vld [vmem:[#allocation27 + $0x38] sm:$0xff] }
0x144a   : > { %10865 = vmatmul.mubr.f32.gmra.mxu1 %v14078_v55  ;;  %10909 = vmatmul.mubr.f32.gmra.mxu0 %v14078_v55  ;;  %v14083_v12 = vmul.f32 %v4680_v58, %v4624_v6  ;;  %v5216_v6 = vld [vmem:[#allocation28 + $0x138] sm:$0xff]  ;;  %v5215_v58 = vld [vmem:[#allocation28 + $0x130] sm:$0xff] }
0x144b   : > { %v14088_v7 = vmul.f32 %v4681_v8, %v4625_v44  ;;  %v5214_v8 = vld [vmem:[#allocation28 + $0x128] sm:$0xff]  ;;  %v5213_v44 = vld [vmem:[#allocation28 + $0x120] sm:$0xff] }
0x144c   : > { %10867 = vmatprep.mubr.f32.mxu1 %v14083_v12  ;;  %10911 = vmatprep.mubr.f32.mxu0 %v14083_v12 }
0x144e   : > { %10868 = vmatmul.mubr.f32.gmra.mxu1 %v14088_v7  ;;  %10912 = vmatmul.mubr.f32.gmra.mxu0 %v14088_v7 }
0x144f   : > { %10930 = vmatprep.mubr.msk.f32.mxu1 %vm2793_vm6, %v4942_v9  ;;  %10958 = vmatprep.mubr.msk.f32.mxu0 %vm2793_vm6, %v4811_v13  ;;  %v5212_v9 = vld [vmem:[#allocation28 + $0x118] sm:$0xff]  ;;  %v5211_v13 = vld [vmem:[#allocation28 + $0x110] sm:$0xff] }
0x1501   : > { %v10860_v59 = vpop.f32.mrf.mxu1  ;;  %v10904_v15 = vpop.f32.mrf.mxu0 }
0x1503   : > { %v4772_v18 = vpop.f32.mrf.mxu1  ;;  %v4902_v11 = vpop.f32.mrf.mxu0 }
0x1506   : > { %v10863_v19 = vpop.f32.mrf.mxu1  ;;  %v10907_v20 = vpop.f32.mrf.mxu0 }
0x1508   : > { %v4782_v21 = vpop.f32.mrf.mxu1  ;;  %v4912_v10 = vpop.f32.mrf.mxu0 }
0x150a   : > { %v10866_v22 = vpop.f32.mrf.mxu1  ;;  %v10910_v54 = vpop.f32.mrf.mxu0 }
0x150c   : > { %v4792_v32 = vpop.f32.mrf.mxu1  ;;  %v4922_v24 = vpop.f32.mrf.mxu0 }
0x150e   : > { %v10869_v25 = vpop.f32.mrf.mxu1  ;;  %v10913_v34 = vpop.f32.mrf.mxu0 }
0x150f   : > { %10914 = vmatprep.subr.mxu1 %v10913_v34  ;;  %10942 = vmatprep.subr.mxu0 %v10869_v25 }
0x1510   : > { %v4802_v26 = vpop.f32.mrf.mxu1  ;;  %v4932_v27 = vpop.f32.mrf.mxu0  ;;  %10915 = vmatpush3.msra.mxu1 %v10913_v34  ;;  %10943 = vmatpush3.msra.mxu0 %v10869_v25 }
0x1511   : > { %10916 = vmatprep.subr.mxu1 %v4932_v27  ;;  %10944 = vmatprep.subr.mxu0 %v4802_v26 }
0x1512   : > { %10917 = vmatpush3.msra.mxu1 %v4932_v27  ;;  %10945 = vmatpush3.msra.mxu0 %v4802_v26 }
0x1513   : > { %10918 = vmatprep.subr.mxu1 %v10910_v54  ;;  %10946 = vmatprep.subr.mxu0 %v10866_v22 }
0x1514   : > { %10919 = vmatpush3.msra.mxu1 %v10910_v54  ;;  %10947 = vmatpush3.msra.mxu0 %v10866_v22 }
0x1515   : > { %10920 = vmatprep.subr.mxu1 %v4922_v24  ;;  %10948 = vmatprep.subr.mxu0 %v4792_v32 }
0x1516   : > { %10921 = vmatpush3.msra.mxu1 %v4922_v24  ;;  %10949 = vmatpush3.msra.mxu0 %v4792_v32 }
0x1517   : > { %10922 = vmatprep.subr.mxu1 %v10907_v20  ;;  %10950 = vmatprep.subr.mxu0 %v10863_v19 }
0x1518   : > { %10923 = vmatpush3.msra.mxu1 %v10907_v20  ;;  %10951 = vmatpush3.msra.mxu0 %v10863_v19  ;;  %v14152_v19 = vld [vmem:[#allocation25 + $0x30] sm:$0xff]  ;;  %v14160_v20 = vld [vmem:[#allocation25 + $0x20] sm:$0xff] }
0x1519   : > { %10924 = vmatprep.subr.mxu1 %v4912_v10  ;;  %10952 = vmatprep.subr.mxu0 %v4782_v21 }
0x151a   : > { %10925 = vmatpush3.msra.mxu1 %v4912_v10  ;;  %10953 = vmatpush3.msra.mxu0 %v4782_v21  ;;  %v14172_v21 = vld [vmem:[#allocation27 + $0x80] sm:$0xff] }
0x151b   : > { %10926 = vmatprep.subr.mxu1 %v10904_v15  ;;  %10954 = vmatprep.subr.mxu0 %v10860_v59 }
0x151c   : > { %10927 = vmatpush3.msra.mxu1 %v10904_v15  ;;  %10955 = vmatpush3.msra.mxu0 %v10860_v59  ;;  %v5209_v59 = vld [vmem:[#allocation28 + $0x100] sm:$0xff]  ;;  %v14110_v15 = vld [vmem:[#allocation25 + $0x78] sm:$0xff] }
0x151d   : > { %10928 = vmatprep.subr.mxu1 %v4902_v11  ;;  %10956 = vmatprep.subr.mxu0 %v4772_v18 }
0x151e   : > { %10929 = vmatpush3.msra.mxu1 %v4902_v11  ;;  %10957 = vmatpush3.msra.mxu0 %v4772_v18  ;;  %v14115_v18 = vld [vmem:[#allocation25 + $0x70] sm:$0xff]  ;;  %v14120_v11 = vld [vmem:[#allocation25 + $0x68] sm:$0xff] }
0x151f   : > { %10931 = vmatmul.mubr.msk.f32.vlgmr.msra.gmra.mxu1 %vm2793_vm6, %v4943_v38  ;;  %10970 = vmatprep.subr.mxu1 %v5224_v29 }
0x1520   : > { %10959 = vmatmul.mubr.msk.f32.vlgmr.msra.gmra.mxu0 %vm2793_vm6, %v4812_v39  ;;  %10971 = vmatpush3.msra.mxu1 %v5224_v29 }
0x1521   : > { %10972 = vmatprep.subr.mxu1 %v5223_v31  ;;  %10933 = vmatprep.mubr.msk.f32.mxu1 %vm2793_vm6, %v4944_v33  ;;  %v5333_v33 = vld [vmem:[#allocation27 + $0x90] sm:$0xff] }
0x1522   : > { %10973 = vmatpush3.msra.mxu1 %v5223_v31  ;;  %10961 = vmatprep.mubr.msk.f32.mxu0 %vm2793_vm6, %v4813_v4  ;;  %v5332_v31 = vld [vmem:[#allocation27 + $0x88] sm:$0xff]  ;;  %v5334_v4 = vld [vmem:[#allocation27 + $0x98] sm:$0xff] }
0x1523   : > { %10934 = vmatmul.mubr.msk.f32.gmra.mxu1 %vm2793_vm6, %v4945_v41  ;;  %10974 = vmatprep.subr.mxu1 %v5222_v35  ;;  %v5335_v41 = vld [vmem:[#allocation27 + $0xa0] sm:$0xff] }
0x1524   : > { %10975 = vmatpush3.msra.mxu1 %v5222_v35  ;;  %10936 = vmatprep.mubr.msk.f32.mxu1 %vm2793_vm6, %v4946_v36  ;;  %v5336_v35 = vld [vmem:[#allocation27 + $0xa8] sm:$0xff]  ;;  %v5337_v36 = vld [vmem:[#allocation27 + $0xb0] sm:$0xff] }
0x1525   : > { %10976 = vmatprep.subr.mxu1 %v5221_v42  ;;  %10962 = vmatmul.mubr.msk.f32.gmra.mxu0 %vm2793_vm6, %v4814_v0  ;;  %v14223_v0 = vld [vmem:[#allocation25 + $0x18] sm:$0xff] }
0x1526   : > { %10977 = vmatpush3.msra.mxu1 %v5221_v42  ;;  %10964 = vmatprep.mubr.msk.f32.mxu0 %vm2793_vm6, %v4815_v23  ;;  %v5338_v42 = vld [vmem:[#allocation27 + $0xb8] sm:$0xff]  ;;  %v14227_v23 = vld [vmem:[#allocation25 + $0x10] sm:$0xff] }
0x1527   : > { %10937 = vmatmul.mubr.msk.f32.gmra.mxu1 %vm2793_vm6, %v4947_v45  ;;  %10978 = vmatprep.subr.mxu1 %v5220_v17  ;;  %v14231_v45 = vld [vmem:[#allocation25 + $0x8] sm:$0xff] }
0x1528   : > { %10979 = vmatpush3.msra.mxu1 %v5220_v17  ;;  %10939 = vmatprep.mubr.msk.f32.mxu1 %vm2793_vm6, %v4948_v49  ;;  %v14235_v17 = vld [vmem:[#allocation25] sm:$0xff] }
0x1529   : > { %10980 = vmatprep.subr.mxu1 %v5219_v57  ;;  %10965 = vmatmul.mubr.msk.f32.gmra.mxu0 %vm2793_vm6, %v4816_v60 }
0x152a   : > { %10981 = vmatpush3.msra.mxu1 %v5219_v57  ;;  %10967 = vmatprep.mubr.msk.f32.mxu0 %vm2793_vm6, %v4817_v61 }
0x152b   : > { %10940 = vmatmul.mubr.msk.f32.gmra.mxu1 %vm2793_vm6, %v4949_v63  ;;  %10982 = vmatprep.subr.mxu1 %v5218_v28 }
0x152c   : > { %10983 = vmatpush3.msra.mxu1 %v5218_v28  ;;  %11002 = vmatprep.mubr.f32.mxu1 %v14054_v37  ;;  %v5210_v37 = vld [vmem:[#allocation28 + $0x108] sm:$0xff] }
0x152d   : > { %10984 = vmatprep.subr.mxu1 %v5217_v1  ;;  %10968 = vmatmul.mubr.msk.f32.gmra.mxu0 %vm2793_vm6, %v4818_v5 }
0x152e   : > { %10985 = vmatpush3.msra.mxu1 %v5217_v1  ;;  %11030 = vmatprep.mubr.msk.f32.mxu0 %vm2793_vm6, %v14172_v21 }
0x152f   : > { %10986 = vmatprep.subr.mxu1 %v5216_v6 }
0x1530   : > { %10987 = vmatpush3.msra.mxu1 %v5216_v6  ;;  %v14239_v6 = vld [vmem:[#allocation31] sm:$0xff] }
0x1531   : > { %10988 = vmatprep.subr.mxu1 %v5215_v58 }
0x1532   : > { %10989 = vmatpush3.msra.mxu1 %v5215_v58  ;;  %v5479_v58 = vrot.slane %v14239_v6, %v13823_v62 }
0x1533   : > { %10990 = vmatprep.subr.mxu1 %v5214_v8 }
0x1534   : > { %10991 = vmatpush3.msra.mxu1 %v5214_v8 }
0x1535   : > { %10992 = vmatprep.subr.mxu1 %v5213_v44 }
0x1536   : > { %10993 = vmatpush3.msra.mxu1 %v5213_v44 }
0x1537   : > { %10994 = vmatprep.subr.mxu1 %v5212_v9 }
0x1538   : > { %10995 = vmatpush3.msra.mxu1 %v5212_v9 }
0x1539   : > { %10996 = vmatprep.subr.mxu1 %v5211_v13 }
0x153a   : > { %10997 = vmatpush3.msra.mxu1 %v5211_v13 }
0x153b   : > { %10998 = vmatprep.subr.mxu1 %v5210_v37 }
0x153c   : > { %10999 = vmatpush3.msra.mxu1 %v5210_v37 }
0x153d   : > { %11000 = vmatprep.subr.mxu1 %v5209_v59 }
0x153e   : > { %11001 = vmatpush3.msra.mxu1 %v5209_v59 }
0x153f   : > { %11003 = vmatmul.mubr.f32.vlgmr.msra.gmra.mxu1 %v14056_v40  ;;  %11086 = vmatprep.subr.mxu1 %v14110_v15  ;;  %v14125_v40 = vld [vmem:[#allocation25 + $0x60] sm:$0xff] }
0x1540   : > { %11005 = vmatprep.mubr.f32.mxu1 %v14064_v50  ;;  %11087 = vmatpush3.msra.mxu1 %v14110_v15  ;;  %v14130_v50 = vld [vmem:[#allocation25 + $0x58] sm:$0xff] }
0x1541   : > { %11088 = vmatprep.subr.mxu1 %v14115_v18 }
0x1542   : > { %11089 = vmatpush3.msra.mxu1 %v14115_v18 }
0x1543   : > { %11006 = vmatmul.mubr.f32.gmra.mxu1 %v14066_v56  ;;  %11090 = vmatprep.subr.mxu1 %v14120_v11  ;;  %v14135_v56 = vld [vmem:[#allocation25 + $0x50] sm:$0xff] }
0x1544   : > { %11008 = vmatprep.mubr.f32.mxu1 %v14073_v30  ;;  %11091 = vmatpush3.msra.mxu1 %v14120_v11  ;;  %v14140_v30 = vld [vmem:[#allocation25 + $0x48] sm:$0xff] }
0x1545   : > { %11092 = vmatprep.subr.mxu1 %v14125_v40 }
0x1546   : > { %11093 = vmatpush3.msra.mxu1 %v14125_v40 }
0x1547   : > { %11009 = vmatmul.mubr.f32.gmra.mxu1 %v14078_v55  ;;  %11094 = vmatprep.subr.mxu1 %v14130_v50  ;;  %v14144_v55 = vld [vmem:[#allocation25 + $0x40] sm:$0xff] }
0x1548   : > { %11011 = vmatprep.mubr.f32.mxu1 %v14083_v12  ;;  %11095 = vmatpush3.msra.mxu1 %v14130_v50  ;;  %v14148_v12 = vld [vmem:[#allocation25 + $0x38] sm:$0xff] }
0x1549   : > { %11096 = vmatprep.subr.mxu1 %v14135_v56 }
0x154a   : > { %11097 = vmatpush3.msra.mxu1 %v14135_v56 }
0x154b   : > { %11012 = vmatmul.mubr.f32.gmra.mxu1 %v14088_v7  ;;  %11098 = vmatprep.subr.mxu1 %v14140_v30  ;;  %v14156_v7 = vld [vmem:[#allocation25 + $0x28] sm:$0xff] }
0x154c   : > { %11099 = vmatpush3.msra.mxu1 %v14140_v30 }
0x154d   : > { %11100 = vmatprep.subr.mxu1 %v14144_v55 }
0x154e   : > { %11101 = vmatpush3.msra.mxu1 %v14144_v55 }
0x154f   : > { %11102 = vmatprep.subr.mxu1 %v14148_v12 }
0x1550   : > { %11103 = vmatpush3.msra.mxu1 %v14148_v12 }
0x1551   : > { %11104 = vmatprep.subr.mxu1 %v14152_v19 }
0x1552   : > { %11105 = vmatpush3.msra.mxu1 %v14152_v19 }
0x1553   : > { %11106 = vmatprep.subr.mxu1 %v14156_v7 }
0x1554   : > { %11107 = vmatpush3.msra.mxu1 %v14156_v7 }
0x1555   : > { %11108 = vmatprep.subr.mxu1 %v14160_v20 }
0x1556   : > { %11109 = vmatpush3.msra.mxu1 %v14160_v20 }
0x1557   : > { %11110 = vmatprep.subr.mxu1 %v13932_v43 }
0x1558   : > { %11111 = vmatpush3.msra.mxu1 %v13932_v43 }
0x1559   : > { %11112 = vmatprep.subr.mxu1 %v13937_v51 }
0x155a   : > { %11113 = vmatpush3.msra.mxu1 %v13937_v51 }
0x155b   : > { %11114 = vmatprep.subr.mxu1 %v13943_v52 }
0x155c   : > { %11115 = vmatpush3.msra.mxu1 %v13943_v52 }
0x155d   : > { %11116 = vmatprep.subr.mxu1 %v13949_v53 }
0x155e   : > { %11117 = vmatpush3.msra.mxu1 %v13949_v53 }
0x15df   : > { %v14176_v10 = vpop.f32.mrf.mxu1 }
0x15e0   : > { %v10960_v49 = vpop.f32.mrf.mxu0 }
0x15e1   : > { %v14178_v43 = vpop.f32.mrf.mxu1  ;;  %v5175_v8 = vadd.f32 %v10960_v49, %v14176_v10 }
0x15e2   : > { %v5169_v57 = vpop.f32.mrf.mxu0 }
0x15e3   : > { %v14180_v22 = vpop.f32.mrf.mxu1  ;;  %v5170_v9 = vadd.f32 %v5169_v57, %v14178_v43 }
0x15e5   : > { %v14182_v51 = vpop.f32.mrf.mxu1  ;;  %v10963_v60 = vpop.f32.mrf.mxu0 }
0x15e6   : > { %v5185_v59 = vadd.f32 %v10963_v60, %v14180_v22 }
0x15e7   : > { %v14184_v54 = vpop.f32.mrf.mxu1  ;;  %v5179_v61 = vpop.f32.mrf.mxu0 }
0x15e9   : > { %v14186_v52 = vpop.f32.mrf.mxu1  ;;  %v10966_v63 = vpop.f32.mrf.mxu0 }
0x15eb   : > { %v14188_v32 = vpop.f32.mrf.mxu1  ;;  %v5189_v28 = vpop.f32.mrf.mxu0 }
0x15ed   : > { %v14190_v53 = vpop.f32.mrf.mxu1  ;;  %v10969_v1 = vpop.f32.mrf.mxu0 }
0x15ef   : > { %v5199_v5 = vpop.f32.mrf.mxu0 }
0x15ff   : > { %v11004_v24 = vpop.f32.mrf.mxu1 }
0x1601   : > { %v5291_v25 = vpop.f32.mrf.mxu1 }
0x1603   : > { %v11007_v34 = vpop.f32.mrf.mxu1 }
0x1605   : > { %v5301_v26 = vpop.f32.mrf.mxu1 }
0x1607   : > { %v11010_v27 = vpop.f32.mrf.mxu1 }
0x1609   : > { %v5311_v38 = vpop.f32.mrf.mxu1 }
0x160b   : > { %v11013_v29 = vpop.f32.mrf.mxu1 }
0x160c   : > { %11014 = vmatprep.subr.mxu0 %v11013_v29 }
0x160d   : > { %v5321_v39 = vpop.f32.mrf.mxu1  ;;  %11015 = vmatpush3.msra.mxu0 %v11013_v29 }
0x160e   : > { %11016 = vmatprep.subr.mxu0 %v5321_v39 }
0x160f   : > { %11017 = vmatpush3.msra.mxu0 %v5321_v39 }
0x1610   : > { %11018 = vmatprep.subr.mxu0 %v11010_v27 }
0x1611   : > { %11019 = vmatpush3.msra.mxu0 %v11010_v27 }
0x1612   : > { %11020 = vmatprep.subr.mxu0 %v5311_v38 }
0x1613   : > { %11021 = vmatpush3.msra.mxu0 %v5311_v38 }
0x1614   : > { %11022 = vmatprep.subr.mxu0 %v11007_v34 }
0x1615   : > { %11023 = vmatpush3.msra.mxu0 %v11007_v34 }
0x1616   : > { %11024 = vmatprep.subr.mxu0 %v5301_v26 }
0x1617   : > { %11025 = vmatpush3.msra.mxu0 %v5301_v26  ;;  %v5200_v26 = vadd.f32 %v5199_v5, %v14190_v53 }
0x1618   : > { %11026 = vmatprep.subr.mxu0 %v11004_v24 }
0x1619   : > { %11027 = vmatpush3.msra.mxu0 %v11004_v24  ;;  %v5205_v24 = vadd.f32 %v10969_v1, %v14188_v32 }
0x161a   : > { %11028 = vmatprep.subr.mxu0 %v5291_v25 }
0x161b   : > { %11029 = vmatpush3.msra.mxu0 %v5291_v25 }
0x161c   : > { %11031 = vmatmul.mubr.msk.f32.vlgmr.msra.gmra.mxu0 %vm2793_vm6, %v5332_v31  ;;  %11042 = vmatprep.subr.mxu0 %v14110_v15 }
0x161d   : > { %11033 = vmatprep.mubr.msk.f32.mxu0 %vm2793_vm6, %v5333_v33  ;;  %11043 = vmatpush3.msra.mxu0 %v14110_v15 }
0x161e   : > { %11044 = vmatprep.subr.mxu0 %v14115_v18 }
0x161f   : > { %11045 = vmatpush3.msra.mxu0 %v14115_v18 }
0x1620   : > { %11034 = vmatmul.mubr.msk.f32.gmra.mxu0 %vm2793_vm6, %v5334_v4  ;;  %11046 = vmatprep.subr.mxu0 %v14120_v11 }
0x1621   : > { %11036 = vmatprep.mubr.msk.f32.mxu0 %vm2793_vm6, %v5335_v41  ;;  %11047 = vmatpush3.msra.mxu0 %v14120_v11 }
0x1622   : > { %11048 = vmatprep.subr.mxu0 %v14125_v40 }
0x1623   : > { %11049 = vmatpush3.msra.mxu0 %v14125_v40  ;;  %v5180_v40 = vadd.f32 %v5179_v61, %v14182_v51 }
0x1624   : > { %11037 = vmatmul.mubr.msk.f32.gmra.mxu0 %vm2793_vm6, %v5336_v35  ;;  %11050 = vmatprep.subr.mxu0 %v14130_v50 }
0x1625   : > { %11039 = vmatprep.mubr.msk.f32.mxu0 %vm2793_vm6, %v5337_v36  ;;  %11051 = vmatpush3.msra.mxu0 %v14130_v50 }
0x1626   : > { %11052 = vmatprep.subr.mxu0 %v14135_v56 }
0x1627   : > { %11053 = vmatpush3.msra.mxu0 %v14135_v56 }
0x1628   : > { %11040 = vmatmul.mubr.msk.f32.gmra.mxu0 %vm2793_vm6, %v5338_v42  ;;  %11054 = vmatprep.subr.mxu0 %v14140_v30 }
0x1629   : > { %11055 = vmatpush3.msra.mxu0 %v14140_v30 }
0x162a   : > { %11056 = vmatprep.subr.mxu0 %v14144_v55 }
0x162b   : > { %11057 = vmatpush3.msra.mxu0 %v14144_v55  ;;  %v5195_v55 = vadd.f32 %v10966_v63, %v14184_v54 }
0x162c   : > { %11058 = vmatprep.subr.mxu0 %v14148_v12 }
0x162d   : > { %11059 = vmatpush3.msra.mxu0 %v14148_v12 }
0x162e   : > { %11060 = vmatprep.subr.mxu0 %v14152_v19 }
0x162f   : > { %11061 = vmatpush3.msra.mxu0 %v14152_v19 }
0x1630   : > { %11062 = vmatprep.subr.mxu0 %v14156_v7 }
0x1631   : > { %11063 = vmatpush3.msra.mxu0 %v14156_v7 }
0x1632   : > { %11064 = vmatprep.subr.mxu0 %v14160_v20 }
0x1633   : > { %11065 = vmatpush3.msra.mxu0 %v14160_v20  ;;  %v5190_v20 = vadd.f32 %v5189_v28, %v14186_v52 }
0x1634   : > { %11066 = vmatprep.subr.mxu0 %v14223_v0 }
0x1635   : > { %11067 = vmatpush3.msra.mxu0 %v14223_v0 }
0x1636   : > { %11068 = vmatprep.subr.mxu0 %v14227_v23 }
0x1637   : > { %11069 = vmatpush3.msra.mxu0 %v14227_v23 }
0x1638   : > { %11070 = vmatprep.subr.mxu0 %v14231_v45 }
0x1639   : > { %11071 = vmatpush3.msra.mxu0 %v14231_v45 }
0x163a   : > { %11072 = vmatprep.subr.mxu0 %v14235_v17 }
0x163b   : > { %11073 = vmatpush3.msra.mxu0 %v14235_v17 }
0x16dc   : > { %v11032_v44 = vpop.f32.mrf.mxu0 }
0x16dd   : > { %v5469_v13 = vadd.f32 %v11032_v44, %v5175_v8 }
0x16de   : > { %v5429_v37 = vpop.f32.mrf.mxu0 }
0x16df   : > { %v5481_v15 = vadd.f32 %v5479_v58, %v5469_v13  ;;  %v5468_v18 = vadd.f32 %v5429_v37, %v5170_v9 }
0x16e0   : > { %v11035_v11 = vpop.f32.mrf.mxu0 }
0x16e1   : > { %v5480_v50 = vadd.f32 %v5479_v58, %v5468_v18  ;;  %v5471_v56 = vadd.f32 %v11035_v11, %v5185_v59  ;;  %v5964_v18 = vld [vmem:[#allocation28 + $0x278] sm:$0xff]  ;;  %v5841_v11 = vld [vmem:[#allocation28 + $0x1f0] sm:$0xff] }
0x16e2   : > { %v5439_v30 = vpop.f32.mrf.mxu0  ;;  %11174 = vmatprep.subr.mxu1 %v5964_v18 }
0x16e3   : > { %v5483_v12 = vadd.f32 %v5479_v58, %v5471_v56  ;;  %v5470_v19 = vadd.f32 %v5439_v30, %v5180_v40  ;;  %11074 = vmatprep.mubr.f32.mxu0 %v5480_v50  ;;  %v5963_v40 = vld [vmem:[#allocation28 + $0x270] sm:$0xff]  ;;  %v5962_v56 = vld [vmem:[#allocation28 + $0x268] sm:$0xff]  ;;  %v5839_v30 = vld [vmem:[#allocation28 + $0x1e0] sm:$0xff] }
0x16e4   : > { %v11038_v7 = vpop.f32.mrf.mxu0  ;;  %11075 = vmatmul.mubr.f32.vlgmr.msra.gmra.mxu0 %v5481_v15 }
0x16e5   : > { %v5482_v10 = vadd.f32 %v5479_v58, %v5470_v19  ;;  %v5473_v43 = vadd.f32 %v11038_v7, %v5195_v55  ;;  %v5961_v55 = vld [vmem:[#allocation28 + $0x260] sm:$0xff]  ;;  %v5960_v19 = vld [vmem:[#allocation28 + $0x258] sm:$0xff]  ;;  %v5837_v7 = vld [vmem:[#allocation28 + $0x1d0] sm:$0xff] }
0x16e6   : > { %v5449_v22 = vpop.f32.mrf.mxu0 }
0x16e7   : > { %v5485_v25 = vadd.f32 %v5479_v58, %v5473_v43  ;;  %v5472_v34 = vadd.f32 %v5449_v22, %v5190_v20  ;;  %11077 = vmatprep.mubr.f32.mxu0 %v5482_v10  ;;  %v5959_v20 = vld [vmem:[#allocation28 + $0x250] sm:$0xff]  ;;  %v5958_v43 = vld [vmem:[#allocation28 + $0x248] sm:$0xff]  ;;  %v5835_v22 = vld [vmem:[#allocation28 + $0x1c0] sm:$0xff] }
0x16e8   : > { %v11041_v51 = vpop.f32.mrf.mxu0  ;;  %11078 = vmatmul.mubr.f32.gmra.mxu0 %v5483_v12 }
0x16e9   : > { %v5484_v54 = vadd.f32 %v5479_v58, %v5472_v34  ;;  %v5475_v27 = vadd.f32 %v11041_v51, %v5205_v24  ;;  %v5957_v24 = vld [vmem:[#allocation28 + $0x240] sm:$0xff]  ;;  %v5956_v34 = vld [vmem:[#allocation28 + $0x238] sm:$0xff]  ;;  %v5833_v51 = vld [vmem:[#allocation28 + $0x1b0] sm:$0xff] }
0x16ea   : > { %v5459_v38 = vpop.f32.mrf.mxu0 }
0x16eb   : > { %v5487_v29 = vadd.f32 %v5479_v58, %v5475_v27  ;;  %v5474_v39 = vadd.f32 %v5459_v38, %v5200_v26  ;;  %11080 = vmatprep.mubr.f32.mxu0 %v5484_v54  ;;  %v5955_v26 = vld [vmem:[#allocation28 + $0x230] sm:$0xff]  ;;  %v5954_v27 = vld [vmem:[#allocation28 + $0x228] sm:$0xff]  ;;  %v5831_v38 = vld [vmem:[#allocation28 + $0x1a0] sm:$0xff] }
0x16ec   : > { %11081 = vmatmul.mubr.f32.gmra.mxu0 %v5485_v25 }
0x16ed   : > { %v5486_v52 = vadd.f32 %v5479_v58, %v5474_v39  ;;  %v5830_v39 = vld [vmem:[#allocation28 + $0x198] sm:$0xff] }
0x16ef   : > { %11083 = vmatprep.mubr.f32.mxu0 %v5486_v52 }
0x16f0   : > { %11084 = vmatmul.mubr.f32.gmra.mxu0 %v5487_v29 }
0x17a4   : > { %v11076_v31 = vpop.f32.mrf.mxu0 }
0x17a5   : > { %v14251_v33 = vsub.f32 %v5481_v15, %v11076_v31  ;;  %v5842_v15 = vld [vmem:[#allocation28 + $0x1f8] sm:$0xff]  ;;  %v5829_v31 = vld [vmem:[#allocation28 + $0x190] sm:$0xff] }
0x17a6   : > { %v5554_v32 = vpop.f32.mrf.mxu0  ;;  %11130 = vmatprep.subr.mxu0 %v5842_v15 }
0x17a7   : > { %v14253_v4 = vsub.f32 %v5480_v50, %v5554_v32  ;;  %v5602_v35 = vmul.f32 %v14251_v33, %v14251_v33  ;;  %11131 = vmatpush3.msra.mxu0 %v5842_v15  ;;  %v5840_v50 = vld [vmem:[#allocation28 + $0x1e8] sm:$0xff]  ;;  %v5951_v32 = vld [vmem:[#allocation28 + $0x210] sm:$0xff] }
0x17a8   : > { %v11079_v41 = vpop.f32.mrf.mxu0  ;;  %11132 = vmatprep.subr.mxu0 %v5841_v11 }
0x17a9   : > { %v5601_v53 = vmul.f32 %v14253_v4, %v14253_v4  ;;  %v14259_v36 = vsub.f32 %v5483_v12, %v11079_v41  ;;  %11133 = vmatpush3.msra.mxu0 %v5841_v11  ;;  %v5838_v12 = vld [vmem:[#allocation28 + $0x1d8] sm:$0xff]  ;;  %v5828_v41 = vld [vmem:[#allocation28 + $0x188] sm:$0xff] }
0x17aa   : > { %v5564_v42 = vpop.f32.mrf.mxu0  ;;  %11134 = vmatprep.subr.mxu0 %v5840_v50 }
0x17ab   : > { %v14261_v49 = vsub.f32 %v5482_v10, %v5564_v42  ;;  %11118 = vmatprep.mubr.f32.mxu1 %v5601_v53  ;;  %v5604_v61 = vmul.f32 %v14259_v36, %v14259_v36  ;;  %11135 = vmatpush3.msra.mxu0 %v5840_v50  ;;  %v5836_v10 = vld [vmem:[#allocation28 + $0x1c8] sm:$0xff]  ;;  %v5949_v42 = vld [vmem:[#allocation28 + $0x200] sm:$0xff] }
0x17ac   : > { %v11082_v57 = vpop.f32.mrf.mxu0  ;;  %11119 = vmatmul.mubr.f32.vlgmr.msra.gmra.mxu1 %v5602_v35  ;;  %11136 = vmatprep.subr.mxu0 %v5839_v30  ;;  %v5950_v53 = vld [vmem:[#allocation28 + $0x208] sm:$0xff]  ;;  %v5827_v35 = vld [vmem:[#allocation28 + $0x180] sm:$0xff] }
0x17ad   : > { %v5603_v60 = vmul.f32 %v14261_v49, %v14261_v49  ;;  %v14267_v63 = vsub.f32 %v5485_v25, %v11082_v57  ;;  %11175 = vmatpush3.msra.mxu1 %v5964_v18  ;;  %11137 = vmatpush3.msra.mxu0 %v5839_v30  ;;  %v5834_v25 = vld [vmem:[#allocation28 + $0x1b8] sm:$0xff]  ;;  %v5732_v18 = vsub.s32 7, %v13776_v2 }
0x17ae   : > { %v5574_v28 = vpop.f32.mrf.mxu0  ;;  %11176 = vmatprep.subr.mxu1 %v5963_v40  ;;  %11138 = vmatprep.subr.mxu0 %v5838_v12 }
0x17af   : > { %v14269_v1 = vsub.f32 %v5484_v54, %v5574_v28  ;;  %11121 = vmatprep.mubr.f32.mxu1 %v5603_v60  ;;  %v5606_v8 = vmul.f32 %v14267_v63, %v14267_v63  ;;  %11177 = vmatpush3.msra.mxu1 %v5963_v40  ;;  %v5832_v54 = vld [vmem:[#allocation28 + $0x1a8] sm:$0xff] }
0x17b0   : > { %v11085_v5 = vpop.f32.mrf.mxu0  ;;  %11122 = vmatmul.mubr.f32.gmra.mxu1 %v5604_v61  ;;  %11178 = vmatprep.subr.mxu1 %v5962_v56 }
0x17b1   : > { %v5605_v58 = vmul.f32 %v14269_v1, %v14269_v1  ;;  %v14275_v44 = vsub.f32 %v5487_v29, %v11085_v5  ;;  %11179 = vmatpush3.msra.mxu1 %v5962_v56  ;;  %11139 = vmatpush3.msra.mxu0 %v5838_v12  ;;  %v5953_v29 = vld [vmem:[#allocation28 + $0x220] sm:$0xff]  ;;  %v2457_v56 = vld [vmem:[#allocation31 + $0x8] sm:$0x1f] }
0x17b2   : > { %v5584_v9 = vpop.f32.mrf.mxu0  ;;  %11180 = vmatprep.subr.mxu1 %v5961_v55  ;;  %11140 = vmatprep.subr.mxu0 %v5837_v7 }
0x17b3   : > { %v14277_v13 = vsub.f32 %v5486_v52, %v5584_v9  ;;  %11124 = vmatprep.mubr.f32.mxu1 %v5605_v58  ;;  %v5608_v59 = vmul.f32 %v14275_v44, %v14275_v44  ;;  %11181 = vmatpush3.msra.mxu1 %v5961_v55  ;;  %v5952_v52 = vld [vmem:[#allocation28 + $0x218] sm:$0xff]  ;;  %v5733_v55 = vrot.slane %v14239_v6, %v5732_v18 }
0x17b4   : > { %11125 = vmatmul.mubr.f32.gmra.mxu1 %v5606_v8  ;;  %11182 = vmatprep.subr.mxu1 %v5960_v19 }
0x17b5   : > { %v5607_v37 = vmul.f32 %v14277_v13, %v14277_v13  ;;  %11183 = vmatpush3.msra.mxu1 %v5960_v19  ;;  %11141 = vmatpush3.msra.mxu0 %v5837_v7  ;;  %v5745_v7 = vrot.slane %v2457_v56, %v13809_v48 }
0x17b6   : > { %11184 = vmatprep.subr.mxu1 %v5959_v20  ;;  %11142 = vmatprep.subr.mxu0 %v5836_v10 }
0x17b7   : > { %11127 = vmatprep.mubr.f32.mxu1 %v5607_v37  ;;  %11185 = vmatpush3.msra.mxu1 %v5959_v20 }
0x17b8   : > { %11128 = vmatmul.mubr.f32.gmra.mxu1 %v5608_v59  ;;  %11186 = vmatprep.subr.mxu1 %v5958_v43 }
0x17b9   : > { %11143 = vmatpush3.msra.mxu0 %v5836_v10  ;;  %11187 = vmatpush3.msra.mxu1 %v5958_v43 }
0x17ba   : > { %11144 = vmatprep.subr.mxu0 %v5835_v22  ;;  %11188 = vmatprep.subr.mxu1 %v5957_v24 }
0x17bb   : > { %11145 = vmatpush3.msra.mxu0 %v5835_v22  ;;  %11189 = vmatpush3.msra.mxu1 %v5957_v24 }
0x17bc   : > { %11146 = vmatprep.subr.mxu0 %v5834_v25  ;;  %11190 = vmatprep.subr.mxu1 %v5956_v34 }
0x17bd   : > { %11147 = vmatpush3.msra.mxu0 %v5834_v25  ;;  %11191 = vmatpush3.msra.mxu1 %v5956_v34 }
0x17be   : > { %11148 = vmatprep.subr.mxu0 %v5833_v51  ;;  %11192 = vmatprep.subr.mxu1 %v5955_v26 }
0x17bf   : > { %11149 = vmatpush3.msra.mxu0 %v5833_v51  ;;  %11193 = vmatpush3.msra.mxu1 %v5955_v26 }
0x17c0   : > { %11150 = vmatprep.subr.mxu0 %v5832_v54  ;;  %11194 = vmatprep.subr.mxu1 %v5954_v27 }
0x17c1   : > { %11151 = vmatpush3.msra.mxu0 %v5832_v54  ;;  %11195 = vmatpush3.msra.mxu1 %v5954_v27 }
0x17c2   : > { %11152 = vmatprep.subr.mxu0 %v5831_v38  ;;  %11196 = vmatprep.subr.mxu1 %v5953_v29 }
0x17c3   : > { %11153 = vmatpush3.msra.mxu0 %v5831_v38  ;;  %11197 = vmatpush3.msra.mxu1 %v5953_v29 }
0x17c4   : > { %11154 = vmatprep.subr.mxu0 %v5830_v39  ;;  %11198 = vmatprep.subr.mxu1 %v5952_v52 }
0x17c5   : > { %11155 = vmatpush3.msra.mxu0 %v5830_v39  ;;  %11199 = vmatpush3.msra.mxu1 %v5952_v52 }
0x17c6   : > { %11156 = vmatprep.subr.mxu0 %v5829_v31  ;;  %11200 = vmatprep.subr.mxu1 %v5951_v32 }
0x17c7   : > { %11157 = vmatpush3.msra.mxu0 %v5829_v31  ;;  %11201 = vmatpush3.msra.mxu1 %v5951_v32 }
0x17c8   : > { %11158 = vmatprep.subr.mxu0 %v5828_v41  ;;  %11202 = vmatprep.subr.mxu1 %v5950_v53 }
0x17c9   : > { %11159 = vmatpush3.msra.mxu0 %v5828_v41  ;;  %11203 = vmatpush3.msra.mxu1 %v5950_v53 }
0x17ca   : > { %11160 = vmatprep.subr.mxu0 %v5827_v35  ;;  %11204 = vmatprep.subr.mxu1 %v5949_v42 }
0x17cb   : > { %11161 = vmatpush3.msra.mxu0 %v5827_v35  ;;  %11205 = vmatpush3.msra.mxu1 %v5949_v42 }
0x186c   : > { %v11120_v57 = vpop.f32.mrf.mxu1 }
0x186d   : > { %v5681_v60 = vadd.f32 1e-06, %v11120_v57 }
0x186e   : > { %v5675_v61 = vpop.f32.mrf.mxu1 }
0x186f   : > { %12271 = vrsqrt.f32 %v5681_v60  ;;  %v5676_v28 = vadd.f32 1e-06, %v5675_v61 }
0x1870   : > { %v11123_v5 = vpop.f32.mrf.mxu1 }
0x1871   : > { %12273 = vrsqrt.f32 %v5676_v28  ;;  %v5691_v58 = vadd.f32 1e-06, %v11123_v5 }
0x1872   : > { %v5685_v8 = vpop.f32.mrf.mxu1 }
0x1873   : > { %12275 = vrsqrt.f32 %v5691_v58  ;;  %v5686_v9 = vadd.f32 1e-06, %v5685_v8 }
0x1874   : > { %v11126_v37 = vpop.f32.mrf.mxu1 }
0x1875   : > { %12277 = vrsqrt.f32 %v5686_v9  ;;  %v5701_v59 = vadd.f32 1e-06, %v11126_v37 }
0x1876   : > { %v5695_v15 = vpop.f32.mrf.mxu1 }
0x1877   : > { %12279 = vrsqrt.f32 %v5701_v59  ;;  %v5696_v11 = vadd.f32 1e-06, %v5695_v15 }
0x1878   : > { %v11129_v40 = vpop.f32.mrf.mxu1 }
0x1879   : > { %12281 = vrsqrt.f32 %v5696_v11  ;;  %v5711_v50 = vadd.f32 1e-06, %v11129_v40 }
0x187a   : > { %v5705_v30 = vpop.f32.mrf.mxu1 }
0x187b   : > { %12283 = vrsqrt.f32 %v5711_v50  ;;  %v5706_v12 = vadd.f32 1e-06, %v5705_v30 }
0x187c   : > { %v12272_v19 = vpop.eup %12271 }
0x187d   : > { %v5723_v20 = vmul.f32 %v12272_v19, %v14251_v33  ;;  %12285 = vrsqrt.f32 %v5706_v12 }
0x187e   : > { %v12274_v10 = vpop.eup %12273 }
0x187f   : > { %v5735_v43 = vmul.f32 %v5733_v55, %v5723_v20  ;;  %v5722_v22 = vmul.f32 %v12274_v10, %v14253_v4 }
0x1880   : > { %v12276_v24 = vpop.eup %12275 }
0x1881   : > { %v14288_v25 = vadd.f32 %v5745_v7, %v5735_v43  ;;  %v5734_v34 = vmul.f32 %v5733_v55, %v5722_v22  ;;  %v5725_v51 = vmul.f32 %v12276_v24, %v14259_v36 }
0x1882   : > { %v12278_v26 = vpop.eup %12277 }
0x1883   : > { %v5737_v6 = vmul.f32 %v5733_v55, %v5725_v51  ;;  %v5724_v54 = vmul.f32 %v12278_v26, %v14261_v49  ;;  %v14292_v27 = vadd.f32 %v5745_v7, %v5734_v34  ;;  %v5763_v33 = vmul.f32 0.044715, %v14288_v25 }
0x1884   : > { %v12280_v48 = vpop.eup %12279 }
0x1885   : > { %v5736_v38 = vmul.f32 %v5733_v55, %v5724_v54  ;;  %v5727_v29 = vmul.f32 %v12280_v48, %v14267_v63  ;;  %v5762_v4 = vmul.f32 0.044715, %v14292_v27  ;;  %v5771_v52 = vmul.f32 %v5763_v33, %v14288_v25 }
0x1886   : > { %v12282_v39 = vpop.eup %12281  ;;  %v14298_v31 = vadd.f32 %v5745_v7, %v5737_v6 }
0x1887   : > { %v5739_v36 = vmul.f32 %v5733_v55, %v5727_v29  ;;  %v5726_v32 = vmul.f32 %v12282_v39, %v14269_v1  ;;  %v5770_v49 = vmul.f32 %v5762_v4, %v14292_v27  ;;  %v14302_v41 = vadd.f32 %v5745_v7, %v5736_v38 }
0x1888   : > { %v12284_v53 = vpop.eup %12283  ;;  %v5779_v35 = vmul.f32 %v5771_v52, %v14288_v25  ;;  %v5765_v42 = vmul.f32 0.044715, %v14298_v31 }
0x1889   : > { %v5738_v63 = vmul.f32 %v5733_v55, %v5726_v32  ;;  %v5729_v57 = vmul.f32 %v12284_v53, %v14275_v44  ;;  %v5778_v60 = vmul.f32 %v5770_v49, %v14292_v27  ;;  %v5764_v5 = vmul.f32 0.044715, %v14302_v41 }
0x188a   : > { %v12286_v61 = vpop.eup %12285  ;;  %v5787_v28 = vadd.f32 %v5779_v35, %v14288_v25  ;;  %v5773_v1 = vmul.f32 %v5765_v42, %v14298_v31  ;;  %v14311_v58 = vadd.f32 %v5745_v7, %v5739_v36  ;;  %v5754_v42 = vmul.f32 0.5, %v14292_v27 }
0x188b   : > { %v5741_v8 = vmul.f32 %v5733_v55, %v5729_v57  ;;  %v5728_v9 = vmul.f32 %v12286_v61, %v14277_v13  ;;  %v5786_v37 = vadd.f32 %v5778_v60, %v14292_v27  ;;  %v14315_v59 = vadd.f32 %v5745_v7, %v5738_v63 }
0x188c   : > { %v5795_v15 = vmul.f32 0.7978846, %v5787_v28  ;;  %v5772_v44 = vmul.f32 %v5764_v5, %v14302_v41  ;;  %v5781_v18 = vmul.f32 %v5773_v1, %v14298_v31  ;;  %v5767_v13 = vmul.f32 0.044715, %v14311_v58 }
0x188d   : > { %v5740_v11 = vmul.f32 %v5733_v55, %v5728_v9  ;;  %v5794_v40 = vmul.f32 0.7978846, %v5786_v37  ;;  %v5766_v50 = vmul.f32 0.044715, %v14315_v59  ;;  %v14326_v20 = vadd.f32 %v5745_v7, %v5741_v8 }
0x188e   : > { %12287 = vtanh.f32 %v5795_v15  ;;  %v5780_v56 = vmul.f32 %v5772_v44, %v14302_v41  ;;  %v5789_v30 = vadd.f32 %v5781_v18, %v14298_v31  ;;  %v5775_v43 = vmul.f32 %v5767_v13, %v14311_v58 }
0x188f   : > { %12289 = vtanh.f32 %v5794_v40  ;;  %v5774_v12 = vmul.f32 %v5766_v50, %v14315_v59  ;;  %v14324_v19 = vadd.f32 %v5745_v7, %v5740_v11  ;;  %v5769_v26 = vmul.f32 0.044715, %v14326_v20 }
0x1890   : > { %v5788_v10 = vadd.f32 %v5780_v56, %v14302_v41  ;;  %v5797_v55 = vmul.f32 0.7978846, %v5789_v30  ;;  %v5783_v51 = vmul.f32 %v5775_v43, %v14311_v58  ;;  %v5755_v57 = vmul.f32 0.5, %v14288_v25  ;;  %v12401_v43 = vld [vmem:[#allocation27] sm:$0xff] }
0x1891   : > { %v5782_v22 = vmul.f32 %v5774_v12, %v14315_v59  ;;  %v5768_v24 = vmul.f32 0.044715, %v14324_v19  ;;  %v5777_v48 = vmul.f32 %v5769_v26, %v14326_v20  ;;  %v5756_v27 = vmul.f32 0.5, %v14302_v41 }
0x1892   : > { %v5796_v34 = vmul.f32 0.7978846, %v5788_v10  ;;  %12291 = vtanh.f32 %v5797_v55  ;;  %v5791_v54 = vadd.f32 %v5783_v51, %v14311_v58  ;;  %v5757_v25 = vmul.f32 0.5, %v14298_v31 }
0x1893   : > { %v5790_v6 = vadd.f32 %v5782_v22, %v14315_v59  ;;  %v5776_v7 = vmul.f32 %v5768_v24, %v14324_v19  ;;  %v5785_v4 = vmul.f32 %v5777_v48, %v14326_v20  ;;  %v5758_v18 = vmul.f32 0.5, %v14315_v59 }
0x1894   : > { %12293 = vtanh.f32 %v5796_v34  ;;  %v5799_v29 = vmul.f32 0.7978846, %v5791_v54  ;;  %v5759_v31 = vmul.f32 0.5, %v14311_v58  ;;  %v5760_v30 = vmul.f32 0.5, %v14324_v19 }
0x1895   : > { %v5798_v33 = vmul.f32 0.7978846, %v5790_v6  ;;  %v5784_v38 = vmul.f32 %v5776_v7, %v14324_v19  ;;  %v5793_v52 = vadd.f32 %v5785_v4, %v14326_v20  ;;  %v5761_v58 = vmul.f32 0.5, %v14326_v20 }
0x1897   : > { %12295 = vtanh.f32 %v5798_v33  ;;  %v5792_v39 = vadd.f32 %v5784_v38, %v14324_v19  ;;  %v5801_v32 = vmul.f32 0.7978846, %v5793_v52  ;;  %v12400_v19 = vld [vmem:[#allocation27 + $0x40] sm:$0xff] }
0x1898   : > { %12297 = vtanh.f32 %v5799_v29 }
0x1899   : > { %v5800_v36 = vmul.f32 0.7978846, %v5792_v39 }
0x189b   : > { %v12288_v49 = vpop.eup %12287  ;;  %12299 = vtanh.f32 %v5800_v36  ;;  %v6296_v36 = vld [vmem:[#allocation28 + $0x2f8] sm:$0xff] }
0x189c   : > { %v12290_v53 = vpop.eup %12289  ;;  %v5811_v35 = vadd.f32 1.0, %v12288_v49  ;;  %12301 = vtanh.f32 %v5801_v32  ;;  %v6295_v32 = vld [vmem:[#allocation28 + $0x2f0] sm:$0xff]  ;;  %v12402_v49 = vld [vmem:[#allocation27 + $0x48] sm:$0xff] }
0x189d   : > { %v5810_v63 = vadd.f32 1.0, %v12290_v53  ;;  %v12403_v53 = vld [vmem:[#allocation27 + $0x8] sm:$0xff] }
0x189e   : > { %v14346_v28 = vmul.f32 %v5811_v35, %v5755_v57  ;;  %v6294_v35 = vld [vmem:[#allocation28 + $0x2e8] sm:$0xff]  ;;  %v12405_v57 = vld [vmem:[#allocation27 + $0x10] sm:$0xff] }
0x189f   : > { %v12292_v60 = vpop.eup %12291  ;;  %v14344_v61 = vmul.f32 %v5810_v63, %v5754_v42  ;;  %v12404_v42 = vld [vmem:[#allocation27 + $0x50] sm:$0xff]  ;;  %v6293_v63 = vld [vmem:[#allocation28 + $0x2e0] sm:$0xff] }
0x18a0   : > { %v5813_v1 = vadd.f32 1.0, %v12292_v60  ;;  %v12406_v60 = vld [vmem:[#allocation27 + $0x58] sm:$0xff] }
0x18a1   : > { %v12294_v5 = vpop.eup %12293  ;;  %11162 = vmatprep.mubr.f32.mxu0 %v14344_v61  ;;  %11206 = vmatprep.mubr.f32.mxu1 %v14344_v61 }
0x18a2   : > { %11163 = vmatmul.mubr.f32.vlgmr.msra.gmra.mxu0 %v14346_v28  ;;  %11207 = vmatmul.mubr.f32.vlgmr.msra.gmra.mxu1 %v14346_v28  ;;  %v5812_v8 = vadd.f32 1.0, %v12294_v5  ;;  %v14356_v44 = vmul.f32 %v5813_v1, %v5757_v25  ;;  %v12407_v5 = vld [vmem:[#allocation27 + $0x60] sm:$0xff]  ;;  %v6292_v1 = vld [vmem:[#allocation28 + $0x2d8] sm:$0xff] }
0x18a3   : > { %v12409_v25 = vld [vmem:[#allocation27 + $0x20] sm:$0xff] }
0x18a4   : > { %v12296_v9 = vpop.eup %12295  ;;  %v14354_v37 = vmul.f32 %v5812_v8, %v5756_v27  ;;  %v12408_v27 = vld [vmem:[#allocation27 + $0x18] sm:$0xff]  ;;  %v6291_v8 = vld [vmem:[#allocation28 + $0x2d0] sm:$0xff] }
0x18a5   : > { %v12298_v15 = vpop.eup %12297  ;;  %v5814_v11 = vadd.f32 1.0, %v12296_v9  ;;  %v12410_v9 = vld [vmem:[#allocation27 + $0x68] sm:$0xff] }
0x18a6   : > { %11165 = vmatprep.mubr.f32.mxu0 %v14354_v37  ;;  %11209 = vmatprep.mubr.f32.mxu1 %v14354_v37  ;;  %v5815_v40 = vadd.f32 1.0, %v12298_v15  ;;  %v12411_v15 = vld [vmem:[#allocation27 + $0x70] sm:$0xff] }
0x18a7   : > { %11166 = vmatmul.mubr.f32.gmra.mxu0 %v14356_v44  ;;  %11210 = vmatmul.mubr.f32.gmra.mxu1 %v14356_v44  ;;  %v14363_v41 = vmul.f32 %v5814_v11, %v5758_v18  ;;  %v6290_v18 = vld [vmem:[#allocation28 + $0x2c8] sm:$0xff] }
0x18a8   : > { %v12300_v50 = vpop.eup %12299  ;;  %v14368_v59 = vmul.f32 %v5815_v40, %v5759_v31  ;;  %v12412_v11 = vld [vmem:[#allocation27 + $0x28] sm:$0xff]  ;;  %v6289_v40 = vld [vmem:[#allocation28 + $0x2c0] sm:$0xff]  ;;  %v12413_v31 = vld [vmem:[#allocation27 + $0x30] sm:$0xff] }
0x18a9   : > { %v12302_v56 = vpop.eup %12301  ;;  %11168 = vmatprep.mubr.f32.mxu0 %v14363_v41  ;;  %11212 = vmatprep.mubr.f32.mxu1 %v14363_v41  ;;  %v5816_v13 = vadd.f32 1.0, %v12300_v50  ;;  %v12414_v50 = vld [vmem:[#allocation27 + $0x78] sm:$0xff] }
0x18aa   : > { %v5817_v12 = vadd.f32 1.0, %v12302_v56  ;;  %v6288_v56 = vld [vmem:[#allocation28 + $0x2b8] sm:$0xff] }
0x18ab   : > { %11169 = vmatmul.mubr.f32.gmra.mxu0 %v14368_v59  ;;  %11213 = vmatmul.mubr.f32.gmra.mxu1 %v14368_v59  ;;  %v14373_v10 = vmul.f32 %v5816_v13, %v5760_v30  ;;  %v12415_v30 = vld [vmem:[#allocation27 + $0x38] sm:$0xff]  ;;  %v6287_v13 = vld [vmem:[#allocation28 + $0x2b0] sm:$0xff] }
0x18ac   : > { %v14378_v55 = vmul.f32 %v5817_v12, %v5761_v58  ;;  %v6286_v12 = vld [vmem:[#allocation28 + $0x2a8] sm:$0xff]  ;;  %v6285_v58 = vld [vmem:[#allocation28 + $0x2a0] sm:$0xff] }
0x18ad   : > { %11171 = vmatprep.mubr.f32.mxu0 %v14373_v10  ;;  %11215 = vmatprep.mubr.f32.mxu1 %v14373_v10 }
0x18af   : > { %11172 = vmatmul.mubr.f32.gmra.mxu0 %v14378_v55  ;;  %11216 = vmatmul.mubr.f32.gmra.mxu1 %v14378_v55 }
0x18b0   : > { %11234 = vmatprep.mubr.msk.f32.mxu0 %vm2793_vm6, %v12400_v19  ;;  %11262 = vmatprep.mubr.msk.f32.mxu1 %vm2793_vm6, %v12401_v43  ;;  %v6284_v19 = vld [vmem:[#allocation28 + $0x298] sm:$0xff]  ;;  %v6282_v43 = vld [vmem:[#allocation28 + $0x288] sm:$0xff] }
0x1962   : > { %v11164_v22 = vpop.f32.mrf.mxu0  ;;  %v11208_v24 = vpop.f32.mrf.mxu1 }
0x1964   : > { %v5909_v34 = vpop.f32.mrf.mxu0  ;;  %v6031_v20 = vpop.f32.mrf.mxu1 }
0x1967   : > { %v11167_v51 = vpop.f32.mrf.mxu0  ;;  %v11211_v26 = vpop.f32.mrf.mxu1 }
0x1969   : > { %v5919_v6 = vpop.f32.mrf.mxu0  ;;  %v6041_v7 = vpop.f32.mrf.mxu1 }
0x196b   : > { %v11170_v54 = vpop.f32.mrf.mxu0  ;;  %v11214_v48 = vpop.f32.mrf.mxu1 }
0x196d   : > { %v5929_v33 = vpop.f32.mrf.mxu0  ;;  %v6051_v38 = vpop.f32.mrf.mxu1 }
0x196f   : > { %v11173_v29 = vpop.f32.mrf.mxu0  ;;  %v11217_v4 = vpop.f32.mrf.mxu1 }
0x1970   : > { %11218 = vmatprep.subr.mxu0 %v11217_v4  ;;  %11246 = vmatprep.subr.mxu1 %v11173_v29 }
0x1971   : > { %v5939_v39 = vpop.f32.mrf.mxu0  ;;  %v6061_v52 = vpop.f32.mrf.mxu1  ;;  %11219 = vmatpush3.msra.mxu0 %v11217_v4  ;;  %11247 = vmatpush3.msra.mxu1 %v11173_v29 }
0x1972   : > { %11220 = vmatprep.subr.mxu0 %v6061_v52  ;;  %11248 = vmatprep.subr.mxu1 %v5939_v39 }
0x1973   : > { %11221 = vmatpush3.msra.mxu0 %v6061_v52  ;;  %11249 = vmatpush3.msra.mxu1 %v5939_v39 }
0x1974   : > { %11222 = vmatprep.subr.mxu0 %v11214_v48  ;;  %11250 = vmatprep.subr.mxu1 %v11170_v54 }
0x1975   : > { %11223 = vmatpush3.msra.mxu0 %v11214_v48  ;;  %11251 = vmatpush3.msra.mxu1 %v11170_v54 }
0x1976   : > { %11224 = vmatprep.subr.mxu0 %v6051_v38  ;;  %11252 = vmatprep.subr.mxu1 %v5929_v33 }
0x1977   : > { %11225 = vmatpush3.msra.mxu0 %v6051_v38  ;;  %11253 = vmatpush3.msra.mxu1 %v5929_v33 }
0x1978   : > { %11226 = vmatprep.subr.mxu0 %v11211_v26  ;;  %11254 = vmatprep.subr.mxu1 %v11167_v51 }
0x1979   : > { %11227 = vmatpush3.msra.mxu0 %v11211_v26  ;;  %11255 = vmatpush3.msra.mxu1 %v11167_v51  ;;  %v14452_v51 = vld [vmem:[#allocation25 + $0x20] sm:$0xff] }
0x197a   : > { %11228 = vmatprep.subr.mxu0 %v6041_v7  ;;  %11256 = vmatprep.subr.mxu1 %v5919_v6 }
0x197b   : > { %11229 = vmatpush3.msra.mxu0 %v6041_v7  ;;  %11257 = vmatpush3.msra.mxu1 %v5919_v6 }
0x197c   : > { %11230 = vmatprep.subr.mxu0 %v11208_v24  ;;  %11258 = vmatprep.subr.mxu1 %v11164_v22 }
0x197d   : > { %11231 = vmatpush3.msra.mxu0 %v11208_v24  ;;  %11259 = vmatpush3.msra.mxu1 %v11164_v22  ;;  %v6281_v22 = vld [vmem:[#allocation28 + $0x280] sm:$0xff]  ;;  %v14407_v24 = vld [vmem:[#allocation25 + $0x70] sm:$0xff] }
0x197e   : > { %11232 = vmatprep.subr.mxu0 %v6031_v20  ;;  %11260 = vmatprep.subr.mxu1 %v5909_v34 }
0x197f   : > { %11233 = vmatpush3.msra.mxu0 %v6031_v20  ;;  %11261 = vmatpush3.msra.mxu1 %v5909_v34  ;;  %v14412_v34 = vld [vmem:[#allocation25 + $0x68] sm:$0xff]  ;;  %v14444_v20 = vld [vmem:[#allocation25 + $0x30] sm:$0xff] }
0x1980   : > { %11235 = vmatmul.mubr.msk.f32.vlgmr.msra.gmra.mxu0 %vm2793_vm6, %v12402_v49  ;;  %11274 = vmatprep.subr.mxu0 %v6296_v36  ;;  %v12429_v49 = vld [vmem:[#allocation27 + $0x90] sm:$0xff] }
0x1981   : > { %11263 = vmatmul.mubr.msk.f32.vlgmr.msra.gmra.mxu1 %vm2793_vm6, %v12403_v53  ;;  %11275 = vmatpush3.msra.mxu0 %v6296_v36  ;;  %v12430_v53 = vld [vmem:[#allocation27 + $0x98] sm:$0xff] }
0x1982   : > { %11276 = vmatprep.subr.mxu0 %v6295_v32  ;;  %11237 = vmatprep.mubr.msk.f32.mxu0 %vm2793_vm6, %v12404_v42  ;;  %v12432_v42 = vld [vmem:[#allocation27 + $0xa8] sm:$0xff] }
0x1983   : > { %11277 = vmatpush3.msra.mxu0 %v6295_v32  ;;  %11265 = vmatprep.mubr.msk.f32.mxu1 %vm2793_vm6, %v12405_v57  ;;  %v12428_v32 = vld [vmem:[#allocation27 + $0x88] sm:$0xff]  ;;  %v12434_v57 = vld [vmem:[#allocation27 + $0xb8] sm:$0xff] }
0x1984   : > { %11238 = vmatmul.mubr.msk.f32.gmra.mxu0 %vm2793_vm6, %v12406_v60  ;;  %11278 = vmatprep.subr.mxu0 %v6294_v35  ;;  %v14511_v60 = vld [vmem:[#allocation25 + $0x18] sm:$0xff] }
0x1985   : > { %11279 = vmatpush3.msra.mxu0 %v6294_v35  ;;  %11240 = vmatprep.mubr.msk.f32.mxu0 %vm2793_vm6, %v12407_v5  ;;  %v12431_v35 = vld [vmem:[#allocation27 + $0xa0] sm:$0xff]  ;;  %v14515_v5 = vld [vmem:[#allocation25 + $0x10] sm:$0xff] }
0x1986   : > { %11280 = vmatprep.subr.mxu0 %v6293_v63  ;;  %11266 = vmatmul.mubr.msk.f32.gmra.mxu1 %vm2793_vm6, %v12408_v27  ;;  %v14523_v27 = vld [vmem:[#allocation25] sm:$0xff] }
0x1987   : > { %11281 = vmatpush3.msra.mxu0 %v6293_v63  ;;  %11268 = vmatprep.mubr.msk.f32.mxu1 %vm2793_vm6, %v12409_v25  ;;  %v12433_v63 = vld [vmem:[#allocation27 + $0xb0] sm:$0xff] }
0x1988   : > { %11241 = vmatmul.mubr.msk.f32.gmra.mxu0 %vm2793_vm6, %v12410_v9  ;;  %11282 = vmatprep.subr.mxu0 %v6292_v1 }
0x1989   : > { %11283 = vmatpush3.msra.mxu0 %v6292_v1  ;;  %11243 = vmatprep.mubr.msk.f32.mxu0 %vm2793_vm6, %v12411_v15  ;;  %v14519_v1 = vld [vmem:[#allocation25 + $0x8] sm:$0xff] }
0x198a   : > { %11284 = vmatprep.subr.mxu0 %v6291_v8  ;;  %11269 = vmatmul.mubr.msk.f32.gmra.mxu1 %vm2793_vm6, %v12412_v11 }
0x198b   : > { %11285 = vmatpush3.msra.mxu0 %v6291_v8  ;;  %11271 = vmatprep.mubr.msk.f32.mxu1 %vm2793_vm6, %v12413_v31 }
0x198c   : > { %11244 = vmatmul.mubr.msk.f32.gmra.mxu0 %vm2793_vm6, %v12414_v50  ;;  %11286 = vmatprep.subr.mxu0 %v6290_v18  ;;  %v12439_v50 = vld [vmem:[#allocation31] sm:$0xff] }
0x198d   : > { %11287 = vmatpush3.msra.mxu0 %v6290_v18  ;;  %11306 = vmatprep.mubr.f32.mxu0 %v14344_v61  ;;  %v6283_v61 = vld [vmem:[#allocation28 + $0x290] sm:$0xff] }
0x198e   : > { %11288 = vmatprep.subr.mxu0 %v6289_v40  ;;  %11272 = vmatmul.mubr.msk.f32.gmra.mxu1 %vm2793_vm6, %v12415_v30 }
0x198f   : > { %11289 = vmatpush3.msra.mxu0 %v6289_v40  ;;  %11334 = vmatprep.mubr.msk.f32.mxu1 %vm2793_vm6, %v14172_v21  ;;  %v14402_v21 = vld [vmem:[#allocation25 + $0x78] sm:$0xff] }
0x1990   : > { %11290 = vmatprep.subr.mxu0 %v6288_v56 }
0x1991   : > { %11291 = vmatpush3.msra.mxu0 %v6288_v56  ;;  %v6518_v56 = vrot.slane %v12439_v50, %v13852_v16 }
0x1992   : > { %11292 = vmatprep.subr.mxu0 %v6287_v13 }
0x1993   : > { %11293 = vmatpush3.msra.mxu0 %v6287_v13 }
0x1994   : > { %11294 = vmatprep.subr.mxu0 %v6286_v12 }
0x1995   : > { %11295 = vmatpush3.msra.mxu0 %v6286_v12 }
0x1996   : > { %11296 = vmatprep.subr.mxu0 %v6285_v58 }
0x1997   : > { %11297 = vmatpush3.msra.mxu0 %v6285_v58 }
0x1998   : > { %11298 = vmatprep.subr.mxu0 %v6284_v19 }
0x1999   : > { %11299 = vmatpush3.msra.mxu0 %v6284_v19 }
0x199a   : > { %11300 = vmatprep.subr.mxu0 %v6283_v61 }
0x199b   : > { %11301 = vmatpush3.msra.mxu0 %v6283_v61 }
0x199c   : > { %11302 = vmatprep.subr.mxu0 %v6282_v43 }
0x199d   : > { %11303 = vmatpush3.msra.mxu0 %v6282_v43 }
0x199e   : > { %11304 = vmatprep.subr.mxu0 %v6281_v22 }
0x199f   : > { %11305 = vmatpush3.msra.mxu0 %v6281_v22 }
0x19a0   : > { %11307 = vmatmul.mubr.f32.vlgmr.msra.gmra.mxu0 %v14346_v28  ;;  %11390 = vmatprep.subr.mxu0 %v14402_v21  ;;  %v14417_v28 = vld [vmem:[#allocation25 + $0x60] sm:$0xff] }
0x19a1   : > { %11309 = vmatprep.mubr.f32.mxu0 %v14354_v37  ;;  %11391 = vmatpush3.msra.mxu0 %v14402_v21  ;;  %v14422_v37 = vld [vmem:[#allocation25 + $0x58] sm:$0xff] }
0x19a2   : > { %11392 = vmatprep.subr.mxu0 %v14407_v24 }
0x19a3   : > { %11393 = vmatpush3.msra.mxu0 %v14407_v24 }
0x19a4   : > { %11310 = vmatmul.mubr.f32.gmra.mxu0 %v14356_v44  ;;  %11394 = vmatprep.subr.mxu0 %v14412_v34  ;;  %v14427_v44 = vld [vmem:[#allocation25 + $0x50] sm:$0xff] }
0x19a5   : > { %11312 = vmatprep.mubr.f32.mxu0 %v14363_v41  ;;  %11395 = vmatpush3.msra.mxu0 %v14412_v34  ;;  %v14432_v41 = vld [vmem:[#allocation25 + $0x48] sm:$0xff] }
0x19a6   : > { %11396 = vmatprep.subr.mxu0 %v14417_v28 }
0x19a7   : > { %11397 = vmatpush3.msra.mxu0 %v14417_v28 }
0x19a8   : > { %11313 = vmatmul.mubr.f32.gmra.mxu0 %v14368_v59  ;;  %11398 = vmatprep.subr.mxu0 %v14422_v37  ;;  %v14436_v59 = vld [vmem:[#allocation25 + $0x40] sm:$0xff] }
0x19a9   : > { %11315 = vmatprep.mubr.f32.mxu0 %v14373_v10  ;;  %11399 = vmatpush3.msra.mxu0 %v14422_v37  ;;  %v14440_v10 = vld [vmem:[#allocation25 + $0x38] sm:$0xff] }
0x19aa   : > { %11400 = vmatprep.subr.mxu0 %v14427_v44 }
0x19ab   : > { %11401 = vmatpush3.msra.mxu0 %v14427_v44 }
0x19ac   : > { %11316 = vmatmul.mubr.f32.gmra.mxu0 %v14378_v55  ;;  %11402 = vmatprep.subr.mxu0 %v14432_v41  ;;  %v14448_v55 = vld [vmem:[#allocation25 + $0x28] sm:$0xff] }
0x19ad   : > { %11403 = vmatpush3.msra.mxu0 %v14432_v41 }
0x19ae   : > { %11404 = vmatprep.subr.mxu0 %v14436_v59 }
0x19af   : > { %11405 = vmatpush3.msra.mxu0 %v14436_v59 }
0x19b0   : > { %11406 = vmatprep.subr.mxu0 %v14440_v10 }
0x19b1   : > { %11407 = vmatpush3.msra.mxu0 %v14440_v10 }
0x19b2   : > { %11408 = vmatprep.subr.mxu0 %v14444_v20 }
0x19b3   : > { %11409 = vmatpush3.msra.mxu0 %v14444_v20 }
0x19b4   : > { %11410 = vmatprep.subr.mxu0 %v14448_v55 }
0x19b5   : > { %11411 = vmatpush3.msra.mxu0 %v14448_v55 }
0x19b6   : > { %11412 = vmatprep.subr.mxu0 %v14452_v51 }
0x19b7   : > { %11413 = vmatpush3.msra.mxu0 %v14452_v51 }
0x19b8   : > { %11414 = vmatprep.subr.mxu0 %v14223_v0 }
0x19b9   : > { %11415 = vmatpush3.msra.mxu0 %v14223_v0 }
0x19ba   : > { %11416 = vmatprep.subr.mxu0 %v14227_v23 }
0x19bb   : > { %11417 = vmatpush3.msra.mxu0 %v14227_v23 }
0x19bc   : > { %11418 = vmatprep.subr.mxu0 %v14231_v45 }
0x19bd   : > { %11419 = vmatpush3.msra.mxu0 %v14231_v45 }
0x19be   : > { %11420 = vmatprep.subr.mxu0 %v14235_v17 }
0x19bf   : > { %11421 = vmatpush3.msra.mxu0 %v14235_v17 }
0x1a40   : > { %v14464_v26 = vpop.f32.mrf.mxu0 }
0x1a41   : > { %v11264_v8 = vpop.f32.mrf.mxu1 }
0x1a42   : > { %v14466_v6 = vpop.f32.mrf.mxu0  ;;  %v6247_v30 = vadd.f32 %v11264_v8, %v14464_v26 }
0x1a43   : > { %v6241_v25 = vpop.f32.mrf.mxu1 }
0x1a44   : > { %v14468_v7 = vpop.f32.mrf.mxu0  ;;  %v6242_v12 = vadd.f32 %v6241_v25, %v14466_v6 }
0x1a46   : > { %v14470_v54 = vpop.f32.mrf.mxu0  ;;  %v11267_v9 = vpop.f32.mrf.mxu1 }
0x1a47   : > { %v6257_v61 = vadd.f32 %v11267_v9, %v14468_v7 }
0x1a48   : > { %v14472_v0 = vpop.f32.mrf.mxu0  ;;  %v6251_v15 = vpop.f32.mrf.mxu1 }
0x1a4a   : > { %v14474_v48 = vpop.f32.mrf.mxu0  ;;  %v11270_v18 = vpop.f32.mrf.mxu1 }
0x1a4c   : > { %v14476_v23 = vpop.f32.mrf.mxu0  ;;  %v6261_v11 = vpop.f32.mrf.mxu1 }
0x1a4e   : > { %v14478_v33 = vpop.f32.mrf.mxu0  ;;  %v11273_v40 = vpop.f32.mrf.mxu1 }
0x1a4f   : > { %v6277_v6 = vadd.f32 %v11273_v40, %v14476_v23 }
0x1a50   : > { %v6271_v31 = vpop.f32.mrf.mxu1 }
0x1a60   : > { %v11308_v45 = vpop.f32.mrf.mxu0 }
0x1a62   : > { %v6363_v38 = vpop.f32.mrf.mxu0 }
0x1a64   : > { %v11311_v29 = vpop.f32.mrf.mxu0 }
0x1a66   : > { %v6373_v17 = vpop.f32.mrf.mxu0 }
0x1a68   : > { %v11314_v4 = vpop.f32.mrf.mxu0 }
0x1a6a   : > { %v6383_v39 = vpop.f32.mrf.mxu0 }
0x1a6c   : > { %v11317_v52 = vpop.f32.mrf.mxu0 }
0x1a6d   : > { %11318 = vmatprep.subr.mxu1 %v11317_v52 }
0x1a6e   : > { %v6393_v36 = vpop.f32.mrf.mxu0  ;;  %11319 = vmatpush3.msra.mxu1 %v11317_v52 }
0x1a6f   : > { %11320 = vmatprep.subr.mxu1 %v6393_v36 }
0x1a70   : > { %11321 = vmatpush3.msra.mxu1 %v6393_v36 }
0x1a71   : > { %11322 = vmatprep.subr.mxu1 %v11314_v4 }
0x1a72   : > { %11323 = vmatpush3.msra.mxu1 %v11314_v4 }
0x1a73   : > { %11324 = vmatprep.subr.mxu1 %v6383_v39 }
0x1a74   : > { %11325 = vmatpush3.msra.mxu1 %v6383_v39 }
0x1a75   : > { %11326 = vmatprep.subr.mxu1 %v11311_v29 }
0x1a76   : > { %11327 = vmatpush3.msra.mxu1 %v11311_v29 }
0x1a77   : > { %11328 = vmatprep.subr.mxu1 %v6373_v17 }
0x1a78   : > { %11329 = vmatpush3.msra.mxu1 %v6373_v17 }
0x1a79   : > { %11330 = vmatprep.subr.mxu1 %v11308_v45 }
0x1a7a   : > { %11331 = vmatpush3.msra.mxu1 %v11308_v45 }
0x1a7b   : > { %11332 = vmatprep.subr.mxu1 %v6363_v38 }
0x1a7c   : > { %11333 = vmatpush3.msra.mxu1 %v6363_v38  ;;  %v6272_v38 = vadd.f32 %v6271_v31, %v14478_v33 }
0x1a7d   : > { %11335 = vmatmul.mubr.msk.f32.vlgmr.msra.gmra.mxu1 %vm2793_vm6, %v12428_v32  ;;  %11346 = vmatprep.subr.mxu1 %v14402_v21 }
0x1a7e   : > { %11337 = vmatprep.mubr.msk.f32.mxu1 %vm2793_vm6, %v12429_v49  ;;  %11347 = vmatpush3.msra.mxu1 %v14402_v21 }
0x1a7f   : > { %11348 = vmatprep.subr.mxu1 %v14407_v24 }
0x1a80   : > { %11349 = vmatpush3.msra.mxu1 %v14407_v24  ;;  %v6252_v24 = vadd.f32 %v6251_v15, %v14470_v54 }
0x1a81   : > { %11338 = vmatmul.mubr.msk.f32.gmra.mxu1 %vm2793_vm6, %v12430_v53  ;;  %11350 = vmatprep.subr.mxu1 %v14412_v34 }
0x1a82   : > { %11340 = vmatprep.mubr.msk.f32.mxu1 %vm2793_vm6, %v12431_v35  ;;  %11351 = vmatpush3.msra.mxu1 %v14412_v34 }
0x1a83   : > { %11352 = vmatprep.subr.mxu1 %v14417_v28 }
0x1a84   : > { %11353 = vmatpush3.msra.mxu1 %v14417_v28 }
0x1a85   : > { %11341 = vmatmul.mubr.msk.f32.gmra.mxu1 %vm2793_vm6, %v12432_v42  ;;  %11354 = vmatprep.subr.mxu1 %v14422_v37 }
0x1a86   : > { %11343 = vmatprep.mubr.msk.f32.mxu1 %vm2793_vm6, %v12433_v63  ;;  %11355 = vmatpush3.msra.mxu1 %v14422_v37 }
0x1a87   : > { %11356 = vmatprep.subr.mxu1 %v14427_v44 }
0x1a88   : > { %11357 = vmatpush3.msra.mxu1 %v14427_v44  ;;  %v6267_v44 = vadd.f32 %v11270_v18, %v14472_v0 }
0x1a89   : > { %11344 = vmatmul.mubr.msk.f32.gmra.mxu1 %vm2793_vm6, %v12434_v57  ;;  %11358 = vmatprep.subr.mxu1 %v14432_v41 }
0x1a8a   : > { %11359 = vmatpush3.msra.mxu1 %v14432_v41 }
0x1a8b   : > { %11360 = vmatprep.subr.mxu1 %v14436_v59 }
0x1a8c   : > { %11361 = vmatpush3.msra.mxu1 %v14436_v59 }
0x1a8d   : > { %11362 = vmatprep.subr.mxu1 %v14440_v10 }
0x1a8e   : > { %11363 = vmatpush3.msra.mxu1 %v14440_v10 }
0x1a8f   : > { %11364 = vmatprep.subr.mxu1 %v14444_v20 }
0x1a90   : > { %11365 = vmatpush3.msra.mxu1 %v14444_v20  ;;  %v6262_v20 = vadd.f32 %v6261_v11, %v14474_v48 }
0x1a91   : > { %11366 = vmatprep.subr.mxu1 %v14448_v55 }
0x1a92   : > { %11367 = vmatpush3.msra.mxu1 %v14448_v55 }
0x1a93   : > { %11368 = vmatprep.subr.mxu1 %v14452_v51 }
0x1a94   : > { %11369 = vmatpush3.msra.mxu1 %v14452_v51 }
0x1a95   : > { %11370 = vmatprep.subr.mxu1 %v14511_v60 }
0x1a96   : > { %11371 = vmatpush3.msra.mxu1 %v14511_v60 }
0x1a97   : > { %11372 = vmatprep.subr.mxu1 %v14515_v5 }
0x1a98   : > { %11373 = vmatpush3.msra.mxu1 %v14515_v5 }
0x1a99   : > { %11374 = vmatprep.subr.mxu1 %v14519_v1 }
0x1a9a   : > { %11375 = vmatpush3.msra.mxu1 %v14519_v1 }
0x1a9b   : > { %11376 = vmatprep.subr.mxu1 %v14523_v27 }
0x1a9c   : > { %11377 = vmatpush3.msra.mxu1 %v14523_v27 }
0x1b3d   : > { %v11336_v13 = vpop.f32.mrf.mxu1 }
0x1b3e   : > { %v6508_v58 = vadd.f32 %v11336_v13, %v6247_v30 }
0x1b3f   : > { %v6468_v19 = vpop.f32.mrf.mxu1 }
0x1b40   : > { %v6520_v43 = vadd.f32 %v6518_v56, %v6508_v58  ;;  %v6507_v22 = vadd.f32 %v6468_v19, %v6242_v12  ;;  %v6881_v58 = vld [vmem:[#allocation28 + $0x378] sm:$0xff] }
0x1b41   : > { %v11339_v21 = vpop.f32.mrf.mxu1  ;;  %v7003_v19 = vld [vmem:[#allocation28 + $0x3f8] sm:$0xff]  ;;  %11434 = vmatprep.subr.mxu1 %v6881_v58 }
0x1b42   : > { %v6519_v34 = vadd.f32 %v6518_v56, %v6507_v22  ;;  %v6510_v28 = vadd.f32 %v11339_v21, %v6257_v61  ;;  %11478 = vmatprep.subr.mxu0 %v7003_v19  ;;  %v6880_v61 = vld [vmem:[#allocation28 + $0x370] sm:$0xff]  ;;  %v6879_v22 = vld [vmem:[#allocation28 + $0x368] sm:$0xff] }
0x1b43   : > { %v6478_v37 = vpop.f32.mrf.mxu1  ;;  %v7001_v21 = vld [vmem:[#allocation28 + $0x3e8] sm:$0xff] }
0x1b44   : > { %v6522_v41 = vadd.f32 %v6518_v56, %v6510_v28  ;;  %v6509_v59 = vadd.f32 %v6478_v37, %v6252_v24  ;;  %11378 = vmatprep.mubr.f32.mxu1 %v6519_v34  ;;  %v6878_v24 = vld [vmem:[#allocation28 + $0x360] sm:$0xff]  ;;  %v6877_v28 = vld [vmem:[#allocation28 + $0x358] sm:$0xff] }
0x1b45   : > { %v11342_v10 = vpop.f32.mrf.mxu1  ;;  %11379 = vmatmul.mubr.f32.vlgmr.msra.gmra.mxu1 %v6520_v43  ;;  %v6999_v37 = vld [vmem:[#allocation28 + $0x3d8] sm:$0xff] }
0x1b46   : > { %v6521_v55 = vadd.f32 %v6518_v56, %v6509_v59  ;;  %v6512_v51 = vadd.f32 %v11342_v10, %v6267_v44  ;;  %11435 = vmatpush3.msra.mxu1 %v6881_v58  ;;  %v6876_v44 = vld [vmem:[#allocation28 + $0x350] sm:$0xff]  ;;  %v6875_v59 = vld [vmem:[#allocation28 + $0x348] sm:$0xff] }
0x1b47   : > { %v6488_v26 = vpop.f32.mrf.mxu1  ;;  %11436 = vmatprep.subr.mxu1 %v6880_v61  ;;  %v6997_v10 = vld [vmem:[#allocation28 + $0x3c8] sm:$0xff] }
0x1b48   : > { %v6524_v7 = vadd.f32 %v6518_v56, %v6512_v51  ;;  %v6511_v45 = vadd.f32 %v6488_v26, %v6262_v20  ;;  %11381 = vmatprep.mubr.f32.mxu1 %v6521_v55  ;;  %11437 = vmatpush3.msra.mxu1 %v6880_v61  ;;  %v6874_v20 = vld [vmem:[#allocation28 + $0x340] sm:$0xff]  ;;  %v6873_v51 = vld [vmem:[#allocation28 + $0x338] sm:$0xff]  ;;  %v12440_v61 = vld [vmem:[#allocation31 + $0x8] sm:$0x1f] }
0x1b49   : > { %v11345_v54 = vpop.f32.mrf.mxu1  ;;  %11382 = vmatmul.mubr.f32.gmra.mxu1 %v6522_v41  ;;  %11438 = vmatprep.subr.mxu1 %v6879_v22  ;;  %v6995_v26 = vld [vmem:[#allocation28 + $0x3b8] sm:$0xff] }
0x1b4a   : > { %v6523_v0 = vadd.f32 %v6518_v56, %v6511_v45  ;;  %v6514_v29 = vadd.f32 %v11345_v54, %v6277_v6  ;;  %11439 = vmatpush3.msra.mxu1 %v6879_v22  ;;  %v6872_v6 = vld [vmem:[#allocation28 + $0x330] sm:$0xff]  ;;  %v6871_v45 = vld [vmem:[#allocation28 + $0x328] sm:$0xff] }
0x1b4b   : > { %v6498_v17 = vpop.f32.mrf.mxu1  ;;  %11440 = vmatprep.subr.mxu1 %v6878_v24  ;;  %v6993_v54 = vld [vmem:[#allocation28 + $0x3a8] sm:$0xff] }
0x1b4c   : > { %v6526_v4 = vadd.f32 %v6518_v56, %v6514_v29  ;;  %v6513_v39 = vadd.f32 %v6498_v17, %v6272_v38  ;;  %11384 = vmatprep.mubr.f32.mxu1 %v6523_v0  ;;  %11441 = vmatpush3.msra.mxu1 %v6878_v24  ;;  %v6870_v38 = vld [vmem:[#allocation28 + $0x320] sm:$0xff]  ;;  %v6869_v29 = vld [vmem:[#allocation28 + $0x318] sm:$0xff]  ;;  %v6784_v24 = vrot.slane %v12440_v61, %v13823_v62 }
0x1b4d   : > { %11385 = vmatmul.mubr.f32.gmra.mxu1 %v6524_v7  ;;  %11442 = vmatprep.subr.mxu1 %v6877_v28  ;;  %v6991_v17 = vld [vmem:[#allocation28 + $0x398] sm:$0xff] }
0x1b4e   : > { %v6525_v48 = vadd.f32 %v6518_v56, %v6513_v39  ;;  %11443 = vmatpush3.msra.mxu1 %v6877_v28  ;;  %v6990_v39 = vld [vmem:[#allocation28 + $0x390] sm:$0xff] }
0x1b4f   : > { %11444 = vmatprep.subr.mxu1 %v6876_v44 }
0x1b50   : > { %11387 = vmatprep.mubr.f32.mxu1 %v6525_v48  ;;  %11445 = vmatpush3.msra.mxu1 %v6876_v44 }
0x1b51   : > { %11388 = vmatmul.mubr.f32.gmra.mxu1 %v6526_v4  ;;  %11446 = vmatprep.subr.mxu1 %v6875_v59 }
0x1b52   : > { %11447 = vmatpush3.msra.mxu1 %v6875_v59 }
0x1b53   : > { %11448 = vmatprep.subr.mxu1 %v6874_v20 }
0x1b54   : > { %11449 = vmatpush3.msra.mxu1 %v6874_v20 }
0x1b55   : > { %11450 = vmatprep.subr.mxu1 %v6873_v51 }
0x1b56   : > { %11451 = vmatpush3.msra.mxu1 %v6873_v51 }
0x1b57   : > { %11452 = vmatprep.subr.mxu1 %v6872_v6 }
0x1b58   : > { %11453 = vmatpush3.msra.mxu1 %v6872_v6 }
0x1b59   : > { %11454 = vmatprep.subr.mxu1 %v6871_v45 }
0x1b5a   : > { %11455 = vmatpush3.msra.mxu1 %v6871_v45 }
0x1b5b   : > { %11456 = vmatprep.subr.mxu1 %v6870_v38 }
0x1b5c   : > { %11457 = vmatpush3.msra.mxu1 %v6870_v38 }
0x1b5d   : > { %11458 = vmatprep.subr.mxu1 %v6869_v29 }
0x1b5e   : > { %11459 = vmatpush3.msra.mxu1 %v6869_v29 }
0x1c05   : > { %v11380_v52 = vpop.f32.mrf.mxu1 }
0x1c06   : > { %v14536_v36 = vsub.f32 %v6520_v43, %v11380_v52  ;;  %v7002_v43 = vld [vmem:[#allocation28 + $0x3f0] sm:$0xff]  ;;  %v6989_v52 = vld [vmem:[#allocation28 + $0x388] sm:$0xff] }
0x1c07   : > { %v6593_v23 = vpop.f32.mrf.mxu1 }
0x1c08   : > { %v14538_v32 = vsub.f32 %v6519_v34, %v6593_v23  ;;  %v6641_v53 = vmul.f32 %v14536_v36, %v14536_v36  ;;  %v7000_v34 = vld [vmem:[#allocation28 + $0x3e0] sm:$0xff] }
0x1c09   : > { %v11383_v49 = vpop.f32.mrf.mxu1  ;;  %v6866_v23 = vld [vmem:[#allocation28 + $0x300] sm:$0xff] }
0x1c0a   : > { %v6640_v33 = vmul.f32 %v14538_v32, %v14538_v32  ;;  %v14544_v35 = vsub.f32 %v6522_v41, %v11383_v49  ;;  %v6998_v41 = vld [vmem:[#allocation28 + $0x3d0] sm:$0xff]  ;;  %v6988_v49 = vld [vmem:[#allocation28 + $0x380] sm:$0xff] }
0x1c0b   : > { %v6603_v42 = vpop.f32.mrf.mxu1 }
0x1c0c   : > { %v14546_v63 = vsub.f32 %v6521_v55, %v6603_v42  ;;  %11422 = vmatprep.mubr.f32.mxu0 %v6640_v33  ;;  %v6643_v25 = vmul.f32 %v14544_v35, %v14544_v35  ;;  %v6996_v55 = vld [vmem:[#allocation28 + $0x3c0] sm:$0xff] }
0x1c0d   : > { %v11386_v57 = vpop.f32.mrf.mxu1  ;;  %11423 = vmatmul.mubr.f32.vlgmr.msra.gmra.mxu0 %v6641_v53 }
0x1c0e   : > { %v6642_v8 = vmul.f32 %v14546_v63, %v14546_v63  ;;  %v14552_v9 = vsub.f32 %v6524_v7, %v11386_v57  ;;  %11479 = vmatpush3.msra.mxu0 %v7003_v19  ;;  %v6994_v7 = vld [vmem:[#allocation28 + $0x3b0] sm:$0xff] }
0x1c0f   : > { %v6613_v15 = vpop.f32.mrf.mxu1  ;;  %11480 = vmatprep.subr.mxu0 %v7002_v43 }
0x1c10   : > { %v14554_v18 = vsub.f32 %v6523_v0, %v6613_v15  ;;  %11425 = vmatprep.mubr.f32.mxu0 %v6642_v8  ;;  %v6645_v31 = vmul.f32 %v14552_v9, %v14552_v9  ;;  %11481 = vmatpush3.msra.mxu0 %v7002_v43  ;;  %v6992_v0 = vld [vmem:[#allocation28 + $0x3a0] sm:$0xff]  ;;  %v6772_v43 = vrot.slane %v12440_v61, %v13779_v3 }
0x1c11   : > { %v11389_v11 = vpop.f32.mrf.mxu1  ;;  %11426 = vmatmul.mubr.f32.gmra.mxu0 %v6643_v25  ;;  %11482 = vmatprep.subr.mxu0 %v7001_v21 }
0x1c12   : > { %v6644_v40 = vmul.f32 %v14554_v18, %v14554_v18  ;;  %v14560_v50 = vsub.f32 %v6526_v4, %v11389_v11  ;;  %11483 = vmatpush3.msra.mxu0 %v7001_v21  ;;  %v6868_v4 = vld [vmem:[#allocation28 + $0x310] sm:$0xff] }
0x1c13   : > { %v6623_v56 = vpop.f32.mrf.mxu1  ;;  %11484 = vmatprep.subr.mxu0 %v7000_v34  ;;  %11460 = vmatprep.subr.mxu1 %v6868_v4 }
0x1c14   : > { %v14562_v30 = vsub.f32 %v6525_v48, %v6623_v56  ;;  %11428 = vmatprep.mubr.f32.mxu0 %v6644_v40  ;;  %v6647_v12 = vmul.f32 %v14560_v50, %v14560_v50  ;;  %11485 = vmatpush3.msra.mxu0 %v7000_v34  ;;  %v6867_v48 = vld [vmem:[#allocation28 + $0x308] sm:$0xff] }
0x1c15   : > { %11429 = vmatmul.mubr.f32.gmra.mxu0 %v6645_v31  ;;  %11486 = vmatprep.subr.mxu0 %v6999_v37 }
0x1c16   : > { %v6646_v13 = vmul.f32 %v14562_v30, %v14562_v30  ;;  %11487 = vmatpush3.msra.mxu0 %v6999_v37  ;;  %11461 = vmatpush3.msra.mxu1 %v6868_v4 }
0x1c17   : > { %11488 = vmatprep.subr.mxu0 %v6998_v41  ;;  %11462 = vmatprep.subr.mxu1 %v6867_v48 }
0x1c18   : > { %11431 = vmatprep.mubr.f32.mxu0 %v6646_v13  ;;  %11489 = vmatpush3.msra.mxu0 %v6998_v41 }
0x1c19   : > { %11432 = vmatmul.mubr.f32.gmra.mxu0 %v6647_v12  ;;  %11490 = vmatprep.subr.mxu0 %v6997_v10 }
0x1c1a   : > { %11491 = vmatpush3.msra.mxu0 %v6997_v10  ;;  %11463 = vmatpush3.msra.mxu1 %v6867_v48 }
0x1c1b   : > { %11492 = vmatprep.subr.mxu0 %v6996_v55  ;;  %11464 = vmatprep.subr.mxu1 %v6866_v23 }
0x1c1c   : > { %11493 = vmatpush3.msra.mxu0 %v6996_v55  ;;  %11465 = vmatpush3.msra.mxu1 %v6866_v23 }
0x1c1d   : > { %11494 = vmatprep.subr.mxu0 %v6995_v26 }
0x1c1e   : > { %11495 = vmatpush3.msra.mxu0 %v6995_v26 }
0x1c1f   : > { %11496 = vmatprep.subr.mxu0 %v6994_v7 }
0x1c20   : > { %11497 = vmatpush3.msra.mxu0 %v6994_v7 }
0x1c21   : > { %11498 = vmatprep.subr.mxu0 %v6993_v54 }
0x1c22   : > { %11499 = vmatpush3.msra.mxu0 %v6993_v54 }
0x1c23   : > { %11500 = vmatprep.subr.mxu0 %v6992_v0 }
0x1c24   : > { %11501 = vmatpush3.msra.mxu0 %v6992_v0 }
0x1c25   : > { %11502 = vmatprep.subr.mxu0 %v6991_v17 }
0x1c26   : > { %11503 = vmatpush3.msra.mxu0 %v6991_v17 }
0x1c27   : > { %11504 = vmatprep.subr.mxu0 %v6990_v39 }
0x1c28   : > { %11505 = vmatpush3.msra.mxu0 %v6990_v39 }
0x1c29   : > { %11506 = vmatprep.subr.mxu0 %v6989_v52 }
0x1c2a   : > { %11507 = vmatpush3.msra.mxu0 %v6989_v52 }
0x1c2b   : > { %11508 = vmatprep.subr.mxu0 %v6988_v49 }
0x1c2c   : > { %11509 = vmatpush3.msra.mxu0 %v6988_v49 }
0x1ccd   : > { %v11424_v33 = vpop.f32.mrf.mxu0 }
0x1cce   : > { %v6720_v53 = vadd.f32 1e-06, %v11424_v33 }
0x1ccf   : > { %v6714_v42 = vpop.f32.mrf.mxu0 }
0x1cd0   : > { %12303 = vrsqrt.f32 %v6720_v53  ;;  %v6715_v57 = vadd.f32 1e-06, %v6714_v42 }
0x1cd1   : > { %v11427_v8 = vpop.f32.mrf.mxu0 }
0x1cd2   : > { %12305 = vrsqrt.f32 %v6715_v57  ;;  %v6730_v25 = vadd.f32 1e-06, %v11427_v8 }
0x1cd3   : > { %v6724_v15 = vpop.f32.mrf.mxu0 }
0x1cd4   : > { %12307 = vrsqrt.f32 %v6730_v25  ;;  %v6725_v11 = vadd.f32 1e-06, %v6724_v15 }
0x1cd5   : > { %v11430_v40 = vpop.f32.mrf.mxu0 }
0x1cd6   : > { %12309 = vrsqrt.f32 %v6725_v11  ;;  %v6740_v31 = vadd.f32 1e-06, %v11430_v40 }
0x1cd7   : > { %v6734_v56 = vpop.f32.mrf.mxu0 }
0x1cd8   : > { %12311 = vrsqrt.f32 %v6740_v31  ;;  %v6735_v13 = vadd.f32 1e-06, %v6734_v56 }
0x1cd9   : > { %v11433_v12 = vpop.f32.mrf.mxu0 }
0x1cda   : > { %12313 = vrsqrt.f32 %v6735_v13  ;;  %v6750_v58 = vadd.f32 1e-06, %v11433_v12 }
0x1cdb   : > { %v6744_v19 = vpop.f32.mrf.mxu0 }
0x1cdc   : > { %12315 = vrsqrt.f32 %v6750_v58  ;;  %v6745_v22 = vadd.f32 1e-06, %v6744_v19 }
0x1cdd   : > { %v12304_v21 = vpop.eup %12303 }
0x1cde   : > { %v6762_v34 = vmul.f32 %v12304_v21, %v14536_v36  ;;  %12317 = vrsqrt.f32 %v6745_v22 }
0x1cdf   : > { %v12306_v28 = vpop.eup %12305 }
0x1ce0   : > { %v6774_v37 = vmul.f32 %v6772_v43, %v6762_v34  ;;  %v6761_v44 = vmul.f32 %v12306_v28, %v14538_v32 }
0x1ce1   : > { %v12308_v41 = vpop.eup %12307 }
0x1ce2   : > { %v14572_v59 = vadd.f32 %v6784_v24, %v6774_v37  ;;  %v6773_v10 = vmul.f32 %v6772_v43, %v6761_v44  ;;  %v6764_v20 = vmul.f32 %v12308_v41, %v14544_v35 }
0x1ce3   : > { %v12310_v55 = vpop.eup %12309 }
0x1ce4   : > { %v6776_v3 = vmul.f32 %v6772_v43, %v6764_v20  ;;  %v6763_v51 = vmul.f32 %v12310_v55, %v14546_v63  ;;  %v14576_v26 = vadd.f32 %v6784_v24, %v6773_v10  ;;  %v6802_v36 = vmul.f32 0.044715, %v14572_v59 }
0x1ce5   : > { %v12312_v62 = vpop.eup %12311 }
0x1ce6   : > { %v14579_v6 = vadd.f32 %v6784_v24, %v6776_v3  ;;  %v6775_v7 = vmul.f32 %v6772_v43, %v6763_v51  ;;  %v6766_v32 = vmul.f32 %v12312_v62, %v14552_v9  ;;  %v6801_v54 = vmul.f32 0.044715, %v14576_v26 }
0x1ce7   : > { %v12314_v45 = vpop.eup %12313  ;;  %v6810_v38 = vmul.f32 %v6802_v36, %v14572_v59 }
0x1ce8   : > { %v6778_v35 = vmul.f32 %v6772_v43, %v6766_v32  ;;  %v6765_v0 = vmul.f32 %v12314_v45, %v14554_v18  ;;  %v14585_v29 = vadd.f32 %v6784_v24, %v6775_v7  ;;  %v6809_v17 = vmul.f32 %v6801_v54, %v14576_v26 }
0x1ce9   : > { %v12316_v63 = vpop.eup %12315  ;;  %v6818_v4 = vmul.f32 %v6810_v38, %v14572_v59  ;;  %v6804_v39 = vmul.f32 0.044715, %v14579_v6 }
0x1cea   : > { %v14590_v48 = vadd.f32 %v6784_v24, %v6778_v35  ;;  %v6777_v9 = vmul.f32 %v6772_v43, %v6765_v0  ;;  %v6768_v52 = vmul.f32 %v12316_v63, %v14560_v50  ;;  %v6817_v49 = vmul.f32 %v6809_v17, %v14576_v26 }
0x1ceb   : > { %v12318_v23 = vpop.eup %12317  ;;  %v6826_v33 = vadd.f32 %v6818_v4, %v14572_v59  ;;  %v6803_v18 = vmul.f32 0.044715, %v14585_v29  ;;  %v6812_v53 = vmul.f32 %v6804_v39, %v14579_v6  ;;  %v6793_v63 = vmul.f32 0.5, %v14576_v26 }
0x1cec   : > { %v6780_v42 = vmul.f32 %v6772_v43, %v6768_v52  ;;  %v6767_v57 = vmul.f32 %v12318_v23, %v14562_v30  ;;  %v14598_v8 = vadd.f32 %v6784_v24, %v6777_v9  ;;  %v6825_v25 = vadd.f32 %v6817_v49, %v14576_v26 }
0x1ced   : > { %v6834_v15 = vmul.f32 0.7978846, %v6826_v33  ;;  %v6811_v11 = vmul.f32 %v6803_v18, %v14585_v29  ;;  %v6820_v50 = vmul.f32 %v6812_v53, %v14579_v6  ;;  %v6806_v19 = vmul.f32 0.044715, %v14590_v48 }
0x1cee   : > { %v14603_v40 = vadd.f32 %v6784_v24, %v6780_v42  ;;  %v6779_v31 = vmul.f32 %v6772_v43, %v6767_v57  ;;  %v6805_v56 = vmul.f32 0.044715, %v14598_v8  ;;  %v6833_v13 = vmul.f32 0.7978846, %v6825_v25 }
0x1cef   : > { %12319 = vtanh.f32 %v6834_v15  ;;  %v6819_v12 = vmul.f32 %v6811_v11, %v14585_v29  ;;  %v6828_v30 = vadd.f32 %v6820_v50, %v14579_v6  ;;  %v6814_v28 = vmul.f32 %v6806_v19, %v14590_v48  ;;  %v12441_v19 = vld [vmem:[#allocation27 + $0x40] sm:$0xff] }
0x1cf0   : > { %v6813_v58 = vmul.f32 %v6805_v56, %v14598_v8  ;;  %v14610_v61 = vadd.f32 %v6784_v24, %v6779_v31  ;;  %12321 = vtanh.f32 %v6833_v13  ;;  %v6808_v43 = vmul.f32 0.044715, %v14603_v40 }
0x1cf1   : > { %v6827_v22 = vadd.f32 %v6819_v12, %v14585_v29  ;;  %v6836_v21 = vmul.f32 0.7978846, %v6828_v30  ;;  %v6822_v24 = vmul.f32 %v6814_v28, %v14590_v48  ;;  %v6794_v39 = vmul.f32 0.5, %v14572_v59 }
0x1cf2   : > { %v6821_v34 = vmul.f32 %v6813_v58, %v14598_v8  ;;  %v6807_v37 = vmul.f32 0.044715, %v14610_v61  ;;  %v6816_v41 = vmul.f32 %v6808_v43, %v14603_v40  ;;  %v6795_v33 = vmul.f32 0.5, %v14585_v29 }
0x1cf3   : > { %v6835_v44 = vmul.f32 0.7978846, %v6827_v22  ;;  %12323 = vtanh.f32 %v6836_v21  ;;  %v6830_v51 = vadd.f32 %v6822_v24, %v14590_v48  ;;  %v6796_v26 = vmul.f32 0.5, %v14579_v6 }
0x1cf4   : > { %v6829_v10 = vadd.f32 %v6821_v34, %v14598_v8  ;;  %v6815_v20 = vmul.f32 %v6807_v37, %v14610_v61  ;;  %v6824_v55 = vmul.f32 %v6816_v41, %v14603_v40  ;;  %v6797_v57 = vmul.f32 0.5, %v14598_v8 }
0x1cf5   : > { %12325 = vtanh.f32 %v6835_v44  ;;  %v6838_v7 = vmul.f32 0.7978846, %v6830_v51  ;;  %v6798_v6 = vmul.f32 0.5, %v14590_v48  ;;  %v6799_v56 = vmul.f32 0.5, %v14610_v61 }
0x1cf6   : > { %v6837_v3 = vmul.f32 0.7978846, %v6829_v10  ;;  %v6823_v62 = vmul.f32 %v6815_v20, %v14610_v61  ;;  %v6832_v36 = vadd.f32 %v6824_v55, %v14603_v40  ;;  %v6800_v48 = vmul.f32 0.5, %v14603_v40 }
0x1cf8   : > { %12327 = vtanh.f32 %v6837_v3  ;;  %v6831_v32 = vadd.f32 %v6823_v62, %v14610_v61  ;;  %v6840_v45 = vmul.f32 0.7978846, %v6832_v36  ;;  %v12442_v61 = vld [vmem:[#allocation27] sm:$0xff]  ;;  %v7335_v36 = vld [vmem:[#allocation28 + $0x478] sm:$0xff] }
0x1cf9   : > { %12329 = vtanh.f32 %v6838_v7  ;;  %v7334_v7 = vld [vmem:[#allocation28 + $0x470] sm:$0xff] }
0x1cfa   : > { %v6839_v54 = vmul.f32 0.7978846, %v6831_v32  ;;  %12331 = vtanh.f32 %v6840_v45  ;;  %v12443_v32 = vld [vmem:[#allocation27 + $0x48] sm:$0xff] }
0x1cfb   : > { %v12444_v45 = vld [vmem:[#allocation27 + $0x8] sm:$0xff] }
0x1cfc   : > { %v12320_v38 = vpop.eup %12319  ;;  %12333 = vtanh.f32 %v6839_v54  ;;  %v7333_v54 = vld [vmem:[#allocation28 + $0x468] sm:$0xff] }
0x1cfd   : > { %v12322_v35 = vpop.eup %12321  ;;  %v6850_v0 = vadd.f32 1.0, %v12320_v38  ;;  %v12445_v38 = vld [vmem:[#allocation27 + $0x50] sm:$0xff] }
0x1cfe   : > { %v6849_v17 = vadd.f32 1.0, %v12322_v35  ;;  %v7332_v35 = vld [vmem:[#allocation28 + $0x460] sm:$0xff] }
0x1cff   : > { %v14630_v23 = vmul.f32 %v6850_v0, %v6794_v39  ;;  %v12446_v0 = vld [vmem:[#allocation27 + $0x10] sm:$0xff]  ;;  %v12449_v39 = vld [vmem:[#allocation27 + $0x18] sm:$0xff] }
0x1d00   : > { %v12324_v4 = vpop.eup %12323  ;;  %v14628_v9 = vmul.f32 %v6849_v17, %v6793_v63  ;;  %v12447_v63 = vld [vmem:[#allocation27 + $0x58] sm:$0xff]  ;;  %v12448_v17 = vld [vmem:[#allocation27 + $0x60] sm:$0xff] }
0x1d01   : > { %v6852_v49 = vadd.f32 1.0, %v12324_v4  ;;  %v7331_v4 = vld [vmem:[#allocation28 + $0x458] sm:$0xff] }
0x1d02   : > { %v12326_v52 = vpop.eup %12325  ;;  %11466 = vmatprep.mubr.f32.mxu1 %v14628_v9  ;;  %11510 = vmatprep.mubr.f32.mxu0 %v14628_v9 }
0x1d03   : > { %v6851_v18 = vadd.f32 1.0, %v12326_v52  ;;  %11467 = vmatmul.mubr.f32.vlgmr.msra.gmra.mxu1 %v14630_v23  ;;  %11511 = vmatmul.mubr.f32.vlgmr.msra.gmra.mxu0 %v14630_v23  ;;  %v14640_v42 = vmul.f32 %v6852_v49, %v6796_v26  ;;  %v7330_v52 = vld [vmem:[#allocation28 + $0x450] sm:$0xff]  ;;  %v12450_v49 = vld [vmem:[#allocation27 + $0x20] sm:$0xff]  ;;  %v7329_v26 = vld [vmem:[#allocation28 + $0x448] sm:$0xff] }
0x1d05   : > { %v12328_v59 = vpop.eup %12327  ;;  %v14638_v53 = vmul.f32 %v6851_v18, %v6795_v33  ;;  %v12451_v33 = vld [vmem:[#allocation27 + $0x68] sm:$0xff]  ;;  %v12452_v18 = vld [vmem:[#allocation27 + $0x70] sm:$0xff] }
0x1d06   : > { %v6853_v25 = vadd.f32 1.0, %v12328_v59  ;;  %v12330_v15 = vpop.eup %12329  ;;  %v12453_v59 = vld [vmem:[#allocation27 + $0x28] sm:$0xff] }
0x1d07   : > { %11469 = vmatprep.mubr.f32.mxu1 %v14638_v53  ;;  %11513 = vmatprep.mubr.f32.mxu0 %v14638_v53  ;;  %v12332_v29 = vpop.eup %12331  ;;  %v6854_v50 = vadd.f32 1.0, %v12330_v15  ;;  %v12455_v15 = vld [vmem:[#allocation27 + $0x78] sm:$0xff] }
0x1d08   : > { %11470 = vmatmul.mubr.f32.gmra.mxu1 %v14640_v42  ;;  %11514 = vmatmul.mubr.f32.gmra.mxu0 %v14640_v42  ;;  %v14647_v11 = vmul.f32 %v6853_v25, %v6797_v57  ;;  %v6856_v12 = vadd.f32 1.0, %v12332_v29  ;;  %v7328_v57 = vld [vmem:[#allocation28 + $0x440] sm:$0xff]  ;;  %v12454_v25 = vld [vmem:[#allocation27 + $0x30] sm:$0xff]  ;;  %v7327_v29 = vld [vmem:[#allocation28 + $0x438] sm:$0xff] }
0x1d09   : > { %v12334_v31 = vpop.eup %12333  ;;  %v14652_v8 = vmul.f32 %v6854_v50, %v6798_v6  ;;  %v12456_v6 = vld [vmem:[#allocation27 + $0x38] sm:$0xff]  ;;  %v7326_v50 = vld [vmem:[#allocation28 + $0x430] sm:$0xff] }
0x1d0a   : > { %11472 = vmatprep.mubr.f32.mxu1 %v14647_v11  ;;  %11516 = vmatprep.mubr.f32.mxu0 %v14647_v11  ;;  %v6855_v13 = vadd.f32 1.0, %v12334_v31  ;;  %v14662_v58 = vmul.f32 %v6856_v12, %v6800_v48  ;;  %v12457_v31 = vld [vmem:[#allocation27 + $0x80] sm:$0xff]  ;;  %v7323_v12 = vld [vmem:[#allocation28 + $0x418] sm:$0xff]  ;;  %v7321_v48 = vld [vmem:[#allocation28 + $0x408] sm:$0xff] }
0x1d0c   : > { %11473 = vmatmul.mubr.f32.gmra.mxu1 %v14652_v8  ;;  %11517 = vmatmul.mubr.f32.gmra.mxu0 %v14652_v8  ;;  %v14657_v30 = vmul.f32 %v6855_v13, %v6799_v56  ;;  %v7325_v56 = vld [vmem:[#allocation28 + $0x428] sm:$0xff]  ;;  %v7324_v13 = vld [vmem:[#allocation28 + $0x420] sm:$0xff] }
0x1d0e   : > { %11475 = vmatprep.mubr.f32.mxu1 %v14657_v30  ;;  %11519 = vmatprep.mubr.f32.mxu0 %v14657_v30 }
0x1d10   : > { %11476 = vmatmul.mubr.f32.gmra.mxu1 %v14662_v58  ;;  %11520 = vmatmul.mubr.f32.gmra.mxu0 %v14662_v58 }
0x1d11   : > { %11538 = vmatprep.mubr.msk.f32.mxu1 %vm2793_vm6, %v12441_v19  ;;  %11566 = vmatprep.mubr.msk.f32.mxu0 %vm2793_vm6, %v12442_v61  ;;  %v7320_v19 = vld [vmem:[#allocation28 + $0x400] sm:$0xff]  ;;  %v14685_v61 = vld [vmem:[#allocation25 + $0x78] sm:$0xff] }
0x1dc3   : > { %v11468_v22 = vpop.f32.mrf.mxu1  ;;  %v11512_v21 = vpop.f32.mrf.mxu0 }
0x1dc5   : > { %v6948_v43 = vpop.f32.mrf.mxu1  ;;  %v7070_v40 = vpop.f32.mrf.mxu0 }
0x1dc8   : > { %v11471_v34 = vpop.f32.mrf.mxu1  ;;  %v11515_v28 = vpop.f32.mrf.mxu0 }
0x1dca   : > { %v6958_v37 = vpop.f32.mrf.mxu1  ;;  %v7080_v44 = vpop.f32.mrf.mxu0 }
0x1dcc   : > { %v11474_v41 = vpop.f32.mrf.mxu1  ;;  %v11518_v10 = vpop.f32.mrf.mxu0 }
0x1dce   : > { %v6968_v24 = vpop.f32.mrf.mxu1  ;;  %v7090_v20 = vpop.f32.mrf.mxu0 }
0x1dd0   : > { %v11477_v55 = vpop.f32.mrf.mxu1  ;;  %v11521_v3 = vpop.f32.mrf.mxu0 }
0x1dd1   : > { %11522 = vmatprep.subr.mxu1 %v11521_v3  ;;  %11550 = vmatprep.subr.mxu0 %v11477_v55 }
0x1dd2   : > { %v6978_v51 = vpop.f32.mrf.mxu1  ;;  %v7100_v62 = vpop.f32.mrf.mxu0  ;;  %11523 = vmatpush3.msra.mxu1 %v11521_v3  ;;  %11551 = vmatpush3.msra.mxu0 %v11477_v55 }
0x1dd3   : > { %11524 = vmatprep.subr.mxu1 %v7100_v62  ;;  %11552 = vmatprep.subr.mxu0 %v6978_v51 }
0x1dd4   : > { %11525 = vmatpush3.msra.mxu1 %v7100_v62  ;;  %11553 = vmatpush3.msra.mxu0 %v6978_v51 }
0x1dd5   : > { %11526 = vmatprep.subr.mxu1 %v11518_v10  ;;  %11554 = vmatprep.subr.mxu0 %v11474_v41 }
0x1dd6   : > { %11527 = vmatpush3.msra.mxu1 %v11518_v10  ;;  %11555 = vmatpush3.msra.mxu0 %v11474_v41 }
0x1dd7   : > { %11528 = vmatprep.subr.mxu1 %v7090_v20  ;;  %11556 = vmatprep.subr.mxu0 %v6968_v24 }
0x1dd8   : > { %11529 = vmatpush3.msra.mxu1 %v7090_v20  ;;  %11557 = vmatpush3.msra.mxu0 %v6968_v24 }
0x1dd9   : > { %11530 = vmatprep.subr.mxu1 %v11515_v28  ;;  %11558 = vmatprep.subr.mxu0 %v11471_v34 }
0x1dda   : > { %11531 = vmatpush3.msra.mxu1 %v11515_v28  ;;  %11559 = vmatpush3.msra.mxu0 %v11471_v34 }
0x1ddb   : > { %11532 = vmatprep.subr.mxu1 %v7080_v44  ;;  %11560 = vmatprep.subr.mxu0 %v6958_v37 }
0x1ddc   : > { %11533 = vmatpush3.msra.mxu1 %v7080_v44  ;;  %11561 = vmatpush3.msra.mxu0 %v6958_v37 }
0x1ddd   : > { %11534 = vmatprep.subr.mxu1 %v11512_v21  ;;  %11562 = vmatprep.subr.mxu0 %v11468_v22 }
0x1dde   : > { %11535 = vmatpush3.msra.mxu1 %v11512_v21  ;;  %11563 = vmatpush3.msra.mxu0 %v11468_v22  ;;  %v14690_v22 = vld [vmem:[#allocation25 + $0x70] sm:$0xff]  ;;  %v14695_v21 = vld [vmem:[#allocation25 + $0x68] sm:$0xff] }
0x1ddf   : > { %11536 = vmatprep.subr.mxu1 %v7070_v40  ;;  %11564 = vmatprep.subr.mxu0 %v6948_v43 }
0x1de0   : > { %11537 = vmatpush3.msra.mxu1 %v7070_v40  ;;  %11565 = vmatpush3.msra.mxu0 %v6948_v43  ;;  %v14727_v43 = vld [vmem:[#allocation25 + $0x30] sm:$0xff]  ;;  %v14735_v40 = vld [vmem:[#allocation25 + $0x20] sm:$0xff] }
0x1de1   : > { %11539 = vmatmul.mubr.msk.f32.vlgmr.msra.gmra.mxu1 %vm2793_vm6, %v12443_v32  ;;  %11578 = vmatprep.subr.mxu1 %v7335_v36  ;;  %v12472_v32 = vld [vmem:[#allocation27 + $0x98] sm:$0xff] }
0x1de2   : > { %11567 = vmatmul.mubr.msk.f32.vlgmr.msra.gmra.mxu0 %vm2793_vm6, %v12444_v45  ;;  %11579 = vmatpush3.msra.mxu1 %v7335_v36  ;;  %v12470_v36 = vld [vmem:[#allocation27 + $0x88] sm:$0xff]  ;;  %v12473_v45 = vld [vmem:[#allocation27 + $0xa0] sm:$0xff] }
0x1de3   : > { %11580 = vmatprep.subr.mxu1 %v7334_v7  ;;  %11541 = vmatprep.mubr.msk.f32.mxu1 %vm2793_vm6, %v12445_v38  ;;  %v12475_v38 = vld [vmem:[#allocation27 + $0xb0] sm:$0xff] }
0x1de4   : > { %11581 = vmatpush3.msra.mxu1 %v7334_v7  ;;  %11569 = vmatprep.mubr.msk.f32.mxu0 %vm2793_vm6, %v12446_v0  ;;  %v12471_v7 = vld [vmem:[#allocation27 + $0x90] sm:$0xff]  ;;  %v12477_v0 = vld [vmem:[#allocation25 + $0x18] sm:$0xff] }
0x1de5   : > { %11542 = vmatmul.mubr.msk.f32.gmra.mxu1 %vm2793_vm6, %v12447_v63  ;;  %11582 = vmatprep.subr.mxu1 %v7333_v54  ;;  %v12478_v63 = vld [vmem:[#allocation25 + $0x10] sm:$0xff] }
0x1de6   : > { %11583 = vmatpush3.msra.mxu1 %v7333_v54  ;;  %11544 = vmatprep.mubr.msk.f32.mxu1 %vm2793_vm6, %v12448_v17  ;;  %v12474_v54 = vld [vmem:[#allocation27 + $0xa8] sm:$0xff] }
0x1de7   : > { %11584 = vmatprep.subr.mxu1 %v7332_v35  ;;  %11570 = vmatmul.mubr.msk.f32.gmra.mxu0 %vm2793_vm6, %v12449_v39  ;;  %v12479_v17 = vld [vmem:[#allocation25 + $0x8] sm:$0xff] }
0x1de8   : > { %11585 = vmatpush3.msra.mxu1 %v7332_v35  ;;  %11572 = vmatprep.mubr.msk.f32.mxu0 %vm2793_vm6, %v12450_v49  ;;  %v14781_v35 = vld [vmem:[#allocation27 + $0xb8] sm:$0xff] }
0x1de9   : > { %11545 = vmatmul.mubr.msk.f32.gmra.mxu1 %vm2793_vm6, %v12451_v33  ;;  %11586 = vmatprep.subr.mxu1 %v7331_v4 }
0x1dea   : > { %11587 = vmatpush3.msra.mxu1 %v7331_v4  ;;  %11547 = vmatprep.mubr.msk.f32.mxu1 %vm2793_vm6, %v12452_v18  ;;  %v12480_v4 = vld [vmem:[#allocation25] sm:$0xff] }
0x1deb   : > { %11588 = vmatprep.subr.mxu1 %v7330_v52  ;;  %11573 = vmatmul.mubr.msk.f32.gmra.mxu0 %vm2793_vm6, %v12453_v59 }
0x1dec   : > { %11589 = vmatpush3.msra.mxu1 %v7330_v52  ;;  %11575 = vmatprep.mubr.msk.f32.mxu0 %vm2793_vm6, %v12454_v25  ;;  %v14797_v25 = vld [vmem:[#allocation31] sm:$0xff] }
0x1ded   : > { %11548 = vmatmul.mubr.msk.f32.gmra.mxu1 %vm2793_vm6, %v12455_v15  ;;  %11590 = vmatprep.subr.mxu1 %v7329_v26  ;;  %v7557_v15 = vrot.slane %v14797_v25, %v3800_v14 }
0x1dee   : > { %11591 = vmatpush3.msra.mxu1 %v7329_v26  ;;  %11610 = vmatprep.mubr.f32.mxu1 %v14628_v9  ;;  %v7322_v9 = vld [vmem:[#allocation28 + $0x410] sm:$0xff] }
0x1def   : > { %11592 = vmatprep.subr.mxu1 %v7328_v57  ;;  %11576 = vmatmul.mubr.msk.f32.gmra.mxu0 %vm2793_vm6, %v12456_v6 }
0x1df0   : > { %11593 = vmatpush3.msra.mxu1 %v7328_v57  ;;  %11638 = vmatprep.mubr.msk.f32.mxu0 %vm2793_vm6, %v12457_v31 }
0x1df1   : > { %11594 = vmatprep.subr.mxu1 %v7327_v29 }
0x1df2   : > { %11595 = vmatpush3.msra.mxu1 %v7327_v29 }
0x1df3   : > { %11596 = vmatprep.subr.mxu1 %v7326_v50 }
0x1df4   : > { %11597 = vmatpush3.msra.mxu1 %v7326_v50 }
0x1df5   : > { %11598 = vmatprep.subr.mxu1 %v7325_v56 }
0x1df6   : > { %11599 = vmatpush3.msra.mxu1 %v7325_v56 }
0x1df7   : > { %11600 = vmatprep.subr.mxu1 %v7324_v13 }
0x1df8   : > { %11601 = vmatpush3.msra.mxu1 %v7324_v13 }
0x1df9   : > { %11602 = vmatprep.subr.mxu1 %v7323_v12 }
0x1dfa   : > { %11603 = vmatpush3.msra.mxu1 %v7323_v12 }
0x1dfb   : > { %11604 = vmatprep.subr.mxu1 %v7322_v9 }
0x1dfc   : > { %11605 = vmatpush3.msra.mxu1 %v7322_v9 }
0x1dfd   : > { %11606 = vmatprep.subr.mxu1 %v7321_v48 }
0x1dfe   : > { %11607 = vmatpush3.msra.mxu1 %v7321_v48 }
0x1dff   : > { %11608 = vmatprep.subr.mxu1 %v7320_v19 }
0x1e00   : > { %11609 = vmatpush3.msra.mxu1 %v7320_v19 }
0x1e01   : > { %11611 = vmatmul.mubr.f32.vlgmr.msra.gmra.mxu1 %v14630_v23  ;;  %11694 = vmatprep.subr.mxu1 %v14685_v61  ;;  %v14700_v23 = vld [vmem:[#allocation25 + $0x60] sm:$0xff] }
0x1e02   : > { %11613 = vmatprep.mubr.f32.mxu1 %v14638_v53  ;;  %11695 = vmatpush3.msra.mxu1 %v14685_v61  ;;  %v14705_v53 = vld [vmem:[#allocation25 + $0x58] sm:$0xff] }
0x1e03   : > { %11696 = vmatprep.subr.mxu1 %v14690_v22 }
0x1e04   : > { %11697 = vmatpush3.msra.mxu1 %v14690_v22 }
0x1e05   : > { %11614 = vmatmul.mubr.f32.gmra.mxu1 %v14640_v42  ;;  %11698 = vmatprep.subr.mxu1 %v14695_v21  ;;  %v14710_v42 = vld [vmem:[#allocation25 + $0x50] sm:$0xff] }
0x1e06   : > { %11616 = vmatprep.mubr.f32.mxu1 %v14647_v11  ;;  %11699 = vmatpush3.msra.mxu1 %v14695_v21  ;;  %v14715_v11 = vld [vmem:[#allocation25 + $0x48] sm:$0xff] }
0x1e07   : > { %11700 = vmatprep.subr.mxu1 %v14700_v23 }
0x1e08   : > { %11701 = vmatpush3.msra.mxu1 %v14700_v23 }
0x1e09   : > { %11617 = vmatmul.mubr.f32.gmra.mxu1 %v14652_v8  ;;  %11702 = vmatprep.subr.mxu1 %v14705_v53  ;;  %v14719_v8 = vld [vmem:[#allocation25 + $0x40] sm:$0xff] }
0x1e0a   : > { %11619 = vmatprep.mubr.f32.mxu1 %v14657_v30  ;;  %11703 = vmatpush3.msra.mxu1 %v14705_v53  ;;  %v14723_v30 = vld [vmem:[#allocation25 + $0x38] sm:$0xff] }
0x1e0b   : > { %11704 = vmatprep.subr.mxu1 %v14710_v42 }
0x1e0c   : > { %11705 = vmatpush3.msra.mxu1 %v14710_v42 }
0x1e0d   : > { %11620 = vmatmul.mubr.f32.gmra.mxu1 %v14662_v58  ;;  %11706 = vmatprep.subr.mxu1 %v14715_v11  ;;  %v14731_v58 = vld [vmem:[#allocation25 + $0x28] sm:$0xff] }
0x1e0e   : > { %11707 = vmatpush3.msra.mxu1 %v14715_v11 }
0x1e0f   : > { %11708 = vmatprep.subr.mxu1 %v14719_v8 }
0x1e10   : > { %11709 = vmatpush3.msra.mxu1 %v14719_v8 }
0x1e11   : > { %11710 = vmatprep.subr.mxu1 %v14723_v30 }
0x1e12   : > { %11711 = vmatpush3.msra.mxu1 %v14723_v30 }
0x1e13   : > { %11712 = vmatprep.subr.mxu1 %v14727_v43 }
0x1e14   : > { %11713 = vmatpush3.msra.mxu1 %v14727_v43 }
0x1e15   : > { %11714 = vmatprep.subr.mxu1 %v14731_v58 }
0x1e16   : > { %11715 = vmatpush3.msra.mxu1 %v14731_v58 }
0x1e17   : > { %11716 = vmatprep.subr.mxu1 %v14735_v40 }
0x1e18   : > { %11717 = vmatpush3.msra.mxu1 %v14735_v40 }
0x1e19   : > { %11718 = vmatprep.subr.mxu1 %v14511_v60 }
0x1e1a   : > { %11719 = vmatpush3.msra.mxu1 %v14511_v60 }
0x1e1b   : > { %11720 = vmatprep.subr.mxu1 %v14515_v5 }
0x1e1c   : > { %11721 = vmatpush3.msra.mxu1 %v14515_v5 }
0x1e1d   : > { %11722 = vmatprep.subr.mxu1 %v14519_v1 }
0x1e1e   : > { %11723 = vmatpush3.msra.mxu1 %v14519_v1 }
0x1e1f   : > { %11724 = vmatprep.subr.mxu1 %v14523_v27 }
0x1e20   : > { %11725 = vmatpush3.msra.mxu1 %v14523_v27 }
0x1ea1   : > { %v14747_v34 = vpop.f32.mrf.mxu1 }
0x1ea2   : > { %v11568_v39 = vpop.f32.mrf.mxu0 }
0x1ea3   : > { %v14749_v28 = vpop.f32.mrf.mxu1  ;;  %v7286_v29 = vadd.f32 %v11568_v39, %v14747_v34 }
0x1ea4   : > { %v7280_v52 = vpop.f32.mrf.mxu0 }
0x1ea5   : > { %v14751_v37 = vpop.f32.mrf.mxu1  ;;  %v7281_v50 = vadd.f32 %v7280_v52, %v14749_v28 }
0x1ea7   : > { %v14753_v44 = vpop.f32.mrf.mxu1  ;;  %v11571_v49 = vpop.f32.mrf.mxu0 }
0x1ea8   : > { %v7296_v13 = vadd.f32 %v11571_v49, %v14751_v37 }
0x1ea9   : > { %v14755_v60 = vpop.f32.mrf.mxu1  ;;  %v7290_v33 = vpop.f32.mrf.mxu0 }
0x1eaa   : > { %v7291_v19 = vadd.f32 %v7290_v33, %v14753_v44 }
0x1eab   : > { %v14757_v41 = vpop.f32.mrf.mxu1  ;;  %v11574_v18 = vpop.f32.mrf.mxu0 }
0x1ead   : > { %v14759_v5 = vpop.f32.mrf.mxu1  ;;  %v7300_v26 = vpop.f32.mrf.mxu0 }
0x1eaf   : > { %v14761_v10 = vpop.f32.mrf.mxu1  ;;  %v11577_v59 = vpop.f32.mrf.mxu0 }
0x1eb1   : > { %v7310_v57 = vpop.f32.mrf.mxu0 }
0x1eb2   : > { %v7311_v37 = vadd.f32 %v7310_v57, %v14761_v10  ;;  %v7920_v57 = vld [vmem:[#allocation28 + $0x4f8] sm:$0xff] }
0x1ec1   : > { %v11612_v1 = vpop.f32.mrf.mxu1 }
0x1ec3   : > { %v7402_v24 = vpop.f32.mrf.mxu1 }
0x1ec5   : > { %v11615_v20 = vpop.f32.mrf.mxu1 }
0x1ec7   : > { %v7412_v27 = vpop.f32.mrf.mxu1 }
0x1ec9   : > { %v11618_v55 = vpop.f32.mrf.mxu1 }
0x1ecb   : > { %v7422_v3 = vpop.f32.mrf.mxu1 }
0x1ecd   : > { %v11621_v51 = vpop.f32.mrf.mxu1 }
0x1ece   : > { %11622 = vmatprep.subr.mxu0 %v11621_v51 }
0x1ecf   : > { %v7432_v62 = vpop.f32.mrf.mxu1  ;;  %11623 = vmatpush3.msra.mxu0 %v11621_v51 }
0x1ed0   : > { %11624 = vmatprep.subr.mxu0 %v7432_v62 }
0x1ed1   : > { %11625 = vmatpush3.msra.mxu0 %v7432_v62 }
0x1ed2   : > { %11626 = vmatprep.subr.mxu0 %v11618_v55 }
0x1ed3   : > { %11627 = vmatpush3.msra.mxu0 %v11618_v55 }
0x1ed4   : > { %11628 = vmatprep.subr.mxu0 %v7422_v3 }
0x1ed5   : > { %11629 = vmatpush3.msra.mxu0 %v7422_v3 }
0x1ed6   : > { %11630 = vmatprep.subr.mxu0 %v11615_v20 }
0x1ed7   : > { %11631 = vmatpush3.msra.mxu0 %v11615_v20 }
0x1ed8   : > { %11632 = vmatprep.subr.mxu0 %v7412_v27 }
0x1ed9   : > { %11633 = vmatpush3.msra.mxu0 %v7412_v27 }
0x1eda   : > { %11634 = vmatprep.subr.mxu0 %v11612_v1 }
0x1edb   : > { %11635 = vmatpush3.msra.mxu0 %v11612_v1 }
0x1edc   : > { %11636 = vmatprep.subr.mxu0 %v7402_v24 }
0x1edd   : > { %11637 = vmatpush3.msra.mxu0 %v7402_v24 }
0x1ede   : > { %11639 = vmatmul.mubr.msk.f32.vlgmr.msra.gmra.mxu0 %vm2793_vm6, %v12470_v36  ;;  %11650 = vmatprep.subr.mxu0 %v14685_v61 }
0x1edf   : > { %11641 = vmatprep.mubr.msk.f32.mxu0 %vm2793_vm6, %v12471_v7  ;;  %11651 = vmatpush3.msra.mxu0 %v14685_v61 }
0x1ee0   : > { %11652 = vmatprep.subr.mxu0 %v14690_v22 }
0x1ee1   : > { %11653 = vmatpush3.msra.mxu0 %v14690_v22 }
0x1ee2   : > { %11642 = vmatmul.mubr.msk.f32.gmra.mxu0 %vm2793_vm6, %v12472_v32  ;;  %11654 = vmatprep.subr.mxu0 %v14695_v21 }
0x1ee3   : > { %11644 = vmatprep.mubr.msk.f32.mxu0 %vm2793_vm6, %v12473_v45  ;;  %11655 = vmatpush3.msra.mxu0 %v14695_v21 }
0x1ee4   : > { %11656 = vmatprep.subr.mxu0 %v14700_v23 }
0x1ee5   : > { %11657 = vmatpush3.msra.mxu0 %v14700_v23  ;;  %v7306_v23 = vadd.f32 %v11574_v18, %v14755_v60 }
0x1ee6   : > { %11645 = vmatmul.mubr.msk.f32.gmra.mxu0 %vm2793_vm6, %v12474_v54  ;;  %11658 = vmatprep.subr.mxu0 %v14705_v53 }
0x1ee7   : > { %11647 = vmatprep.mubr.msk.f32.mxu0 %vm2793_vm6, %v12475_v38  ;;  %11659 = vmatpush3.msra.mxu0 %v14705_v53 }
0x1ee8   : > { %11660 = vmatprep.subr.mxu0 %v14710_v42 }
0x1ee9   : > { %11661 = vmatpush3.msra.mxu0 %v14710_v42 }
0x1eea   : > { %11648 = vmatmul.mubr.msk.f32.gmra.mxu0 %vm2793_vm6, %v14781_v35  ;;  %11662 = vmatprep.subr.mxu0 %v14715_v11 }
0x1eeb   : > { %11663 = vmatpush3.msra.mxu0 %v14715_v11  ;;  %v7301_v11 = vadd.f32 %v7300_v26, %v14757_v41 }
0x1eec   : > { %11664 = vmatprep.subr.mxu0 %v14719_v8 }
0x1eed   : > { %11665 = vmatpush3.msra.mxu0 %v14719_v8 }
0x1eee   : > { %11666 = vmatprep.subr.mxu0 %v14723_v30 }
0x1eef   : > { %11667 = vmatpush3.msra.mxu0 %v14723_v30 }
0x1ef0   : > { %11668 = vmatprep.subr.mxu0 %v14727_v43 }
0x1ef1   : > { %11669 = vmatpush3.msra.mxu0 %v14727_v43 }
0x1ef2   : > { %11670 = vmatprep.subr.mxu0 %v14731_v58 }
0x1ef3   : > { %11671 = vmatpush3.msra.mxu0 %v14731_v58  ;;  %v7316_v58 = vadd.f32 %v11577_v59, %v14759_v5 }
0x1ef4   : > { %11672 = vmatprep.subr.mxu0 %v14735_v40 }
0x1ef5   : > { %11673 = vmatpush3.msra.mxu0 %v14735_v40 }
0x1ef6   : > { %11674 = vmatprep.subr.mxu0 %v12477_v0 }
0x1ef7   : > { %11675 = vmatpush3.msra.mxu0 %v12477_v0 }
0x1ef8   : > { %11676 = vmatprep.subr.mxu0 %v12478_v63 }
0x1ef9   : > { %11677 = vmatpush3.msra.mxu0 %v12478_v63 }
0x1efa   : > { %11678 = vmatprep.subr.mxu0 %v12479_v17 }
0x1efb   : > { %11679 = vmatpush3.msra.mxu0 %v12479_v17 }
0x1efc   : > { %11680 = vmatprep.subr.mxu0 %v12480_v4 }
0x1efd   : > { %11681 = vmatpush3.msra.mxu0 %v12480_v4 }
0x1efe   : > { %11738 = vmatprep.subr.mxu0 %v7920_v57 }
0x1f9e   : > { %v11640_v6 = vpop.f32.mrf.mxu0 }
0x1f9f   : > { %v7547_v31 = vadd.f32 %v11640_v6, %v7286_v29  ;;  %v7919_v29 = vld [vmem:[#allocation28 + $0x4f0] sm:$0xff] }
0x1fa0   : > { %v7507_v56 = vpop.f32.mrf.mxu0  ;;  %v8041_v6 = vld [vmem:[#allocation28 + $0x570] sm:$0xff] }
0x1fa1   : > { %v7559_v12 = vadd.f32 %v7557_v15, %v7547_v31  ;;  %v7546_v9 = vadd.f32 %v7507_v56, %v7281_v50  ;;  %v7918_v50 = vld [vmem:[#allocation28 + $0x4e8] sm:$0xff]  ;;  %v7917_v56 = vld [vmem:[#allocation28 + $0x4e0] sm:$0xff] }
0x1fa2   : > { %v11643_v48 = vpop.f32.mrf.mxu0  ;;  %v8040_v31 = vld [vmem:[#allocation28 + $0x568] sm:$0xff] }
0x1fa3   : > { %v7558_v61 = vadd.f32 %v7557_v15, %v7546_v9  ;;  %v7549_v22 = vadd.f32 %v11643_v48, %v7296_v13  ;;  %v8039_v13 = vld [vmem:[#allocation28 + $0x560] sm:$0xff]  ;;  %v8038_v9 = vld [vmem:[#allocation28 + $0x558] sm:$0xff]  ;;  %v7915_v48 = vld [vmem:[#allocation28 + $0x4d0] sm:$0xff] }
0x1fa4   : > { %v7517_v21 = vpop.f32.mrf.mxu0 }
0x1fa5   : > { %v7561_v14 = vadd.f32 %v7557_v15, %v7549_v22  ;;  %v7548_v53 = vadd.f32 %v7517_v21, %v7291_v19  ;;  %11682 = vmatprep.mubr.f32.mxu0 %v7558_v61  ;;  %v8037_v19 = vld [vmem:[#allocation28 + $0x550] sm:$0xff]  ;;  %v8036_v22 = vld [vmem:[#allocation28 + $0x548] sm:$0xff]  ;;  %v7913_v21 = vld [vmem:[#allocation28 + $0x4c0] sm:$0xff] }
0x1fa6   : > { %v11646_v42 = vpop.f32.mrf.mxu0  ;;  %11683 = vmatmul.mubr.f32.vlgmr.msra.gmra.mxu0 %v7559_v12 }
0x1fa7   : > { %v7560_v8 = vadd.f32 %v7557_v15, %v7548_v53  ;;  %v7551_v30 = vadd.f32 %v11646_v42, %v7306_v23  ;;  %11739 = vmatpush3.msra.mxu0 %v7920_v57  ;;  %v8035_v23 = vld [vmem:[#allocation28 + $0x540] sm:$0xff]  ;;  %v8034_v53 = vld [vmem:[#allocation28 + $0x538] sm:$0xff]  ;;  %v7911_v42 = vld [vmem:[#allocation28 + $0x4b0] sm:$0xff] }
0x1fa8   : > { %v7527_v43 = vpop.f32.mrf.mxu0  ;;  %11740 = vmatprep.subr.mxu0 %v7919_v29 }
0x1fa9   : > { %v7563_v40 = vadd.f32 %v7557_v15, %v7551_v30  ;;  %v7550_v34 = vadd.f32 %v7527_v43, %v7301_v11  ;;  %11685 = vmatprep.mubr.f32.mxu0 %v7560_v8  ;;  %11741 = vmatpush3.msra.mxu0 %v7919_v29  ;;  %v8033_v11 = vld [vmem:[#allocation28 + $0x530] sm:$0xff]  ;;  %v8032_v30 = vld [vmem:[#allocation28 + $0x528] sm:$0xff]  ;;  %v7909_v43 = vld [vmem:[#allocation28 + $0x4a0] sm:$0xff] }
0x1faa   : > { %v11649_v28 = vpop.f32.mrf.mxu0  ;;  %11686 = vmatmul.mubr.f32.gmra.mxu0 %v7561_v14  ;;  %11742 = vmatprep.subr.mxu0 %v7918_v50 }
0x1fab   : > { %v7562_v44 = vadd.f32 %v7557_v15, %v7550_v34  ;;  %v7553_v60 = vadd.f32 %v11649_v28, %v7316_v58  ;;  %11743 = vmatpush3.msra.mxu0 %v7918_v50  ;;  %v8031_v58 = vld [vmem:[#allocation28 + $0x520] sm:$0xff]  ;;  %v8030_v34 = vld [vmem:[#allocation28 + $0x518] sm:$0xff]  ;;  %v7907_v28 = vld [vmem:[#allocation28 + $0x490] sm:$0xff] }
0x1fac   : > { %v7537_v1 = vpop.f32.mrf.mxu0  ;;  %11744 = vmatprep.subr.mxu0 %v7917_v56 }
0x1fad   : > { %v7565_v24 = vadd.f32 %v7557_v15, %v7553_v60  ;;  %v7552_v20 = vadd.f32 %v7537_v1, %v7311_v37  ;;  %11688 = vmatprep.mubr.f32.mxu0 %v7562_v44  ;;  %11745 = vmatpush3.msra.mxu0 %v7917_v56  ;;  %v8029_v37 = vld [vmem:[#allocation28 + $0x510] sm:$0xff]  ;;  %v8028_v60 = vld [vmem:[#allocation28 + $0x508] sm:$0xff]  ;;  %v7905_v1 = vld [vmem:[#allocation28 + $0x480] sm:$0xff] }
0x1fae   : > { %11689 = vmatmul.mubr.f32.gmra.mxu0 %v7563_v40 }
0x1faf   : > { %v7564_v41 = vadd.f32 %v7557_v15, %v7552_v20  ;;  %v8042_v15 = vld [vmem:[#allocation28 + $0x578] sm:$0xff] }
0x1fb0   : > { %11782 = vmatprep.subr.mxu1 %v8042_v15 }
0x1fb1   : > { %11691 = vmatprep.mubr.f32.mxu0 %v7564_v41 }
0x1fb2   : > { %11692 = vmatmul.mubr.f32.gmra.mxu0 %v7565_v24 }
0x2066   : > { %v11684_v27 = vpop.f32.mrf.mxu0 }
0x2067   : > { %v14810_v55 = vsub.f32 %v7559_v12, %v11684_v27  ;;  %v7916_v12 = vld [vmem:[#allocation28 + $0x4d8] sm:$0xff] }
0x2068   : > { %v7632_v5 = vpop.f32.mrf.mxu0  ;;  %11746 = vmatprep.subr.mxu0 %v7916_v12 }
0x2069   : > { %v14812_v3 = vsub.f32 %v7558_v61, %v7632_v5  ;;  %v7680_v62 = vmul.f32 %v14810_v55, %v14810_v55  ;;  %11747 = vmatpush3.msra.mxu0 %v7916_v12  ;;  %v7914_v61 = vld [vmem:[#allocation28 + $0x4c8] sm:$0xff] }
0x206a   : > { %v11687_v51 = vpop.f32.mrf.mxu0  ;;  %11748 = vmatprep.subr.mxu0 %v7915_v48 }
0x206b   : > { %v7679_v10 = vmul.f32 %v14812_v3, %v14812_v3  ;;  %v14818_v36 = vsub.f32 %v7561_v14, %v11687_v51  ;;  %11749 = vmatpush3.msra.mxu0 %v7915_v48  ;;  %v7912_v14 = vld [vmem:[#allocation28 + $0x4b8] sm:$0xff] }
0x206c   : > { %v7642_v7 = vpop.f32.mrf.mxu0  ;;  %11750 = vmatprep.subr.mxu0 %v7914_v61 }
0x206d   : > { %v14820_v32 = vsub.f32 %v7560_v8, %v7642_v7  ;;  %11726 = vmatprep.mubr.f32.mxu1 %v7679_v10  ;;  %v7682_v38 = vmul.f32 %v14818_v36, %v14818_v36  ;;  %11751 = vmatpush3.msra.mxu0 %v7914_v61  ;;  %v7910_v8 = vld [vmem:[#allocation28 + $0x4a8] sm:$0xff] }
0x206e   : > { %v11690_v45 = vpop.f32.mrf.mxu0  ;;  %11727 = vmatmul.mubr.f32.vlgmr.msra.gmra.mxu1 %v7680_v62  ;;  %11752 = vmatprep.subr.mxu0 %v7913_v21 }
0x206f   : > { %v7681_v54 = vmul.f32 %v14820_v32, %v14820_v32  ;;  %v14826_v0 = vsub.f32 %v7563_v40, %v11690_v45  ;;  %11783 = vmatpush3.msra.mxu1 %v8042_v15  ;;  %11753 = vmatpush3.msra.mxu0 %v7913_v21  ;;  %v7908_v40 = vld [vmem:[#allocation28 + $0x498] sm:$0xff] }
0x2070   : > { %v7652_v63 = vpop.f32.mrf.mxu0  ;;  %11784 = vmatprep.subr.mxu1 %v8041_v6  ;;  %11754 = vmatprep.subr.mxu0 %v7912_v14 }
0x2071   : > { %v14828_v17 = vsub.f32 %v7562_v44, %v7652_v63  ;;  %11729 = vmatprep.mubr.f32.mxu1 %v7681_v54  ;;  %v7684_v52 = vmul.f32 %v14826_v0, %v14826_v0  ;;  %11785 = vmatpush3.msra.mxu1 %v8041_v6  ;;  %v7906_v44 = vld [vmem:[#allocation28 + $0x488] sm:$0xff] }
0x2072   : > { %v11693_v4 = vpop.f32.mrf.mxu0  ;;  %11730 = vmatmul.mubr.f32.gmra.mxu1 %v7682_v38  ;;  %11786 = vmatprep.subr.mxu1 %v8040_v31 }
0x2073   : > { %v7683_v39 = vmul.f32 %v14828_v17, %v14828_v17  ;;  %v14834_v49 = vsub.f32 %v7565_v24, %v11693_v4  ;;  %11787 = vmatpush3.msra.mxu1 %v8040_v31  ;;  %11755 = vmatpush3.msra.mxu0 %v7912_v14  ;;  %v8027_v24 = vld [vmem:[#allocation28 + $0x500] sm:$0xff] }
0x2074   : > { %v7662_v33 = vpop.f32.mrf.mxu0  ;;  %11788 = vmatprep.subr.mxu1 %v8039_v13  ;;  %11756 = vmatprep.subr.mxu0 %v7911_v42 }
0x2075   : > { %v14836_v18 = vsub.f32 %v7564_v41, %v7662_v33  ;;  %11732 = vmatprep.mubr.f32.mxu1 %v7683_v39  ;;  %v7686_v59 = vmul.f32 %v14834_v49, %v14834_v49  ;;  %11789 = vmatpush3.msra.mxu1 %v8039_v13  ;;  %v12482_v33 = vld [vmem:[#allocation31 + $0x8] sm:$0x1f] }
0x2076   : > { %11733 = vmatmul.mubr.f32.gmra.mxu1 %v7684_v52  ;;  %11790 = vmatprep.subr.mxu1 %v8038_v9  ;;  %v7823_v15 = vrot.slane %v12482_v33, %v13852_v16 }
0x2077   : > { %v7685_v26 = vmul.f32 %v14836_v18, %v14836_v18  ;;  %11791 = vmatpush3.msra.mxu1 %v8038_v9  ;;  %11757 = vmatpush3.msra.mxu0 %v7911_v42 }
0x2078   : > { %11792 = vmatprep.subr.mxu1 %v8037_v19  ;;  %11758 = vmatprep.subr.mxu0 %v7910_v8 }
0x2079   : > { %11735 = vmatprep.mubr.f32.mxu1 %v7685_v26  ;;  %11793 = vmatpush3.msra.mxu1 %v8037_v19  ;;  %v7811_v26 = vrot.slane %v12482_v33, %v13806_v47 }
0x207a   : > { %11736 = vmatmul.mubr.f32.gmra.mxu1 %v7686_v59  ;;  %11794 = vmatprep.subr.mxu1 %v8036_v22 }
0x207b   : > { %11795 = vmatpush3.msra.mxu1 %v8036_v22  ;;  %11759 = vmatpush3.msra.mxu0 %v7910_v8 }
0x207c   : > { %11796 = vmatprep.subr.mxu1 %v8035_v23  ;;  %11760 = vmatprep.subr.mxu0 %v7909_v43 }
0x207d   : > { %11797 = vmatpush3.msra.mxu1 %v8035_v23  ;;  %11761 = vmatpush3.msra.mxu0 %v7909_v43 }
0x207e   : > { %11798 = vmatprep.subr.mxu1 %v8034_v53  ;;  %11762 = vmatprep.subr.mxu0 %v7908_v40 }
0x207f   : > { %11799 = vmatpush3.msra.mxu1 %v8034_v53  ;;  %11763 = vmatpush3.msra.mxu0 %v7908_v40 }
0x2080   : > { %11800 = vmatprep.subr.mxu1 %v8033_v11  ;;  %11764 = vmatprep.subr.mxu0 %v7907_v28 }
0x2081   : > { %11801 = vmatpush3.msra.mxu1 %v8033_v11  ;;  %11765 = vmatpush3.msra.mxu0 %v7907_v28 }
0x2082   : > { %11802 = vmatprep.subr.mxu1 %v8032_v30  ;;  %11766 = vmatprep.subr.mxu0 %v7906_v44 }
0x2083   : > { %11803 = vmatpush3.msra.mxu1 %v8032_v30  ;;  %11767 = vmatpush3.msra.mxu0 %v7906_v44 }
0x2084   : > { %11804 = vmatprep.subr.mxu1 %v8031_v58  ;;  %11768 = vmatprep.subr.mxu0 %v7905_v1 }
0x2085   : > { %11805 = vmatpush3.msra.mxu1 %v8031_v58  ;;  %11769 = vmatpush3.msra.mxu0 %v7905_v1 }
0x2086   : > { %11806 = vmatprep.subr.mxu1 %v8030_v34 }
0x2087   : > { %11807 = vmatpush3.msra.mxu1 %v8030_v34 }
0x2088   : > { %11808 = vmatprep.subr.mxu1 %v8029_v37 }
0x2089   : > { %11809 = vmatpush3.msra.mxu1 %v8029_v37 }
0x208a   : > { %11810 = vmatprep.subr.mxu1 %v8028_v60 }
0x208b   : > { %11811 = vmatpush3.msra.mxu1 %v8028_v60 }
0x208c   : > { %11812 = vmatprep.subr.mxu1 %v8027_v24 }
0x208d   : > { %11813 = vmatpush3.msra.mxu1 %v8027_v24 }
0x212e   : > { %v11728_v20 = vpop.f32.mrf.mxu1 }
0x212f   : > { %v7759_v41 = vadd.f32 1e-06, %v11728_v20 }
0x2130   : > { %v7753_v27 = vpop.f32.mrf.mxu1 }
0x2131   : > { %12335 = vrsqrt.f32 %v7759_v41  ;;  %v7754_v5 = vadd.f32 1e-06, %v7753_v27 }
0x2132   : > { %v11731_v51 = vpop.f32.mrf.mxu1 }
0x2133   : > { %12337 = vrsqrt.f32 %v7754_v5  ;;  %v7769_v10 = vadd.f32 1e-06, %v11731_v51 }
0x2134   : > { %v7763_v62 = vpop.f32.mrf.mxu1 }
0x2135   : > { %12339 = vrsqrt.f32 %v7769_v10  ;;  %v7764_v7 = vadd.f32 1e-06, %v7763_v62 }
0x2136   : > { %v11734_v45 = vpop.f32.mrf.mxu1 }
0x2137   : > { %12341 = vrsqrt.f32 %v7764_v7  ;;  %v7779_v54 = vadd.f32 1e-06, %v11734_v45 }
0x2138   : > { %v7773_v38 = vpop.f32.mrf.mxu1 }
0x2139   : > { %12343 = vrsqrt.f32 %v7779_v54  ;;  %v7774_v63 = vadd.f32 1e-06, %v7773_v38 }
0x213a   : > { %v11737_v4 = vpop.f32.mrf.mxu1 }
0x213b   : > { %12345 = vrsqrt.f32 %v7774_v63  ;;  %v7789_v39 = vadd.f32 1e-06, %v11737_v4 }
0x213c   : > { %v7783_v52 = vpop.f32.mrf.mxu1 }
0x213d   : > { %12347 = vrsqrt.f32 %v7789_v39  ;;  %v7784_v59 = vadd.f32 1e-06, %v7783_v52 }
0x213e   : > { %v12336_v57 = vpop.eup %12335 }
0x213f   : > { %v7801_v29 = vmul.f32 %v12336_v57, %v14810_v55  ;;  %12349 = vrsqrt.f32 %v7784_v59 }
0x2140   : > { %v12338_v6 = vpop.eup %12337 }
0x2141   : > { %v7813_v50 = vmul.f32 %v7811_v26, %v7801_v29  ;;  %v7800_v31 = vmul.f32 %v12338_v6, %v14812_v3 }
0x2142   : > { %v12340_v56 = vpop.eup %12339 }
0x2143   : > { %v14846_v13 = vadd.f32 %v7823_v15, %v7813_v50  ;;  %v7812_v12 = vmul.f32 %v7811_v26, %v7800_v31  ;;  %v7803_v9 = vmul.f32 %v12340_v56, %v14818_v36 }
0x2144   : > { %v12342_v48 = vpop.eup %12341 }
0x2145   : > { %v7815_v47 = vmul.f32 %v7811_v26, %v7803_v9  ;;  %v7802_v19 = vmul.f32 %v12342_v48, %v14820_v32  ;;  %v14850_v61 = vadd.f32 %v7823_v15, %v7812_v12  ;;  %v7841_v55 = vmul.f32 0.044715, %v14846_v13 }
0x2146   : > { %v12344_v16 = vpop.eup %12343 }
0x2147   : > { %v14853_v22 = vadd.f32 %v7823_v15, %v7815_v47  ;;  %v7814_v21 = vmul.f32 %v7811_v26, %v7802_v19  ;;  %v7805_v3 = vmul.f32 %v12344_v16, %v14826_v0  ;;  %v7840_v14 = vmul.f32 0.044715, %v14850_v61 }
0x2148   : > { %v12346_v23 = vpop.eup %12345  ;;  %v7849_v53 = vmul.f32 %v7841_v55, %v14846_v13 }
0x2149   : > { %v7817_v36 = vmul.f32 %v7811_v26, %v7805_v3  ;;  %v7804_v42 = vmul.f32 %v12346_v23, %v14828_v17  ;;  %v14859_v11 = vadd.f32 %v7823_v15, %v7814_v21  ;;  %v7848_v8 = vmul.f32 %v7840_v14, %v14850_v61 }
0x214a   : > { %v12348_v32 = vpop.eup %12347  ;;  %v7857_v30 = vmul.f32 %v7849_v53, %v14846_v13  ;;  %v7843_v43 = vmul.f32 0.044715, %v14853_v22  ;;  %v7832_v23 = vmul.f32 0.5, %v14850_v61 }
0x214b   : > { %v7816_v58 = vmul.f32 %v7811_v26, %v7804_v42  ;;  %v7807_v0 = vmul.f32 %v12348_v32, %v14834_v49  ;;  %v7856_v34 = vmul.f32 %v7848_v8, %v14850_v61  ;;  %v7842_v37 = vmul.f32 0.044715, %v14859_v11 }
0x214c   : > { %v12350_v40 = vpop.eup %12349  ;;  %v7865_v28 = vadd.f32 %v7857_v30, %v14846_v13  ;;  %v7851_v17 = vmul.f32 %v7843_v43, %v14853_v22  ;;  %v14869_v44 = vadd.f32 %v7823_v15, %v7817_v36  ;;  %v7833_v36 = vmul.f32 0.5, %v14846_v13 }
0x214d   : > { %v7819_v60 = vmul.f32 %v7811_v26, %v7807_v0  ;;  %v7806_v1 = vmul.f32 %v12350_v40, %v14836_v18  ;;  %v14872_v24 = vadd.f32 %v7823_v15, %v7816_v58  ;;  %v7864_v20 = vadd.f32 %v7856_v34, %v14850_v61 }
0x214e   : > { %v7873_v41 = vmul.f32 0.7978846, %v7865_v28  ;;  %v7850_v49 = vmul.f32 %v7842_v37, %v14859_v11  ;;  %v7859_v27 = vmul.f32 %v7851_v17, %v14853_v22  ;;  %v7845_v54 = vmul.f32 0.044715, %v14869_v44 }
0x214f   : > { %v14877_v5 = vadd.f32 %v7823_v15, %v7819_v60  ;;  %v7818_v51 = vmul.f32 %v7811_v26, %v7806_v1  ;;  %v7844_v10 = vmul.f32 0.044715, %v14872_v24  ;;  %v7872_v62 = vmul.f32 0.7978846, %v7864_v20 }
0x2150   : > { %12351 = vtanh.f32 %v7873_v41  ;;  %v7858_v7 = vmul.f32 %v7850_v49, %v14859_v11  ;;  %v7867_v18 = vadd.f32 %v7859_v27, %v14853_v22  ;;  %v7853_v33 = vmul.f32 %v7845_v54, %v14869_v44 }
0x2151   : > { %v7852_v45 = vmul.f32 %v7844_v10, %v14872_v24  ;;  %v14884_v38 = vadd.f32 %v7823_v15, %v7818_v51  ;;  %12353 = vtanh.f32 %v7872_v62  ;;  %v7847_v39 = vmul.f32 0.044715, %v14877_v5  ;;  %v12483_v10 = vld [vmem:[#allocation27 + $0x40] sm:$0xff] }
0x2152   : > { %v7866_v63 = vadd.f32 %v7858_v7, %v14859_v11  ;;  %v7875_v4 = vmul.f32 0.7978846, %v7867_v18  ;;  %v7861_v15 = vmul.f32 %v7853_v33, %v14869_v44  ;;  %v7834_v43 = vmul.f32 0.5, %v14859_v11  ;;  %v12484_v62 = vld [vmem:[#allocation27] sm:$0xff] }
0x2153   : > { %v7860_v52 = vmul.f32 %v7852_v45, %v14872_v24  ;;  %v7846_v26 = vmul.f32 0.044715, %v14884_v38  ;;  %v7855_v57 = vmul.f32 %v7847_v39, %v14877_v5  ;;  %v7835_v61 = vmul.f32 0.5, %v14853_v22 }
0x2154   : > { %v7874_v59 = vmul.f32 0.7978846, %v7866_v63  ;;  %12355 = vtanh.f32 %v7875_v4  ;;  %v7869_v56 = vadd.f32 %v7861_v15, %v14869_v44  ;;  %v7836_v34 = vmul.f32 0.5, %v14872_v24 }
0x2155   : > { %v7868_v29 = vadd.f32 %v7860_v52, %v14872_v24  ;;  %v7854_v6 = vmul.f32 %v7846_v26, %v14884_v38  ;;  %v7863_v50 = vmul.f32 %v7855_v57, %v14877_v5  ;;  %v7837_v22 = vmul.f32 0.5, %v14869_v44 }
0x2156   : > { %12357 = vtanh.f32 %v7874_v59  ;;  %v7877_v48 = vmul.f32 0.7978846, %v7869_v56  ;;  %v7838_v20 = vmul.f32 0.5, %v14884_v38  ;;  %v7839_v44 = vmul.f32 0.5, %v14877_v5  ;;  %v12486_v56 = vld [vmem:[#allocation27 + $0x8] sm:$0xff] }
0x2157   : > { %v7876_v31 = vmul.f32 0.7978846, %v7868_v29  ;;  %v7862_v12 = vmul.f32 %v7854_v6, %v14884_v38  ;;  %v7871_v9 = vadd.f32 %v7863_v50, %v14877_v5  ;;  %v8374_v6 = vld [vmem:[#allocation28 + $0x5f8] sm:$0xff]  ;;  %v8373_v50 = vld [vmem:[#allocation28 + $0x5f0] sm:$0xff] }
0x2159   : > { %12359 = vtanh.f32 %v7876_v31  ;;  %v7870_v47 = vadd.f32 %v7862_v12, %v14884_v38  ;;  %v7879_v19 = vmul.f32 0.7978846, %v7871_v9  ;;  %v12485_v31 = vld [vmem:[#allocation27 + $0x48] sm:$0xff]  ;;  %v12487_v9 = vld [vmem:[#allocation27 + $0x50] sm:$0xff] }
0x215a   : > { %12361 = vtanh.f32 %v7877_v48  ;;  %v8372_v12 = vld [vmem:[#allocation28 + $0x5e8] sm:$0xff]  ;;  %v8371_v48 = vld [vmem:[#allocation28 + $0x5e0] sm:$0xff] }
0x215b   : > { %v7878_v16 = vmul.f32 0.7978846, %v7870_v47  ;;  %12363 = vtanh.f32 %v7879_v19  ;;  %v12488_v47 = vld [vmem:[#allocation27 + $0x10] sm:$0xff]  ;;  %v12489_v19 = vld [vmem:[#allocation27 + $0x58] sm:$0xff] }
0x215d   : > { %v12352_v55 = vpop.eup %12351  ;;  %12365 = vtanh.f32 %v7878_v16  ;;  %v12490_v16 = vld [vmem:[#allocation27 + $0x60] sm:$0xff] }
0x215e   : > { %v12354_v21 = vpop.eup %12353  ;;  %v7889_v3 = vadd.f32 1.0, %v12352_v55  ;;  %v8370_v55 = vld [vmem:[#allocation28 + $0x5d8] sm:$0xff] }
0x215f   : > { %v7888_v14 = vadd.f32 1.0, %v12354_v21  ;;  %v12491_v21 = vld [vmem:[#allocation27 + $0x18] sm:$0xff] }
0x2160   : > { %v14904_v8 = vmul.f32 %v7889_v3, %v7833_v36  ;;  %v8369_v3 = vld [vmem:[#allocation28 + $0x5d0] sm:$0xff]  ;;  %v8368_v36 = vld [vmem:[#allocation28 + $0x5c8] sm:$0xff] }
0x2161   : > { %v12356_v53 = vpop.eup %12355  ;;  %v14902_v42 = vmul.f32 %v7888_v14, %v7832_v23  ;;  %v12492_v23 = vld [vmem:[#allocation27 + $0x20] sm:$0xff]  ;;  %v12493_v14 = vld [vmem:[#allocation27 + $0x68] sm:$0xff] }
0x2162   : > { %v7891_v30 = vadd.f32 1.0, %v12356_v53  ;;  %v12494_v53 = vld [vmem:[#allocation27 + $0x70] sm:$0xff] }
0x2163   : > { %v12358_v32 = vpop.eup %12357  ;;  %11770 = vmatprep.mubr.f32.mxu0 %v14902_v42  ;;  %11814 = vmatprep.mubr.f32.mxu1 %v14902_v42 }
0x2164   : > { %v7890_v58 = vadd.f32 1.0, %v12358_v32  ;;  %11771 = vmatmul.mubr.f32.vlgmr.msra.gmra.mxu0 %v14904_v8  ;;  %11815 = vmatmul.mubr.f32.vlgmr.msra.gmra.mxu1 %v14904_v8  ;;  %v14914_v40 = vmul.f32 %v7891_v30, %v7835_v61  ;;  %v12495_v32 = vld [vmem:[#allocation27 + $0x28] sm:$0xff]  ;;  %v8367_v30 = vld [vmem:[#allocation28 + $0x5c0] sm:$0xff]  ;;  %v8366_v61 = vld [vmem:[#allocation28 + $0x5b8] sm:$0xff] }
0x2166   : > { %v12360_v13 = vpop.eup %12359  ;;  %v14912_v0 = vmul.f32 %v7890_v58, %v7834_v43  ;;  %v12496_v43 = vld [vmem:[#allocation27 + $0x30] sm:$0xff]  ;;  %v12497_v58 = vld [vmem:[#allocation27 + $0x78] sm:$0xff] }
0x2167   : > { %v7892_v28 = vadd.f32 1.0, %v12360_v13  ;;  %v12362_v37 = vpop.eup %12361  ;;  %v12498_v13 = vld [vmem:[#allocation27 + $0x38] sm:$0xff] }
0x2168   : > { %11773 = vmatprep.mubr.f32.mxu0 %v14912_v0  ;;  %11817 = vmatprep.mubr.f32.mxu1 %v14912_v0  ;;  %v12364_v11 = vpop.eup %12363  ;;  %v7893_v60 = vadd.f32 1.0, %v12362_v37  ;;  %v8364_v37 = vld [vmem:[#allocation28 + $0x5a8] sm:$0xff] }
0x2169   : > { %11774 = vmatmul.mubr.f32.gmra.mxu0 %v14914_v40  ;;  %11818 = vmatmul.mubr.f32.gmra.mxu1 %v14914_v40  ;;  %v14921_v17 = vmul.f32 %v7892_v28, %v7836_v34  ;;  %v7895_v49 = vadd.f32 1.0, %v12364_v11  ;;  %v8365_v34 = vld [vmem:[#allocation28 + $0x5b0] sm:$0xff]  ;;  %v12499_v28 = vld [vmem:[#allocation27 + $0x80] sm:$0xff] }
0x216a   : > { %v12366_v1 = vpop.eup %12365  ;;  %v14926_v24 = vmul.f32 %v7893_v60, %v7837_v22  ;;  %v8363_v11 = vld [vmem:[#allocation28 + $0x5a0] sm:$0xff]  ;;  %v8362_v22 = vld [vmem:[#allocation28 + $0x598] sm:$0xff]  ;;  %v8360_v60 = vld [vmem:[#allocation28 + $0x588] sm:$0xff] }
0x216b   : > { %11776 = vmatprep.mubr.f32.mxu0 %v14921_v17  ;;  %11820 = vmatprep.mubr.f32.mxu1 %v14921_v17  ;;  %v7894_v41 = vadd.f32 1.0, %v12366_v1  ;;  %v14936_v51 = vmul.f32 %v7895_v49, %v7839_v44  ;;  %v8359_v1 = vld [vmem:[#allocation28 + $0x580] sm:$0xff] }
0x216d   : > { %11777 = vmatmul.mubr.f32.gmra.mxu0 %v14926_v24  ;;  %11821 = vmatmul.mubr.f32.gmra.mxu1 %v14926_v24  ;;  %v14931_v27 = vmul.f32 %v7894_v41, %v7838_v20 }
0x216f   : > { %11779 = vmatprep.mubr.f32.mxu0 %v14931_v27  ;;  %11823 = vmatprep.mubr.f32.mxu1 %v14931_v27 }
0x2171   : > { %11780 = vmatmul.mubr.f32.gmra.mxu0 %v14936_v51  ;;  %11824 = vmatmul.mubr.f32.gmra.mxu1 %v14936_v51 }
0x2172   : > { %11842 = vmatprep.mubr.msk.f32.mxu0 %vm2793_vm6, %v12483_v10  ;;  %11870 = vmatprep.mubr.msk.f32.mxu1 %vm2793_vm6, %v12484_v62 }
0x2224   : > { %v11772_v7 = vpop.f32.mrf.mxu0  ;;  %v11816_v18 = vpop.f32.mrf.mxu1 }
0x2226   : > { %v7987_v45 = vpop.f32.mrf.mxu0  ;;  %v8109_v5 = vpop.f32.mrf.mxu1 }
0x2229   : > { %v11775_v54 = vpop.f32.mrf.mxu0  ;;  %v11819_v38 = vpop.f32.mrf.mxu1 }
0x222b   : > { %v7997_v63 = vpop.f32.mrf.mxu0  ;;  %v8119_v4 = vpop.f32.mrf.mxu1 }
0x222d   : > { %v11778_v39 = vpop.f32.mrf.mxu0  ;;  %v11822_v52 = vpop.f32.mrf.mxu1 }
0x222f   : > { %v8007_v33 = vpop.f32.mrf.mxu0  ;;  %v8129_v26 = vpop.f32.mrf.mxu1 }
0x2231   : > { %v11781_v59 = vpop.f32.mrf.mxu0  ;;  %v11825_v57 = vpop.f32.mrf.mxu1 }
0x2232   : > { %11826 = vmatprep.subr.mxu0 %v11825_v57  ;;  %11854 = vmatprep.subr.mxu1 %v11781_v59 }
0x2233   : > { %v8017_v29 = vpop.f32.mrf.mxu0  ;;  %v8139_v15 = vpop.f32.mrf.mxu1  ;;  %11827 = vmatpush3.msra.mxu0 %v11825_v57  ;;  %11855 = vmatpush3.msra.mxu1 %v11781_v59 }
0x2234   : > { %11828 = vmatprep.subr.mxu0 %v8139_v15  ;;  %11856 = vmatprep.subr.mxu1 %v8017_v29 }
0x2235   : > { %11829 = vmatpush3.msra.mxu0 %v8139_v15  ;;  %11857 = vmatpush3.msra.mxu1 %v8017_v29 }
0x2236   : > { %11830 = vmatprep.subr.mxu0 %v11822_v52  ;;  %11858 = vmatprep.subr.mxu1 %v11778_v39 }
0x2237   : > { %11831 = vmatpush3.msra.mxu0 %v11822_v52  ;;  %11859 = vmatpush3.msra.mxu1 %v11778_v39  ;;  %v12505_v39 = vld [vmem:[#allocation27 + $0xb0] sm:$0xff] }
0x2238   : > { %11832 = vmatprep.subr.mxu0 %v8129_v26  ;;  %11860 = vmatprep.subr.mxu1 %v8007_v33 }
0x2239   : > { %11833 = vmatpush3.msra.mxu0 %v8129_v26  ;;  %11861 = vmatpush3.msra.mxu1 %v8007_v33 }
0x223a   : > { %11834 = vmatprep.subr.mxu0 %v11819_v38  ;;  %11862 = vmatprep.subr.mxu1 %v11775_v54 }
0x223b   : > { %11835 = vmatpush3.msra.mxu0 %v11819_v38  ;;  %11863 = vmatpush3.msra.mxu1 %v11775_v54  ;;  %v12501_v54 = vld [vmem:[#allocation27 + $0x90] sm:$0xff]  ;;  %v12502_v38 = vld [vmem:[#allocation27 + $0x98] sm:$0xff] }
0x223c   : > { %11836 = vmatprep.subr.mxu0 %v8119_v4  ;;  %11864 = vmatprep.subr.mxu1 %v7997_v63 }
0x223d   : > { %11837 = vmatpush3.msra.mxu0 %v8119_v4  ;;  %11865 = vmatpush3.msra.mxu1 %v7997_v63  ;;  %v12503_v63 = vld [vmem:[#allocation27 + $0xa0] sm:$0xff]  ;;  %v12504_v4 = vld [vmem:[#allocation27 + $0xa8] sm:$0xff] }
0x223e   : > { %11838 = vmatprep.subr.mxu0 %v11816_v18  ;;  %11866 = vmatprep.subr.mxu1 %v11772_v7 }
0x223f   : > { %11839 = vmatpush3.msra.mxu0 %v11816_v18  ;;  %11867 = vmatpush3.msra.mxu1 %v11772_v7 }
0x2240   : > { %11840 = vmatprep.subr.mxu0 %v8109_v5  ;;  %11868 = vmatprep.subr.mxu1 %v7987_v45 }
0x2241   : > { %11841 = vmatpush3.msra.mxu0 %v8109_v5  ;;  %11869 = vmatpush3.msra.mxu1 %v7987_v45  ;;  %v12500_v5 = vld [vmem:[#allocation27 + $0x88] sm:$0xff] }
0x2242   : > { %11843 = vmatmul.mubr.msk.f32.vlgmr.msra.gmra.mxu0 %vm2793_vm6, %v12485_v31  ;;  %11882 = vmatprep.subr.mxu0 %v8374_v6 }
0x2243   : > { %11871 = vmatmul.mubr.msk.f32.vlgmr.msra.gmra.mxu1 %vm2793_vm6, %v12486_v56  ;;  %11883 = vmatpush3.msra.mxu0 %v8374_v6 }
0x2244   : > { %11884 = vmatprep.subr.mxu0 %v8373_v50  ;;  %11845 = vmatprep.mubr.msk.f32.mxu0 %vm2793_vm6, %v12487_v9 }
0x2245   : > { %11885 = vmatpush3.msra.mxu0 %v8373_v50  ;;  %11873 = vmatprep.mubr.msk.f32.mxu1 %vm2793_vm6, %v12488_v47  ;;  %v8596_v50 = vrot.slane %v14797_v25, %v3808_v46 }
0x2246   : > { %11846 = vmatmul.mubr.msk.f32.gmra.mxu0 %vm2793_vm6, %v12489_v19  ;;  %11886 = vmatprep.subr.mxu0 %v8372_v12 }
0x2247   : > { %11887 = vmatpush3.msra.mxu0 %v8372_v12  ;;  %11848 = vmatprep.mubr.msk.f32.mxu0 %vm2793_vm6, %v12490_v16 }
0x2248   : > { %11888 = vmatprep.subr.mxu0 %v8371_v48  ;;  %11874 = vmatmul.mubr.msk.f32.gmra.mxu1 %vm2793_vm6, %v12491_v21 }
0x2249   : > { %11889 = vmatpush3.msra.mxu0 %v8371_v48  ;;  %11876 = vmatprep.mubr.msk.f32.mxu1 %vm2793_vm6, %v12492_v23 }
0x224a   : > { %11849 = vmatmul.mubr.msk.f32.gmra.mxu0 %vm2793_vm6, %v12493_v14  ;;  %11890 = vmatprep.subr.mxu0 %v8370_v55 }
0x224b   : > { %11891 = vmatpush3.msra.mxu0 %v8370_v55  ;;  %11851 = vmatprep.mubr.msk.f32.mxu0 %vm2793_vm6, %v12494_v53 }
0x224c   : > { %11892 = vmatprep.subr.mxu0 %v8369_v3  ;;  %11877 = vmatmul.mubr.msk.f32.gmra.mxu1 %vm2793_vm6, %v12495_v32 }
0x224d   : > { %11893 = vmatpush3.msra.mxu0 %v8369_v3  ;;  %11879 = vmatprep.mubr.msk.f32.mxu1 %vm2793_vm6, %v12496_v43 }
0x224e   : > { %11852 = vmatmul.mubr.msk.f32.gmra.mxu0 %vm2793_vm6, %v12497_v58  ;;  %11894 = vmatprep.subr.mxu0 %v8368_v36 }
0x224f   : > { %11895 = vmatpush3.msra.mxu0 %v8368_v36  ;;  %11914 = vmatprep.mubr.f32.mxu0 %v14902_v42  ;;  %v8361_v42 = vld [vmem:[#allocation28 + $0x590] sm:$0xff] }
0x2250   : > { %11896 = vmatprep.subr.mxu0 %v8367_v30  ;;  %11880 = vmatmul.mubr.msk.f32.gmra.mxu1 %vm2793_vm6, %v12498_v13 }
0x2251   : > { %11897 = vmatpush3.msra.mxu0 %v8367_v30  ;;  %11942 = vmatprep.mubr.msk.f32.mxu1 %vm2793_vm6, %v12499_v28 }
0x2252   : > { %11898 = vmatprep.subr.mxu0 %v8366_v61 }
0x2253   : > { %11899 = vmatpush3.msra.mxu0 %v8366_v61 }
0x2254   : > { %11900 = vmatprep.subr.mxu0 %v8365_v34 }
0x2255   : > { %11901 = vmatpush3.msra.mxu0 %v8365_v34 }
0x2256   : > { %11902 = vmatprep.subr.mxu0 %v8364_v37 }
0x2257   : > { %11903 = vmatpush3.msra.mxu0 %v8364_v37 }
0x2258   : > { %11904 = vmatprep.subr.mxu0 %v8363_v11 }
0x2259   : > { %11905 = vmatpush3.msra.mxu0 %v8363_v11 }
0x225a   : > { %11906 = vmatprep.subr.mxu0 %v8362_v22 }
0x225b   : > { %11907 = vmatpush3.msra.mxu0 %v8362_v22 }
0x225c   : > { %11908 = vmatprep.subr.mxu0 %v8361_v42 }
0x225d   : > { %11909 = vmatpush3.msra.mxu0 %v8361_v42 }
0x225e   : > { %11910 = vmatprep.subr.mxu0 %v8360_v60 }
0x225f   : > { %11911 = vmatpush3.msra.mxu0 %v8360_v60 }
0x2260   : > { %11912 = vmatprep.subr.mxu0 %v8359_v1 }
0x2261   : > { %11913 = vmatpush3.msra.mxu0 %v8359_v1 }
0x2262   : > { %11915 = vmatmul.mubr.f32.vlgmr.msra.gmra.mxu0 %v14904_v8 }
0x2263   : > { %11917 = vmatprep.mubr.f32.mxu0 %v14912_v0 }
0x2266   : > { %11918 = vmatmul.mubr.f32.gmra.mxu0 %v14914_v40 }
0x2267   : > { %11920 = vmatprep.mubr.f32.mxu0 %v14921_v17 }
0x226a   : > { %11921 = vmatmul.mubr.f32.gmra.mxu0 %v14926_v24 }
0x226b   : > { %11923 = vmatprep.mubr.f32.mxu0 %v14931_v27 }
0x226e   : > { %11924 = vmatmul.mubr.f32.gmra.mxu0 %v14936_v51 }
0x2302   : > { %v11844_v20 = vpop.f32.mrf.mxu0 }
0x2303   : > { %v11872_v52 = vpop.f32.mrf.mxu1 }
0x2304   : > { %v8214_v41 = vpop.f32.mrf.mxu0  ;;  %v8325_v31 = vadd.f32 %v11872_v52, %v11844_v20 }
0x2305   : > { %v8319_v33 = vpop.f32.mrf.mxu1 }
0x2306   : > { %v11847_v49 = vpop.f32.mrf.mxu0  ;;  %v8320_v12 = vadd.f32 %v8319_v33, %v8214_v41 }
0x2308   : > { %v14965_v44 = vpop.f32.mrf.mxu0  ;;  %v11875_v26 = vpop.f32.mrf.mxu1 }
0x2309   : > { %v8335_v47 = vadd.f32 %v11875_v26, %v11847_v49 }
0x230a   : > { %v14967_v10 = vpop.f32.mrf.mxu0  ;;  %v8329_v59 = vpop.f32.mrf.mxu1 }
0x230b   : > { %v8330_v23 = vadd.f32 %v8329_v59, %v14965_v44 }
0x230c   : > { %v14969_v8 = vpop.f32.mrf.mxu0  ;;  %v11878_v57 = vpop.f32.mrf.mxu1 }
0x230d   : > { %v8345_v53 = vadd.f32 %v11878_v57, %v14967_v10 }
0x230e   : > { %v14971_v0 = vpop.f32.mrf.mxu0  ;;  %v8339_v29 = vpop.f32.mrf.mxu1 }
0x230f   : > { %v8340_v30 = vadd.f32 %v8339_v29, %v14969_v8 }
0x2310   : > { %v14973_v40 = vpop.f32.mrf.mxu0  ;;  %v11881_v15 = vpop.f32.mrf.mxu1 }
0x2311   : > { %v8355_v60 = vadd.f32 %v11881_v15, %v14971_v0 }
0x2312   : > { %v8349_v6 = vpop.f32.mrf.mxu1 }
0x2313   : > { %v8350_v0 = vadd.f32 %v8349_v6, %v14973_v40 }
0x2322   : > { %v11916_v17 = vpop.f32.mrf.mxu0 }
0x2324   : > { %v8441_v62 = vpop.f32.mrf.mxu0 }
0x2326   : > { %v11919_v24 = vpop.f32.mrf.mxu0 }
0x2328   : > { %v8451_v7 = vpop.f32.mrf.mxu0 }
0x232a   : > { %v11922_v27 = vpop.f32.mrf.mxu0 }
0x232c   : > { %v8461_v18 = vpop.f32.mrf.mxu0 }
0x232e   : > { %v11925_v51 = vpop.f32.mrf.mxu0 }
0x232f   : > { %11926 = vmatprep.subr.mxu1 %v11925_v51 }
0x2330   : > { %v8471_v45 = vpop.f32.mrf.mxu0  ;;  %11927 = vmatpush3.msra.mxu1 %v11925_v51 }
0x2331   : > { %11928 = vmatprep.subr.mxu1 %v8471_v45 }
0x2332   : > { %11929 = vmatpush3.msra.mxu1 %v8471_v45 }
0x2333   : > { %11930 = vmatprep.subr.mxu1 %v11922_v27 }
0x2334   : > { %11931 = vmatpush3.msra.mxu1 %v11922_v27 }
0x2335   : > { %11932 = vmatprep.subr.mxu1 %v8461_v18 }
0x2336   : > { %11933 = vmatpush3.msra.mxu1 %v8461_v18 }
0x2337   : > { %11934 = vmatprep.subr.mxu1 %v11919_v24 }
0x2338   : > { %11935 = vmatpush3.msra.mxu1 %v11919_v24 }
0x2339   : > { %11936 = vmatprep.subr.mxu1 %v8451_v7 }
0x233a   : > { %11937 = vmatpush3.msra.mxu1 %v8451_v7 }
0x233b   : > { %11938 = vmatprep.subr.mxu1 %v11916_v17 }
0x233c   : > { %11939 = vmatpush3.msra.mxu1 %v11916_v17 }
0x233d   : > { %11940 = vmatprep.subr.mxu1 %v8441_v62 }
0x233e   : > { %11941 = vmatpush3.msra.mxu1 %v8441_v62 }
0x233f   : > { %11943 = vmatmul.mubr.msk.f32.vlgmr.msra.gmra.mxu1 %vm2793_vm6, %v12500_v5 }
0x2340   : > { %11945 = vmatprep.mubr.msk.f32.mxu1 %vm2793_vm6, %v12501_v54 }
0x2343   : > { %11946 = vmatmul.mubr.msk.f32.gmra.mxu1 %vm2793_vm6, %v12502_v38 }
0x2344   : > { %11948 = vmatprep.mubr.msk.f32.mxu1 %vm2793_vm6, %v12503_v63 }
0x2347   : > { %11949 = vmatmul.mubr.msk.f32.gmra.mxu1 %vm2793_vm6, %v12504_v4 }
0x2348   : > { %11951 = vmatprep.mubr.msk.f32.mxu1 %vm2793_vm6, %v12505_v39 }
0x234b   : > { %11952 = vmatmul.mubr.msk.f32.gmra.mxu1 %vm2793_vm6, %v14781_v35 }
0x23ff   : > { %v11944_v56 = vpop.f32.mrf.mxu1 }
0x2400   : > { %v8586_v9 = vadd.f32 %v11944_v56, %v8325_v31 }
0x2401   : > { %v8546_v48 = vpop.f32.mrf.mxu1 }
0x2402   : > { %v14986_v19 = vadd.f32 %v8596_v50, %v8586_v9  ;;  %v8585_v35 = vadd.f32 %v8546_v48, %v8320_v12 }
0x2403   : > { %v11947_v16 = vpop.f32.mrf.mxu1 }
0x2404   : > { %v8614_v55 = vmul.f32 0.044715, %v14986_v19  ;;  %v14989_v21 = vadd.f32 %v8596_v50, %v8585_v35  ;;  %v8588_v3 = vadd.f32 %v11947_v16, %v8335_v47 }
0x2405   : > { %v8556_v2 = vpop.f32.mrf.mxu1 }
0x2406   : > { %v8622_v46 = vmul.f32 %v8614_v55, %v14986_v19  ;;  %v8613_v25 = vmul.f32 0.044715, %v14989_v21  ;;  %v14994_v14 = vadd.f32 %v8596_v50, %v8588_v3  ;;  %v8587_v36 = vadd.f32 %v8556_v2, %v8330_v23 }
0x2407   : > { %v11950_v32 = vpop.f32.mrf.mxu1  ;;  %v8606_v55 = vmul.f32 0.5, %v14986_v19 }
0x2408   : > { %v8630_v43 = vmul.f32 %v8622_v46, %v14986_v19  ;;  %v8621_v58 = vmul.f32 %v8613_v25, %v14989_v21  ;;  %v8616_v61 = vmul.f32 0.044715, %v14994_v14  ;;  %v15001_v13 = vadd.f32 %v8596_v50, %v8587_v36 }
0x2409   : > { %v8590_v34 = vadd.f32 %v11950_v32, %v8345_v53  ;;  %v8566_v28 = vpop.f32.mrf.mxu1  ;;  %v8605_v25 = vmul.f32 0.5, %v14989_v21 }
0x240a   : > { %v8638_v37 = vadd.f32 %v8630_v43, %v14986_v19  ;;  %v8629_v11 = vmul.f32 %v8621_v58, %v14989_v21  ;;  %v8624_v22 = vmul.f32 %v8616_v61, %v14994_v14  ;;  %v8589_v42 = vadd.f32 %v8566_v28, %v8340_v30 }
0x240b   : > { %v8615_v1 = vmul.f32 0.044715, %v15001_v13  ;;  %v15008_v20 = vadd.f32 %v8596_v50, %v8590_v34  ;;  %v11953_v41 = vpop.f32.mrf.mxu1  ;;  %v8608_v19 = vmul.f32 0.5, %v14994_v14  ;;  %v8607_v61 = vmul.f32 0.5, %v15001_v13 }
0x240c   : > { %v8646_v49 = vmul.f32 0.7978846, %v8638_v37  ;;  %v8637_v44 = vadd.f32 %v8629_v11, %v14989_v21  ;;  %v8632_v10 = vmul.f32 %v8624_v22, %v14994_v14  ;;  %v15012_v8 = vadd.f32 %v8596_v50, %v8589_v42 }
0x240d   : > { %v8623_v17 = vmul.f32 %v8615_v1, %v15001_v13  ;;  %v8618_v62 = vmul.f32 0.044715, %v15008_v20  ;;  %v8592_v24 = vadd.f32 %v11953_v41, %v8355_v60  ;;  %v8576_v7 = vpop.f32.mrf.mxu1  ;;  %v8610_v37 = vmul.f32 0.5, %v15008_v20 }
0x240e   : > { %12367 = vtanh.f32 %v8646_v49  ;;  %v8645_v27 = vmul.f32 0.7978846, %v8637_v44  ;;  %v8640_v18 = vadd.f32 %v8632_v10, %v14994_v14  ;;  %v8617_v5 = vmul.f32 0.044715, %v15012_v8 }
0x240f   : > { %v8631_v51 = vmul.f32 %v8623_v17, %v15001_v13  ;;  %v8626_v45 = vmul.f32 %v8618_v62, %v15008_v20  ;;  %v8604_v54 = vadd.f32 %v8596_v50, %v8592_v24  ;;  %v8591_v63 = vadd.f32 %v8576_v7, %v8350_v0 }
0x2410   : > { %12369 = vtanh.f32 %v8645_v27  ;;  %v8648_v38 = vmul.f32 0.7978846, %v8640_v18  ;;  %v8625_v40 = vmul.f32 %v8617_v5, %v15012_v8  ;;  %v8609_v42 = vmul.f32 0.5, %v15012_v8 }
0x2411   : > { %v8639_v4 = vadd.f32 %v8631_v51, %v15001_v13  ;;  %v8634_v39 = vmul.f32 %v8626_v45, %v15008_v20  ;;  %v8620_v52 = vmul.f32 0.044715, %v8604_v54  ;;  %v8603_v33 = vadd.f32 %v8596_v50, %v8591_v63 }
0x2412   : > { %12371 = vtanh.f32 %v8648_v38  ;;  %v8633_v57 = vmul.f32 %v8625_v40, %v15012_v8  ;;  %v8612_v13 = vmul.f32 0.5, %v8604_v54 }
0x2413   : > { %v8647_v26 = vmul.f32 0.7978846, %v8639_v4  ;;  %v8642_v59 = vadd.f32 %v8634_v39, %v15008_v20  ;;  %v8628_v29 = vmul.f32 %v8620_v52, %v8604_v54  ;;  %v8619_v15 = vmul.f32 0.044715, %v8603_v33 }
0x2414   : > { %v8641_v31 = vadd.f32 %v8633_v57, %v15012_v8  ;;  %v8611_v17 = vmul.f32 0.5, %v8603_v33 }
0x2415   : > { %12373 = vtanh.f32 %v8647_v26  ;;  %v8650_v6 = vmul.f32 0.7978846, %v8642_v59  ;;  %v8636_v56 = vmul.f32 %v8628_v29, %v8604_v54  ;;  %v8627_v12 = vmul.f32 %v8619_v15, %v8603_v33 }
0x2416   : > { %v8649_v9 = vmul.f32 0.7978846, %v8641_v31 }
0x2417   : > { %12375 = vtanh.f32 %v8650_v6  ;;  %v8644_v48 = vadd.f32 %v8636_v56, %v8604_v54  ;;  %v8635_v47 = vmul.f32 %v8627_v12, %v8603_v33 }
0x2418   : > { %12377 = vtanh.f32 %v8649_v9 }
0x2419   : > { %v8652_v50 = vmul.f32 0.7978846, %v8644_v48  ;;  %v8643_v35 = vadd.f32 %v8635_v47, %v8603_v33 }
0x241b   : > { %v12368_v16 = vpop.eup %12367  ;;  %12379 = vtanh.f32 %v8652_v50  ;;  %v8651_v23 = vmul.f32 0.7978846, %v8643_v35 }
0x241c   : > { %v8662_v3 = vadd.f32 1.0, %v12368_v16 }
0x241d   : > { %v12370_v2 = vpop.eup %12369  ;;  %12381 = vtanh.f32 %v8651_v23 }
0x241e   : > { %v8670_v46 = vmul.f32 %v8662_v3, %v8606_v55  ;;  %v8661_v53 = vadd.f32 1.0, %v12370_v2 }
0x241f   : > { %v12372_v36 = vpop.eup %12371 }
0x2420   : > { %8678 = vst [vmem:[%s15030_s6 + $0x8] sm:$0xff] %v8670_v46  ;;  %v8669_v32 = vmul.f32 %v8661_v53, %v8605_v25  ;;  %v8664_v30 = vadd.f32 1.0, %v12372_v36 }
0x2422   : > { %v12374_v43 = vpop.eup %12373  ;;  %8677 = vst [vmem:[%s15030_s6] sm:$0xff] %v8669_v32  ;;  %v8672_v58 = vmul.f32 %v8664_v30, %v8608_v19 }
0x2423   : > { %v8663_v34 = vadd.f32 1.0, %v12374_v43 }
0x2424   : > { %v12376_v28 = vpop.eup %12375  ;;  %8680 = vst [vmem:[%s15030_s6 + $0x18] sm:$0xff] %v8672_v58 }
0x2425   : > { %v8671_v21 = vmul.f32 %v8663_v34, %v8607_v61  ;;  %v8666_v11 = vadd.f32 1.0, %v12376_v28  ;;  %v12378_v22 = vpop.eup %12377 }
0x2426   : > { %v8665_v60 = vadd.f32 1.0, %v12378_v22 }
0x2427   : > { %8679 = vst [vmem:[%s15030_s6 + $0x10] sm:$0xff] %v8671_v21  ;;  %v8674_v14 = vmul.f32 %v8666_v11, %v8610_v37 }
0x2428   : > { %v12380_v1 = vpop.eup %12379  ;;  %v8673_v41 = vmul.f32 %v8665_v60, %v8609_v42 }
0x2429   : > { %8682 = vst [vmem:[%s15030_s6 + $0x28] sm:$0xff] %v8674_v14  ;;  %v8668_v49 = vadd.f32 1.0, %v12380_v1 }
0x242a   : > { %v12382_v44 = vpop.eup %12381  ;;  %8681 = vst [vmem:[%s15030_s6 + $0x20] sm:$0xff] %v8673_v41 }
0x242b   : > { %v8676_v10 = vmul.f32 %v8668_v49, %v8612_v13  ;;  %v8667_v62 = vadd.f32 1.0, %v12382_v44 }
0x242d   : > { %8684 = vst [vmem:[%s15030_s6 + $0x38] sm:$0xff] %v8676_v10  ;;  %v8675_v20 = vmul.f32 %v8667_v62, %v8611_v17 }
0x242f   : > { %8683 = vst [vmem:[%s15030_s6 + $0x30] sm:$0xff] %v8675_v20 }
0x2430 PF: > { %s81_s7 = sadd.s32 1, %s13076_s7  }
0x2431   : > { %p78_p10 = scmp.ge.s32.totalorder %s81_s7, 4  }
0x2433   :  { %80 = sbr.rel (!%p78_p10) target bundleno = 57 (0x39), region = 322 }
0x2438   :  { %8736 = vsyncpa [#allocation3], 1 }
0x2439   :  { %8738 = vsyncpa [#allocation3 + $0x1], 1 }
0x243a   :  { %8739 = vsyncpa [#allocation5], 1 }
0x243b   :  { %8740 = vsyncpa [#allocation8], 1 }
0x243c   :  { %8741 = vsyncpa [#allocation11], 1 }
0x243d   :  { %8742 = vsyncpa [#allocation14], 1 }
0x243e   :  { %8743 = vsyncpa [#allocation17], 1 }
0x243f   :  { %8744 = vsyncpa [#allocation20], 1 }
0x2440   :  { %8745 = vsyncpa [#allocation23], 1 }
0x2441   :  { %8746 = vsyncpa [#allocation26], 1 }
0x2442   :  { %8747 = vsyncpa [#allocation29], 1 }
0x2443   :  { %8748 = vsyncpa [#allocation32], 1 }

</bundles_post_ra>
